<compile_context>
chip_gen: v6e
topology: v6e:2x2x1
jax: 0.10.0
libtpu: 0.0.40
codegen_flags: <defaults>
</compile_context>

<pallas_src>
import math
import functools

import jax
import jax.numpy as jnp
from jax import lax
from jax.experimental import pallas as pl
from jax.experimental.pallas import tpu as pltpu

# Scoped-VMEM budget: fits v7x (64 MiB physical) with headroom; fine on v5e/v6e.
VMEM_LIMIT = 48 * 1024 * 1024


def _sigmoid(x):
    return 1.0 / (1.0 + jnp.exp(-x))


def _round_up(x, m):
    return ((x + m - 1) // m) * m


def _pick_m_tile(M, tile_m):
    """Pick an M tile: prefer a divisor of M (no pad/slice HBM round trips)."""
    if M <= tile_m:
        return M, M
    t = max(8, (tile_m // 8) * 8)
    for tm in range(t, 127, -8):          # divisor tiles (multiples of 8, >=128)
        if M % tm == 0:
            return tm, M
    return t, _round_up(M, t)             # fallback: pad the ragged tail


# -------------------- Kernel 1: in_proj (two lane-dense outputs) ---------------------
def _in_proj_kernel(x_ref, wx_ref, wz_ref, xo_ref, zo_ref):
    xb = x_ref[...].astype(jnp.bfloat16)                     # activations -> bf16 MXU
    xo_ref[...] = jnp.dot(xb, wx_ref[...], preferred_element_type=jnp.float32)
    zo_ref[...] = jnp.dot(xb, wz_ref[...], preferred_element_type=jnp.float32)


def pallas_in_proj(x, wx, wz, *, tile_m=1024):
    # x: (M, K) f32   wx, wz: (K, N) bf16 (pre-cast, resident across the grid)
    M, K = x.shape
    N = wx.shape[1]
    tm, Mp = _pick_m_tile(M, tile_m)
    xp = x if Mp == M else jnp.pad(x, ((0, Mp - M), (0, 0)))
    outs = pl.pallas_call(
        _in_proj_kernel,
        out_shape=(jax.ShapeDtypeStruct((Mp, N), jnp.float32),
                   jax.ShapeDtypeStruct((Mp, N), jnp.float32)),
        grid=(Mp // tm,),
        in_specs=[pl.BlockSpec((tm, K), lambda i: (i, 0)),
                  pl.BlockSpec((K, N), lambda i: (0, 0)),      # resident weight (bf16)
                  pl.BlockSpec((K, N), lambda i: (0, 0))],     # resident weight (bf16)
        out_specs=(pl.BlockSpec((tm, N), lambda i: (i, 0)),
                   pl.BlockSpec((tm, N), lambda i: (i, 0))),
        compiler_params=pltpu.CompilerParams(
            dimension_semantics=("parallel",),
            vmem_limit_bytes=VMEM_LIMIT),
    )(xp, wx, wz)
    if Mp != M:
        outs = tuple(o[:M] for o in outs)
    return outs
    # TODO(synk): emit bf16 outputs to halve HBM on this memory-bound matmul once
    # downstream numerics are validated against the f32 reference.


# ------------------ Kernel 2: depthwise 3x3 conv (groups=C) + SiLU -------------------
def _dwconv_silu_kernel(x_ref, w_ref, b_ref, o_ref, xp_ref):
    H, W, C = o_ref.shape

    # Zero the halo scratch only once; the interior is fully rewritten every grid
    # step and the border ring stays zero (requires a sequential batch axis).
    @pl.when(pl.program_id(0) == 0)
    def _():
        xp_ref[...] = jnp.zeros_like(xp_ref)

    xp_ref[pl.ds(1, H), pl.ds(1, W), :] = x_ref[...]
    w = w_ref[...]                                    # (3, 3, C)
    acc = jnp.zeros((H, W, C), jnp.float32)
    for dh in range(3):
        for dw in range(3):
            acc = acc + xp_ref[pl.ds(dh, H), pl.ds(dw, W), :] * w[dh:dh + 1, dw:dw + 1, :]
    acc = acc + b_ref[...]                            # (1, 1, C) broadcast
    o_ref[...] = acc * _sigmoid(acc)                  # SiLU


def pallas_dwconv3x3_silu(x, w, b):
    # x: (B, H, W, C)   w: (3, 3, C)   b: (1, 1, C)
    # TODO(synk): tile over H with a 1-row halo (and use an (H, C, W) lane-dense
    # layout) for large images on v7x's 64 MiB VMEM; whole-image blocks are fine here.
    B, H, W, C = x.shape
    return pl.pallas_call(
        _dwconv_silu_kernel,
        out_shape=jax.ShapeDtypeStruct((B, H, W, C), jnp.float32),
        grid=(B,),
        in_specs=[pl.BlockSpec((None, H, W, C), lambda i: (i, 0, 0, 0)),
                  pl.BlockSpec((3, 3, C), lambda i: (0, 0, 0)),
                  pl.BlockSpec((1, 1, C), lambda i: (0, 0, 0))],
        out_specs=pl.BlockSpec((None, H, W, C), lambda i: (i, 0, 0, 0)),
        scratch_shapes=[pltpu.VMEM((H + 2, W + 2, C), jnp.float32)],
        compiler_params=pltpu.CompilerParams(
            # batch must stay sequential: the halo ring is zeroed only at step 0.
            dimension_semantics=("arbitrary",),
            vmem_limit_bytes=VMEM_LIMIT),
    )(x, w, b)


# ------ Kernel 3: fused x_proj(+folded dt_proj) + softplus + 4-direction scan --------
def _selective_scan_kernel(xhwf_ref, xwhf_ref, xhwr_ref, xwhr_ref,
                           wd_ref, wb_ref, wc_ref, a_ref, dskip_ref, bias_ref,
                           y0_ref, y1_ref, y2_ref, y3_ref,
                           dl_s, b_s, c_s, state_s, *, t_chunk):
    # x*_ref:  (TL, C) f32 blocks — dirs 0/1 read block l, dirs 2/3 read block nl-1-l
    # wd_ref:  (K, C, C) bf16 (x_proj dt slice folded with dt_proj)
    # wb_ref/wc_ref: (K, C, N) bf16     a_ref: (K, N, C) f32
    # dskip_ref, bias_ref: (K, 1, C) f32
    # y*_ref:  (TL, C) f32 output blocks (reverse dirs already un-flipped)
    # dl_s: (K*TL, C) softplus(delta)   b_s/c_s: (K*TL, N)   state_s: (K, N, C) carry
    TL, C = y0_ref.shape
    K, N, _ = a_ref.shape
    T = t_chunk

    # Reset the carried scan state at the start of every batch row's sequence.
    @pl.when(pl.program_id(1) == 0)
    def _():
        state_s[...] = jnp.zeros_like(state_s)

    wd = wd_ref[...]
    wb = wb_ref[...]
    wc = wc_ref[...]
    a_all = a_ref[...]                                   # (K, N, C)
    dskip_all = dskip_ref[...]                           # (K, 1, C)
    bias_all = bias_ref[...]                             # (K, 1, C)

    u_refs = (xhwf_ref, xwhf_ref, xhwr_ref, xwhr_ref)
    y_refs = (y0_ref, y1_ref, y2_ref, y3_ref)

    # Per-direction projections for the whole L block (bf16 MXU, f32 accumulate).
    for k in range(4):
        ub = u_refs[k][...].astype(jnp.bfloat16)         # (TL, C)
        dt_raw = jnp.dot(ub, wd[k], preferred_element_type=jnp.float32) + bias_all[k]
        # Overflow-safe softplus (matches F.softplus incl. its >20 threshold).
        dl_s[pl.ds(k * TL, TL), :] = (jnp.maximum(dt_raw, 0.0)
                                      + jnp.log(1.0 + jnp.exp(-jnp.abs(dt_raw))))
        b_s[pl.ds(k * TL, TL), :] = jnp.dot(ub, wb[k], preferred_element_type=jnp.float32)
        c_s[pl.ds(k * TL, TL), :] = jnp.dot(ub, wc[k], preferred_element_type=jnp.float32)

    def chunk_body(cidx, carry):                         # carry: (K, N, C) f32
        fb = pl.multiple_of(cidx * T, T)                 # forward dirs: chunk start
        rb = pl.multiple_of(TL - T - cidx * T, T)        # reverse dirs: chunk start
        new_states = []
        for k in range(4):
            fwd = k < 2
            base = fb if fwd else rb
            u_ck = u_refs[k][pl.ds(base, T), :]                  # (T, C)
            d_ck = dl_s[pl.ds(k * TL + base, T), :]              # (T, C) softplus(delta)
            b_ck = b_s[pl.ds(k * TL + base, T), :]               # (T, N)
            c_ck = c_s[pl.ds(k * TL + base, T), :]               # (T, N)
            du_ck = d_ck * u_ck                                  # (T, C)

            # One batched EUP exp per chunk; per-dir liveness stays bounded since
            # directions are emitted sequentially (the scheduler interleaves the
            # 4 independent recurrence chains for latency hiding).
            dA = jnp.exp(d_ck[:, None, :] * a_all[k][None, :, :])   # (T, N, C)
            dBu = b_ck[:, :, None] * du_ck[:, None, :]              # (T, N, C)
            c3 = c_ck[:, :, None]                                   # (T, N, 1)

            st = carry[k]
            rows = [None] * T
            for s in range(T):                        # s = time step within chunk
                r = s if fwd else T - 1 - s           # storage row (rev dirs flipped)
                st = dA[r] * st + dBu[r]              # (N, C)
                rows[r] = jnp.sum(c3[r] * st, axis=0, keepdims=True)   # (1, C)
            y_ck = jnp.concatenate(rows, axis=0)      # (T, C) in storage order
            # Sublane-aligned (T, C) store with the D skip connection; reverse
            # directions land already un-flipped at the mirrored output block.
            y_refs[k][pl.ds(base, T), :] = y_ck + u_ck * dskip_all[k]
            new_states.append(st)
        return jnp.stack(new_states, axis=0)

    state_s[...] = lax.fori_loop(0, TL // T, chunk_body, state_s[...])


def pallas_selective_scan(x_hw, x_wh, wd, wb, wc, a_nc, ds, dt_bias, *,
                          max_l_tile=1024, t_chunk=8):
    # x_hw/x_wh: (B, L, C)  wd: (K,C,C) bf16  wb/wc: (K,C,N) bf16
    # a_nc: (K,N,C) f32     ds, dt_bias: (K,1,C) f32
    B, L, C = x_hw.shape
    K, N, _ = a_nc.shape
    T = t_chunk
    assert L % T == 0, "L = H*W must be a multiple of 8"

    # L tile: bounds per-step VMEM; state carried across tiles in scratch.
    if L <= max_l_tile:
        tl = L
    else:
        divs = [d for d in range(T, max_l_tile + 1, T) if L % d == 0]
        if divs:
            tl = max(divs)
        else:  # ragged L: smallest chunk-multiple divisor above the cap (bounded blow-up)
            tl = min(d for d in range(max_l_tile + T, L + 1, T) if L % d == 0)
    nl = L // tl

    kernel = functools.partial(_selective_scan_kernel, t_chunk=T)
    blk_f = lambda b, l: (b, l, 0)                 # forward dirs: block l
    blk_r = lambda b, l: (b, nl - 1 - l, 0)        # reverse dirs: mirrored block
    const = lambda b, l: (0, 0, 0)
    yshape = jax.ShapeDtypeStruct((B, L, C), jnp.float32)

    return pl.pallas_call(
        kernel,
        out_shape=(yshape, yshape, yshape, yshape),
        grid=(B, nl),
        in_specs=[
            pl.BlockSpec((None, tl, C), blk_f),    # x_hw, forward
            pl.BlockSpec((None, tl, C), blk_f),    # x_wh, forward
            pl.BlockSpec((None, tl, C), blk_r),    # x_hw, reverse (in-kernel flip)
            pl.BlockSpec((None, tl, C), blk_r),    # x_wh, reverse (in-kernel flip)
            pl.BlockSpec((K, C, C), const),        # W_delta (resident, bf16)
            pl.BlockSpec((K, C, N), const),        # W_b
            pl.BlockSpec((K, C, N), const),        # W_c
            pl.BlockSpec((K, N, C), const),        # A
            pl.BlockSpec((K, 1, C), const),        # D skip
            pl.BlockSpec((K, 1, C), const),        # dt bias
        ],
        out_specs=(
            pl.BlockSpec((None, tl, C), blk_f),    # dir0: HW-order positions
            pl.BlockSpec((None, tl, C), blk_f),    # dir1: WH-order positions
            pl.BlockSpec((None, tl, C), blk_r),    # dir2: HW-order, un-flipped
            pl.BlockSpec((None, tl, C), blk_r),    # dir3: WH-order, un-flipped
        ),
        scratch_shapes=[pltpu.VMEM((K * tl, C), jnp.float32),    # softplus(delta)
                        pltpu.VMEM((K * tl, N), jnp.float32),    # B projection
                        pltpu.VMEM((K * tl, N), jnp.float32),    # C projection
                        pltpu.VMEM((K, N, C), jnp.float32)],     # carried scan state
        compiler_params=pltpu.CompilerParams(
            # L carries state -> must stay sequential ("arbitrary"); B is parallel.
            dimension_semantics=("parallel", "arbitrary"),
            vmem_limit_bytes=VMEM_LIMIT),
    )(x_hw, x_wh, x_hw, x_wh, wd, wb, wc, a_nc, ds, dt_bias)


# ----------- Kernel 4: LayerNorm + SiLU(z) gate + out_proj matmul (fused) ------------
def _norm_gate_proj_kernel(y_ref, z_ref, g_ref, b_ref, w_ref, o_ref):
    y = y_ref[...]
    mu = jnp.mean(y, axis=-1, keepdims=True)
    var = jnp.mean(jnp.square(y - mu), axis=-1, keepdims=True)
    yn = (y - mu) * lax.rsqrt(var + 1e-5) * g_ref[...] + b_ref[...]
    z = z_ref[...]
    gated = yn * (z * _sigmoid(z))
    o_ref[...] = jnp.dot(gated.astype(jnp.bfloat16), w_ref[...],
                         preferred_element_type=jnp.float32)


def pallas_norm_gate_proj(y, z, gamma, beta, w_out, *, tile_m=1024):
    M, C = y.shape
    D = w_out.shape[1]
    tm, Mp = _pick_m_tile(M, tile_m)
    if Mp != M:
        y = jnp.pad(y, ((0, Mp - M), (0, 0)))
        z = jnp.pad(z, ((0, Mp - M), (0, 0)))
    out = pl.pallas_call(
        _norm_gate_proj_kernel,
        out_shape=jax.ShapeDtypeStruct((Mp, D), jnp.float32),
        grid=(Mp // tm,),
        in_specs=[pl.BlockSpec((tm, C), lambda i: (i, 0)),
                  pl.BlockSpec((tm, C), lambda i: (i, 0)),
                  pl.BlockSpec((1, C), lambda i: (0, 0)),
                  pl.BlockSpec((1, C), lambda i: (0, 0)),
                  pl.BlockSpec((C, D), lambda i: (0, 0))],      # resident bf16 weight
        out_specs=pl.BlockSpec((tm, D), lambda i: (i, 0)),
        compiler_params=pltpu.CompilerParams(
            dimension_semantics=("parallel",),
            vmem_limit_bytes=VMEM_LIMIT),
    )(y, z, gamma, beta, w_out)
    return out[:M] if Mp != M else out


# ---------------------------- plain-JAX glue (tiny ops) -------------------------------
def channel_attention(z, w1, w2):
    # z: (B, H, W, C);  w1: (C//4, C);  w2: (C, C//4)
    avg = jnp.mean(z, axis=(1, 2))
    mx = jnp.max(z, axis=(1, 2))

    def fc(v):
        return jnp.maximum(v @ w1.T, 0.0) @ w2.T

    attn = _sigmoid(fc(avg) + fc(mx))       # (B, C)
    return z * attn[:, None, None, :]


def spatial_attention(z, w):
    # w: (7, 7, 2, 1)
    avg_c = jnp.mean(z, axis=-1, keepdims=True)
    max_c = jnp.max(z, axis=-1, keepdims=True)
    s = jnp.concatenate([avg_c, max_c], axis=-1)
    attn = lax.conv_general_dilated(s, w, (1, 1), "SAME",
                                    dimension_numbers=("NHWC", "HWIO", "NHWC"))
    return z * _sigmoid(attn)


# --------------------------------- full SS2D forward ---------------------------------
def ss2d_forward(p, x):
    B, H, W, D = x.shape
    Ci = p["W_in_x"].shape[1]
    L = H * W
    M = B * L

    # in_proj: two lane-dense outputs (no post-hoc xz lane slice).
    x2, z2 = pallas_in_proj(x.reshape(M, D), p["W_in_x"], p["W_in_z"])
    x_part = x2.reshape(B, H, W, Ci)
    z_part = z2.reshape(B, H, W, Ci)

    # z branch: channel attention then spatial attention (glue)
    z = channel_attention(z_part, p["ca_w1"], p["ca_w2"])
    z = spatial_attention(z, p["sa_w"])

    # x branch: depthwise conv + SiLU (Pallas, halo built once in VMEM)
    xc = pallas_dwconv3x3_silu(x_part, p["conv_w"], p["conv_b"])

    # Only two orderings are materialized; forward/reverse directions are handled
    # inside the scan kernel via mirrored index_maps + in-chunk time reversal.
    x_hw = xc.reshape(B, L, Ci)
    # TODO(synk): the WH-order transpose (and its inverse on y_wh below) could be
    # folded into the scan / out_proj index_maps with an in-kernel transpose.
    x_wh = jnp.transpose(xc, (0, 2, 1, 3)).reshape(B, L, Ci)

    yhw_f, ywh_f, yhw_r, ywh_r = pallas_selective_scan(
        x_hw, x_wh, p["W_delta"], p["W_b"], p["W_c"],
        p["A_nc"], p["Ds"], p["dt_bias"])

    y_hw = yhw_f + yhw_r                    # HW-position contributions (dirs 0, 2)
    y_wh = ywh_f + ywh_r                    # WH-position contributions (dirs 1, 3)
    y = y_hw + jnp.transpose(y_wh.reshape(B, W, H, Ci), (0, 2, 1, 3)).reshape(B, L, Ci)

    # LayerNorm + SiLU(z) gating + out_proj (fused Pallas)
    out = pallas_norm_gate_proj(y.reshape(M, Ci), z.reshape(M, Ci),
                                p["ln_g"], p["ln_b"], p["W_out"])
    return out.reshape(B, H, W, D)
    # TODO(synk): dropout is identity here since the module default is dropout=0.0


# --------------------------- deterministic parameter init ----------------------------
def init_params(key, d_model, d_state=16, expand=0.5,
                dt_min=0.001, dt_max=0.1, dt_init_floor=1e-4):
    d_inner = int(expand * d_model)
    dt_rank = math.ceil(d_model / 16)
    K = 4
    ks = jax.random.split(key, 12)

    def u(k, shape, b):
        return jax.random.uniform(k, shape, jnp.float32, -b, b)

    p = {}
    w_in = u(ks[0], (d_model, 2 * d_inner), 1.0 / math.sqrt(d_model))
    # in_proj split into x / z halves; MXU weights pre-cast to bf16 once.
    p["W_in_x"] = w_in[:, :d_inner].astype(jnp.bfloat16)
    p["W_in_z"] = w_in[:, d_inner:].astype(jnp.bfloat16)
    p["conv_w"] = u(ks[1], (3, 3, d_inner), 1.0 / 3.0)
    p["conv_b"] = u(ks[2], (1, 1, d_inner), 1.0 / 3.0)
    p["ca_w1"] = u(ks[3], (d_inner // 4, d_inner), 1.0 / math.sqrt(d_inner))
    p["ca_w2"] = u(ks[4], (d_inner, d_inner // 4), 1.0 / math.sqrt(d_inner // 4))
    p["sa_w"] = u(ks[5], (7, 7, 2, 1), 1.0 / math.sqrt(2 * 49))

    # x_proj weights (K, R+2N, C_in) and dt_proj weights (K, C_out, R)
    xw = u(ks[6], (K, dt_rank + 2 * d_state, d_inner), 1.0 / math.sqrt(d_inner))
    dtw = u(ks[7], (K, d_inner, dt_rank), dt_rank ** -0.5)
    # Fold dt_proj into x_proj's dt slice: W_delta[k] = X_dt[k]^T @ W_dt[k]^T  (C, C)
    xdt = xw[:, :dt_rank, :]
    p["W_delta"] = jnp.einsum("krc,kdr->kcd", xdt, dtw).astype(jnp.bfloat16)
    p["W_b"] = jnp.transpose(xw[:, dt_rank:dt_rank + d_state, :], (0, 2, 1)).astype(jnp.bfloat16)
    p["W_c"] = jnp.transpose(xw[:, dt_rank + d_state:, :], (0, 2, 1)).astype(jnp.bfloat16)

    dt = jnp.exp(jax.random.uniform(ks[8], (K, d_inner))
                 * (math.log(dt_max) - math.log(dt_min)) + math.log(dt_min))
    dt = jnp.maximum(dt, dt_init_floor)
    inv_dt = dt + jnp.log(-jnp.expm1(-dt))
    p["dt_bias"] = inv_dt.reshape(K, 1, d_inner).astype(jnp.float32)

    A = -jnp.exp(jnp.log(jnp.arange(1, d_state + 1, dtype=jnp.float32)))  # (N,)
    p["A_nc"] = jnp.broadcast_to(A[None, :, None], (K, d_state, d_inner)).astype(jnp.float32)
    p["Ds"] = jnp.ones((K, 1, d_inner), jnp.float32)
    p["ln_g"] = jnp.ones((1, d_inner), jnp.float32)
    p["ln_b"] = jnp.zeros((1, d_inner), jnp.float32)
    p["W_out"] = u(ks[9], (d_inner, d_model), 1.0 / math.sqrt(d_inner)).astype(jnp.bfloat16)
    return p


if __name__ == "__main__":
    B, H, W = 2, 8, 8
    d_model = 32   # -> d_inner=16, dt_rank=2, d_state=16, L=64

    key = jax.random.PRNGKey(0)
    kx, kp = jax.random.split(key)
    x = jax.random.normal(kx, (B, H, W, d_model), jnp.float32)
    params = init_params(kp, d_model)

    fwd = jax.jit(ss2d_forward)
    out = fwd(params, x)
    out = jax.block_until_ready(out)
    assert out.shape == (B, H, W, d_model)
    assert bool(jnp.all(jnp.isfinite(out)))
    print("KERNEL_OK")
</pallas_src>

<mosaic_0001>
module attributes {stable_mosaic.version = 11 : i64} {
  func.func @_in_proj_kernel(%arg0: i32, %arg1: memref<128x32xf32, #tpu.memory_space<vmem>>, %arg2: memref<32x16xbf16, #tpu.memory_space<vmem>>, %arg3: memref<32x16xbf16, #tpu.memory_space<vmem>>, %arg4: memref<128x16xf32, #tpu.memory_space<vmem>>, %arg5: memref<128x16xf32, #tpu.memory_space<vmem>>) attributes {dimension_semantics = [#tpu.dimension_semantics<parallel>], iteration_bounds = array<i64: 1>, scalar_prefetch = 0 : i64, scratch_operands = 0 : i64, tpu.core_type = #tpu.core_type<tc>, window_params = [{transform_indices = @transform_0, window_bounds = array<i64: 128, 32>}, {pipeline_mode = #tpu.pipeline_mode<synchronous>, transform_indices = @transform_1, window_bounds = array<i64: 32, 16>}, {pipeline_mode = #tpu.pipeline_mode<synchronous>, transform_indices = @transform_2, window_bounds = array<i64: 32, 16>}, {transform_indices = @transform_3, window_bounds = array<i64: 128, 16>}, {transform_indices = @transform_4, window_bounds = array<i64: 128, 16>}]} {
    %c0 = arith.constant 0 : index
    %c0_0 = arith.constant 0 : index
    %0 = vector.load %arg1[%c0, %c0_0] : memref<128x32xf32, #tpu.memory_space<vmem>>, vector<128x32xf32>
    %1 = arith.truncf %0 : vector<128x32xf32> to vector<128x32xbf16>
    %c0_1 = arith.constant 0 : index
    %c0_2 = arith.constant 0 : index
    %2 = vector.load %arg2[%c0_1, %c0_2] : memref<32x16xbf16, #tpu.memory_space<vmem>>, vector<32x16xbf16>
    %cst = arith.constant dense<0.000000e+00> : vector<128x16xf32>
    %3 = tpu.matmul %1, %2, %cst {dimension_numbers = #tpu.dot_dimension_numbers<[1], [0], [0], [1], [0, 0, 1, 1], [], []>} : vector<128x32xbf16>, vector<32x16xbf16>, vector<128x16xf32> -> vector<128x16xf32>
    %c0_3 = arith.constant 0 : index
    %c0_4 = arith.constant 0 : index
    %4 = vector.load %arg4[%c0_3, %c0_4] : memref<128x16xf32, #tpu.memory_space<vmem>>, vector<128x16xf32>
    tpu.vector_store %arg4[%c0_3, %c0_4], %3 {strides = array<i32>} : memref<128x16xf32, #tpu.memory_space<vmem>>, vector<128x16xf32>,
    %c0_5 = arith.constant 0 : index
    %c0_6 = arith.constant 0 : index
    %5 = vector.load %arg3[%c0_5, %c0_6] : memref<32x16xbf16, #tpu.memory_space<vmem>>, vector<32x16xbf16>
    %cst_7 = arith.constant dense<0.000000e+00> : vector<128x16xf32>
    %6 = tpu.matmul %1, %5, %cst_7 {dimension_numbers = #tpu.dot_dimension_numbers<[1], [0], [0], [1], [0, 0, 1, 1], [], []>} : vector<128x32xbf16>, vector<32x16xbf16>, vector<128x16xf32> -> vector<128x16xf32>
    %c0_8 = arith.constant 0 : index
    %c0_9 = arith.constant 0 : index
    %7 = vector.load %arg5[%c0_8, %c0_9] : memref<128x16xf32, #tpu.memory_space<vmem>>, vector<128x16xf32>
    tpu.vector_store %arg5[%c0_8, %c0_9], %6 {strides = array<i32>} : memref<128x16xf32, #tpu.memory_space<vmem>>, vector<128x16xf32>,
    return
  }
  func.func @transform_0(%arg0: i32) -> (i32, i32) {
    %c0_i32 = arith.constant 0 : i32
    %c0_i32_0 = arith.constant 0 : i32
    return %arg0, %c0_i32 : i32, i32
  }
  func.func @transform_1(%arg0: i32) -> (i32, i32) {
    %c0_i32 = arith.constant 0 : i32
    %c0_i32_0 = arith.constant 0 : i32
    %c0_i32_1 = arith.constant 0 : i32
    return %c0_i32, %c0_i32_0 : i32, i32
  }
  func.func @transform_2(%arg0: i32) -> (i32, i32) {
    %c0_i32 = arith.constant 0 : i32
    %c0_i32_0 = arith.constant 0 : i32
    %c0_i32_1 = arith.constant 0 : i32
    return %c0_i32, %c0_i32_0 : i32, i32
  }
  func.func @transform_3(%arg0: i32) -> (i32, i32) {
    %c0_i32 = arith.constant 0 : i32
    %c0_i32_0 = arith.constant 0 : i32
    return %arg0, %c0_i32 : i32, i32
  }
  func.func @transform_4(%arg0: i32) -> (i32, i32) {
    %c0_i32 = arith.constant 0 : i32
    %c0_i32_0 = arith.constant 0 : i32
    return %arg0, %c0_i32 : i32, i32
  }
}

module attributes {stable_mosaic.version = 11 : i64} {
  func.func @_dwconv_silu_kernel(%arg0: i32, %arg1: memref<1x8x8x16xf32, #tpu.memory_space<vmem>>, %arg2: memref<3x3x16xf32, #tpu.memory_space<vmem>>, %arg3: memref<1x1x16xf32, #tpu.memory_space<vmem>>, %arg4: memref<1x8x8x16xf32, #tpu.memory_space<vmem>>, %arg5: memref<10x10x16xf32, #tpu.memory_space<vmem>>) attributes {dimension_semantics = [#tpu.dimension_semantics<arbitrary>], iteration_bounds = array<i64: 2>, scalar_prefetch = 0 : i64, scratch_operands = 1 : i64, tpu.core_type = #tpu.core_type<tc>, window_params = [{transform_indices = @transform_0, window_bounds = array<i64: 1, 8, 8, 16>}, {pipeline_mode = #tpu.pipeline_mode<synchronous>, transform_indices = @transform_1, window_bounds = array<i64: 3, 3, 16>}, {pipeline_mode = #tpu.pipeline_mode<synchronous>, transform_indices = @transform_2, window_bounds = array<i64: 1, 1, 16>}, {transform_indices = @transform_3, window_bounds = array<i64: 1, 8, 8, 16>}]} {
    %c0_i32 = arith.constant 0 : i32
    %0 = arith.cmpi eq, %arg0, %c0_i32 : i32
    %1 = arith.extui %0 : i1 to i32
    %c0_i32_0 = arith.constant 0 : i32
    %2 = arith.cmpi ne, %1, %c0_i32_0 : i32
    scf.if %2 {
      %cst_45 = arith.constant 0.000000e+00 : f32
      %67 = vector.broadcast %cst_45 : f32 to vector<10x10x16xf32>
      %c0_46 = arith.constant 0 : index
      %c0_47 = arith.constant 0 : index
      %c0_48 = arith.constant 0 : index
      %68 = vector.load %arg5[%c0_46, %c0_47, %c0_48] : memref<10x10x16xf32, #tpu.memory_space<vmem>>, vector<10x10x16xf32>
      tpu.vector_store %arg5[%c0_46, %c0_47, %c0_48], %67 {strides = array<i32>} : memref<10x10x16xf32, #tpu.memory_space<vmem>>, vector<10x10x16xf32>,
    } else {
    }
    %c0 = arith.constant 0 : index
    %c0_1 = arith.constant 0 : index
    %c0_2 = arith.constant 0 : index
    %c0_3 = arith.constant 0 : index
    %3 = vector.load %arg1[%c0, %c0_1, %c0_2, %c0_3] : memref<1x8x8x16xf32, #tpu.memory_space<vmem>>, vector<1x8x8x16xf32>
    %4 = vector.shape_cast %3 : vector<1x8x8x16xf32> to vector<8x8x16xf32>
    %c1 = arith.constant 1 : index
    %c1_4 = arith.constant 1 : index
    %c0_5 = arith.constant 0 : index
    %5 = vector.load %arg5[%c1, %c1_4, %c0_5] : memref<10x10x16xf32, #tpu.memory_space<vmem>>, vector<8x8x16xf32>
    tpu.vector_store %arg5[%c1, %c1_4, %c0_5], %4 {strides = array<i32>} : memref<10x10x16xf32, #tpu.memory_space<vmem>>, vector<8x8x16xf32>,
    %c0_6 = arith.constant 0 : index
    %c0_7 = arith.constant 0 : index
    %c0_8 = arith.constant 0 : index
    %6 = vector.load %arg2[%c0_6, %c0_7, %c0_8] : memref<3x3x16xf32, #tpu.memory_space<vmem>>, vector<3x3x16xf32>
    %cst = arith.constant 0.000000e+00 : f32
    %7 = vector.broadcast %cst : f32 to vector<8x8x16xf32>
    %c0_9 = arith.constant 0 : index
    %c0_10 = arith.constant 0 : index
    %c0_11 = arith.constant 0 : index
    %8 = vector.load %arg5[%c0_9, %c0_10, %c0_11] : memref<10x10x16xf32, #tpu.memory_space<vmem>>, vector<8x8x16xf32>
    %9 = vector.extract_strided_slice %6 {offsets = [0, 0, 0], sizes = [1, 1, 16], strides = [1, 1, 1]} : vector<3x3x16xf32> to vector<1x1x16xf32>
    %10 = vector.broadcast %9 : vector<1x1x16xf32> to vector<8x8x16xf32>
    %11 = arith.mulf %8, %10 : vector<8x8x16xf32>
    %12 = arith.addf %7, %11 : vector<8x8x16xf32>
    %c0_12 = arith.constant 0 : index
    %c1_13 = arith.constant 1 : index
    %c0_14 = arith.constant 0 : index
    %13 = vector.load %arg5[%c0_12, %c1_13, %c0_14] : memref<10x10x16xf32, #tpu.memory_space<vmem>>, vector<8x8x16xf32>
    %14 = vector.extract_strided_slice %6 {offsets = [0, 1, 0], sizes = [1, 1, 16], strides = [1, 1, 1]} : vector<3x3x16xf32> to vector<1x1x16xf32>
    %15 = vector.broadcast %14 : vector<1x1x16xf32> to vector<8x8x16xf32>
    %16 = arith.mulf %13, %15 : vector<8x8x16xf32>
    %17 = arith.addf %12, %16 : vector<8x8x16xf32>
    %c0_15 = arith.constant 0 : index
    %c2 = arith.constant 2 : index
    %c0_16 = arith.constant 0 : index
    %18 = vector.load %arg5[%c0_15, %c2, %c0_16] : memref<10x10x16xf32, #tpu.memory_space<vmem>>, vector<8x8x16xf32>
    %19 = vector.extract_strided_slice %6 {offsets = [0, 2, 0], sizes = [1, 1, 16], strides = [1, 1, 1]} : vector<3x3x16xf32> to vector<1x1x16xf32>
    %20 = vector.broadcast %19 : vector<1x1x16xf32> to vector<8x8x16xf32>
    %21 = arith.mulf %18, %20 : vector<8x8x16xf32>
    %22 = arith.addf %17, %21 : vector<8x8x16xf32>
    %c1_17 = arith.constant 1 : index
    %c0_18 = arith.constant 0 : index
    %c0_19 = arith.constant 0 : index
    %23 = vector.load %arg5[%c1_17, %c0_18, %c0_19] : memref<10x10x16xf32, #tpu.memory_space<vmem>>, vector<8x8x16xf32>
    %24 = vector.extract_strided_slice %6 {offsets = [1, 0, 0], sizes = [1, 1, 16], strides = [1, 1, 1]} : vector<3x3x16xf32> to vector<1x1x16xf32>
    %25 = vector.broadcast %24 : vector<1x1x16xf32> to vector<8x8x16xf32>
    %26 = arith.mulf %23, %25 : vector<8x8x16xf32>
    %27 = arith.addf %22, %26 : vector<8x8x16xf32>
    %c1_20 = arith.constant 1 : index
    %c1_21 = arith.constant 1 : index
    %c0_22 = arith.constant 0 : index
    %28 = vector.load %arg5[%c1_20, %c1_21, %c0_22] : memref<10x10x16xf32, #tpu.memory_space<vmem>>, vector<8x8x16xf32>
    %29 = vector.extract_strided_slice %6 {offsets = [1, 1, 0], sizes = [1, 1, 16], strides = [1, 1, 1]} : vector<3x3x16xf32> to vector<1x1x16xf32>
    %30 = vector.broadcast %29 : vector<1x1x16xf32> to vector<8x8x16xf32>
    %31 = arith.mulf %28, %30 : vector<8x8x16xf32>
    %32 = arith.addf %27, %31 : vector<8x8x16xf32>
    %c1_23 = arith.constant 1 : index
    %c2_24 = arith.constant 2 : index
    %c0_25 = arith.constant 0 : index
    %33 = vector.load %arg5[%c1_23, %c2_24, %c0_25] : memref<10x10x16xf32, #tpu.memory_space<vmem>>, vector<8x8x16xf32>
    %34 = vector.extract_strided_slice %6 {offsets = [1, 2, 0], sizes = [1, 1, 16], strides = [1, 1, 1]} : vector<3x3x16xf32> to vector<1x1x16xf32>
    %35 = vector.broadcast %34 : vector<1x1x16xf32> to vector<8x8x16xf32>
    %36 = arith.mulf %33, %35 : vector<8x8x16xf32>
    %37 = arith.addf %32, %36 : vector<8x8x16xf32>
    %c2_26 = arith.constant 2 : index
    %c0_27 = arith.constant 0 : index
    %c0_28 = arith.constant 0 : index
    %38 = vector.load %arg5[%c2_26, %c0_27, %c0_28] : memref<10x10x16xf32, #tpu.memory_space<vmem>>, vector<8x8x16xf32>
    %39 = vector.extract_strided_slice %6 {offsets = [2, 0, 0], sizes = [1, 1, 16], strides = [1, 1, 1]} : vector<3x3x16xf32> to vector<1x1x16xf32>
    %40 = vector.broadcast %39 : vector<1x1x16xf32> to vector<8x8x16xf32>
    %41 = arith.mulf %38, %40 : vector<8x8x16xf32>
    %42 = arith.addf %37, %41 : vector<8x8x16xf32>
    %c2_29 = arith.constant 2 : index
    %c1_30 = arith.constant 1 : index
    %c0_31 = arith.constant 0 : index
    %43 = vector.load %arg5[%c2_29, %c1_30, %c0_31] : memref<10x10x16xf32, #tpu.memory_space<vmem>>, vector<8x8x16xf32>
    %44 = vector.extract_strided_slice %6 {offsets = [2, 1, 0], sizes = [1, 1, 16], strides = [1, 1, 1]} : vector<3x3x16xf32> to vector<1x1x16xf32>
    %45 = vector.broadcast %44 : vector<1x1x16xf32> to vector<8x8x16xf32>
    %46 = arith.mulf %43, %45 : vector<8x8x16xf32>
    %47 = arith.addf %42, %46 : vector<8x8x16xf32>
    %c2_32 = arith.constant 2 : index
    %c2_33 = arith.constant 2 : index
    %c0_34 = arith.constant 0 : index
    %48 = vector.load %arg5[%c2_32, %c2_33, %c0_34] : memref<10x10x16xf32, #tpu.memory_space<vmem>>, vector<8x8x16xf32>
    %49 = vector.extract_strided_slice %6 {offsets = [2, 2, 0], sizes = [1, 1, 16], strides = [1, 1, 1]} : vector<3x3x16xf32> to vector<1x1x16xf32>
    %50 = vector.broadcast %49 : vector<1x1x16xf32> to vector<8x8x16xf32>
    %51 = arith.mulf %48, %50 : vector<8x8x16xf32>
    %52 = arith.addf %47, %51 : vector<8x8x16xf32>
    %c0_35 = arith.constant 0 : index
    %c0_36 = arith.constant 0 : index
    %c0_37 = arith.constant 0 : index
    %53 = vector.load %arg3[%c0_35, %c0_36, %c0_37] : memref<1x1x16xf32, #tpu.memory_space<vmem>>, vector<1x1x16xf32>
    %54 = vector.broadcast %53 : vector<1x1x16xf32> to vector<8x8x16xf32>
    %55 = arith.addf %52, %54 : vector<8x8x16xf32>
    %cst_38 = arith.constant 0.000000e+00 : f32
    %56 = vector.broadcast %cst_38 : f32 to vector<8x8x16xf32>
    %57 = arith.subf %56, %55 : vector<8x8x16xf32>
    %58 = math.exp %57 : vector<8x8x16xf32>
    %cst_39 = arith.constant 1.000000e+00 : f32
    %59 = vector.broadcast %cst_39 : f32 to vector<8x8x16xf32>
    %60 = arith.addf %59, %58 : vector<8x8x16xf32>
    %cst_40 = arith.constant 1.000000e+00 : f32
    %61 = vector.broadcast %cst_40 : f32 to vector<8x8x16xf32>
    %62 = arith.divf %61, %60 : vector<8x8x16xf32>
    %63 = arith.mulf %55, %62 : vector<8x8x16xf32>
    %c0_41 = arith.constant 0 : index
    %c0_42 = arith.constant 0 : index
    %c0_43 = arith.constant 0 : index
    %c0_44 = arith.constant 0 : index
    %64 = vector.load %arg4[%c0_41, %c0_42, %c0_43, %c0_44] : memref<1x8x8x16xf32, #tpu.memory_space<vmem>>, vector<1x8x8x16xf32>
    %65 = vector.shape_cast %64 : vector<1x8x8x16xf32> to vector<8x8x16xf32>
    %66 = vector.shape_cast %63 : vector<8x8x16xf32> to vector<1x8x8x16xf32>
    tpu.vector_store %arg4[%c0_41, %c0_42, %c0_43, %c0_44], %66 {strides = array<i32>} : memref<1x8x8x16xf32, #tpu.memory_space<vmem>>, vector<1x8x8x16xf32>,
    return
  }
  func.func @transform_0(%arg0: i32) -> (i32, i32, i32, i32) {
    %c0_i32 = arith.constant 0 : i32
    %c0_i32_0 = arith.constant 0 : i32
    %c0_i32_1 = arith.constant 0 : i32
    %c0_i32_2 = arith.constant 0 : i32
    return %arg0, %c0_i32, %c0_i32_0, %c0_i32_1 : i32, i32, i32, i32
  }
  func.func @transform_1(%arg0: i32) -> (i32, i32, i32) {
    %c0_i32 = arith.constant 0 : i32
    %c0_i32_0 = arith.constant 0 : i32
    %c0_i32_1 = arith.constant 0 : i32
    %c0_i32_2 = arith.constant 0 : i32
    return %c0_i32, %c0_i32_0, %c0_i32_1 : i32, i32, i32
  }
  func.func @transform_2(%arg0: i32) -> (i32, i32, i32) {
    %c0_i32 = arith.constant 0 : i32
    %c0_i32_0 = arith.constant 0 : i32
    %c0_i32_1 = arith.constant 0 : i32
    %c0_i32_2 = arith.constant 0 : i32
    return %c0_i32, %c0_i32_0, %c0_i32_1 : i32, i32, i32
  }
  func.func @transform_3(%arg0: i32) -> (i32, i32, i32, i32) {
    %c0_i32 = arith.constant 0 : i32
    %c0_i32_0 = arith.constant 0 : i32
    %c0_i32_1 = arith.constant 0 : i32
    %c0_i32_2 = arith.constant 0 : i32
    return %arg0, %c0_i32, %c0_i32_0, %c0_i32_1 : i32, i32, i32, i32
  }
}

module attributes {stable_mosaic.version = 11 : i64} {
  func.func @_selective_scan_kernel(%arg0: i32, %arg1: i32, %arg2: memref<1x64x16xf32, #tpu.memory_space<vmem>>, %arg3: memref<1x64x16xf32, #tpu.memory_space<vmem>>, %arg4: memref<1x64x16xf32, #tpu.memory_space<vmem>>, %arg5: memref<1x64x16xf32, #tpu.memory_space<vmem>>, %arg6: memref<4x16x16xbf16, #tpu.memory_space<vmem>>, %arg7: memref<4x16x16xbf16, #tpu.memory_space<vmem>>, %arg8: memref<4x16x16xbf16, #tpu.memory_space<vmem>>, %arg9: memref<4x16x16xf32, #tpu.memory_space<vmem>>, %arg10: memref<4x1x16xf32, #tpu.memory_space<vmem>>, %arg11: memref<4x1x16xf32, #tpu.memory_space<vmem>>, %arg12: memref<1x64x16xf32, #tpu.memory_space<vmem>>, %arg13: memref<1x64x16xf32, #tpu.memory_space<vmem>>, %arg14: memref<1x64x16xf32, #tpu.memory_space<vmem>>, %arg15: memref<1x64x16xf32, #tpu.memory_space<vmem>>, %arg16: memref<256x16xf32, #tpu.memory_space<vmem>>, %arg17: memref<256x16xf32, #tpu.memory_space<vmem>>, %arg18: memref<256x16xf32, #tpu.memory_space<vmem>>, %arg19: memref<4x16x16xf32, #tpu.memory_space<vmem>>) attributes {dimension_semantics = [#tpu.dimension_semantics<parallel>, #tpu.dimension_semantics<arbitrary>], iteration_bounds = array<i64: 2, 1>, scalar_prefetch = 0 : i64, scratch_operands = 4 : i64, tpu.core_type = #tpu.core_type<tc>, window_params = [{transform_indices = @transform_0, window_bounds = array<i64: 1, 64, 16>}, {transform_indices = @transform_1, window_bounds = array<i64: 1, 64, 16>}, {transform_indices = @transform_2, window_bounds = array<i64: 1, 64, 16>}, {transform_indices = @transform_3, window_bounds = array<i64: 1, 64, 16>}, {pipeline_mode = #tpu.pipeline_mode<synchronous>, transform_indices = @transform_4, window_bounds = array<i64: 4, 16, 16>}, {pipeline_mode = #tpu.pipeline_mode<synchronous>, transform_indices = @transform_5, window_bounds = array<i64: 4, 16, 16>}, {pipeline_mode = #tpu.pipeline_mode<synchronous>, transform_indices = @transform_6, window_bounds = array<i64: 4, 16, 16>}, {pipeline_mode = #tpu.pipeline_mode<synchronous>, transform_indices = @transform_7, window_bounds = array<i64: 4, 16, 16>}, {pipeline_mode = #tpu.pipeline_mode<synchronous>, transform_indices = @transform_8, window_bounds = array<i64: 4, 1, 16>}, {pipeline_mode = #tpu.pipeline_mode<synchronous>, transform_indices = @transform_9, window_bounds = array<i64: 4, 1, 16>}, {transform_indices = @transform_10, window_bounds = array<i64: 1, 64, 16>}, {transform_indices = @transform_11, window_bounds = array<i64: 1, 64, 16>}, {transform_indices = @transform_12, window_bounds = array<i64: 1, 64, 16>}, {transform_indices = @transform_13, window_bounds = array<i64: 1, 64, 16>}]} {
    %c0_i32 = arith.constant 0 : i32
    %0 = arith.cmpi eq, %arg1, %c0_i32 : i32
    %1 = arith.extui %0 : i1 to i32
    %c0_i32_0 = arith.constant 0 : i32
    %2 = arith.cmpi ne, %1, %c0_i32_0 : i32
    scf.if %2 {
      %cst_82 = arith.constant 0.000000e+00 : f32
      %129 = vector.broadcast %cst_82 : f32 to vector<4x16x16xf32>
      %c0_83 = arith.constant 0 : index
      %c0_84 = arith.constant 0 : index
      %c0_85 = arith.constant 0 : index
      %130 = vector.load %arg19[%c0_83, %c0_84, %c0_85] : memref<4x16x16xf32, #tpu.memory_space<vmem>>, vector<4x16x16xf32>
      tpu.vector_store %arg19[%c0_83, %c0_84, %c0_85], %129 {strides = array<i32>} : memref<4x16x16xf32, #tpu.memory_space<vmem>>, vector<4x16x16xf32>,
    } else {
    }
    %c0 = arith.constant 0 : index
    %c0_1 = arith.constant 0 : index
    %c0_2 = arith.constant 0 : index
    %3 = vector.load %arg6[%c0, %c0_1, %c0_2] : memref<4x16x16xbf16, #tpu.memory_space<vmem>>, vector<4x16x16xbf16>
    %c0_3 = arith.constant 0 : index
    %c0_4 = arith.constant 0 : index
    %c0_5 = arith.constant 0 : index
    %4 = vector.load %arg7[%c0_3, %c0_4, %c0_5] : memref<4x16x16xbf16, #tpu.memory_space<vmem>>, vector<4x16x16xbf16>
    %c0_6 = arith.constant 0 : index
    %c0_7 = arith.constant 0 : index
    %c0_8 = arith.constant 0 : index
    %5 = vector.load %arg8[%c0_6, %c0_7, %c0_8] : memref<4x16x16xbf16, #tpu.memory_space<vmem>>, vector<4x16x16xbf16>
    %c0_9 = arith.constant 0 : index
    %c0_10 = arith.constant 0 : index
    %c0_11 = arith.constant 0 : index
    %6 = vector.load %arg9[%c0_9, %c0_10, %c0_11] : memref<4x16x16xf32, #tpu.memory_space<vmem>>, vector<4x16x16xf32>
    %c0_12 = arith.constant 0 : index
    %c0_13 = arith.constant 0 : index
    %c0_14 = arith.constant 0 : index
    %7 = vector.load %arg10[%c0_12, %c0_13, %c0_14] : memref<4x1x16xf32, #tpu.memory_space<vmem>>, vector<4x1x16xf32>
    %c0_15 = arith.constant 0 : index
    %c0_16 = arith.constant 0 : index
    %c0_17 = arith.constant 0 : index
    %8 = vector.load %arg11[%c0_15, %c0_16, %c0_17] : memref<4x1x16xf32, #tpu.memory_space<vmem>>, vector<4x1x16xf32>
    %c0_18 = arith.constant 0 : index
    %c0_19 = arith.constant 0 : index
    %c0_20 = arith.constant 0 : index
    %9 = vector.load %arg2[%c0_18, %c0_19, %c0_20] : memref<1x64x16xf32, #tpu.memory_space<vmem>>, vector<1x64x16xf32>
    %10 = vector.shape_cast %9 : vector<1x64x16xf32> to vector<64x16xf32>
    %11 = arith.truncf %10 : vector<64x16xf32> to vector<64x16xbf16>
    %12 = vector.extract_strided_slice %3 {offsets = [0, 0, 0], sizes = [1, 16, 16], strides = [1, 1, 1]} : vector<4x16x16xbf16> to vector<1x16x16xbf16>
    %13 = vector.shape_cast %12 : vector<1x16x16xbf16> to vector<16x16xbf16>
    %cst = arith.constant dense<0.000000e+00> : vector<64x16xf32>
    %14 = tpu.matmul %11, %13, %cst {dimension_numbers = #tpu.dot_dimension_numbers<[1], [0], [0], [1], [0, 0, 1, 1], [], []>} : vector<64x16xbf16>, vector<16x16xbf16>, vector<64x16xf32> -> vector<64x16xf32>
    %15 = vector.extract_strided_slice %8 {offsets = [0, 0, 0], sizes = [1, 1, 16], strides = [1, 1, 1]} : vector<4x1x16xf32> to vector<1x1x16xf32>
    %16 = vector.shape_cast %15 : vector<1x1x16xf32> to vector<1x16xf32>
    %17 = vector.broadcast %16 : vector<1x16xf32> to vector<64x16xf32>
    %18 = arith.addf %14, %17 : vector<64x16xf32>
    %cst_21 = arith.constant 0.000000e+00 : f32
    %19 = vector.broadcast %cst_21 : f32 to vector<64x16xf32>
    %20 = arith.maximumf %18, %19 : vector<64x16xf32>
    %21 = math.absf %18 : vector<64x16xf32>
    %cst_22 = arith.constant 0.000000e+00 : f32
    %22 = vector.broadcast %cst_22 : f32 to vector<64x16xf32>
    %23 = arith.subf %22, %21 : vector<64x16xf32>
    %24 = math.exp %23 : vector<64x16xf32>
    %cst_23 = arith.constant 1.000000e+00 : f32
    %25 = vector.broadcast %cst_23 : f32 to vector<64x16xf32>
    %26 = arith.addf %25, %24 : vector<64x16xf32>
    %27 = math.log %26 : vector<64x16xf32>
    %28 = arith.addf %20, %27 : vector<64x16xf32>
    %c0_24 = arith.constant 0 : index
    %c0_25 = arith.constant 0 : index
    %29 = vector.load %arg16[%c0_24, %c0_25] : memref<256x16xf32, #tpu.memory_space<vmem>>, vector<64x16xf32>
    tpu.vector_store %arg16[%c0_24, %c0_25], %28 {strides = array<i32>} : memref<256x16xf32, #tpu.memory_space<vmem>>, vector<64x16xf32>,
    %30 = vector.extract_strided_slice %4 {offsets = [0, 0, 0], sizes = [1, 16, 16], strides = [1, 1, 1]} : vector<4x16x16xbf16> to vector<1x16x16xbf16>
    %31 = vector.shape_cast %30 : vector<1x16x16xbf16> to vector<16x16xbf16>
    %cst_26 = arith.constant dense<0.000000e+00> : vector<64x16xf32>
    %32 = tpu.matmul %11, %31, %cst_26 {dimension_numbers = #tpu.dot_dimension_numbers<[1], [0], [0], [1], [0, 0, 1, 1], [], []>} : vector<64x16xbf16>, vector<16x16xbf16>, vector<64x16xf32> -> vector<64x16xf32>
    %c0_27 = arith.constant 0 : index
    %c0_28 = arith.constant 0 : index
    %33 = vector.load %arg17[%c0_27, %c0_28] : memref<256x16xf32, #tpu.memory_space<vmem>>, vector<64x16xf32>
    tpu.vector_store %arg17[%c0_27, %c0_28], %32 {strides = array<i32>} : memref<256x16xf32, #tpu.memory_space<vmem>>, vector<64x16xf32>,
    %34 = vector.extract_strided_slice %5 {offsets = [0, 0, 0], sizes = [1, 16, 16], strides = [1, 1, 1]} : vector<4x16x16xbf16> to vector<1x16x16xbf16>
    %35 = vector.shape_cast %34 : vector<1x16x16xbf16> to vector<16x16xbf16>
    %cst_29 = arith.constant dense<0.000000e+00> : vector<64x16xf32>
    %36 = tpu.matmul %11, %35, %cst_29 {dimension_numbers = #tpu.dot_dimension_numbers<[1], [0], [0], [1], [0, 0, 1, 1], [], []>} : vector<64x16xbf16>, vector<16x16xbf16>, vector<64x16xf32> -> vector<64x16xf32>
    %c0_30 = arith.constant 0 : index
    %c0_31 = arith.constant 0 : index
    %37 = vector.load %arg18[%c0_30, %c0_31] : memref<256x16xf32, #tpu.memory_space<vmem>>, vector<64x16xf32>
    tpu.vector_store %arg18[%c0_30, %c0_31], %36 {strides = array<i32>} : memref<256x16xf32, #tpu.memory_space<vmem>>, vector<64x16xf32>,
    %c0_32 = arith.constant 0 : index
    %c0_33 = arith.constant 0 : index
    %c0_34 = arith.constant 0 : index
    %38 = vector.load %arg3[%c0_32, %c0_33, %c0_34] : memref<1x64x16xf32, #tpu.memory_space<vmem>>, vector<1x64x16xf32>
    %39 = vector.shape_cast %38 : vector<1x64x16xf32> to vector<64x16xf32>
    %40 = arith.truncf %39 : vector<64x16xf32> to vector<64x16xbf16>
    %41 = vector.extract_strided_slice %3 {offsets = [1, 0, 0], sizes = [1, 16, 16], strides = [1, 1, 1]} : vector<4x16x16xbf16> to vector<1x16x16xbf16>
    %42 = vector.shape_cast %41 : vector<1x16x16xbf16> to vector<16x16xbf16>
    %cst_35 = arith.constant dense<0.000000e+00> : vector<64x16xf32>
    %43 = tpu.matmul %40, %42, %cst_35 {dimension_numbers = #tpu.dot_dimension_numbers<[1], [0], [0], [1], [0, 0, 1, 1], [], []>} : vector<64x16xbf16>, vector<16x16xbf16>, vector<64x16xf32> -> vector<64x16xf32>
    %44 = vector.extract_strided_slice %8 {offsets = [1, 0, 0], sizes = [1, 1, 16], strides = [1, 1, 1]} : vector<4x1x16xf32> to vector<1x1x16xf32>
    %45 = vector.shape_cast %44 : vector<1x1x16xf32> to vector<1x16xf32>
    %46 = vector.broadcast %45 : vector<1x16xf32> to vector<64x16xf32>
    %47 = arith.addf %43, %46 : vector<64x16xf32>
    %cst_36 = arith.constant 0.000000e+00 : f32
    %48 = vector.broadcast %cst_36 : f32 to vector<64x16xf32>
    %49 = arith.maximumf %47, %48 : vector<64x16xf32>
    %50 = math.absf %47 : vector<64x16xf32>
    %cst_37 = arith.constant 0.000000e+00 : f32
    %51 = vector.broadcast %cst_37 : f32 to vector<64x16xf32>
    %52 = arith.subf %51, %50 : vector<64x16xf32>
    %53 = math.exp %52 : vector<64x16xf32>
    %cst_38 = arith.constant 1.000000e+00 : f32
    %54 = vector.broadcast %cst_38 : f32 to vector<64x16xf32>
    %55 = arith.addf %54, %53 : vector<64x16xf32>
    %56 = math.log %55 : vector<64x16xf32>
    %57 = arith.addf %49, %56 : vector<64x16xf32>
    %c64 = arith.constant 64 : index
    %c0_39 = arith.constant 0 : index
    %58 = vector.load %arg16[%c64, %c0_39] : memref<256x16xf32, #tpu.memory_space<vmem>>, vector<64x16xf32>
    tpu.vector_store %arg16[%c64, %c0_39], %57 {strides = array<i32>} : memref<256x16xf32, #tpu.memory_space<vmem>>, vector<64x16xf32>,
    %59 = vector.extract_strided_slice %4 {offsets = [1, 0, 0], sizes = [1, 16, 16], strides = [1, 1, 1]} : vector<4x16x16xbf16> to vector<1x16x16xbf16>
    %60 = vector.shape_cast %59 : vector<1x16x16xbf16> to vector<16x16xbf16>
    %cst_40 = arith.constant dense<0.000000e+00> : vector<64x16xf32>
    %61 = tpu.matmul %40, %60, %cst_40 {dimension_numbers = #tpu.dot_dimension_numbers<[1], [0], [0], [1], [0, 0, 1, 1], [], []>} : vector<64x16xbf16>, vector<16x16xbf16>, vector<64x16xf32> -> vector<64x16xf32>
    %c64_41 = arith.constant 64 : index
    %c0_42 = arith.constant 0 : index
    %62 = vector.load %arg17[%c64_41, %c0_42] : memref<256x16xf32, #tpu.memory_space<vmem>>, vector<64x16xf32>
    tpu.vector_store %arg17[%c64_41, %c0_42], %61 {strides = array<i32>} : memref<256x16xf32, #tpu.memory_space<vmem>>, vector<64x16xf32>,
    %63 = vector.extract_strided_slice %5 {offsets = [1, 0, 0], sizes = [1, 16, 16], strides = [1, 1, 1]} : vector<4x16x16xbf16> to vector<1x16x16xbf16>
    %64 = vector.shape_cast %63 : vector<1x16x16xbf16> to vector<16x16xbf16>
    %cst_43 = arith.constant dense<0.000000e+00> : vector<64x16xf32>
    %65 = tpu.matmul %40, %64, %cst_43 {dimension_numbers = #tpu.dot_dimension_numbers<[1], [0], [0], [1], [0, 0, 1, 1], [], []>} : vector<64x16xbf16>, vector<16x16xbf16>, vector<64x16xf32> -> vector<64x16xf32>
    %c64_44 = arith.constant 64 : index
    %c0_45 = arith.constant 0 : index
    %66 = vector.load %arg18[%c64_44, %c0_45] : memref<256x16xf32, #tpu.memory_space<vmem>>, vector<64x16xf32>
    tpu.vector_store %arg18[%c64_44, %c0_45], %65 {strides = array<i32>} : memref<256x16xf32, #tpu.memory_space<vmem>>, vector<64x16xf32>,
    %c0_46 = arith.constant 0 : index
    %c0_47 = arith.constant 0 : index
    %c0_48 = arith.constant 0 : index
    %67 = vector.load %arg4[%c0_46, %c0_47, %c0_48] : memref<1x64x16xf32, #tpu.memory_space<vmem>>, vector<1x64x16xf32>
    %68 = vector.shape_cast %67 : vector<1x64x16xf32> to vector<64x16xf32>
    %69 = arith.truncf %68 : vector<64x16xf32> to vector<64x16xbf16>
    %70 = vector.extract_strided_slice %3 {offsets = [2, 0, 0], sizes = [1, 16, 16], strides = [1, 1, 1]} : vector<4x16x16xbf16> to vector<1x16x16xbf16>
    %71 = vector.shape_cast %70 : vector<1x16x16xbf16> to vector<16x16xbf16>
    %cst_49 = arith.constant dense<0.000000e+00> : vector<64x16xf32>
    %72 = tpu.matmul %69, %71, %cst_49 {dimension_numbers = #tpu.dot_dimension_numbers<[1], [0], [0], [1], [0, 0, 1, 1], [], []>} : vector<64x16xbf16>, vector<16x16xbf16>, vector<64x16xf32> -> vector<64x16xf32>
    %73 = vector.extract_strided_slice %8 {offsets = [2, 0, 0], sizes = [1, 1, 16], strides = [1, 1, 1]} : vector<4x1x16xf32> to vector<1x1x16xf32>
    %74 = vector.shape_cast %73 : vector<1x1x16xf32> to vector<1x16xf32>
    %75 = vector.broadcast %74 : vector<1x16xf32> to vector<64x16xf32>
    %76 = arith.addf %72, %75 : vector<64x16xf32>
    %cst_50 = arith.constant 0.000000e+00 : f32
    %77 = vector.broadcast %cst_50 : f32 to vector<64x16xf32>
    %78 = arith.maximumf %76, %77 : vector<64x16xf32>
    %79 = math.absf %76 : vector<64x16xf32>
    %cst_51 = arith.constant 0.000000e+00 : f32
    %80 = vector.broadcast %cst_51 : f32 to vector<64x16xf32>
    %81 = arith.subf %80, %79 : vector<64x16xf32>
    %82 = math.exp %81 : vector<64x16xf32>
    %cst_52 = arith.constant 1.000000e+00 : f32
    %83 = vector.broadcast %cst_52 : f32 to vector<64x16xf32>
    %84 = arith.addf %83, %82 : vector<64x16xf32>
    %85 = math.log %84 : vector<64x16xf32>
    %86 = arith.addf %78, %85 : vector<64x16xf32>
    %c128 = arith.constant 128 : index
    %c0_53 = arith.constant 0 : index
    %87 = vector.load %arg16[%c128, %c0_53] : memref<256x16xf32, #tpu.memory_space<vmem>>, vector<64x16xf32>
    tpu.vector_store %arg16[%c128, %c0_53], %86 {strides = array<i32>} : memref<256x16xf32, #tpu.memory_space<vmem>>, vector<64x16xf32>,
    %88 = vector.extract_strided_slice %4 {offsets = [2, 0, 0], sizes = [1, 16, 16], strides = [1, 1, 1]} : vector<4x16x16xbf16> to vector<1x16x16xbf16>
    %89 = vector.shape_cast %88 : vector<1x16x16xbf16> to vector<16x16xbf16>
    %cst_54 = arith.constant dense<0.000000e+00> : vector<64x16xf32>
    %90 = tpu.matmul %69, %89, %cst_54 {dimension_numbers = #tpu.dot_dimension_numbers<[1], [0], [0], [1], [0, 0, 1, 1], [], []>} : vector<64x16xbf16>, vector<16x16xbf16>, vector<64x16xf32> -> vector<64x16xf32>
    %c128_55 = arith.constant 128 : index
    %c0_56 = arith.constant 0 : index
    %91 = vector.load %arg17[%c128_55, %c0_56] : memref<256x16xf32, #tpu.memory_space<vmem>>, vector<64x16xf32>
    tpu.vector_store %arg17[%c128_55, %c0_56], %90 {strides = array<i32>} : memref<256x16xf32, #tpu.memory_space<vmem>>, vector<64x16xf32>,
    %92 = vector.extract_strided_slice %5 {offsets = [2, 0, 0], sizes = [1, 16, 16], strides = [1, 1, 1]} : vector<4x16x16xbf16> to vector<1x16x16xbf16>
    %93 = vector.shape_cast %92 : vector<1x16x16xbf16> to vector<16x16xbf16>
    %cst_57 = arith.constant dense<0.000000e+00> : vector<64x16xf32>
    %94 = tpu.matmul %69, %93, %cst_57 {dimension_numbers = #tpu.dot_dimension_numbers<[1], [0], [0], [1], [0, 0, 1, 1], [], []>} : vector<64x16xbf16>, vector<16x16xbf16>, vector<64x16xf32> -> vector<64x16xf32>
    %c128_58 = arith.constant 128 : index
    %c0_59 = arith.constant 0 : index
    %95 = vector.load %arg18[%c128_58, %c0_59] : memref<256x16xf32, #tpu.memory_space<vmem>>, vector<64x16xf32>
    tpu.vector_store %arg18[%c128_58, %c0_59], %94 {strides = array<i32>} : memref<256x16xf32, #tpu.memory_space<vmem>>, vector<64x16xf32>,
    %c0_60 = arith.constant 0 : index
    %c0_61 = arith.constant 0 : index
    %c0_62 = arith.constant 0 : index
    %96 = vector.load %arg5[%c0_60, %c0_61, %c0_62] : memref<1x64x16xf32, #tpu.memory_space<vmem>>, vector<1x64x16xf32>
    %97 = vector.shape_cast %96 : vector<1x64x16xf32> to vector<64x16xf32>
    %98 = arith.truncf %97 : vector<64x16xf32> to vector<64x16xbf16>
    %99 = vector.extract_strided_slice %3 {offsets = [3, 0, 0], sizes = [1, 16, 16], strides = [1, 1, 1]} : vector<4x16x16xbf16> to vector<1x16x16xbf16>
    %100 = vector.shape_cast %99 : vector<1x16x16xbf16> to vector<16x16xbf16>
    %cst_63 = arith.constant dense<0.000000e+00> : vector<64x16xf32>
    %101 = tpu.matmul %98, %100, %cst_63 {dimension_numbers = #tpu.dot_dimension_numbers<[1], [0], [0], [1], [0, 0, 1, 1], [], []>} : vector<64x16xbf16>, vector<16x16xbf16>, vector<64x16xf32> -> vector<64x16xf32>
    %102 = vector.extract_strided_slice %8 {offsets = [3, 0, 0], sizes = [1, 1, 16], strides = [1, 1, 1]} : vector<4x1x16xf32> to vector<1x1x16xf32>
    %103 = vector.shape_cast %102 : vector<1x1x16xf32> to vector<1x16xf32>
    %104 = vector.broadcast %103 : vector<1x16xf32> to vector<64x16xf32>
    %105 = arith.addf %101, %104 : vector<64x16xf32>
    %cst_64 = arith.constant 0.000000e+00 : f32
    %106 = vector.broadcast %cst_64 : f32 to vector<64x16xf32>
    %107 = arith.maximumf %105, %106 : vector<64x16xf32>
    %108 = math.absf %105 : vector<64x16xf32>
    %cst_65 = arith.constant 0.000000e+00 : f32
    %109 = vector.broadcast %cst_65 : f32 to vector<64x16xf32>
    %110 = arith.subf %109, %108 : vector<64x16xf32>
    %111 = math.exp %110 : vector<64x16xf32>
    %cst_66 = arith.constant 1.000000e+00 : f32
    %112 = vector.broadcast %cst_66 : f32 to vector<64x16xf32>
    %113 = arith.addf %112, %111 : vector<64x16xf32>
    %114 = math.log %113 : vector<64x16xf32>
    %115 = arith.addf %107, %114 : vector<64x16xf32>
    %c192 = arith.constant 192 : index
    %c0_67 = arith.constant 0 : index
    %116 = vector.load %arg16[%c192, %c0_67] : memref<256x16xf32, #tpu.memory_space<vmem>>, vector<64x16xf32>
    tpu.vector_store %arg16[%c192, %c0_67], %115 {strides = array<i32>} : memref<256x16xf32, #tpu.memory_space<vmem>>, vector<64x16xf32>,
    %117 = vector.extract_strided_slice %4 {offsets = [3, 0, 0], sizes = [1, 16, 16], strides = [1, 1, 1]} : vector<4x16x16xbf16> to vector<1x16x16xbf16>
    %118 = vector.shape_cast %117 : vector<1x16x16xbf16> to vector<16x16xbf16>
    %cst_68 = arith.constant dense<0.000000e+00> : vector<64x16xf32>
    %119 = tpu.matmul %98, %118, %cst_68 {dimension_numbers = #tpu.dot_dimension_numbers<[1], [0], [0], [1], [0, 0, 1, 1], [], []>} : vector<64x16xbf16>, vector<16x16xbf16>, vector<64x16xf32> -> vector<64x16xf32>
    %c192_69 = arith.constant 192 : index
    %c0_70 = arith.constant 0 : index
    %120 = vector.load %arg17[%c192_69, %c0_70] : memref<256x16xf32, #tpu.memory_space<vmem>>, vector<64x16xf32>
    tpu.vector_store %arg17[%c192_69, %c0_70], %119 {strides = array<i32>} : memref<256x16xf32, #tpu.memory_space<vmem>>, vector<64x16xf32>,
    %121 = vector.extract_strided_slice %5 {offsets = [3, 0, 0], sizes = [1, 16, 16], strides = [1, 1, 1]} : vector<4x16x16xbf16> to vector<1x16x16xbf16>
    %122 = vector.shape_cast %121 : vector<1x16x16xbf16> to vector<16x16xbf16>
    %cst_71 = arith.constant dense<0.000000e+00> : vector<64x16xf32>
    %123 = tpu.matmul %98, %122, %cst_71 {dimension_numbers = #tpu.dot_dimension_numbers<[1], [0], [0], [1], [0, 0, 1, 1], [], []>} : vector<64x16xbf16>, vector<16x16xbf16>, vector<64x16xf32> -> vector<64x16xf32>
    %c192_72 = arith.constant 192 : index
    %c0_73 = arith.constant 0 : index
    %124 = vector.load %arg18[%c192_72, %c0_73] : memref<256x16xf32, #tpu.memory_space<vmem>>, vector<64x16xf32>
    tpu.vector_store %arg18[%c192_72, %c0_73], %123 {strides = array<i32>} : memref<256x16xf32, #tpu.memory_space<vmem>>, vector<64x16xf32>,
    %c0_74 = arith.constant 0 : index
    %c0_75 = arith.constant 0 : index
    %c0_76 = arith.constant 0 : index
    %125 = vector.load %arg19[%c0_74, %c0_75, %c0_76] : memref<4x16x16xf32, #tpu.memory_space<vmem>>, vector<4x16x16xf32>
    %c0_i32_77 = arith.constant 0 : i32
    %c8_i32 = arith.constant 8 : i32
    %126 = arith.addi %c0_i32_77, %c8_i32 : i32
    %c1_i32 = arith.constant 1 : i32
    %127 = scf.for %arg20 = %c0_i32_77 to %126 step %c1_i32 iter_args(%arg21 = %125) -> (vector<4x16x16xf32>)  : i32 {
      %c8_i32_82 = arith.constant 8 : i32
      %129 = arith.muli %arg20, %c8_i32_82 : i32
      %130 = tpu.assume_multiple %129, 8 : i32
      %c8_i32_83 = arith.constant 8 : i32
      %131 = arith.muli %arg20, %c8_i32_83 : i32
      %c56_i32 = arith.constant 56 : i32
      %132 = arith.subi %c56_i32, %131 : i32
      %133 = tpu.assume_multiple %132, 8 : i32
      %c0_84 = arith.constant 0 : index
      %134 = arith.index_cast %130 : i32 to index
      %c0_85 = arith.constant 0 : index
      %135 = vector.load %arg2[%c0_84, %134, %c0_85] : memref<1x64x16xf32, #tpu.memory_space<vmem>>, vector<1x8x16xf32>
      %136 = vector.shape_cast %135 : vector<1x8x16xf32> to vector<8x16xf32>
      %c0_i32_86 = arith.constant 0 : i32
      %137 = arith.addi %c0_i32_86, %130 : i32
      %138 = arith.index_cast %137 : i32 to index
      %c0_87 = arith.constant 0 : index
      %139 = vector.load %arg16[%138, %c0_87] : memref<256x16xf32, #tpu.memory_space<vmem>>, vector<8x16xf32>
      %c0_i32_88 = arith.constant 0 : i32
      %140 = arith.addi %c0_i32_88, %130 : i32
      %141 = arith.index_cast %140 : i32 to index
      %c0_89 = arith.constant 0 : index
      %142 = vector.load %arg17[%141, %c0_89] : memref<256x16xf32, #tpu.memory_space<vmem>>, vector<8x16xf32>
      %c0_i32_90 = arith.constant 0 : i32
      %143 = arith.addi %c0_i32_90, %130 : i32
      %144 = arith.index_cast %143 : i32 to index
      %c0_91 = arith.constant 0 : index
      %145 = vector.load %arg18[%144, %c0_91] : memref<256x16xf32, #tpu.memory_space<vmem>>, vector<8x16xf32>
      %146 = arith.mulf %139, %136 : vector<8x16xf32>
      %147 = vector.shape_cast %139 : vector<8x16xf32> to vector<8x1x16xf32>
      %148 = vector.extract_strided_slice %6 {offsets = [0, 0, 0], sizes = [1, 16, 16], strides = [1, 1, 1]} : vector<4x16x16xf32> to vector<1x16x16xf32>
      %149 = vector.shape_cast %148 : vector<1x16x16xf32> to vector<16x16xf32>
      %150 = vector.shape_cast %149 : vector<16x16xf32> to vector<1x16x16xf32>
      %151 = vector.broadcast %147 : vector<8x1x16xf32> to vector<8x16x16xf32>
      %152 = vector.broadcast %150 : vector<1x16x16xf32> to vector<8x16x16xf32>
      %153 = arith.mulf %151, %152 : vector<8x16x16xf32>
      %154 = math.exp %153 : vector<8x16x16xf32>
      %155 = vector.shape_cast %142 : vector<8x16xf32> to vector<8x16x1xf32>
      %156 = vector.shape_cast %146 : vector<8x16xf32> to vector<8x1x16xf32>
      %157 = vector.broadcast %155 : vector<8x16x1xf32> to vector<8x16x16xf32>
      %158 = vector.broadcast %156 : vector<8x1x16xf32> to vector<8x16x16xf32>
      %159 = arith.mulf %157, %158 : vector<8x16x16xf32>
      %160 = vector.shape_cast %145 : vector<8x16xf32> to vector<8x16x1xf32>
      %161 = vector.extract_strided_slice %arg21 {offsets = [0, 0, 0], sizes = [1, 16, 16], strides = [1, 1, 1]} : vector<4x16x16xf32> to vector<1x16x16xf32>
      %162 = vector.shape_cast %161 : vector<1x16x16xf32> to vector<16x16xf32>
      %163 = vector.extract_strided_slice %154 {offsets = [0, 0, 0], sizes = [1, 16, 16], strides = [1, 1, 1]} : vector<8x16x16xf32> to vector<1x16x16xf32>
      %164 = vector.shape_cast %163 : vector<1x16x16xf32> to vector<16x16xf32>
      %165 = arith.mulf %164, %162 : vector<16x16xf32>
      %166 = vector.extract_strided_slice %159 {offsets = [0, 0, 0], sizes = [1, 16, 16], strides = [1, 1, 1]} : vector<8x16x16xf32> to vector<1x16x16xf32>
      %167 = vector.shape_cast %166 : vector<1x16x16xf32> to vector<16x16xf32>
      %168 = arith.addf %165, %167 : vector<16x16xf32>
      %169 = vector.extract_strided_slice %160 {offsets = [0, 0, 0], sizes = [1, 16, 1], strides = [1, 1, 1]} : vector<8x16x1xf32> to vector<1x16x1xf32>
      %170 = vector.shape_cast %169 : vector<1x16x1xf32> to vector<16x1xf32>
      %171 = vector.broadcast %170 : vector<16x1xf32> to vector<16x16xf32>
      %172 = arith.mulf %171, %168 : vector<16x16xf32>
      %cst_92 = arith.constant dense<0.000000e+00> : vector<16xf32>
      %173 = vector.multi_reduction <add>, %172, %cst_92 [0] : vector<16x16xf32> to vector<16xf32>
      %174 = vector.shape_cast %173 : vector<16xf32> to vector<1x16xf32>
      %175 = vector.extract_strided_slice %154 {offsets = [1, 0, 0], sizes = [1, 16, 16], strides = [1, 1, 1]} : vector<8x16x16xf32> to vector<1x16x16xf32>
      %176 = vector.shape_cast %175 : vector<1x16x16xf32> to vector<16x16xf32>
      %177 = arith.mulf %176, %168 : vector<16x16xf32>
      %178 = vector.extract_strided_slice %159 {offsets = [1, 0, 0], sizes = [1, 16, 16], strides = [1, 1, 1]} : vector<8x16x16xf32> to vector<1x16x16xf32>
      %179 = vector.shape_cast %178 : vector<1x16x16xf32> to vector<16x16xf32>
      %180 = arith.addf %177, %179 : vector<16x16xf32>
      %181 = vector.extract_strided_slice %160 {offsets = [1, 0, 0], sizes = [1, 16, 1], strides = [1, 1, 1]} : vector<8x16x1xf32> to vector<1x16x1xf32>
      %182 = vector.shape_cast %181 : vector<1x16x1xf32> to vector<16x1xf32>
      %183 = vector.broadcast %182 : vector<16x1xf32> to vector<16x16xf32>
      %184 = arith.mulf %183, %180 : vector<16x16xf32>
      %cst_93 = arith.constant dense<0.000000e+00> : vector<16xf32>
      %185 = vector.multi_reduction <add>, %184, %cst_93 [0] : vector<16x16xf32> to vector<16xf32>
      %186 = vector.shape_cast %185 : vector<16xf32> to vector<1x16xf32>
      %187 = vector.extract_strided_slice %154 {offsets = [2, 0, 0], sizes = [1, 16, 16], strides = [1, 1, 1]} : vector<8x16x16xf32> to vector<1x16x16xf32>
      %188 = vector.shape_cast %187 : vector<1x16x16xf32> to vector<16x16xf32>
      %189 = arith.mulf %188, %180 : vector<16x16xf32>
      %190 = vector.extract_strided_slice %159 {offsets = [2, 0, 0], sizes = [1, 16, 16], strides = [1, 1, 1]} : vector<8x16x16xf32> to vector<1x16x16xf32>
      %191 = vector.shape_cast %190 : vector<1x16x16xf32> to vector<16x16xf32>
      %192 = arith.addf %189, %191 : vector<16x16xf32>
      %193 = vector.extract_strided_slice %160 {offsets = [2, 0, 0], sizes = [1, 16, 1], strides = [1, 1, 1]} : vector<8x16x1xf32> to vector<1x16x1xf32>
      %194 = vector.shape_cast %193 : vector<1x16x1xf32> to vector<16x1xf32>
      %195 = vector.broadcast %194 : vector<16x1xf32> to vector<16x16xf32>
      %196 = arith.mulf %195, %192 : vector<16x16xf32>
      %cst_94 = arith.constant dense<0.000000e+00> : vector<16xf32>
      %197 = vector.multi_reduction <add>, %196, %cst_94 [0] : vector<16x16xf32> to vector<16xf32>
      %198 = vector.shape_cast %197 : vector<16xf32> to vector<1x16xf32>
      %199 = vector.extract_strided_slice %154 {offsets = [3, 0, 0], sizes = [1, 16, 16], strides = [1, 1, 1]} : vector<8x16x16xf32> to vector<1x16x16xf32>
      %200 = vector.shape_cast %199 : vector<1x16x16xf32> to vector<16x16xf32>
      %201 = arith.mulf %200, %192 : vector<16x16xf32>
      %202 = vector.extract_strided_slice %159 {offsets = [3, 0, 0], sizes = [1, 16, 16], strides = [1, 1, 1]} : vector<8x16x16xf32> to vector<1x16x16xf32>
      %203 = vector.shape_cast %202 : vector<1x16x16xf32> to vector<16x16xf32>
      %204 = arith.addf %201, %203 : vector<16x16xf32>
      %205 = vector.extract_strided_slice %160 {offsets = [3, 0, 0], sizes = [1, 16, 1], strides = [1, 1, 1]} : vector<8x16x1xf32> to vector<1x16x1xf32>
      %206 = vector.shape_cast %205 : vector<1x16x1xf32> to vector<16x1xf32>
      %207 = vector.broadcast %206 : vector<16x1xf32> to vector<16x16xf32>
      %208 = arith.mulf %207, %204 : vector<16x16xf32>
      %cst_95 = arith.constant dense<0.000000e+00> : vector<16xf32>
      %209 = vector.multi_reduction <add>, %208, %cst_95 [0] : vector<16x16xf32> to vector<16xf32>
      %210 = vector.shape_cast %209 : vector<16xf32> to vector<1x16xf32>
      %211 = vector.extract_strided_slice %154 {offsets = [4, 0, 0], sizes = [1, 16, 16], strides = [1, 1, 1]} : vector<8x16x16xf32> to vector<1x16x16xf32>
      %212 = vector.shape_cast %211 : vector<1x16x16xf32> to vector<16x16xf32>
      %213 = arith.mulf %212, %204 : vector<16x16xf32>
      %214 = vector.extract_strided_slice %159 {offsets = [4, 0, 0], sizes = [1, 16, 16], strides = [1, 1, 1]} : vector<8x16x16xf32> to vector<1x16x16xf32>
      %215 = vector.shape_cast %214 : vector<1x16x16xf32> to vector<16x16xf32>
      %216 = arith.addf %213, %215 : vector<16x16xf32>
      %217 = vector.extract_strided_slice %160 {offsets = [4, 0, 0], sizes = [1, 16, 1], strides = [1, 1, 1]} : vector<8x16x1xf32> to vector<1x16x1xf32>
      %218 = vector.shape_cast %217 : vector<1x16x1xf32> to vector<16x1xf32>
      %219 = vector.broadcast %218 : vector<16x1xf32> to vector<16x16xf32>
      %220 = arith.mulf %219, %216 : vector<16x16xf32>
      %cst_96 = arith.constant dense<0.000000e+00> : vector<16xf32>
      %221 = vector.multi_reduction <add>, %220, %cst_96 [0] : vector<16x16xf32> to vector<16xf32>
      %222 = vector.shape_cast %221 : vector<16xf32> to vector<1x16xf32>
      %223 = vector.extract_strided_slice %154 {offsets = [5, 0, 0], sizes = [1, 16, 16], strides = [1, 1, 1]} : vector<8x16x16xf32> to vector<1x16x16xf32>
      %224 = vector.shape_cast %223 : vector<1x16x16xf32> to vector<16x16xf32>
      %225 = arith.mulf %224, %216 : vector<16x16xf32>
      %226 = vector.extract_strided_slice %159 {offsets = [5, 0, 0], sizes = [1, 16, 16], strides = [1, 1, 1]} : vector<8x16x16xf32> to vector<1x16x16xf32>
      %227 = vector.shape_cast %226 : vector<1x16x16xf32> to vector<16x16xf32>
      %228 = arith.addf %225, %227 : vector<16x16xf32>
      %229 = vector.extract_strided_slice %160 {offsets = [5, 0, 0], sizes = [1, 16, 1], strides = [1, 1, 1]} : vector<8x16x1xf32> to vector<1x16x1xf32>
      %230 = vector.shape_cast %229 : vector<1x16x1xf32> to vector<16x1xf32>
      %231 = vector.broadcast %230 : vector<16x1xf32> to vector<16x16xf32>
      %232 = arith.mulf %231, %228 : vector<16x16xf32>
      %cst_97 = arith.constant dense<0.000000e+00> : vector<16xf32>
      %233 = vector.multi_reduction <add>, %232, %cst_97 [0] : vector<16x16xf32> to vector<16xf32>
      %234 = vector.shape_cast %233 : vector<16xf32> to vector<1x16xf32>
      %235 = vector.extract_strided_slice %154 {offsets = [6, 0, 0], sizes = [1, 16, 16], strides = [1, 1, 1]} : vector<8x16x16xf32> to vector<1x16x16xf32>
      %236 = vector.shape_cast %235 : vector<1x16x16xf32> to vector<16x16xf32>
      %237 = arith.mulf %236, %228 : vector<16x16xf32>
      %238 = vector.extract_strided_slice %159 {offsets = [6, 0, 0], sizes = [1, 16, 16], strides = [1, 1, 1]} : vector<8x16x16xf32> to vector<1x16x16xf32>
      %239 = vector.shape_cast %238 : vector<1x16x16xf32> to vector<16x16xf32>
      %240 = arith.addf %237, %239 : vector<16x16xf32>
      %241 = vector.extract_strided_slice %160 {offsets = [6, 0, 0], sizes = [1, 16, 1], strides = [1, 1, 1]} : vector<8x16x1xf32> to vector<1x16x1xf32>
      %242 = vector.shape_cast %241 : vector<1x16x1xf32> to vector<16x1xf32>
      %243 = vector.broadcast %242 : vector<16x1xf32> to vector<16x16xf32>
      %244 = arith.mulf %243, %240 : vector<16x16xf32>
      %cst_98 = arith.constant dense<0.000000e+00> : vector<16xf32>
      %245 = vector.multi_reduction <add>, %244, %cst_98 [0] : vector<16x16xf32> to vector<16xf32>
      %246 = vector.shape_cast %245 : vector<16xf32> to vector<1x16xf32>
      %247 = vector.extract_strided_slice %154 {offsets = [7, 0, 0], sizes = [1, 16, 16], strides = [1, 1, 1]} : vector<8x16x16xf32> to vector<1x16x16xf32>
      %248 = vector.shape_cast %247 : vector<1x16x16xf32> to vector<16x16xf32>
      %249 = arith.mulf %248, %240 : vector<16x16xf32>
      %250 = vector.extract_strided_slice %159 {offsets = [7, 0, 0], sizes = [1, 16, 16], strides = [1, 1, 1]} : vector<8x16x16xf32> to vector<1x16x16xf32>
      %251 = vector.shape_cast %250 : vector<1x16x16xf32> to vector<16x16xf32>
      %252 = arith.addf %249, %251 : vector<16x16xf32>
      %253 = vector.extract_strided_slice %160 {offsets = [7, 0, 0], sizes = [1, 16, 1], strides = [1, 1, 1]} : vector<8x16x1xf32> to vector<1x16x1xf32>
      %254 = vector.shape_cast %253 : vector<1x16x1xf32> to vector<16x1xf32>
      %255 = vector.broadcast %254 : vector<16x1xf32> to vector<16x16xf32>
      %256 = arith.mulf %255, %252 : vector<16x16xf32>
      %cst_99 = arith.constant dense<0.000000e+00> : vector<16xf32>
      %257 = vector.multi_reduction <add>, %256, %cst_99 [0] : vector<16x16xf32> to vector<16xf32>
      %258 = vector.shape_cast %257 : vector<16xf32> to vector<1x16xf32>
      %259 = tpu.concatenate %174, %186, %198, %210, %222, %234, %246, %258 in 0 : vector<1x16xf32>, vector<1x16xf32>, vector<1x16xf32>, vector<1x16xf32>, vector<1x16xf32>, vector<1x16xf32>, vector<1x16xf32>, vector<1x16xf32> -> vector<8x16xf32>
      %260 = vector.extract_strided_slice %7 {offsets = [0, 0, 0], sizes = [1, 1, 16], strides = [1, 1, 1]} : vector<4x1x16xf32> to vector<1x1x16xf32>
      %261 = vector.shape_cast %260 : vector<1x1x16xf32> to vector<1x16xf32>
      %262 = vector.broadcast %261 : vector<1x16xf32> to vector<8x16xf32>
      %263 = arith.mulf %136, %262 : vector<8x16xf32>
      %264 = arith.addf %259, %263 : vector<8x16xf32>
      %c0_100 = arith.constant 0 : index
      %265 = arith.index_cast %130 : i32 to index
      %c0_101 = arith.constant 0 : index
      %266 = vector.load %arg12[%c0_100, %265, %c0_101] : memref<1x64x16xf32, #tpu.memory_space<vmem>>, vector<1x8x16xf32>
      %267 = vector.shape_cast %266 : vector<1x8x16xf32> to vector<8x16xf32>
      %268 = vector.shape_cast %264 : vector<8x16xf32> to vector<1x8x16xf32>
      tpu.vector_store %arg12[%c0_100, %265, %c0_101], %268 {strides = array<i32>} : memref<1x64x16xf32, #tpu.memory_space<vmem>>, vector<1x8x16xf32>,
      %c0_102 = arith.constant 0 : index
      %269 = arith.index_cast %130 : i32 to index
      %c0_103 = arith.constant 0 : index
      %270 = vector.load %arg3[%c0_102, %269, %c0_103] : memref<1x64x16xf32, #tpu.memory_space<vmem>>, vector<1x8x16xf32>
      %271 = vector.shape_cast %270 : vector<1x8x16xf32> to vector<8x16xf32>
      %c64_i32 = arith.constant 64 : i32
      %272 = arith.addi %c64_i32, %130 : i32
      %273 = arith.index_cast %272 : i32 to index
      %c0_104 = arith.constant 0 : index
      %274 = vector.load %arg16[%273, %c0_104] : memref<256x16xf32, #tpu.memory_space<vmem>>, vector<8x16xf32>
      %c64_i32_105 = arith.constant 64 : i32
      %275 = arith.addi %c64_i32_105, %130 : i32
      %276 = arith.index_cast %275 : i32 to index
      %c0_106 = arith.constant 0 : index
      %277 = vector.load %arg17[%276, %c0_106] : memref<256x16xf32, #tpu.memory_space<vmem>>, vector<8x16xf32>
      %c64_i32_107 = arith.constant 64 : i32
      %278 = arith.addi %c64_i32_107, %130 : i32
      %279 = arith.index_cast %278 : i32 to index
      %c0_108 = arith.constant 0 : index
      %280 = vector.load %arg18[%279, %c0_108] : memref<256x16xf32, #tpu.memory_space<vmem>>, vector<8x16xf32>
      %281 = arith.mulf %274, %271 : vector<8x16xf32>
      %282 = vector.shape_cast %274 : vector<8x16xf32> to vector<8x1x16xf32>
      %283 = vector.extract_strided_slice %6 {offsets = [1, 0, 0], sizes = [1, 16, 16], strides = [1, 1, 1]} : vector<4x16x16xf32> to vector<1x16x16xf32>
      %284 = vector.shape_cast %283 : vector<1x16x16xf32> to vector<16x16xf32>
      %285 = vector.shape_cast %284 : vector<16x16xf32> to vector<1x16x16xf32>
      %286 = vector.broadcast %282 : vector<8x1x16xf32> to vector<8x16x16xf32>
      %287 = vector.broadcast %285 : vector<1x16x16xf32> to vector<8x16x16xf32>
      %288 = arith.mulf %286, %287 : vector<8x16x16xf32>
      %289 = math.exp %288 : vector<8x16x16xf32>
      %290 = vector.shape_cast %277 : vector<8x16xf32> to vector<8x16x1xf32>
      %291 = vector.shape_cast %281 : vector<8x16xf32> to vector<8x1x16xf32>
      %292 = vector.broadcast %290 : vector<8x16x1xf32> to vector<8x16x16xf32>
      %293 = vector.broadcast %291 : vector<8x1x16xf32> to vector<8x16x16xf32>
      %294 = arith.mulf %292, %293 : vector<8x16x16xf32>
      %295 = vector.shape_cast %280 : vector<8x16xf32> to vector<8x16x1xf32>
      %296 = vector.extract_strided_slice %arg21 {offsets = [1, 0, 0], sizes = [1, 16, 16], strides = [1, 1, 1]} : vector<4x16x16xf32> to vector<1x16x16xf32>
      %297 = vector.shape_cast %296 : vector<1x16x16xf32> to vector<16x16xf32>
      %298 = vector.extract_strided_slice %289 {offsets = [0, 0, 0], sizes = [1, 16, 16], strides = [1, 1, 1]} : vector<8x16x16xf32> to vector<1x16x16xf32>
      %299 = vector.shape_cast %298 : vector<1x16x16xf32> to vector<16x16xf32>
      %300 = arith.mulf %299, %297 : vector<16x16xf32>
      %301 = vector.extract_strided_slice %294 {offsets = [0, 0, 0], sizes = [1, 16, 16], strides = [1, 1, 1]} : vector<8x16x16xf32> to vector<1x16x16xf32>
      %302 = vector.shape_cast %301 : vector<1x16x16xf32> to vector<16x16xf32>
      %303 = arith.addf %300, %302 : vector<16x16xf32>
      %304 = vector.extract_strided_slice %295 {offsets = [0, 0, 0], sizes = [1, 16, 1], strides = [1, 1, 1]} : vector<8x16x1xf32> to vector<1x16x1xf32>
      %305 = vector.shape_cast %304 : vector<1x16x1xf32> to vector<16x1xf32>
      %306 = vector.broadcast %305 : vector<16x1xf32> to vector<16x16xf32>
      %307 = arith.mulf %306, %303 : vector<16x16xf32>
      %cst_109 = arith.constant dense<0.000000e+00> : vector<16xf32>
      %308 = vector.multi_reduction <add>, %307, %cst_109 [0] : vector<16x16xf32> to vector<16xf32>
      %309 = vector.shape_cast %308 : vector<16xf32> to vector<1x16xf32>
      %310 = vector.extract_strided_slice %289 {offsets = [1, 0, 0], sizes = [1, 16, 16], strides = [1, 1, 1]} : vector<8x16x16xf32> to vector<1x16x16xf32>
      %311 = vector.shape_cast %310 : vector<1x16x16xf32> to vector<16x16xf32>
      %312 = arith.mulf %311, %303 : vector<16x16xf32>
      %313 = vector.extract_strided_slice %294 {offsets = [1, 0, 0], sizes = [1, 16, 16], strides = [1, 1, 1]} : vector<8x16x16xf32> to vector<1x16x16xf32>
      %314 = vector.shape_cast %313 : vector<1x16x16xf32> to vector<16x16xf32>
      %315 = arith.addf %312, %314 : vector<16x16xf32>
      %316 = vector.extract_strided_slice %295 {offsets = [1, 0, 0], sizes = [1, 16, 1], strides = [1, 1, 1]} : vector<8x16x1xf32> to vector<1x16x1xf32>
      %317 = vector.shape_cast %316 : vector<1x16x1xf32> to vector<16x1xf32>
      %318 = vector.broadcast %317 : vector<16x1xf32> to vector<16x16xf32>
      %319 = arith.mulf %318, %315 : vector<16x16xf32>
      %cst_110 = arith.constant dense<0.000000e+00> : vector<16xf32>
      %320 = vector.multi_reduction <add>, %319, %cst_110 [0] : vector<16x16xf32> to vector<16xf32>
      %321 = vector.shape_cast %320 : vector<16xf32> to vector<1x16xf32>
      %322 = vector.extract_strided_slice %289 {offsets = [2, 0, 0], sizes = [1, 16, 16], strides = [1, 1, 1]} : vector<8x16x16xf32> to vector<1x16x16xf32>
      %323 = vector.shape_cast %322 : vector<1x16x16xf32> to vector<16x16xf32>
      %324 = arith.mulf %323, %315 : vector<16x16xf32>
      %325 = vector.extract_strided_slice %294 {offsets = [2, 0, 0], sizes = [1, 16, 16], strides = [1, 1, 1]} : vector<8x16x16xf32> to vector<1x16x16xf32>
      %326 = vector.shape_cast %325 : vector<1x16x16xf32> to vector<16x16xf32>
      %327 = arith.addf %324, %326 : vector<16x16xf32>
      %328 = vector.extract_strided_slice %295 {offsets = [2, 0, 0], sizes = [1, 16, 1], strides = [1, 1, 1]} : vector<8x16x1xf32> to vector<1x16x1xf32>
      %329 = vector.shape_cast %328 : vector<1x16x1xf32> to vector<16x1xf32>
      %330 = vector.broadcast %329 : vector<16x1xf32> to vector<16x16xf32>
      %331 = arith.mulf %330, %327 : vector<16x16xf32>
      %cst_111 = arith.constant dense<0.000000e+00> : vector<16xf32>
      %332 = vector.multi_reduction <add>, %331, %cst_111 [0] : vector<16x16xf32> to vector<16xf32>
      %333 = vector.shape_cast %332 : vector<16xf32> to vector<1x16xf32>
      %334 = vector.extract_strided_slice %289 {offsets = [3, 0, 0], sizes = [1, 16, 16], strides = [1, 1, 1]} : vector<8x16x16xf32> to vector<1x16x16xf32>
      %335 = vector.shape_cast %334 : vector<1x16x16xf32> to vector<16x16xf32>
      %336 = arith.mulf %335, %327 : vector<16x16xf32>
      %337 = vector.extract_strided_slice %294 {offsets = [3, 0, 0], sizes = [1, 16, 16], strides = [1, 1, 1]} : vector<8x16x16xf32> to vector<1x16x16xf32>
      %338 = vector.shape_cast %337 : vector<1x16x16xf32> to vector<16x16xf32>
      %339 = arith.addf %336, %338 : vector<16x16xf32>
      %340 = vector.extract_strided_slice %295 {offsets = [3, 0, 0], sizes = [1, 16, 1], strides = [1, 1, 1]} : vector<8x16x1xf32> to vector<1x16x1xf32>
      %341 = vector.shape_cast %340 : vector<1x16x1xf32> to vector<16x1xf32>
      %342 = vector.broadcast %341 : vector<16x1xf32> to vector<16x16xf32>
      %343 = arith.mulf %342, %339 : vector<16x16xf32>
      %cst_112 = arith.constant dense<0.000000e+00> : vector<16xf32>
      %344 = vector.multi_reduction <add>, %343, %cst_112 [0] : vector<16x16xf32> to vector<16xf32>
      %345 = vector.shape_cast %344 : vector<16xf32> to vector<1x16xf32>
      %346 = vector.extract_strided_slice %289 {offsets = [4, 0, 0], sizes = [1, 16, 16], strides = [1, 1, 1]} : vector<8x16x16xf32> to vector<1x16x16xf32>
      %347 = vector.shape_cast %346 : vector<1x16x16xf32> to vector<16x16xf32>
      %348 = arith.mulf %347, %339 : vector<16x16xf32>
      %349 = vector.extract_strided_slice %294 {offsets = [4, 0, 0], sizes = [1, 16, 16], strides = [1, 1, 1]} : vector<8x16x16xf32> to vector<1x16x16xf32>
      %350 = vector.shape_cast %349 : vector<1x16x16xf32> to vector<16x16xf32>
      %351 = arith.addf %348, %350 : vector<16x16xf32>
      %352 = vector.extract_strided_slice %295 {offsets = [4, 0, 0], sizes = [1, 16, 1], strides = [1, 1, 1]} : vector<8x16x1xf32> to vector<1x16x1xf32>
      %353 = vector.shape_cast %352 : vector<1x16x1xf32> to vector<16x1xf32>
      %354 = vector.broadcast %353 : vector<16x1xf32> to vector<16x16xf32>
      %355 = arith.mulf %354, %351 : vector<16x16xf32>
      %cst_113 = arith.constant dense<0.000000e+00> : vector<16xf32>
      %356 = vector.multi_reduction <add>, %355, %cst_113 [0] : vector<16x16xf32> to vector<16xf32>
      %357 = vector.shape_cast %356 : vector<16xf32> to vector<1x16xf32>
      %358 = vector.extract_strided_slice %289 {offsets = [5, 0, 0], sizes = [1, 16, 16], strides = [1, 1, 1]} : vector<8x16x16xf32> to vector<1x16x16xf32>
      %359 = vector.shape_cast %358 : vector<1x16x16xf32> to vector<16x16xf32>
      %360 = arith.mulf %359, %351 : vector<16x16xf32>
      %361 = vector.extract_strided_slice %294 {offsets = [5, 0, 0], sizes = [1, 16, 16], strides = [1, 1, 1]} : vector<8x16x16xf32> to vector<1x16x16xf32>
      %362 = vector.shape_cast %361 : vector<1x16x16xf32> to vector<16x16xf32>
      %363 = arith.addf %360, %362 : vector<16x16xf32>
      %364 = vector.extract_strided_slice %295 {offsets = [5, 0, 0], sizes = [1, 16, 1], strides = [1, 1, 1]} : vector<8x16x1xf32> to vector<1x16x1xf32>
      %365 = vector.shape_cast %364 : vector<1x16x1xf32> to vector<16x1xf32>
      %366 = vector.broadcast %365 : vector<16x1xf32> to vector<16x16xf32>
      %367 = arith.mulf %366, %363 : vector<16x16xf32>
      %cst_114 = arith.constant dense<0.000000e+00> : vector<16xf32>
      %368 = vector.multi_reduction <add>, %367, %cst_114 [0] : vector<16x16xf32> to vector<16xf32>
      %369 = vector.shape_cast %368 : vector<16xf32> to vector<1x16xf32>
      %370 = vector.extract_strided_slice %289 {offsets = [6, 0, 0], sizes = [1, 16, 16], strides = [1, 1, 1]} : vector<8x16x16xf32> to vector<1x16x16xf32>
      %371 = vector.shape_cast %370 : vector<1x16x16xf32> to vector<16x16xf32>
      %372 = arith.mulf %371, %363 : vector<16x16xf32>
      %373 = vector.extract_strided_slice %294 {offsets = [6, 0, 0], sizes = [1, 16, 16], strides = [1, 1, 1]} : vector<8x16x16xf32> to vector<1x16x16xf32>
      %374 = vector.shape_cast %373 : vector<1x16x16xf32> to vector<16x16xf32>
      %375 = arith.addf %372, %374 : vector<16x16xf32>
      %376 = vector.extract_strided_slice %295 {offsets = [6, 0, 0], sizes = [1, 16, 1], strides = [1, 1, 1]} : vector<8x16x1xf32> to vector<1x16x1xf32>
      %377 = vector.shape_cast %376 : vector<1x16x1xf32> to vector<16x1xf32>
      %378 = vector.broadcast %377 : vector<16x1xf32> to vector<16x16xf32>
      %379 = arith.mulf %378, %375 : vector<16x16xf32>
      %cst_115 = arith.constant dense<0.000000e+00> : vector<16xf32>
      %380 = vector.multi_reduction <add>, %379, %cst_115 [0] : vector<16x16xf32> to vector<16xf32>
      %381 = vector.shape_cast %380 : vector<16xf32> to vector<1x16xf32>
      %382 = vector.extract_strided_slice %289 {offsets = [7, 0, 0], sizes = [1, 16, 16], strides = [1, 1, 1]} : vector<8x16x16xf32> to vector<1x16x16xf32>
      %383 = vector.shape_cast %382 : vector<1x16x16xf32> to vector<16x16xf32>
      %384 = arith.mulf %383, %375 : vector<16x16xf32>
      %385 = vector.extract_strided_slice %294 {offsets = [7, 0, 0], sizes = [1, 16, 16], strides = [1, 1, 1]} : vector<8x16x16xf32> to vector<1x16x16xf32>
      %386 = vector.shape_cast %385 : vector<1x16x16xf32> to vector<16x16xf32>
      %387 = arith.addf %384, %386 : vector<16x16xf32>
      %388 = vector.extract_strided_slice %295 {offsets = [7, 0, 0], sizes = [1, 16, 1], strides = [1, 1, 1]} : vector<8x16x1xf32> to vector<1x16x1xf32>
      %389 = vector.shape_cast %388 : vector<1x16x1xf32> to vector<16x1xf32>
      %390 = vector.broadcast %389 : vector<16x1xf32> to vector<16x16xf32>
      %391 = arith.mulf %390, %387 : vector<16x16xf32>
      %cst_116 = arith.constant dense<0.000000e+00> : vector<16xf32>
      %392 = vector.multi_reduction <add>, %391, %cst_116 [0] : vector<16x16xf32> to vector<16xf32>
      %393 = vector.shape_cast %392 : vector<16xf32> to vector<1x16xf32>
      %394 = tpu.concatenate %309, %321, %333, %345, %357, %369, %381, %393 in 0 : vector<1x16xf32>, vector<1x16xf32>, vector<1x16xf32>, vector<1x16xf32>, vector<1x16xf32>, vector<1x16xf32>, vector<1x16xf32>, vector<1x16xf32> -> vector<8x16xf32>
      %395 = vector.extract_strided_slice %7 {offsets = [1, 0, 0], sizes = [1, 1, 16], strides = [1, 1, 1]} : vector<4x1x16xf32> to vector<1x1x16xf32>
      %396 = vector.shape_cast %395 : vector<1x1x16xf32> to vector<1x16xf32>
      %397 = vector.broadcast %396 : vector<1x16xf32> to vector<8x16xf32>
      %398 = arith.mulf %271, %397 : vector<8x16xf32>
      %399 = arith.addf %394, %398 : vector<8x16xf32>
      %c0_117 = arith.constant 0 : index
      %400 = arith.index_cast %130 : i32 to index
      %c0_118 = arith.constant 0 : index
      %401 = vector.load %arg13[%c0_117, %400, %c0_118] : memref<1x64x16xf32, #tpu.memory_space<vmem>>, vector<1x8x16xf32>
      %402 = vector.shape_cast %401 : vector<1x8x16xf32> to vector<8x16xf32>
      %403 = vector.shape_cast %399 : vector<8x16xf32> to vector<1x8x16xf32>
      tpu.vector_store %arg13[%c0_117, %400, %c0_118], %403 {strides = array<i32>} : memref<1x64x16xf32, #tpu.memory_space<vmem>>, vector<1x8x16xf32>,
      %c0_119 = arith.constant 0 : index
      %404 = arith.index_cast %133 : i32 to index
      %c0_120 = arith.constant 0 : index
      %405 = vector.load %arg4[%c0_119, %404, %c0_120] : memref<1x64x16xf32, #tpu.memory_space<vmem>>, vector<1x8x16xf32>
      %406 = vector.shape_cast %405 : vector<1x8x16xf32> to vector<8x16xf32>
      %c128_i32 = arith.constant 128 : i32
      %407 = arith.addi %c128_i32, %133 : i32
      %408 = arith.index_cast %407 : i32 to index
      %c0_121 = arith.constant 0 : index
      %409 = vector.load %arg16[%408, %c0_121] : memref<256x16xf32, #tpu.memory_space<vmem>>, vector<8x16xf32>
      %c128_i32_122 = arith.constant 128 : i32
      %410 = arith.addi %c128_i32_122, %133 : i32
      %411 = arith.index_cast %410 : i32 to index
      %c0_123 = arith.constant 0 : index
      %412 = vector.load %arg17[%411, %c0_123] : memref<256x16xf32, #tpu.memory_space<vmem>>, vector<8x16xf32>
      %c128_i32_124 = arith.constant 128 : i32
      %413 = arith.addi %c128_i32_124, %133 : i32
      %414 = arith.index_cast %413 : i32 to index
      %c0_125 = arith.constant 0 : index
      %415 = vector.load %arg18[%414, %c0_125] : memref<256x16xf32, #tpu.memory_space<vmem>>, vector<8x16xf32>
      %416 = arith.mulf %409, %406 : vector<8x16xf32>
      %417 = vector.shape_cast %409 : vector<8x16xf32> to vector<8x1x16xf32>
      %418 = vector.extract_strided_slice %6 {offsets = [2, 0, 0], sizes = [1, 16, 16], strides = [1, 1, 1]} : vector<4x16x16xf32> to vector<1x16x16xf32>
      %419 = vector.shape_cast %418 : vector<1x16x16xf32> to vector<16x16xf32>
      %420 = vector.shape_cast %419 : vector<16x16xf32> to vector<1x16x16xf32>
      %421 = vector.broadcast %417 : vector<8x1x16xf32> to vector<8x16x16xf32>
      %422 = vector.broadcast %420 : vector<1x16x16xf32> to vector<8x16x16xf32>
      %423 = arith.mulf %421, %422 : vector<8x16x16xf32>
      %424 = math.exp %423 : vector<8x16x16xf32>
      %425 = vector.shape_cast %412 : vector<8x16xf32> to vector<8x16x1xf32>
      %426 = vector.shape_cast %416 : vector<8x16xf32> to vector<8x1x16xf32>
      %427 = vector.broadcast %425 : vector<8x16x1xf32> to vector<8x16x16xf32>
      %428 = vector.broadcast %426 : vector<8x1x16xf32> to vector<8x16x16xf32>
      %429 = arith.mulf %427, %428 : vector<8x16x16xf32>
      %430 = vector.shape_cast %415 : vector<8x16xf32> to vector<8x16x1xf32>
      %431 = vector.extract_strided_slice %arg21 {offsets = [2, 0, 0], sizes = [1, 16, 16], strides = [1, 1, 1]} : vector<4x16x16xf32> to vector<1x16x16xf32>
      %432 = vector.shape_cast %431 : vector<1x16x16xf32> to vector<16x16xf32>
      %433 = vector.extract_strided_slice %424 {offsets = [7, 0, 0], sizes = [1, 16, 16], strides = [1, 1, 1]} : vector<8x16x16xf32> to vector<1x16x16xf32>
      %434 = vector.shape_cast %433 : vector<1x16x16xf32> to vector<16x16xf32>
      %435 = arith.mulf %434, %432 : vector<16x16xf32>
      %436 = vector.extract_strided_slice %429 {offsets = [7, 0, 0], sizes = [1, 16, 16], strides = [1, 1, 1]} : vector<8x16x16xf32> to vector<1x16x16xf32>
      %437 = vector.shape_cast %436 : vector<1x16x16xf32> to vector<16x16xf32>
      %438 = arith.addf %435, %437 : vector<16x16xf32>
      %439 = vector.extract_strided_slice %430 {offsets = [7, 0, 0], sizes = [1, 16, 1], strides = [1, 1, 1]} : vector<8x16x1xf32> to vector<1x16x1xf32>
      %440 = vector.shape_cast %439 : vector<1x16x1xf32> to vector<16x1xf32>
      %441 = vector.broadcast %440 : vector<16x1xf32> to vector<16x16xf32>
      %442 = arith.mulf %441, %438 : vector<16x16xf32>
      %cst_126 = arith.constant dense<0.000000e+00> : vector<16xf32>
      %443 = vector.multi_reduction <add>, %442, %cst_126 [0] : vector<16x16xf32> to vector<16xf32>
      %444 = vector.shape_cast %443 : vector<16xf32> to vector<1x16xf32>
      %445 = vector.extract_strided_slice %424 {offsets = [6, 0, 0], sizes = [1, 16, 16], strides = [1, 1, 1]} : vector<8x16x16xf32> to vector<1x16x16xf32>
      %446 = vector.shape_cast %445 : vector<1x16x16xf32> to vector<16x16xf32>
      %447 = arith.mulf %446, %438 : vector<16x16xf32>
      %448 = vector.extract_strided_slice %429 {offsets = [6, 0, 0], sizes = [1, 16, 16], strides = [1, 1, 1]} : vector<8x16x16xf32> to vector<1x16x16xf32>
      %449 = vector.shape_cast %448 : vector<1x16x16xf32> to vector<16x16xf32>
      %450 = arith.addf %447, %449 : vector<16x16xf32>
      %451 = vector.extract_strided_slice %430 {offsets = [6, 0, 0], sizes = [1, 16, 1], strides = [1, 1, 1]} : vector<8x16x1xf32> to vector<1x16x1xf32>
      %452 = vector.shape_cast %451 : vector<1x16x1xf32> to vector<16x1xf32>
      %453 = vector.broadcast %452 : vector<16x1xf32> to vector<16x16xf32>
      %454 = arith.mulf %453, %450 : vector<16x16xf32>
      %cst_127 = arith.constant dense<0.000000e+00> : vector<16xf32>
      %455 = vector.multi_reduction <add>, %454, %cst_127 [0] : vector<16x16xf32> to vector<16xf32>
      %456 = vector.shape_cast %455 : vector<16xf32> to vector<1x16xf32>
      %457 = vector.extract_strided_slice %424 {offsets = [5, 0, 0], sizes = [1, 16, 16], strides = [1, 1, 1]} : vector<8x16x16xf32> to vector<1x16x16xf32>
      %458 = vector.shape_cast %457 : vector<1x16x16xf32> to vector<16x16xf32>
      %459 = arith.mulf %458, %450 : vector<16x16xf32>
      %460 = vector.extract_strided_slice %429 {offsets = [5, 0, 0], sizes = [1, 16, 16], strides = [1, 1, 1]} : vector<8x16x16xf32> to vector<1x16x16xf32>
      %461 = vector.shape_cast %460 : vector<1x16x16xf32> to vector<16x16xf32>
      %462 = arith.addf %459, %461 : vector<16x16xf32>
      %463 = vector.extract_strided_slice %430 {offsets = [5, 0, 0], sizes = [1, 16, 1], strides = [1, 1, 1]} : vector<8x16x1xf32> to vector<1x16x1xf32>
      %464 = vector.shape_cast %463 : vector<1x16x1xf32> to vector<16x1xf32>
      %465 = vector.broadcast %464 : vector<16x1xf32> to vector<16x16xf32>
      %466 = arith.mulf %465, %462 : vector<16x16xf32>
      %cst_128 = arith.constant dense<0.000000e+00> : vector<16xf32>
      %467 = vector.multi_reduction <add>, %466, %cst_128 [0] : vector<16x16xf32> to vector<16xf32>
      %468 = vector.shape_cast %467 : vector<16xf32> to vector<1x16xf32>
      %469 = vector.extract_strided_slice %424 {offsets = [4, 0, 0], sizes = [1, 16, 16], strides = [1, 1, 1]} : vector<8x16x16xf32> to vector<1x16x16xf32>
      %470 = vector.shape_cast %469 : vector<1x16x16xf32> to vector<16x16xf32>
      %471 = arith.mulf %470, %462 : vector<16x16xf32>
      %472 = vector.extract_strided_slice %429 {offsets = [4, 0, 0], sizes = [1, 16, 16], strides = [1, 1, 1]} : vector<8x16x16xf32> to vector<1x16x16xf32>
      %473 = vector.shape_cast %472 : vector<1x16x16xf32> to vector<16x16xf32>
      %474 = arith.addf %471, %473 : vector<16x16xf32>
      %475 = vector.extract_strided_slice %430 {offsets = [4, 0, 0], sizes = [1, 16, 1], strides = [1, 1, 1]} : vector<8x16x1xf32> to vector<1x16x1xf32>
      %476 = vector.shape_cast %475 : vector<1x16x1xf32> to vector<16x1xf32>
      %477 = vector.broadcast %476 : vector<16x1xf32> to vector<16x16xf32>
      %478 = arith.mulf %477, %474 : vector<16x16xf32>
      %cst_129 = arith.constant dense<0.000000e+00> : vector<16xf32>
      %479 = vector.multi_reduction <add>, %478, %cst_129 [0] : vector<16x16xf32> to vector<16xf32>
      %480 = vector.shape_cast %479 : vector<16xf32> to vector<1x16xf32>
      %481 = vector.extract_strided_slice %424 {offsets = [3, 0, 0], sizes = [1, 16, 16], strides = [1, 1, 1]} : vector<8x16x16xf32> to vector<1x16x16xf32>
      %482 = vector.shape_cast %481 : vector<1x16x16xf32> to vector<16x16xf32>
      %483 = arith.mulf %482, %474 : vector<16x16xf32>
      %484 = vector.extract_strided_slice %429 {offsets = [3, 0, 0], sizes = [1, 16, 16], strides = [1, 1, 1]} : vector<8x16x16xf32> to vector<1x16x16xf32>
      %485 = vector.shape_cast %484 : vector<1x16x16xf32> to vector<16x16xf32>
      %486 = arith.addf %483, %485 : vector<16x16xf32>
      %487 = vector.extract_strided_slice %430 {offsets = [3, 0, 0], sizes = [1, 16, 1], strides = [1, 1, 1]} : vector<8x16x1xf32> to vector<1x16x1xf32>
      %488 = vector.shape_cast %487 : vector<1x16x1xf32> to vector<16x1xf32>
      %489 = vector.broadcast %488 : vector<16x1xf32> to vector<16x16xf32>
      %490 = arith.mulf %489, %486 : vector<16x16xf32>
      %cst_130 = arith.constant dense<0.000000e+00> : vector<16xf32>
      %491 = vector.multi_reduction <add>, %490, %cst_130 [0] : vector<16x16xf32> to vector<16xf32>
      %492 = vector.shape_cast %491 : vector<16xf32> to vector<1x16xf32>
      %493 = vector.extract_strided_slice %424 {offsets = [2, 0, 0], sizes = [1, 16, 16], strides = [1, 1, 1]} : vector<8x16x16xf32> to vector<1x16x16xf32>
      %494 = vector.shape_cast %493 : vector<1x16x16xf32> to vector<16x16xf32>
      %495 = arith.mulf %494, %486 : vector<16x16xf32>
      %496 = vector.extract_strided_slice %429 {offsets = [2, 0, 0], sizes = [1, 16, 16], strides = [1, 1, 1]} : vector<8x16x16xf32> to vector<1x16x16xf32>
      %497 = vector.shape_cast %496 : vector<1x16x16xf32> to vector<16x16xf32>
      %498 = arith.addf %495, %497 : vector<16x16xf32>
      %499 = vector.extract_strided_slice %430 {offsets = [2, 0, 0], sizes = [1, 16, 1], strides = [1, 1, 1]} : vector<8x16x1xf32> to vector<1x16x1xf32>
      %500 = vector.shape_cast %499 : vector<1x16x1xf32> to vector<16x1xf32>
      %501 = vector.broadcast %500 : vector<16x1xf32> to vector<16x16xf32>
      %502 = arith.mulf %501, %498 : vector<16x16xf32>
      %cst_131 = arith.constant dense<0.000000e+00> : vector<16xf32>
      %503 = vector.multi_reduction <add>, %502, %cst_131 [0] : vector<16x16xf32> to vector<16xf32>
      %504 = vector.shape_cast %503 : vector<16xf32> to vector<1x16xf32>
      %505 = vector.extract_strided_slice %424 {offsets = [1, 0, 0], sizes = [1, 16, 16], strides = [1, 1, 1]} : vector<8x16x16xf32> to vector<1x16x16xf32>
      %506 = vector.shape_cast %505 : vector<1x16x16xf32> to vector<16x16xf32>
      %507 = arith.mulf %506, %498 : vector<16x16xf32>
      %508 = vector.extract_strided_slice %429 {offsets = [1, 0, 0], sizes = [1, 16, 16], strides = [1, 1, 1]} : vector<8x16x16xf32> to vector<1x16x16xf32>
      %509 = vector.shape_cast %508 : vector<1x16x16xf32> to vector<16x16xf32>
      %510 = arith.addf %507, %509 : vector<16x16xf32>
      %511 = vector.extract_strided_slice %430 {offsets = [1, 0, 0], sizes = [1, 16, 1], strides = [1, 1, 1]} : vector<8x16x1xf32> to vector<1x16x1xf32>
      %512 = vector.shape_cast %511 : vector<1x16x1xf32> to vector<16x1xf32>
      %513 = vector.broadcast %512 : vector<16x1xf32> to vector<16x16xf32>
      %514 = arith.mulf %513, %510 : vector<16x16xf32>
      %cst_132 = arith.constant dense<0.000000e+00> : vector<16xf32>
      %515 = vector.multi_reduction <add>, %514, %cst_132 [0] : vector<16x16xf32> to vector<16xf32>
      %516 = vector.shape_cast %515 : vector<16xf32> to vector<1x16xf32>
      %517 = vector.extract_strided_slice %424 {offsets = [0, 0, 0], sizes = [1, 16, 16], strides = [1, 1, 1]} : vector<8x16x16xf32> to vector<1x16x16xf32>
      %518 = vector.shape_cast %517 : vector<1x16x16xf32> to vector<16x16xf32>
      %519 = arith.mulf %518, %510 : vector<16x16xf32>
      %520 = vector.extract_strided_slice %429 {offsets = [0, 0, 0], sizes = [1, 16, 16], strides = [1, 1, 1]} : vector<8x16x16xf32> to vector<1x16x16xf32>
      %521 = vector.shape_cast %520 : vector<1x16x16xf32> to vector<16x16xf32>
      %522 = arith.addf %519, %521 : vector<16x16xf32>
      %523 = vector.extract_strided_slice %430 {offsets = [0, 0, 0], sizes = [1, 16, 1], strides = [1, 1, 1]} : vector<8x16x1xf32> to vector<1x16x1xf32>
      %524 = vector.shape_cast %523 : vector<1x16x1xf32> to vector<16x1xf32>
      %525 = vector.broadcast %524 : vector<16x1xf32> to vector<16x16xf32>
      %526 = arith.mulf %525, %522 : vector<16x16xf32>
      %cst_133 = arith.constant dense<0.000000e+00> : vector<16xf32>
      %527 = vector.multi_reduction <add>, %526, %cst_133 [0] : vector<16x16xf32> to vector<16xf32>
      %528 = vector.shape_cast %527 : vector<16xf32> to vector<1x16xf32>
      %529 = tpu.concatenate %528, %516, %504, %492, %480, %468, %456, %444 in 0 : vector<1x16xf32>, vector<1x16xf32>, vector<1x16xf32>, vector<1x16xf32>, vector<1x16xf32>, vector<1x16xf32>, vector<1x16xf32>, vector<1x16xf32> -> vector<8x16xf32>
      %530 = vector.extract_strided_slice %7 {offsets = [2, 0, 0], sizes = [1, 1, 16], strides = [1, 1, 1]} : vector<4x1x16xf32> to vector<1x1x16xf32>
      %531 = vector.shape_cast %530 : vector<1x1x16xf32> to vector<1x16xf32>
      %532 = vector.broadcast %531 : vector<1x16xf32> to vector<8x16xf32>
      %533 = arith.mulf %406, %532 : vector<8x16xf32>
      %534 = arith.addf %529, %533 : vector<8x16xf32>
      %c0_134 = arith.constant 0 : index
      %535 = arith.index_cast %133 : i32 to index
      %c0_135 = arith.constant 0 : index
      %536 = vector.load %arg14[%c0_134, %535, %c0_135] : memref<1x64x16xf32, #tpu.memory_space<vmem>>, vector<1x8x16xf32>
      %537 = vector.shape_cast %536 : vector<1x8x16xf32> to vector<8x16xf32>
      %538 = vector.shape_cast %534 : vector<8x16xf32> to vector<1x8x16xf32>
      tpu.vector_store %arg14[%c0_134, %535, %c0_135], %538 {strides = array<i32>} : memref<1x64x16xf32, #tpu.memory_space<vmem>>, vector<1x8x16xf32>,
      %c0_136 = arith.constant 0 : index
      %539 = arith.index_cast %133 : i32 to index
      %c0_137 = arith.constant 0 : index
      %540 = vector.load %arg5[%c0_136, %539, %c0_137] : memref<1x64x16xf32, #tpu.memory_space<vmem>>, vector<1x8x16xf32>
      %541 = vector.shape_cast %540 : vector<1x8x16xf32> to vector<8x16xf32>
      %c192_i32 = arith.constant 192 : i32
      %542 = arith.addi %c192_i32, %133 : i32
      %543 = arith.index_cast %542 : i32 to index
      %c0_138 = arith.constant 0 : index
      %544 = vector.load %arg16[%543, %c0_138] : memref<256x16xf32, #tpu.memory_space<vmem>>, vector<8x16xf32>
      %c192_i32_139 = arith.constant 192 : i32
      %545 = arith.addi %c192_i32_139, %133 : i32
      %546 = arith.index_cast %545 : i32 to index
      %c0_140 = arith.constant 0 : index
      %547 = vector.load %arg17[%546, %c0_140] : memref<256x16xf32, #tpu.memory_space<vmem>>, vector<8x16xf32>
      %c192_i32_141 = arith.constant 192 : i32
      %548 = arith.addi %c192_i32_141, %133 : i32
      %549 = arith.index_cast %548 : i32 to index
      %c0_142 = arith.constant 0 : index
      %550 = vector.load %arg18[%549, %c0_142] : memref<256x16xf32, #tpu.memory_space<vmem>>, vector<8x16xf32>
      %551 = arith.mulf %544, %541 : vector<8x16xf32>
      %552 = vector.shape_cast %544 : vector<8x16xf32> to vector<8x1x16xf32>
      %553 = vector.extract_strided_slice %6 {offsets = [3, 0, 0], sizes = [1, 16, 16], strides = [1, 1, 1]} : vector<4x16x16xf32> to vector<1x16x16xf32>
      %554 = vector.shape_cast %553 : vector<1x16x16xf32> to vector<16x16xf32>
      %555 = vector.shape_cast %554 : vector<16x16xf32> to vector<1x16x16xf32>
      %556 = vector.broadcast %552 : vector<8x1x16xf32> to vector<8x16x16xf32>
      %557 = vector.broadcast %555 : vector<1x16x16xf32> to vector<8x16x16xf32>
      %558 = arith.mulf %556, %557 : vector<8x16x16xf32>
      %559 = math.exp %558 : vector<8x16x16xf32>
      %560 = vector.shape_cast %547 : vector<8x16xf32> to vector<8x16x1xf32>
      %561 = vector.shape_cast %551 : vector<8x16xf32> to vector<8x1x16xf32>
      %562 = vector.broadcast %560 : vector<8x16x1xf32> to vector<8x16x16xf32>
      %563 = vector.broadcast %561 : vector<8x1x16xf32> to vector<8x16x16xf32>
      %564 = arith.mulf %562, %563 : vector<8x16x16xf32>
      %565 = vector.shape_cast %550 : vector<8x16xf32> to vector<8x16x1xf32>
      %566 = vector.extract_strided_slice %arg21 {offsets = [3, 0, 0], sizes = [1, 16, 16], strides = [1, 1, 1]} : vector<4x16x16xf32> to vector<1x16x16xf32>
      %567 = vector.shape_cast %566 : vector<1x16x16xf32> to vector<16x16xf32>
      %568 = vector.extract_strided_slice %559 {offsets = [7, 0, 0], sizes = [1, 16, 16], strides = [1, 1, 1]} : vector<8x16x16xf32> to vector<1x16x16xf32>
      %569 = vector.shape_cast %568 : vector<1x16x16xf32> to vector<16x16xf32>
      %570 = arith.mulf %569, %567 : vector<16x16xf32>
      %571 = vector.extract_strided_slice %564 {offsets = [7, 0, 0], sizes = [1, 16, 16], strides = [1, 1, 1]} : vector<8x16x16xf32> to vector<1x16x16xf32>
      %572 = vector.shape_cast %571 : vector<1x16x16xf32> to vector<16x16xf32>
      %573 = arith.addf %570, %572 : vector<16x16xf32>
      %574 = vector.extract_strided_slice %565 {offsets = [7, 0, 0], sizes = [1, 16, 1], strides = [1, 1, 1]} : vector<8x16x1xf32> to vector<1x16x1xf32>
      %575 = vector.shape_cast %574 : vector<1x16x1xf32> to vector<16x1xf32>
      %576 = vector.broadcast %575 : vector<16x1xf32> to vector<16x16xf32>
      %577 = arith.mulf %576, %573 : vector<16x16xf32>
      %cst_143 = arith.constant dense<0.000000e+00> : vector<16xf32>
      %578 = vector.multi_reduction <add>, %577, %cst_143 [0] : vector<16x16xf32> to vector<16xf32>
      %579 = vector.shape_cast %578 : vector<16xf32> to vector<1x16xf32>
      %580 = vector.extract_strided_slice %559 {offsets = [6, 0, 0], sizes = [1, 16, 16], strides = [1, 1, 1]} : vector<8x16x16xf32> to vector<1x16x16xf32>
      %581 = vector.shape_cast %580 : vector<1x16x16xf32> to vector<16x16xf32>
      %582 = arith.mulf %581, %573 : vector<16x16xf32>
      %583 = vector.extract_strided_slice %564 {offsets = [6, 0, 0], sizes = [1, 16, 16], strides = [1, 1, 1]} : vector<8x16x16xf32> to vector<1x16x16xf32>
      %584 = vector.shape_cast %583 : vector<1x16x16xf32> to vector<16x16xf32>
      %585 = arith.addf %582, %584 : vector<16x16xf32>
      %586 = vector.extract_strided_slice %565 {offsets = [6, 0, 0], sizes = [1, 16, 1], strides = [1, 1, 1]} : vector<8x16x1xf32> to vector<1x16x1xf32>
      %587 = vector.shape_cast %586 : vector<1x16x1xf32> to vector<16x1xf32>
      %588 = vector.broadcast %587 : vector<16x1xf32> to vector<16x16xf32>
      %589 = arith.mulf %588, %585 : vector<16x16xf32>
      %cst_144 = arith.constant dense<0.000000e+00> : vector<16xf32>
      %590 = vector.multi_reduction <add>, %589, %cst_144 [0] : vector<16x16xf32> to vector<16xf32>
      %591 = vector.shape_cast %590 : vector<16xf32> to vector<1x16xf32>
      %592 = vector.extract_strided_slice %559 {offsets = [5, 0, 0], sizes = [1, 16, 16], strides = [1, 1, 1]} : vector<8x16x16xf32> to vector<1x16x16xf32>
      %593 = vector.shape_cast %592 : vector<1x16x16xf32> to vector<16x16xf32>
      %594 = arith.mulf %593, %585 : vector<16x16xf32>
      %595 = vector.extract_strided_slice %564 {offsets = [5, 0, 0], sizes = [1, 16, 16], strides = [1, 1, 1]} : vector<8x16x16xf32> to vector<1x16x16xf32>
      %596 = vector.shape_cast %595 : vector<1x16x16xf32> to vector<16x16xf32>
      %597 = arith.addf %594, %596 : vector<16x16xf32>
      %598 = vector.extract_strided_slice %565 {offsets = [5, 0, 0], sizes = [1, 16, 1], strides = [1, 1, 1]} : vector<8x16x1xf32> to vector<1x16x1xf32>
      %599 = vector.shape_cast %598 : vector<1x16x1xf32> to vector<16x1xf32>
      %600 = vector.broadcast %599 : vector<16x1xf32> to vector<16x16xf32>
      %601 = arith.mulf %600, %597 : vector<16x16xf32>
      %cst_145 = arith.constant dense<0.000000e+00> : vector<16xf32>
      %602 = vector.multi_reduction <add>, %601, %cst_145 [0] : vector<16x16xf32> to vector<16xf32>
      %603 = vector.shape_cast %602 : vector<16xf32> to vector<1x16xf32>
      %604 = vector.extract_strided_slice %559 {offsets = [4, 0, 0], sizes = [1, 16, 16], strides = [1, 1, 1]} : vector<8x16x16xf32> to vector<1x16x16xf32>
      %605 = vector.shape_cast %604 : vector<1x16x16xf32> to vector<16x16xf32>
      %606 = arith.mulf %605, %597 : vector<16x16xf32>
      %607 = vector.extract_strided_slice %564 {offsets = [4, 0, 0], sizes = [1, 16, 16], strides = [1, 1, 1]} : vector<8x16x16xf32> to vector<1x16x16xf32>
      %608 = vector.shape_cast %607 : vector<1x16x16xf32> to vector<16x16xf32>
      %609 = arith.addf %606, %608 : vector<16x16xf32>
      %610 = vector.extract_strided_slice %565 {offsets = [4, 0, 0], sizes = [1, 16, 1], strides = [1, 1, 1]} : vector<8x16x1xf32> to vector<1x16x1xf32>
      %611 = vector.shape_cast %610 : vector<1x16x1xf32> to vector<16x1xf32>
      %612 = vector.broadcast %611 : vector<16x1xf32> to vector<16x16xf32>
      %613 = arith.mulf %612, %609 : vector<16x16xf32>
      %cst_146 = arith.constant dense<0.000000e+00> : vector<16xf32>
      %614 = vector.multi_reduction <add>, %613, %cst_146 [0] : vector<16x16xf32> to vector<16xf32>
      %615 = vector.shape_cast %614 : vector<16xf32> to vector<1x16xf32>
      %616 = vector.extract_strided_slice %559 {offsets = [3, 0, 0], sizes = [1, 16, 16], strides = [1, 1, 1]} : vector<8x16x16xf32> to vector<1x16x16xf32>
      %617 = vector.shape_cast %616 : vector<1x16x16xf32> to vector<16x16xf32>
      %618 = arith.mulf %617, %609 : vector<16x16xf32>
      %619 = vector.extract_strided_slice %564 {offsets = [3, 0, 0], sizes = [1, 16, 16], strides = [1, 1, 1]} : vector<8x16x16xf32> to vector<1x16x16xf32>
      %620 = vector.shape_cast %619 : vector<1x16x16xf32> to vector<16x16xf32>
      %621 = arith.addf %618, %620 : vector<16x16xf32>
      %622 = vector.extract_strided_slice %565 {offsets = [3, 0, 0], sizes = [1, 16, 1], strides = [1, 1, 1]} : vector<8x16x1xf32> to vector<1x16x1xf32>
      %623 = vector.shape_cast %622 : vector<1x16x1xf32> to vector<16x1xf32>
      %624 = vector.broadcast %623 : vector<16x1xf32> to vector<16x16xf32>
      %625 = arith.mulf %624, %621 : vector<16x16xf32>
      %cst_147 = arith.constant dense<0.000000e+00> : vector<16xf32>
      %626 = vector.multi_reduction <add>, %625, %cst_147 [0] : vector<16x16xf32> to vector<16xf32>
      %627 = vector.shape_cast %626 : vector<16xf32> to vector<1x16xf32>
      %628 = vector.extract_strided_slice %559 {offsets = [2, 0, 0], sizes = [1, 16, 16], strides = [1, 1, 1]} : vector<8x16x16xf32> to vector<1x16x16xf32>
      %629 = vector.shape_cast %628 : vector<1x16x16xf32> to vector<16x16xf32>
      %630 = arith.mulf %629, %621 : vector<16x16xf32>
      %631 = vector.extract_strided_slice %564 {offsets = [2, 0, 0], sizes = [1, 16, 16], strides = [1, 1, 1]} : vector<8x16x16xf32> to vector<1x16x16xf32>
      %632 = vector.shape_cast %631 : vector<1x16x16xf32> to vector<16x16xf32>
      %633 = arith.addf %630, %632 : vector<16x16xf32>
      %634 = vector.extract_strided_slice %565 {offsets = [2, 0, 0], sizes = [1, 16, 1], strides = [1, 1, 1]} : vector<8x16x1xf32> to vector<1x16x1xf32>
      %635 = vector.shape_cast %634 : vector<1x16x1xf32> to vector<16x1xf32>
      %636 = vector.broadcast %635 : vector<16x1xf32> to vector<16x16xf32>
      %637 = arith.mulf %636, %633 : vector<16x16xf32>
      %cst_148 = arith.constant dense<0.000000e+00> : vector<16xf32>
      %638 = vector.multi_reduction <add>, %637, %cst_148 [0] : vector<16x16xf32> to vector<16xf32>
      %639 = vector.shape_cast %638 : vector<16xf32> to vector<1x16xf32>
      %640 = vector.extract_strided_slice %559 {offsets = [1, 0, 0], sizes = [1, 16, 16], strides = [1, 1, 1]} : vector<8x16x16xf32> to vector<1x16x16xf32>
      %641 = vector.shape_cast %640 : vector<1x16x16xf32> to vector<16x16xf32>
      %642 = arith.mulf %641, %633 : vector<16x16xf32>
      %643 = vector.extract_strided_slice %564 {offsets = [1, 0, 0], sizes = [1, 16, 16], strides = [1, 1, 1]} : vector<8x16x16xf32> to vector<1x16x16xf32>
      %644 = vector.shape_cast %643 : vector<1x16x16xf32> to vector<16x16xf32>
      %645 = arith.addf %642, %644 : vector<16x16xf32>
      %646 = vector.extract_strided_slice %565 {offsets = [1, 0, 0], sizes = [1, 16, 1], strides = [1, 1, 1]} : vector<8x16x1xf32> to vector<1x16x1xf32>
      %647 = vector.shape_cast %646 : vector<1x16x1xf32> to vector<16x1xf32>
      %648 = vector.broadcast %647 : vector<16x1xf32> to vector<16x16xf32>
      %649 = arith.mulf %648, %645 : vector<16x16xf32>
      %cst_149 = arith.constant dense<0.000000e+00> : vector<16xf32>
      %650 = vector.multi_reduction <add>, %649, %cst_149 [0] : vector<16x16xf32> to vector<16xf32>
      %651 = vector.shape_cast %650 : vector<16xf32> to vector<1x16xf32>
      %652 = vector.extract_strided_slice %559 {offsets = [0, 0, 0], sizes = [1, 16, 16], strides = [1, 1, 1]} : vector<8x16x16xf32> to vector<1x16x16xf32>
      %653 = vector.shape_cast %652 : vector<1x16x16xf32> to vector<16x16xf32>
      %654 = arith.mulf %653, %645 : vector<16x16xf32>
      %655 = vector.extract_strided_slice %564 {offsets = [0, 0, 0], sizes = [1, 16, 16], strides = [1, 1, 1]} : vector<8x16x16xf32> to vector<1x16x16xf32>
      %656 = vector.shape_cast %655 : vector<1x16x16xf32> to vector<16x16xf32>
      %657 = arith.addf %654, %656 : vector<16x16xf32>
      %658 = vector.extract_strided_slice %565 {offsets = [0, 0, 0], sizes = [1, 16, 1], strides = [1, 1, 1]} : vector<8x16x1xf32> to vector<1x16x1xf32>
      %659 = vector.shape_cast %658 : vector<1x16x1xf32> to vector<16x1xf32>
      %660 = vector.broadcast %659 : vector<16x1xf32> to vector<16x16xf32>
      %661 = arith.mulf %660, %657 : vector<16x16xf32>
      %cst_150 = arith.constant dense<0.000000e+00> : vector<16xf32>
      %662 = vector.multi_reduction <add>, %661, %cst_150 [0] : vector<16x16xf32> to vector<16xf32>
      %663 = vector.shape_cast %662 : vector<16xf32> to vector<1x16xf32>
      %664 = tpu.concatenate %663, %651, %639, %627, %615, %603, %591, %579 in 0 : vector<1x16xf32>, vector<1x16xf32>, vector<1x16xf32>, vector<1x16xf32>, vector<1x16xf32>, vector<1x16xf32>, vector<1x16xf32>, vector<1x16xf32> -> vector<8x16xf32>
      %665 = vector.extract_strided_slice %7 {offsets = [3, 0, 0], sizes = [1, 1, 16], strides = [1, 1, 1]} : vector<4x1x16xf32> to vector<1x1x16xf32>
      %666 = vector.shape_cast %665 : vector<1x1x16xf32> to vector<1x16xf32>
      %667 = vector.broadcast %666 : vector<1x16xf32> to vector<8x16xf32>
      %668 = arith.mulf %541, %667 : vector<8x16xf32>
      %669 = arith.addf %664, %668 : vector<8x16xf32>
      %c0_151 = arith.constant 0 : index
      %670 = arith.index_cast %133 : i32 to index
      %c0_152 = arith.constant 0 : index
      %671 = vector.load %arg15[%c0_151, %670, %c0_152] : memref<1x64x16xf32, #tpu.memory_space<vmem>>, vector<1x8x16xf32>
      %672 = vector.shape_cast %671 : vector<1x8x16xf32> to vector<8x16xf32>
      %673 = vector.shape_cast %669 : vector<8x16xf32> to vector<1x8x16xf32>
      tpu.vector_store %arg15[%c0_151, %670, %c0_152], %673 {strides = array<i32>} : memref<1x64x16xf32, #tpu.memory_space<vmem>>, vector<1x8x16xf32>,
      %674 = vector.shape_cast %252 : vector<16x16xf32> to vector<1x16x16xf32>
      %675 = vector.shape_cast %387 : vector<16x16xf32> to vector<1x16x16xf32>
      %676 = vector.shape_cast %522 : vector<16x16xf32> to vector<1x16x16xf32>
      %677 = vector.shape_cast %657 : vector<16x16xf32> to vector<1x16x16xf32>
      %678 = tpu.concatenate %674, %675, %676, %677 in 0 : vector<1x16x16xf32>, vector<1x16x16xf32>, vector<1x16x16xf32>, vector<1x16x16xf32> -> vector<4x16x16xf32>
      scf.yield %678 : vector<4x16x16xf32>
    }
    %c8_i32_78 = arith.constant 8 : i32
    %c0_79 = arith.constant 0 : index
    %c0_80 = arith.constant 0 : index
    %c0_81 = arith.constant 0 : index
    %128 = vector.load %arg19[%c0_79, %c0_80, %c0_81] : memref<4x16x16xf32, #tpu.memory_space<vmem>>, vector<4x16x16xf32>
    tpu.vector_store %arg19[%c0_79, %c0_80, %c0_81], %127 {strides = array<i32>} : memref<4x16x16xf32, #tpu.memory_space<vmem>>, vector<4x16x16xf32>,
    return
  }
  func.func @transform_0(%arg0: i32, %arg1: i32) -> (i32, i32, i32) {
    %c0_i32 = arith.constant 0 : i32
    %c0_i32_0 = arith.constant 0 : i32
    return %arg0, %arg1, %c0_i32 : i32, i32, i32
  }
  func.func @transform_1(%arg0: i32, %arg1: i32) -> (i32, i32, i32) {
    %c0_i32 = arith.constant 0 : i32
    %c0_i32_0 = arith.constant 0 : i32
    return %arg0, %arg1, %c0_i32 : i32, i32, i32
  }
  func.func @transform_2(%arg0: i32, %arg1: i32) -> (i32, i32, i32) {
    %c0_i32 = arith.constant 0 : i32
    %0 = arith.subi %c0_i32, %arg1 : i32
    %c0_i32_0 = arith.constant 0 : i32
    %c0_i32_1 = arith.constant 0 : i32
    return %arg0, %0, %c0_i32_0 : i32, i32, i32
  }
  func.func @transform_3(%arg0: i32, %arg1: i32) -> (i32, i32, i32) {
    %c0_i32 = arith.constant 0 : i32
    %0 = arith.subi %c0_i32, %arg1 : i32
    %c0_i32_0 = arith.constant 0 : i32
    %c0_i32_1 = arith.constant 0 : i32
    return %arg0, %0, %c0_i32_0 : i32, i32, i32
  }
  func.func @transform_4(%arg0: i32, %arg1: i32) -> (i32, i32, i32) {
    %c0_i32 = arith.constant 0 : i32
    %c0_i32_0 = arith.constant 0 : i32
    %c0_i32_1 = arith.constant 0 : i32
    %c0_i32_2 = arith.constant 0 : i32
    return %c0_i32, %c0_i32_0, %c0_i32_1 : i32, i32, i32
  }
  func.func @transform_5(%arg0: i32, %arg1: i32) -> (i32, i32, i32) {
    %c0_i32 = arith.constant 0 : i32
    %c0_i32_0 = arith.constant 0 : i32
    %c0_i32_1 = arith.constant 0 : i32
    %c0_i32_2 = arith.constant 0 : i32
    return %c0_i32, %c0_i32_0, %c0_i32_1 : i32, i32, i32
  }
  func.func @transform_6(%arg0: i32, %arg1: i32) -> (i32, i32, i32) {
    %c0_i32 = arith.constant 0 : i32
    %c0_i32_0 = arith.constant 0 : i32
    %c0_i32_1 = arith.constant 0 : i32
    %c0_i32_2 = arith.constant 0 : i32
    return %c0_i32, %c0_i32_0, %c0_i32_1 : i32, i32, i32
  }
  func.func @transform_7(%arg0: i32, %arg1: i32) -> (i32, i32, i32) {
    %c0_i32 = arith.constant 0 : i32
    %c0_i32_0 = arith.constant 0 : i32
    %c0_i32_1 = arith.constant 0 : i32
    %c0_i32_2 = arith.constant 0 : i32
    return %c0_i32, %c0_i32_0, %c0_i32_1 : i32, i32, i32
  }
  func.func @transform_8(%arg0: i32, %arg1: i32) -> (i32, i32, i32) {
    %c0_i32 = arith.constant 0 : i32
    %c0_i32_0 = arith.constant 0 : i32
    %c0_i32_1 = arith.constant 0 : i32
    %c0_i32_2 = arith.constant 0 : i32
    return %c0_i32, %c0_i32_0, %c0_i32_1 : i32, i32, i32
  }
  func.func @transform_9(%arg0: i32, %arg1: i32) -> (i32, i32, i32) {
    %c0_i32 = arith.constant 0 : i32
    %c0_i32_0 = arith.constant 0 : i32
    %c0_i32_1 = arith.constant 0 : i32
    %c0_i32_2 = arith.constant 0 : i32
    return %c0_i32, %c0_i32_0, %c0_i32_1 : i32, i32, i32
  }
  func.func @transform_10(%arg0: i32, %arg1: i32) -> (i32, i32, i32) {
    %c0_i32 = arith.constant 0 : i32
    %c0_i32_0 = arith.constant 0 : i32
    return %arg0, %arg1, %c0_i32 : i32, i32, i32
  }
  func.func @transform_11(%arg0: i32, %arg1: i32) -> (i32, i32, i32) {
    %c0_i32 = arith.constant 0 : i32
    %c0_i32_0 = arith.constant 0 : i32
    return %arg0, %arg1, %c0_i32 : i32, i32, i32
  }
  func.func @transform_12(%arg0: i32, %arg1: i32) -> (i32, i32, i32) {
    %c0_i32 = arith.constant 0 : i32
    %0 = arith.subi %c0_i32, %arg1 : i32
    %c0_i32_0 = arith.constant 0 : i32
    %c0_i32_1 = arith.constant 0 : i32
    return %arg0, %0, %c0_i32_0 : i32, i32, i32
  }
  func.func @transform_13(%arg0: i32, %arg1: i32) -> (i32, i32, i32) {
    %c0_i32 = arith.constant 0 : i32
    %0 = arith.subi %c0_i32, %arg1 : i32
    %c0_i32_0 = arith.constant 0 : i32
    %c0_i32_1 = arith.constant 0 : i32
    return %arg0, %0, %c0_i32_0 : i32, i32, i32
  }
}

module attributes {stable_mosaic.version = 11 : i64} {
  func.func @_norm_gate_proj_kernel(%arg0: i32, %arg1: memref<128x16xf32, #tpu.memory_space<vmem>>, %arg2: memref<128x16xf32, #tpu.memory_space<vmem>>, %arg3: memref<1x16xf32, #tpu.memory_space<vmem>>, %arg4: memref<1x16xf32, #tpu.memory_space<vmem>>, %arg5: memref<16x32xbf16, #tpu.memory_space<vmem>>, %arg6: memref<128x32xf32, #tpu.memory_space<vmem>>) attributes {dimension_semantics = [#tpu.dimension_semantics<parallel>], iteration_bounds = array<i64: 1>, scalar_prefetch = 0 : i64, scratch_operands = 0 : i64, tpu.core_type = #tpu.core_type<tc>, window_params = [{transform_indices = @transform_0, window_bounds = array<i64: 128, 16>}, {transform_indices = @transform_1, window_bounds = array<i64: 128, 16>}, {pipeline_mode = #tpu.pipeline_mode<synchronous>, transform_indices = @transform_2, window_bounds = array<i64: 1, 16>}, {pipeline_mode = #tpu.pipeline_mode<synchronous>, transform_indices = @transform_3, window_bounds = array<i64: 1, 16>}, {pipeline_mode = #tpu.pipeline_mode<synchronous>, transform_indices = @transform_4, window_bounds = array<i64: 16, 32>}, {transform_indices = @transform_5, window_bounds = array<i64: 128, 32>}]} {
    %c0 = arith.constant 0 : index
    %c0_0 = arith.constant 0 : index
    %0 = vector.load %arg1[%c0, %c0_0] : memref<128x16xf32, #tpu.memory_space<vmem>>, vector<128x16xf32>
    %cst = arith.constant dense<0.000000e+00> : vector<128xf32>
    %1 = vector.multi_reduction <add>, %0, %cst [1] : vector<128x16xf32> to vector<128xf32>
    %2 = vector.shape_cast %1 : vector<128xf32> to vector<128x1xf32>
    %cst_1 = arith.constant 1.600000e+01 : f32
    %3 = vector.broadcast %cst_1 : f32 to vector<128x1xf32>
    %4 = arith.divf %2, %3 : vector<128x1xf32>
    %5 = vector.broadcast %4 : vector<128x1xf32> to vector<128x16xf32>
    %6 = arith.subf %0, %5 : vector<128x16xf32>
    %7 = arith.mulf %6, %6 : vector<128x16xf32>
    %cst_2 = arith.constant dense<0.000000e+00> : vector<128xf32>
    %8 = vector.multi_reduction <add>, %7, %cst_2 [1] : vector<128x16xf32> to vector<128xf32>
    %9 = vector.shape_cast %8 : vector<128xf32> to vector<128x1xf32>
    %cst_3 = arith.constant 1.600000e+01 : f32
    %10 = vector.broadcast %cst_3 : f32 to vector<128x1xf32>
    %11 = arith.divf %9, %10 : vector<128x1xf32>
    %12 = vector.broadcast %4 : vector<128x1xf32> to vector<128x16xf32>
    %13 = arith.subf %0, %12 : vector<128x16xf32>
    %cst_4 = arith.constant 9.99999974E-6 : f32
    %14 = vector.broadcast %cst_4 : f32 to vector<128x1xf32>
    %15 = arith.addf %11, %14 : vector<128x1xf32>
    %16 = math.rsqrt %15 : vector<128x1xf32>
    %17 = vector.broadcast %16 : vector<128x1xf32> to vector<128x16xf32>
    %18 = arith.mulf %13, %17 : vector<128x16xf32>
    %c0_5 = arith.constant 0 : index
    %c0_6 = arith.constant 0 : index
    %19 = vector.load %arg3[%c0_5, %c0_6] : memref<1x16xf32, #tpu.memory_space<vmem>>, vector<1x16xf32>
    %20 = vector.broadcast %19 : vector<1x16xf32> to vector<128x16xf32>
    %21 = arith.mulf %18, %20 : vector<128x16xf32>
    %c0_7 = arith.constant 0 : index
    %c0_8 = arith.constant 0 : index
    %22 = vector.load %arg4[%c0_7, %c0_8] : memref<1x16xf32, #tpu.memory_space<vmem>>, vector<1x16xf32>
    %23 = vector.broadcast %22 : vector<1x16xf32> to vector<128x16xf32>
    %24 = arith.addf %21, %23 : vector<128x16xf32>
    %c0_9 = arith.constant 0 : index
    %c0_10 = arith.constant 0 : index
    %25 = vector.load %arg2[%c0_9, %c0_10] : memref<128x16xf32, #tpu.memory_space<vmem>>, vector<128x16xf32>
    %cst_11 = arith.constant 0.000000e+00 : f32
    %26 = vector.broadcast %cst_11 : f32 to vector<128x16xf32>
    %27 = arith.subf %26, %25 : vector<128x16xf32>
    %28 = math.exp %27 : vector<128x16xf32>
    %cst_12 = arith.constant 1.000000e+00 : f32
    %29 = vector.broadcast %cst_12 : f32 to vector<128x16xf32>
    %30 = arith.addf %29, %28 : vector<128x16xf32>
    %cst_13 = arith.constant 1.000000e+00 : f32
    %31 = vector.broadcast %cst_13 : f32 to vector<128x16xf32>
    %32 = arith.divf %31, %30 : vector<128x16xf32>
    %33 = arith.mulf %25, %32 : vector<128x16xf32>
    %34 = arith.mulf %24, %33 : vector<128x16xf32>
    %35 = arith.truncf %34 : vector<128x16xf32> to vector<128x16xbf16>
    %c0_14 = arith.constant 0 : index
    %c0_15 = arith.constant 0 : index
    %36 = vector.load %arg5[%c0_14, %c0_15] : memref<16x32xbf16, #tpu.memory_space<vmem>>, vector<16x32xbf16>
    %cst_16 = arith.constant dense<0.000000e+00> : vector<128x32xf32>
    %37 = tpu.matmul %35, %36, %cst_16 {dimension_numbers = #tpu.dot_dimension_numbers<[1], [0], [0], [1], [0, 0, 1, 1], [], []>} : vector<128x16xbf16>, vector<16x32xbf16>, vector<128x32xf32> -> vector<128x32xf32>
    %c0_17 = arith.constant 0 : index
    %c0_18 = arith.constant 0 : index
    %38 = vector.load %arg6[%c0_17, %c0_18] : memref<128x32xf32, #tpu.memory_space<vmem>>, vector<128x32xf32>
    tpu.vector_store %arg6[%c0_17, %c0_18], %37 {strides = array<i32>} : memref<128x32xf32, #tpu.memory_space<vmem>>, vector<128x32xf32>,
    return
  }
  func.func @transform_0(%arg0: i32) -> (i32, i32) {
    %c0_i32 = arith.constant 0 : i32
    %c0_i32_0 = arith.constant 0 : i32
    return %arg0, %c0_i32 : i32, i32
  }
  func.func @transform_1(%arg0: i32) -> (i32, i32) {
    %c0_i32 = arith.constant 0 : i32
    %c0_i32_0 = arith.constant 0 : i32
    return %arg0, %c0_i32 : i32, i32
  }
  func.func @transform_2(%arg0: i32) -> (i32, i32) {
    %c0_i32 = arith.constant 0 : i32
    %c0_i32_0 = arith.constant 0 : i32
    %c0_i32_1 = arith.constant 0 : i32
    return %c0_i32, %c0_i32_0 : i32, i32
  }
  func.func @transform_3(%arg0: i32) -> (i32, i32) {
    %c0_i32 = arith.constant 0 : i32
    %c0_i32_0 = arith.constant 0 : i32
    %c0_i32_1 = arith.constant 0 : i32
    return %c0_i32, %c0_i32_0 : i32, i32
  }
  func.func @transform_4(%arg0: i32) -> (i32, i32) {
    %c0_i32 = arith.constant 0 : i32
    %c0_i32_0 = arith.constant 0 : i32
    %c0_i32_1 = arith.constant 0 : i32
    return %c0_i32, %c0_i32_0 : i32, i32
  }
  func.func @transform_5(%arg0: i32) -> (i32, i32) {
    %c0_i32 = arith.constant 0 : i32
    %c0_i32_0 = arith.constant 0 : i32
    return %arg0, %c0_i32 : i32, i32
  }
}

</mosaic_0001>

<bundles_post_ra>
// kernel: ss2d_forward.4
= control target key start
LH: loop header
LB: loop body
LE: loop exit
PB: predicated region body
PF: predicated region fallthrough
CT: control target
= control target key end

     0   :  { %vm57_vm0 = vcmask 261120   ;;  %vm179_vm1 = vcmask 130048   ;;  %s646_s1 = inlined_call_operand.vmem [shape: bf16[32,16], index: 1, kind: input, shape index: {}]   ;;  %s647_s2 = inlined_call_operand.vmem [shape: bf16[32,16], index: 2, kind: input, shape index: {}]   ;;  %s648_s0 = inlined_call_operand.vmem [shape: f32[128,32], index: 0, kind: input, shape index: {}]   ;;  %s649_s3 = inlined_call_operand.vmem [shape: f32[128,16], index: 3, kind: output, shape index: {0}]   ;;  %s650_s4 = inlined_call_operand.vmem [shape: f32[128,16], index: 4, kind: output, shape index: {1}]  }
   0x1   :  { %v413_v0 = vld [vmem:[%s646_s1 + $0x8] sm:$0xff]   ;;  %v415_v2 = vld [vmem:[%s646_s1] sm:$0xff]   ;;  %v19_v6 = vld [vmem:[%s648_s0 + $0x10] sm:$0xff] }
   0x2   :  { %v414_v1 = vld [vmem:[%s647_s2 + $0x8] sm:$0xff]   ;;  %373 = vmatprep.subr.bf16.mxu0 %v413_v0  ;;  %v416_v3 = vld [vmem:[%s647_s2] sm:$0xff]   ;;  %v20_v8 = vld [vmem:[%s648_s0 + $0x18] sm:$0xff] }
   0x3   :  { %393 = vmatprep.subr.bf16.mxu1 %v414_v1  ;;  %374 = vmatpush3.bf16.msra.mxu0 %v413_v0  ;;  %v17_v4 = vld [vmem:[%s648_s0] sm:$0xff]  ;;  %v18_v5 = vld [vmem:[%s648_s0 + $0x8] sm:$0xff]  ;;  %v34_v11 = vpack.c.bf16 %v20_v8, %v19_v6  ;;  %v23_v13 = vld [vmem:[%s648_s0 + $0x30] sm:$0xff] }
   0x4   :  { %394 = vmatpush3.bf16.msra.mxu1 %v414_v1  ;;  %375 = vmatprep.subr.bf16.mxu0 %v415_v2  ;;  %v33_v7 = vpack.c.bf16 %v18_v5, %v17_v4  ;;  %v21_v9 = vld [vmem:[%s648_s0 + $0x20] sm:$0xff]  ;;  %v22_v10 = vld [vmem:[%s648_s0 + $0x28] sm:$0xff]  ;;  %v24_v14 = vld [vmem:[%s648_s0 + $0x38] sm:$0xff] }
   0x5   :  { %395 = vmatprep.subr.bf16.mxu1 %v416_v3  ;;  %v35_v12 = vpack.c.bf16 %v22_v10, %v21_v9  ;;  %v25_v15 = vld [vmem:[%s648_s0 + $0x40] sm:$0xff]  ;;  %v26_v16 = vld [vmem:[%s648_s0 + $0x48] sm:$0xff]  ;;  %v36_v17 = vpack.c.bf16 %v24_v14, %v23_v13  ;;  %v27_v19 = vld [vmem:[%s648_s0 + $0x50] sm:$0xff] }
   0x6   :  { %377 = vmatprep.mubr.msk.bf16.mxu0 %vm57_vm0, %v33_v7  ;;  %397 = vmatprep.mubr.msk.bf16.mxu1 %vm57_vm0, %v33_v7  ;;  %v37_v18 = vpack.c.bf16 %v26_v16, %v25_v15  ;;  %v28_v20 = vld [vmem:[%s648_s0 + $0x58] sm:$0xff]  ;;  %v29_v21 = vld [vmem:[%s648_s0 + $0x60] sm:$0xff]  ;;  %v30_v22 = vld [vmem:[%s648_s0 + $0x68] sm:$0xff] }
   0x7   :  { %376 = vmatpush3.bf16.msra.mxu0 %v415_v2  ;;  %v38_v23 = vpack.c.bf16 %v28_v20, %v27_v19  ;;  %v39_v24 = vpack.c.bf16 %v30_v22, %v29_v21  ;;  %v31_v25 = vld [vmem:[%s648_s0 + $0x70] sm:$0xff]  ;;  %v32_v26 = vld [vmem:[%s648_s0 + $0x78] sm:$0xff] }
   0x8   :  { %396 = vmatpush3.bf16.msra.mxu1 %v416_v3  ;;  %v40_v27 = vpack.c.bf16 %v32_v26, %v31_v25 }
   0xa   :  { %378 = vmatmul.mubr.msk.bf16.vlgmr.msra.gmra.mxu0 %vm57_vm0, %v34_v11 }
   0xb   :  { %398 = vmatmul.mubr.msk.bf16.vlgmr.msra.gmra.mxu1 %vm57_vm0, %v34_v11  ;;  %381 = vmatprep.mubr.msk.bf16.mxu0 %vm57_vm0, %v35_v12 }
   0xc   :  { %401 = vmatprep.mubr.msk.bf16.mxu1 %vm57_vm0, %v35_v12 }
  0x12   :  { %382 = vmatmul.mubr.msk.bf16.gmra.mxu0 %vm57_vm0, %v36_v17 }
  0x13   :  { %402 = vmatmul.mubr.msk.bf16.gmra.mxu1 %vm57_vm0, %v36_v17  ;;  %385 = vmatprep.mubr.msk.bf16.mxu0 %vm57_vm0, %v37_v18 }
  0x14   :  { %405 = vmatprep.mubr.msk.bf16.mxu1 %vm57_vm0, %v37_v18 }
  0x1a   :  { %386 = vmatmul.mubr.msk.bf16.gmra.mxu0 %vm57_vm0, %v38_v23 }
  0x1b   :  { %406 = vmatmul.mubr.msk.bf16.gmra.mxu1 %vm57_vm0, %v38_v23  ;;  %389 = vmatprep.mubr.msk.bf16.mxu0 %vm57_vm0, %v39_v24 }
  0x1c   :  { %409 = vmatprep.mubr.msk.bf16.mxu1 %vm57_vm0, %v39_v24 }
  0x22   :  { %390 = vmatmul.mubr.msk.bf16.gmra.mxu0 %vm57_vm0, %v40_v27 }
  0x23   :  { %410 = vmatmul.mubr.msk.bf16.gmra.mxu1 %vm57_vm0, %v40_v27 }
  0xca   :  { %v379_v28 = vpop.f32.mrf.mxu0 }
  0xcb   :  { %182 = vst.msk [vmem:[%s649_s3 + $0x10] sm:$0xff] %vm179_vm1, %v379_v28  ;;  %v399_v29 = vpop.f32.mrf.mxu1 }
  0xcc   :  { %311 = vst.msk [vmem:[%s650_s4 + $0x10] sm:$0xff] %vm179_vm1, %v399_v29  ;;  %v116_v30 = vpop.f32.mrf.mxu0 }
  0xcd   :  { %180 = vst.msk [vmem:[%s649_s3] sm:$0xff] %vm179_vm1, %v116_v30  ;;  %v246_v31 = vpop.f32.mrf.mxu1 }
  0xce   :  { %309 = vst.msk [vmem:[%s650_s4] sm:$0xff] %vm179_vm1, %v246_v31  ;;  %v380_v32 = vpop.f32.mrf.mxu0 }
  0xcf   :  { %183 = vst.msk [vmem:[%s649_s3 + $0x18] sm:$0xff] %vm179_vm1, %v380_v32  ;;  %v400_v33 = vpop.f32.mrf.mxu1 }
  0xd0   :  { %312 = vst.msk [vmem:[%s650_s4 + $0x18] sm:$0xff] %vm179_vm1, %v400_v33  ;;  %v119_v34 = vpop.f32.mrf.mxu0 }
  0xd1   :  { %181 = vst.msk [vmem:[%s649_s3 + $0x8] sm:$0xff] %vm179_vm1, %v119_v34  ;;  %v249_v35 = vpop.f32.mrf.mxu1 }
  0xd2   :  { %310 = vst.msk [vmem:[%s650_s4 + $0x8] sm:$0xff] %vm179_vm1, %v249_v35  ;;  %v383_v36 = vpop.f32.mrf.mxu0 }
  0xd3   :  { %186 = vst.msk [vmem:[%s649_s3 + $0x30] sm:$0xff] %vm179_vm1, %v383_v36  ;;  %v403_v37 = vpop.f32.mrf.mxu1 }
  0xd4   :  { %315 = vst.msk [vmem:[%s650_s4 + $0x30] sm:$0xff] %vm179_vm1, %v403_v37  ;;  %v132_v38 = vpop.f32.mrf.mxu0 }
  0xd5   :  { %184 = vst.msk [vmem:[%s649_s3 + $0x20] sm:$0xff] %vm179_vm1, %v132_v38  ;;  %v262_v39 = vpop.f32.mrf.mxu1 }
  0xd6   :  { %313 = vst.msk [vmem:[%s650_s4 + $0x20] sm:$0xff] %vm179_vm1, %v262_v39  ;;  %v384_v40 = vpop.f32.mrf.mxu0 }
  0xd7   :  { %187 = vst.msk [vmem:[%s649_s3 + $0x38] sm:$0xff] %vm179_vm1, %v384_v40  ;;  %v404_v41 = vpop.f32.mrf.mxu1 }
  0xd8   :  { %316 = vst.msk [vmem:[%s650_s4 + $0x38] sm:$0xff] %vm179_vm1, %v404_v41  ;;  %v135_v42 = vpop.f32.mrf.mxu0 }
  0xd9   :  { %185 = vst.msk [vmem:[%s649_s3 + $0x28] sm:$0xff] %vm179_vm1, %v135_v42  ;;  %v265_v43 = vpop.f32.mrf.mxu1 }
  0xda   :  { %314 = vst.msk [vmem:[%s650_s4 + $0x28] sm:$0xff] %vm179_vm1, %v265_v43  ;;  %v387_v44 = vpop.f32.mrf.mxu0 }
  0xdb   :  { %190 = vst.msk [vmem:[%s649_s3 + $0x50] sm:$0xff] %vm179_vm1, %v387_v44  ;;  %v407_v45 = vpop.f32.mrf.mxu1 }
  0xdc   :  { %319 = vst.msk [vmem:[%s650_s4 + $0x50] sm:$0xff] %vm179_vm1, %v407_v45  ;;  %v148_v46 = vpop.f32.mrf.mxu0 }
  0xdd   :  { %188 = vst.msk [vmem:[%s649_s3 + $0x40] sm:$0xff] %vm179_vm1, %v148_v46  ;;  %v278_v47 = vpop.f32.mrf.mxu1 }
  0xde   :  { %317 = vst.msk [vmem:[%s650_s4 + $0x40] sm:$0xff] %vm179_vm1, %v278_v47  ;;  %v388_v48 = vpop.f32.mrf.mxu0 }
  0xdf   :  { %191 = vst.msk [vmem:[%s649_s3 + $0x58] sm:$0xff] %vm179_vm1, %v388_v48  ;;  %v408_v49 = vpop.f32.mrf.mxu1 }
  0xe0   :  { %320 = vst.msk [vmem:[%s650_s4 + $0x58] sm:$0xff] %vm179_vm1, %v408_v49  ;;  %v151_v50 = vpop.f32.mrf.mxu0 }
  0xe1   :  { %189 = vst.msk [vmem:[%s649_s3 + $0x48] sm:$0xff] %vm179_vm1, %v151_v50  ;;  %v281_v51 = vpop.f32.mrf.mxu1 }
  0xe2   :  { %318 = vst.msk [vmem:[%s650_s4 + $0x48] sm:$0xff] %vm179_vm1, %v281_v51  ;;  %v391_v52 = vpop.f32.mrf.mxu0 }
  0xe3   :  { %194 = vst.msk [vmem:[%s649_s3 + $0x70] sm:$0xff] %vm179_vm1, %v391_v52  ;;  %v411_v53 = vpop.f32.mrf.mxu1 }
  0xe4   :  { %323 = vst.msk [vmem:[%s650_s4 + $0x70] sm:$0xff] %vm179_vm1, %v411_v53  ;;  %v164_v54 = vpop.f32.mrf.mxu0 }
  0xe5   :  { %192 = vst.msk [vmem:[%s649_s3 + $0x60] sm:$0xff] %vm179_vm1, %v164_v54  ;;  %v294_v55 = vpop.f32.mrf.mxu1 }
  0xe6   :  { %321 = vst.msk [vmem:[%s650_s4 + $0x60] sm:$0xff] %vm179_vm1, %v294_v55  ;;  %v392_v56 = vpop.f32.mrf.mxu0 }
  0xe7   :  { %195 = vst.msk [vmem:[%s649_s3 + $0x78] sm:$0xff] %vm179_vm1, %v392_v56  ;;  %v412_v57 = vpop.f32.mrf.mxu1 }
  0xe8   :  { %324 = vst.msk [vmem:[%s650_s4 + $0x78] sm:$0xff] %vm179_vm1, %v412_v57  ;;  %v167_v58 = vpop.f32.mrf.mxu0 }
  0xe9   :  { %193 = vst.msk [vmem:[%s649_s3 + $0x68] sm:$0xff] %vm179_vm1, %v167_v58  ;;  %v297_v59 = vpop.f32.mrf.mxu1 }
  0xea   :  { %322 = vst.msk [vmem:[%s650_s4 + $0x68] sm:$0xff] %vm179_vm1, %v297_v59 }

// kernel: ss2d_forward.5
= control target key start
LH: loop header
LB: loop body
LE: loop exit
PB: predicated region body
PF: predicated region fallthrough
CT: control target
= control target key end

     0   :  { %s690_s12 = smov 0   ;;  %s889_s0 = inlined_call_operand.vmem [shape: f32[2,8,8,16], index: 0, kind: input, shape index: {}]   ;;  %s890_s1 = inlined_call_operand.vmem [shape: f32[3,3,16], index: 1, kind: input, shape index: {}]   ;;  %s891_s2 = inlined_call_operand.vmem [shape: f32[1,1,16], index: 2, kind: input, shape index: {}]   ;;  %s892_s3 = inlined_call_operand.vmem [shape: f32[2,8,8,16], index: 3, kind: output, shape index: {}]  }
   0x1 LB: > { %s605_s13 = sadd.s32 4294967295, %s667_s12   ;;  %p609_p0 = scmp.ge.s32.totalorder %s667_s12, 1  ;;  %s667_s12 = sphi %s690_s12, %s13_s12  }
   0x2   : > { %p137_p1 = scmp.lt.s32.totalorder %s667_s12, 3 }
   0x4   : > { %p138_p2 = pnand %p609_p0, %p137_p1 }
   0x5   : > { %p161_p3 = scmp.lt.s32.totalorder (!%p138_p2), %s605_s13, 1  ;;  %p614_p4 = scmp.ne.s32.totalorder (!%p138_p2), %s605_s13, 0 }
   0x6   : > { %141 = sbr.rel (%p138_p2) target bundleno = 125 (0x7d), region = 32 }
   0xb   : > { %s162_s14 = scalar_select %p161_p3, %s605_s13, 1 }
   0xc   : > { %174 = sbr.rel (%p614_p4) target bundleno = 28 (0x1c), region = 36 }
   0xd   : > { %s618_s15 = sshll.u32 %s162_s14, 6 }
   0xe   : > { %s701_s18 = scalar_lea.vmem %s889_s0, %s618_s15  ;;  %s706_s21 = scalar_lea.vmem %s892_s3, %s618_s15 }
  0x11   : > { %vm175_vm0 = vcmask 130048   ;;  %vm177_vm1 = vcmask 123904   ;;  %v669_v0 = vmov 0.0  }
  0x12   : > { %176 = vst.msk [vmem:[#allocation2] sm:$0xff] %vm175_vm0, %v669_v0  ;;  %179 = vst.msk [vmem:[#allocation2 + $0x10] sm:$0xff] %vm175_vm0, %v669_v0 }
  0x13   : > { %181 = vst.msk [vmem:[#allocation2 + $0x20] sm:$0xff] %vm175_vm0, %v669_v0  ;;  %183 = vst.msk [vmem:[#allocation2 + $0x30] sm:$0xff] %vm175_vm0, %v669_v0 }
  0x14   : > { %185 = vst.msk [vmem:[#allocation2 + $0x40] sm:$0xff] %vm175_vm0, %v669_v0  ;;  %187 = vst.msk [vmem:[#allocation2 + $0x50] sm:$0xff] %vm175_vm0, %v669_v0 }
  0x15   : > { %189 = vst.msk [vmem:[#allocation2 + $0x60] sm:$0xff] %vm175_vm0, %v669_v0  ;;  %191 = vst.msk [vmem:[#allocation2 + $0x70] sm:$0xff] %vm175_vm0, %v669_v0 }
  0x16   : > { %193 = vst.msk [vmem:[#allocation2 + $0x80] sm:$0xff] %vm175_vm0, %v669_v0  ;;  %195 = vst.msk [vmem:[#allocation2 + $0x90] sm:$0xff] %vm175_vm0, %v669_v0 }
  0x17   : > { %178 = vst.msk [vmem:[#allocation2 + $0x8] sm:$0x3] %vm177_vm1, %v669_v0  ;;  %180 = vst.msk [vmem:[#allocation2 + $0x18] sm:$0x3] %vm177_vm1, %v669_v0 }
  0x18   : > { %182 = vst.msk [vmem:[#allocation2 + $0x28] sm:$0x3] %vm177_vm1, %v669_v0  ;;  %184 = vst.msk [vmem:[#allocation2 + $0x38] sm:$0x3] %vm177_vm1, %v669_v0 }
  0x19   : > { %186 = vst.msk [vmem:[#allocation2 + $0x48] sm:$0x3] %vm177_vm1, %v669_v0  ;;  %188 = vst.msk [vmem:[#allocation2 + $0x58] sm:$0x3] %vm177_vm1, %v669_v0 }
  0x1a   : > { %190 = vst.msk [vmem:[#allocation2 + $0x68] sm:$0x3] %vm177_vm1, %v669_v0  ;;  %192 = vst.msk [vmem:[#allocation2 + $0x78] sm:$0x3] %vm177_vm1, %v669_v0 }
  0x1b   : > { %194 = vst.msk [vmem:[#allocation2 + $0x88] sm:$0x3] %vm177_vm1, %v669_v0  ;;  %196 = vst.msk [vmem:[#allocation2 + $0x98] sm:$0x3] %vm177_vm1, %v669_v0 }
  0x1c PF: > { %v197_v1 = vld [vmem:[%s701_s18] sm:$0xff]  ;;  %vm206_vm2 = vcmask 130048   ;;  %v198_v2 = vld [vmem:[%s701_s18 + $0x8] sm:$0xff]  ;;  %v199_v3 = vld [vmem:[%s701_s18 + $0x10] sm:$0xff]  ;;  %v226_v4 = vlaneseq }
  0x1d   : > { %207 = vst.msk [vmem:[#allocation2 + $0x11] sm:$0xff] %vm206_vm2, %v197_v1  ;;  %208 = vst.msk [vmem:[#allocation2 + $0x21] sm:$0xff] %vm206_vm2, %v198_v2  ;;  %v200_v5 = vld [vmem:[%s701_s18 + $0x18] sm:$0xff]  ;;  %v201_v6 = vld [vmem:[%s701_s18 + $0x20] sm:$0xff] }
  0x1e   : > { %209 = vst.msk [vmem:[#allocation2 + $0x31] sm:$0xff] %vm206_vm2, %v199_v3  ;;  %v202_v7 = vld [vmem:[%s701_s18 + $0x28] sm:$0xff]  ;;  %210 = vst.msk [vmem:[#allocation2 + $0x41] sm:$0xff] %vm206_vm2, %v200_v5  ;;  %v203_v8 = vld [vmem:[%s701_s18 + $0x30] sm:$0xff]  ;;  %v227_v10 = vshrl.u32 %v226_v4, 7 }
  0x1f   : > { %211 = vst.msk [vmem:[#allocation2 + $0x51] sm:$0xff] %vm206_vm2, %v201_v6  ;;  %212 = vst.msk [vmem:[#allocation2 + $0x61] sm:$0xff] %vm206_vm2, %v202_v7  ;;  %v204_v9 = vld [vmem:[%s701_s18 + $0x38] sm:$0xff]  ;;  %v215_v11 = vld [vmem:[%s890_s1] sm:$0x7] }
  0x20   : > { %213 = vst.msk [vmem:[#allocation2 + $0x71] sm:$0xff] %vm206_vm2, %v203_v8  ;;  %214 = vst.msk [vmem:[#allocation2 + $0x81] sm:$0xff] %vm206_vm2, %v204_v9  ;;  %v216_v12 = vld [vmem:[%s890_s1 + $0x4] sm:$0x7]  ;;  %v217_v13 = vld [vmem:[%s890_s1 + $0x8] sm:$0x7] }
  0x21   : > { %v228_v14 = vsub.s32 0, %v227_v10  ;;  %v256_v15 = vsub.s32 1, %v227_v10  ;;  %v284_v16 = vsub.s32 2, %v227_v10  ;;  %v218_v17 = vld [vmem:[#allocation2] sm:$0xff] }
  0x22   : > { %v246_v18 = vld [vmem:[#allocation2 + $0x1] sm:$0xff] }
  0x23   : > { %v274_v19 = vld [vmem:[#allocation2 + $0x2] sm:$0xff]  ;;  %v743_v20 = vrot.slane %v215_v11, %v228_v14  ;;  %v745_v21 = vrot.slane %v215_v11, %v256_v15  ;;  %v747_v22 = vrot.slane %v215_v11, %v284_v16  ;;  %v749_v23 = vrot.slane %v216_v12, %v228_v14 }
  0x24   : > { %v751_v24 = vrot.slane %v216_v12, %v256_v15  ;;  %v753_v25 = vrot.slane %v216_v12, %v284_v16  ;;  %v755_v26 = vrot.slane %v217_v13, %v228_v14  ;;  %v757_v27 = vrot.slane %v217_v13, %v256_v15  ;;  %v302_v31 = vld [vmem:[#allocation2 + $0x10] sm:$0xff]  ;;  %v387_v35 = vld [vmem:[#allocation2 + $0x20] sm:$0xff] }
  0x25   : > { %v230_v28 = vmul.f32 %v743_v20, %v218_v17  ;;  %v258_v29 = vmul.f32 %v745_v21, %v246_v18  ;;  %v286_v30 = vmul.f32 %v747_v22, %v274_v19  ;;  %v330_v32 = vld [vmem:[#allocation2 + $0x11] sm:$0xff]  ;;  %v762_v34 = vrot.slane %v217_v13, %v284_v16  ;;  %v415_v36 = vld [vmem:[#allocation2 + $0x21] sm:$0xff] }
  0x26   : > { %v358_v33 = vld [vmem:[#allocation2 + $0x12] sm:$0xff]  ;;  %v443_v37 = vld [vmem:[#allocation2 + $0x22] sm:$0xff]  ;;  %v231_v38 = vmul.f32 %v302_v31, %v743_v20  ;;  %v314_v40 = vmul.f32 %v749_v23, %v302_v31  ;;  %v342_v41 = vmul.f32 %v751_v24, %v330_v32  ;;  %v399_v43 = vmul.f32 %v755_v26, %v387_v35 }
  0x27   : > { %v266_v39 = vadd.f32 %v258_v29, %v230_v28  ;;  %v370_v42 = vmul.f32 %v753_v25, %v358_v33  ;;  %v427_v44 = vmul.f32 %v757_v27, %v415_v36  ;;  %v455_v45 = vmul.f32 %v762_v34, %v443_v37  ;;  %v388_v47 = vld [vmem:[#allocation2 + $0x30] sm:$0xff]  ;;  %v389_v62 = vld [vmem:[#allocation2 + $0x40] sm:$0xff] }
  0x28   : > { %v259_v46 = vmul.f32 %v330_v32, %v745_v21  ;;  %v416_v48 = vld [vmem:[#allocation2 + $0x31] sm:$0xff]  ;;  %v287_v51 = vmul.f32 %v358_v33, %v747_v22  ;;  %v315_v52 = vmul.f32 %v387_v35, %v749_v23  ;;  %v343_v53 = vmul.f32 %v415_v36, %v751_v24  ;;  %v417_v3 = vld [vmem:[#allocation2 + $0x41] sm:$0xff] }
  0x29   : > { %v444_v49 = vld [vmem:[#allocation2 + $0x32] sm:$0xff]  ;;  %v294_v50 = vadd.f32 %v286_v30, %v266_v39  ;;  %v371_v55 = vmul.f32 %v443_v37, %v753_v25  ;;  %v232_v56 = vmul.f32 %v387_v35, %v743_v20  ;;  %v260_v57 = vmul.f32 %v415_v36, %v745_v21  ;;  %v445_v4 = vld [vmem:[#allocation2 + $0x42] sm:$0xff] }
  0x2a   : > { %v267_v54 = vadd.f32 %v259_v46, %v231_v38  ;;  %v400_v59 = vmul.f32 %v755_v26, %v388_v47  ;;  %v428_v60 = vmul.f32 %v757_v27, %v416_v48  ;;  %v456_v61 = vmul.f32 %v762_v34, %v444_v49  ;;  %v390_v29 = vld [vmem:[#allocation2 + $0x50] sm:$0xff] }
  0x2b   : > { %v322_v58 = vadd.f32 %v314_v40, %v294_v50  ;;  %v268_v0 = vadd.f32 %v260_v57, %v232_v56  ;;  %v288_v1 = vmul.f32 %v443_v37, %v747_v22  ;;  %v316_v2 = vmul.f32 %v388_v47, %v749_v23  ;;  %v418_v30 = vld [vmem:[#allocation2 + $0x51] sm:$0xff] }
  0x2c   : > { %v295_v63 = vadd.f32 %v287_v51, %v267_v54  ;;  %v344_v6 = vmul.f32 %v416_v48, %v751_v24  ;;  %v372_v7 = vmul.f32 %v444_v49, %v753_v25  ;;  %v233_v8 = vmul.f32 %v388_v47, %v743_v20  ;;  %v446_v39 = vld [vmem:[#allocation2 + $0x52] sm:$0xff] }
  0x2d   : > { %v350_v5 = vadd.f32 %v342_v41, %v322_v58  ;;  %v296_v10 = vadd.f32 %v288_v1, %v268_v0  ;;  %v401_v11 = vmul.f32 %v755_v26, %v389_v62  ;;  %v261_v12 = vmul.f32 %v416_v48, %v745_v21 }
  0x2e   : > { %v323_v9 = vadd.f32 %v315_v52, %v295_v63  ;;  %v429_v14 = vmul.f32 %v757_v27, %v417_v3  ;;  %v457_v15 = vmul.f32 %v762_v34, %v445_v4  ;;  %v289_v16 = vmul.f32 %v444_v49, %v747_v22 }
  0x2f   : > { %v378_v13 = vadd.f32 %v370_v42, %v350_v5  ;;  %v324_v18 = vadd.f32 %v316_v2, %v296_v10  ;;  %v269_v19 = vadd.f32 %v261_v12, %v233_v8  ;;  %v317_v28 = vmul.f32 %v389_v62, %v749_v23  ;;  %v419_v5 = vld [vmem:[#allocation2 + $0x61] sm:$0xff] }
  0x30   : > { %v351_v17 = vadd.f32 %v343_v53, %v323_v9  ;;  %v345_v32 = vmul.f32 %v417_v3, %v751_v24  ;;  %v373_v33 = vmul.f32 %v445_v4, %v753_v25  ;;  %v234_v35 = vmul.f32 %v389_v62, %v743_v20  ;;  %v391_v62 = vld [vmem:[#allocation2 + $0x60] sm:$0xff] }
  0x31   : > { %v407_v31 = vadd.f32 %v399_v43, %v378_v13  ;;  %v352_v37 = vadd.f32 %v344_v6, %v324_v18  ;;  %v297_v38 = vadd.f32 %v289_v16, %v269_v19  ;;  %v262_v40 = vmul.f32 %v417_v3, %v745_v21  ;;  %v802_v43 = vld [vmem:[%s891_s2] ss:$0 sm:$0xff]  ;;  %v447_v13 = vld [vmem:[#allocation2 + $0x62] sm:$0xff] }
  0x32   : > { %v379_v36 = vadd.f32 %v371_v55, %v351_v17  ;;  %v402_v42 = vmul.f32 %v755_v26, %v390_v29  ;;  %v430_v46 = vmul.f32 %v757_v27, %v418_v30  ;;  %v290_v47 = vmul.f32 %v445_v4, %v747_v22 }
  0x33   : > { %v435_v41 = vadd.f32 %v427_v44, %v407_v31  ;;  %v380_v49 = vadd.f32 %v372_v7, %v352_v37  ;;  %v325_v50 = vadd.f32 %v317_v28, %v297_v38  ;;  %v270_v51 = vadd.f32 %v262_v40, %v234_v35  ;;  %v392_v37 = vld [vmem:[#allocation2 + $0x70] sm:$0xff] }
  0x34   : > { %v408_v48 = vadd.f32 %v400_v59, %v379_v36  ;;  %v458_v53 = vmul.f32 %v762_v34, %v446_v39  ;;  %v318_v44 = vmul.f32 %v390_v29, %v749_v23  ;;  %v346_v54 = vmul.f32 %v418_v30, %v751_v24 }
  0x35   : > { %v463_v52 = vadd.f32 %v455_v45, %v435_v41  ;;  %v409_v56 = vadd.f32 %v401_v11, %v380_v49  ;;  %v353_v57 = vadd.f32 %v345_v32, %v325_v50  ;;  %v298_v58 = vadd.f32 %v290_v47, %v270_v51  ;;  %v448_v51 = vld [vmem:[#allocation2 + $0x72] sm:$0xff] }
  0x36   : > { %v436_v55 = vadd.f32 %v428_v60, %v408_v48  ;;  %v374_v59 = vmul.f32 %v446_v39, %v753_v25  ;;  %v235_v0 = vmul.f32 %v390_v29, %v743_v20  ;;  %v263_v45 = vmul.f32 %v418_v30, %v745_v21  ;;  %v420_v48 = vld [vmem:[#allocation2 + $0x71] sm:$0xff] }
  0x37   : > { %v808_v63 = vadd.f32 %v802_v43, %v463_v52  ;;  %v437_v2 = vadd.f32 %v429_v14, %v409_v56  ;;  %v381_v3 = vadd.f32 %v373_v33, %v353_v57  ;;  %v326_v4 = vadd.f32 %v318_v44, %v298_v58 }
  0x38   : > { %v464_v1 = vadd.f32 %v456_v61, %v436_v55  ;;  %v403_v6 = vmul.f32 %v755_v26, %v391_v62  ;;  %v271_v7 = vadd.f32 %v263_v45, %v235_v0  ;;  %v291_v8 = vmul.f32 %v446_v39, %v747_v22 }
  0x39   : > { %v486_v60 = vsub.f32 0.0, %v808_v63  ;;  %v465_v10 = vadd.f32 %v457_v15, %v437_v2  ;;  %v410_v11 = vadd.f32 %v402_v42, %v381_v3  ;;  %v354_v12 = vadd.f32 %v346_v54, %v326_v4 }
  0x3a   : > { %v817_v9 = vadd.f32 %v802_v43, %v464_v1  ;;  %v431_v61 = vmul.f32 %v757_v27, %v419_v5  ;;  %v299_v14 = vadd.f32 %v291_v8, %v271_v7  ;;  %v319_v17 = vmul.f32 %v391_v62, %v749_v23  ;;  %v393_v1 = vld [vmem:[#allocation2 + $0x80] sm:$0xff] }
  0x3b   : > { %v494_v16 = vmul.f32 1.442695, %v486_v60  ;;  %v823_v19 = vadd.f32 %v802_v43, %v465_v10  ;;  %v438_v28 = vadd.f32 %v430_v46, %v410_v11  ;;  %v382_v29 = vadd.f32 %v374_v59, %v354_v12  ;;  %v421_v11 = vld [vmem:[#allocation2 + $0x81] sm:$0xff] }
  0x3c   : > { %v487_v18 = vsub.f32 0.0, %v817_v9  ;;  %v459_v30 = vmul.f32 %v762_v34, %v447_v13  ;;  %v327_v15 = vadd.f32 %v319_v17, %v299_v14  ;;  %v347_v31 = vmul.f32 %v419_v5, %v751_v24  ;;  %v449_v14 = vld [vmem:[#allocation2 + $0x82] sm:$0xff] }
  0x3d   : > { %629 = vpow2.f32 %v494_v16  ;;  %v488_v33 = vsub.f32 0.0, %v823_v19  ;;  %v466_v35 = vadd.f32 %v458_v53, %v438_v28  ;;  %v411_v36 = vadd.f32 %v403_v6, %v382_v29 }
  0x3e   : > { %v496_v32 = vmul.f32 1.442695, %v487_v18  ;;  %v355_v38 = vadd.f32 %v347_v31, %v327_v15  ;;  %v375_v39 = vmul.f32 %v447_v13, %v753_v25  ;;  %v236_v40 = vmul.f32 %v391_v62, %v743_v20  ;;  %v394_v18 = vld [vmem:[#allocation2 + $0x90] sm:$0xff] }
  0x3f   : > { %v264_v41 = vmul.f32 %v419_v5, %v745_v21  ;;  %v498_v42 = vmul.f32 1.442695, %v488_v33  ;;  %v832_v46 = vadd.f32 %v802_v43, %v466_v35  ;;  %v439_v47 = vadd.f32 %v431_v61, %v411_v36  ;;  %v422_v36 = vld [vmem:[#allocation2 + $0x91] sm:$0xff] }
  0x40   : > { %631 = vpow2.f32 %v496_v32  ;;  %v383_v49 = vadd.f32 %v375_v39, %v355_v38  ;;  %v404_v50 = vmul.f32 %v755_v26, %v392_v37  ;;  %v292_v53 = vmul.f32 %v447_v13, %v747_v22 }
  0x41   : > { %v272_v52 = vadd.f32 %v264_v41, %v236_v40  ;;  %633 = vpow2.f32 %v498_v42  ;;  %v489_v44 = vsub.f32 0.0, %v832_v46  ;;  %v467_v54 = vadd.f32 %v459_v30, %v439_v47  ;;  %v450_v42 = vld [vmem:[#allocation2 + $0x92] sm:$0xff] }
  0x42   : > { %v412_v55 = vadd.f32 %v404_v50, %v383_v49  ;;  %v432_v56 = vmul.f32 %v757_v27, %v420_v48  ;;  %v320_v58 = vmul.f32 %v392_v37, %v749_v23  ;;  %v460_v0 = vmul.f32 %v762_v34, %v448_v51 }
  0x43   : > { %v300_v57 = vadd.f32 %v292_v53, %v272_v52  ;;  %v500_v62 = vmul.f32 1.442695, %v489_v44  ;;  %v840_v59 = vadd.f32 %v802_v43, %v467_v54  ;;  %v348_v45 = vmul.f32 %v420_v48, %v751_v24 }
  0x44   : > { %v440_v2 = vadd.f32 %v432_v56, %v412_v55  ;;  %v237_v4 = vmul.f32 %v392_v37, %v743_v20  ;;  %v265_v5 = vmul.f32 %v420_v48, %v745_v21  ;;  %v376_v6 = vmul.f32 %v448_v51, %v753_v25 }
  0x45   : > { %v328_v3 = vadd.f32 %v320_v58, %v300_v57  ;;  %635 = vpow2.f32 %v500_v62  ;;  %v490_v60 = vsub.f32 0.0, %v840_v59  ;;  %v293_v7 = vmul.f32 %v448_v51, %v747_v22 }
  0x46   : > { %v468_v8 = vadd.f32 %v460_v0, %v440_v2  ;;  %v273_v12 = vadd.f32 %v265_v5, %v237_v4  ;;  %v321_v13 = vmul.f32 %v393_v1, %v749_v23  ;;  %v405_v21 = vmul.f32 %v755_v26, %v393_v1 }
  0x47   : > { %v356_v10 = vadd.f32 %v348_v45, %v328_v3  ;;  %v502_v16 = vmul.f32 1.442695, %v490_v60  ;;  %v433_v22 = vmul.f32 %v757_v27, %v421_v11  ;;  %v349_v29 = vmul.f32 %v421_v11, %v751_v24 }
  0x48   : > { %v851_v61 = vadd.f32 %v802_v43, %v468_v8  ;;  %v301_v17 = vadd.f32 %v293_v7, %v273_v12  ;;  %v461_v32 = vmul.f32 %v762_v34, %v449_v14  ;;  %v377_v33 = vmul.f32 %v449_v14, %v753_v25 }
  0x49   : > { %v384_v20 = vadd.f32 %v376_v6, %v356_v10  ;;  %637 = vpow2.f32 %v502_v16  ;;  %v406_v35 = vmul.f32 %v755_v26, %v394_v18  ;;  %v434_v49 = vmul.f32 %v757_v27, %v422_v36 }
  0x4a   : > { %v630_v28 = vpop.eup %629  ;;  %v491_v15 = vsub.f32 0.0, %v851_v61  ;;  %v329_v31 = vadd.f32 %v321_v13, %v301_v17  ;;  %v462_v26 = vmul.f32 %v762_v34, %v450_v42 }
  0x4b   : > { %v510_v30 = vadd.f32 1.0, %v630_v28  ;;  %v413_v23 = vadd.f32 %v405_v21, %v384_v20 }
  0x4c   : > { %v504_v38 = vmul.f32 1.442695, %v491_v15  ;;  %v357_v40 = vadd.f32 %v349_v29, %v329_v31 }
  0x4d   : > { %v632_v37 = vpop.eup %631  ;;  %639 = vrcp.f32 %v510_v30  ;;  %v441_v39 = vadd.f32 %v433_v22, %v413_v23 }
  0x4e   : > { %v511_v41 = vadd.f32 1.0, %v632_v37  ;;  %v634_v24 = vpop.eup %633  ;;  %641 = vpow2.f32 %v504_v38  ;;  %v385_v48 = vadd.f32 %v377_v33, %v357_v40 }
  0x4f   : > { %v469_v47 = vadd.f32 %v461_v32, %v441_v39  ;;  %v512_v50 = vadd.f32 1.0, %v634_v24 }
  0x50   : > { %643 = vrcp.f32 %v511_v41  ;;  %v414_v51 = vadd.f32 %v406_v35, %v385_v48 }
  0x51   : > { %v484_v25 = vadd.f32 %v802_v43, %v469_v47  ;;  %645 = vrcp.f32 %v512_v50 }
  0x52   : > { %v636_v52 = vpop.eup %635  ;;  %v442_v44 = vadd.f32 %v434_v49, %v414_v51 }
  0x53   : > { %v492_v53 = vsub.f32 0.0, %v484_v25  ;;  %v513_v54 = vadd.f32 1.0, %v636_v52 }
  0x54   : > { %v470_v56 = vadd.f32 %v462_v26, %v442_v44 }
  0x55   : > { %v506_v55 = vmul.f32 1.442695, %v492_v53  ;;  %647 = vrcp.f32 %v513_v54 }
  0x56   : > { %v638_v57 = vpop.eup %637  ;;  %v485_v27 = vadd.f32 %v802_v43, %v470_v56 }
  0x57   : > { %649 = vpow2.f32 %v506_v55  ;;  %v514_v58 = vadd.f32 1.0, %v638_v57 }
  0x58   : > { %v493_v62 = vsub.f32 0.0, %v485_v27 }
  0x59   : > { %651 = vrcp.f32 %v514_v58 }
  0x5a   : > { %v640_v0 = vpop.eup %639  ;;  %v508_v45 = vmul.f32 1.442695, %v493_v62 }
  0x5b   : > { %v534_v34 = vmul.f32 %v640_v0, %v808_v63  ;;  %v642_v1 = vpop.eup %641 }
  0x5c   : > { %v515_v3 = vadd.f32 1.0, %v642_v1  ;;  %653 = vpow2.f32 %v508_v45 }
  0x5d   : > { %v644_v2 = vpop.eup %643  ;;  %542 = vst.msk [vmem:[%s706_s21] sm:$0xff] %vm206_vm2, %v534_v34 }
  0x5e   : > { %v535_v4 = vmul.f32 %v644_v2, %v817_v9  ;;  %v646_v5 = vpop.eup %645  ;;  %655 = vrcp.f32 %v515_v3 }
  0x5f   : > { %v536_v43 = vmul.f32 %v646_v5, %v823_v19 }
  0x60   : > { %543 = vst.msk [vmem:[%s706_s21 + $0x8] sm:$0xff] %vm206_vm2, %v535_v4 }
  0x61   : > { %544 = vst.msk [vmem:[%s706_s21 + $0x10] sm:$0xff] %vm206_vm2, %v536_v43 }
  0x62   : > { %v648_v63 = vpop.eup %647 }
  0x63   : > { %v537_v6 = vmul.f32 %v648_v63, %v832_v46 }
  0x64   : > { %v650_v60 = vpop.eup %649 }
  0x65   : > { %v516_v7 = vadd.f32 1.0, %v650_v60  ;;  %545 = vst.msk [vmem:[%s706_s21 + $0x18] sm:$0xff] %vm206_vm2, %v537_v6 }
  0x66   : > { %v652_v8 = vpop.eup %651 }
  0x67   : > { %657 = vrcp.f32 %v516_v7  ;;  %v538_v9 = vmul.f32 %v652_v8, %v840_v59 }
  0x69   : > { %v654_v10 = vpop.eup %653  ;;  %546 = vst.msk [vmem:[%s706_s21 + $0x20] sm:$0xff] %vm206_vm2, %v538_v9 }
  0x6a   : > { %v517_v19 = vadd.f32 1.0, %v654_v10 }
  0x6b   : > { %v656_v11 = vpop.eup %655 }
  0x6c   : > { %v539_v12 = vmul.f32 %v656_v11, %v851_v61  ;;  %659 = vrcp.f32 %v517_v19 }
  0x6e   : > { %547 = vst.msk [vmem:[%s706_s21 + $0x28] sm:$0xff] %vm206_vm2, %v539_v12 }
  0x74   : > { %v658_v13 = vpop.eup %657 }
  0x75   : > { %v540_v46 = vmul.f32 %v658_v13, %v484_v25 }
  0x77   : > { %548 = vst.msk [vmem:[%s706_s21 + $0x30] sm:$0xff] %vm206_vm2, %v540_v46 }
  0x79   : > { %v660_v16 = vpop.eup %659 }
  0x7a   : > { %v541_v20 = vmul.f32 %v660_v16, %v485_v27 }
  0x7c   : > { %549 = vst.msk [vmem:[%s706_s21 + $0x38] sm:$0xff] %vm206_vm2, %v541_v20 }
  0x7d PF: > { %s13_s12 = sadd.s32 1, %s667_s12  }
  0x7e   : > { %p10_p5 = scmp.ge.s32.totalorder %s13_s12, 4  }
  0x80   :  { %12 = sbr.rel (!%p10_p5) target bundleno = 1 (0x1), region = 68 }

// kernel: ss2d_forward.7
= control target key start
LH: loop header
LB: loop body
LE: loop exit
PB: predicated region body
PF: predicated region fallthrough
CT: control target
= control target key end

     0   :  { %vm38_vm0 = vcmask 130048   ;;  %s1199_s0 = inlined_call_operand.vmem [shape: f32[128,16], index: 0, kind: input, shape index: {}]   ;;  %s1200_s1 = inlined_call_operand.vmem [shape: f32[128,16], index: 1, kind: input, shape index: {}]   ;;  %s1201_s2 = inlined_call_operand.vmem [shape: f32[1,16], index: 2, kind: input, shape index: {}]   ;;  %s1202_s3 = inlined_call_operand.vmem [shape: f32[1,16], index: 3, kind: input, shape index: {}]   ;;  %s1203_s4 = inlined_call_operand.vmem [shape: bf16[16,32], index: 4, kind: input, shape index: {}]   ;;  %s1204_s5 = inlined_call_operand.hbm [shape: f32[128,32], index: 5, kind: output, shape index: {}]  }
   0x1   :  { %v22_v0 = vld [vmem:[%s1199_s0] sm:$0xff]  ;;  %v23_v2 = vld [vmem:[%s1199_s0 + $0x8] sm:$0xff]  ;;  %v24_v8 = vld [vmem:[%s1199_s0 + $0x10] sm:$0xff] }
   0x2   :  { %v30_v1 = vld [vmem:[%s1199_s0 + $0x40] sm:$0xff]  ;;  %v39_v3 = vsel %vm38_vm0, %v22_v0, 0.0  ;;  %v31_v5 = vld [vmem:[%s1199_s0 + $0x48] sm:$0xff]  ;;  %v42_v6 = vsel %vm38_vm0, %v23_v2, 0.0  ;;  %v25_v9 = vld [vmem:[%s1199_s0 + $0x18] sm:$0xff] }
   0x3   :  { %v63_v4 = vsel %vm38_vm0, %v30_v1, 0.0  ;;  %40 = vadd.xlane.f32.xlu0 %v39_v3  ;;  %v66_v7 = vsel %vm38_vm0, %v31_v5, 0.0 }
   0x4   :  { %64 = vadd.xlane.f32.xlu1 %v63_v4 }
   0x7   :  { %43 = vadd.xlane.f32.xlu0 %v42_v6 }
   0x8   :  { %67 = vadd.xlane.f32.xlu1 %v66_v7 }
   0x9   :  { %10 = vsyncpa [#allocation3], 0  ;;  %v45_v10 = vsel %vm38_vm0, %v24_v8, 0.0  ;;  %v48_v11 = vsel %vm38_vm0, %v25_v9, 0.0  ;;  %v830_v12 = vld [vmem:[%s1199_s0 + $0x50] sm:$0xff]  ;;  %v835_v13 = vld [vmem:[%s1199_s0 + $0x58] sm:$0xff] }
   0xa   :  { %v69_v14 = vsel %vm38_vm0, %v830_v12, 0.0  ;;  %v72_v15 = vsel %vm38_vm0, %v835_v13, 0.0  ;;  %v844_v16 = vld [vmem:[%s1199_s0 + $0x20] sm:$0xff]  ;;  %v849_v17 = vld [vmem:[%s1199_s0 + $0x28] sm:$0xff]  ;;  %v872_v24 = vld [vmem:[%s1199_s0 + $0x30] sm:$0xff]  ;;  %vm575_vm1 = vcmask 261120  }
   0xb   :  { %46 = vadd.xlane.f32.xlu0 %v45_v10  ;;  %v51_v18 = vsel %vm38_vm0, %v844_v16, 0.0  ;;  %v54_v19 = vsel %vm38_vm0, %v849_v17, 0.0  ;;  %v858_v20 = vld [vmem:[%s1199_s0 + $0x60] sm:$0xff]  ;;  %v863_v21 = vld [vmem:[%s1199_s0 + $0x68] sm:$0xff]  ;;  %v877_v25 = vld [vmem:[%s1199_s0 + $0x38] sm:$0xff]  ;;  %v57_v26 = vsel %vm38_vm0, %v872_v24, 0.0 }
   0xc   :  { %49 = vadd.xlane.f32.xlu1 %v48_v11  ;;  %v75_v22 = vsel %vm38_vm0, %v858_v20, 0.0  ;;  %v78_v23 = vsel %vm38_vm0, %v863_v21, 0.0  ;;  %v60_v27 = vsel %vm38_vm0, %v877_v25, 0.0  ;;  %v886_v28 = vld [vmem:[%s1199_s0 + $0x70] sm:$0xff]  ;;  %v891_v29 = vld [vmem:[%s1199_s0 + $0x78] sm:$0xff] }
   0xd   :  { %v81_v30 = vsel %vm38_vm0, %v886_v28, 0.0  ;;  %v84_v31 = vsel %vm38_vm0, %v891_v29, 0.0 }
   0xf   :  { %70 = vadd.xlane.f32.xlu0 %v69_v14 }
  0x10   :  { %73 = vadd.xlane.f32.xlu1 %v72_v15 }
  0x13   :  { %52 = vadd.xlane.f32.xlu0 %v51_v18 }
  0x14   :  { %55 = vadd.xlane.f32.xlu1 %v54_v19 }
  0x17   :  { %76 = vadd.xlane.f32.xlu0 %v75_v22 }
  0x18   :  { %79 = vadd.xlane.f32.xlu1 %v78_v23 }
  0x1b   :  { %58 = vadd.xlane.f32.xlu0 %v57_v26 }
  0x1c   :  { %61 = vadd.xlane.f32.xlu1 %v60_v27 }
  0x1f   :  { %82 = vadd.xlane.f32.xlu0 %v81_v30 }
  0x20   :  { %85 = vadd.xlane.f32.xlu1 %v84_v31 }
  0x8c   :  { %v41_v32 = vpop.xlane.xlu0 %40 }
  0x8d   :  { %v65_v33 = vpop.xlane.xlu1 %64  ;;  %v88_v34 = vmul.f32 0.0625, %v41_v32 }
  0x8e   :  { %v96_v35 = vmul.f32 0.0625, %v65_v33 }
  0x8f   :  { %v897_v36 = vsub.f32 %v22_v0, %v88_v34 }
  0x90   :  { %v899_v37 = vsub.f32 %v30_v1, %v96_v35  ;;  %v44_v38 = vpop.xlane.xlu0 %43 }
  0x91   :  { %v68_v39 = vpop.xlane.xlu1 %67  ;;  %v89_v40 = vmul.f32 0.0625, %v44_v38  ;;  %v120_v42 = vmul.f32 %v897_v36, %v897_v36 }
  0x92   :  { %v97_v41 = vmul.f32 0.0625, %v68_v39  ;;  %v128_v43 = vmul.f32 %v899_v37, %v899_v37 }
  0x93   :  { %v905_v44 = vsub.f32 %v23_v2, %v89_v40  ;;  %v136_v46 = vsel %vm38_vm0, %v120_v42, 0.0 }
  0x94   :  { %v907_v45 = vsub.f32 %v31_v5, %v97_v41  ;;  %137 = vadd.xlane.f32.xlu0 %v136_v46  ;;  %v47_v47 = vpop.xlane.xlu0 %46  ;;  %v160_v49 = vsel %vm38_vm0, %v128_v43, 0.0 }
  0x95   :  { %v50_v48 = vpop.xlane.xlu1 %49  ;;  %v90_v50 = vmul.f32 0.0625, %v47_v47  ;;  %v121_v52 = vmul.f32 %v905_v44, %v905_v44 }
  0x96   :  { %v91_v51 = vmul.f32 0.0625, %v50_v48  ;;  %v129_v53 = vmul.f32 %v907_v45, %v907_v45 }
  0x97   :  { %v915_v54 = vsub.f32 %v24_v8, %v90_v50  ;;  %v139_v56 = vsel %vm38_vm0, %v121_v52, 0.0 }
  0x98   :  { %v917_v55 = vsub.f32 %v25_v9, %v91_v51  ;;  %161 = vadd.xlane.f32.xlu0 %v160_v49  ;;  %140 = vadd.xlane.f32.xlu1 %v139_v56  ;;  %v71_v57 = vpop.xlane.xlu0 %70  ;;  %v163_v59 = vsel %vm38_vm0, %v129_v53, 0.0  ;;  %v993_v53 = vld [vmem:[%s1200_s1] sm:$0xff]  ;;  %v998_v56 = vld [vmem:[%s1200_s1 + $0x8] sm:$0xff] }
  0x99   :  { %v74_v58 = vpop.xlane.xlu1 %73  ;;  %v98_v60 = vmul.f32 0.0625, %v71_v57  ;;  %v122_v62 = vmul.f32 %v915_v54, %v915_v54  ;;  %v310_v57 = vsub.f32 0.0, %v993_v53 }
  0x9a   :  { %v99_v61 = vmul.f32 0.0625, %v74_v58  ;;  %v123_v63 = vmul.f32 %v917_v55, %v917_v55  ;;  %v1004_v58 = vld [vmem:[%s1200_s1 + $0x40] sm:$0xff] }
  0x9b   :  { %v926_v0 = vsub.f32 %v830_v12, %v98_v60  ;;  %v142_v2 = vsel %vm38_vm0, %v122_v62, 0.0  ;;  %v311_v60 = vsub.f32 0.0, %v998_v56  ;;  %v318_v62 = vsub.f32 0.0, %v1004_v58 }
  0x9c   :  { %v929_v1 = vsub.f32 %v835_v13, %v99_v61  ;;  %164 = vadd.xlane.f32.xlu1 %v163_v59  ;;  %143 = vadd.xlane.f32.xlu0 %v142_v2  ;;  %v53_v3 = vpop.xlane.xlu0 %52  ;;  %v145_v5 = vsel %vm38_vm0, %v123_v63, 0.0  ;;  %v1009_v59 = vld [vmem:[%s1200_s1 + $0x48] sm:$0xff]  ;;  %v326_v61 = vmul.f32 1.442695, %v310_v57  ;;  %v1016_v63 = vld [vmem:[%s1200_s1 + $0x10] sm:$0xff] }
  0x9d   :  { %v56_v4 = vpop.xlane.xlu1 %55  ;;  %v92_v6 = vmul.f32 0.0625, %v53_v3  ;;  %v130_v8 = vmul.f32 %v926_v0, %v926_v0  ;;  %v319_v2 = vsub.f32 0.0, %v1009_v59  ;;  %v1022_v3 = vld [vmem:[%s1200_s1 + $0x18] sm:$0xff] }
  0x9e   :  { %v93_v7 = vmul.f32 0.0625, %v56_v4  ;;  %v131_v9 = vmul.f32 %v929_v1, %v929_v1  ;;  %v328_v4 = vmul.f32 1.442695, %v311_v60  ;;  %652 = vpow2.f32 %v326_v61  ;;  %v1076_v60 = vld [vmem:[%s1200_s1 + $0x70] sm:$0xff] }
  0x9f   :  { %v938_v10 = vsub.f32 %v844_v16, %v92_v6  ;;  %v166_v12 = vsel %vm38_vm0, %v130_v8, 0.0  ;;  %v342_v6 = vmul.f32 1.442695, %v318_v62  ;;  %v313_v8 = vsub.f32 0.0, %v1022_v3 }
  0xa0   :  { %v941_v11 = vsub.f32 %v849_v17, %v93_v7  ;;  %146 = vadd.xlane.f32.xlu1 %v145_v5  ;;  %167 = vadd.xlane.f32.xlu0 %v166_v12  ;;  %v77_v13 = vpop.xlane.xlu0 %76  ;;  %v169_v15 = vsel %vm38_vm0, %v131_v9, 0.0  ;;  %v312_v5 = vsub.f32 0.0, %v1016_v63  ;;  %v344_v7 = vmul.f32 1.442695, %v319_v2  ;;  %v1029_v9 = vld [vmem:[%s1200_s1 + $0x50] sm:$0xff] }
  0xa1   :  { %v80_v14 = vpop.xlane.xlu1 %79  ;;  %v100_v18 = vmul.f32 0.0625, %v77_v13  ;;  %v124_v22 = vmul.f32 %v938_v10, %v938_v10  ;;  %654 = vpow2.f32 %v328_v4  ;;  %v320_v13 = vsub.f32 0.0, %v1029_v9 }
  0xa2   :  { %v101_v19 = vmul.f32 0.0625, %v80_v14  ;;  %v125_v16 = vmul.f32 %v941_v11, %v941_v11  ;;  %v330_v12 = vmul.f32 1.442695, %v312_v5  ;;  %656 = vpow2.f32 %v342_v6 }
  0xa3   :  { %v950_v23 = vsub.f32 %v858_v20, %v100_v18  ;;  %v148_v26 = vsel %vm38_vm0, %v124_v22, 0.0  ;;  %658 = vpow2.f32 %v344_v7  ;;  %v332_v14 = vmul.f32 1.442695, %v313_v8  ;;  %v1041_v22 = vld [vmem:[%s1200_s1 + $0x20] sm:$0xff]  ;;  %v1082_v7 = vld [vmem:[%s1200_s1 + $0x78] sm:$0xff] }
  0xa4   :  { %v953_v17 = vsub.f32 %v863_v21, %v101_v19  ;;  %170 = vadd.xlane.f32.xlu1 %v169_v15  ;;  %149 = vadd.xlane.f32.xlu0 %v148_v26  ;;  %v59_v27 = vpop.xlane.xlu0 %58  ;;  %v151_v31 = vsel %vm38_vm0, %v125_v16, 0.0  ;;  %660 = vpow2.f32 %v330_v12  ;;  %v1035_v15 = vld [vmem:[%s1200_s1 + $0x58] sm:$0xff]  ;;  %v346_v18 = vmul.f32 1.442695, %v320_v13  ;;  %v1046_v16 = vld [vmem:[%s1200_s1 + $0x28] sm:$0xff] }
  0xa5   :  { %v62_v30 = vpop.xlane.xlu1 %61  ;;  %v94_v32 = vmul.f32 0.0625, %v59_v27  ;;  %v132_v34 = vmul.f32 %v950_v23, %v950_v23  ;;  %662 = vpow2.f32 %v332_v14  ;;  %v321_v19 = vsub.f32 0.0, %v1035_v15 }
  0xa6   :  { %v95_v33 = vmul.f32 0.0625, %v62_v30  ;;  %v133_v20 = vmul.f32 %v953_v17, %v953_v17  ;;  %664 = vpow2.f32 %v346_v18  ;;  %v314_v27 = vsub.f32 0.0, %v1041_v22 }
  0xa7   :  { %v962_v35 = vsub.f32 %v872_v24, %v94_v32  ;;  %v172_v38 = vsel %vm38_vm0, %v132_v34, 0.0  ;;  %v348_v30 = vmul.f32 1.442695, %v321_v19  ;;  %v1053_v32 = vld [vmem:[%s1200_s1 + $0x60] sm:$0xff]  ;;  %v324_v8 = vsub.f32 0.0, %v1076_v60 }
  0xa8   :  { %v965_v21 = vsub.f32 %v877_v25, %v95_v33  ;;  %152 = vadd.xlane.f32.xlu1 %v151_v31  ;;  %173 = vadd.xlane.f32.xlu0 %v172_v38  ;;  %v83_v39 = vpop.xlane.xlu0 %82  ;;  %v175_v41 = vsel %vm38_vm0, %v133_v20, 0.0  ;;  %v315_v31 = vsub.f32 0.0, %v1046_v16  ;;  %v334_v38 = vmul.f32 1.442695, %v314_v27 }
  0xa9   :  { %v86_v40 = vpop.xlane.xlu1 %85  ;;  %v102_v42 = vmul.f32 0.0625, %v83_v39  ;;  %v126_v46 = vmul.f32 %v962_v35, %v962_v35  ;;  %v1058_v39 = vld [vmem:[%s1200_s1 + $0x68] sm:$0xff]  ;;  %666 = vpow2.f32 %v348_v30  ;;  %v325_v19 = vsub.f32 0.0, %v1082_v7 }
  0xaa   :  { %v103_v43 = vmul.f32 0.0625, %v86_v40  ;;  %v127_v24 = vmul.f32 %v965_v21, %v965_v21  ;;  %v354_v30 = vmul.f32 1.442695, %v324_v8 }
  0xab   :  { %v974_v47 = vsub.f32 %v886_v28, %v102_v42  ;;  %v154_v48 = vsel %vm38_vm0, %v126_v46, 0.0  ;;  %v653_v26 = vpop.eup %652  ;;  %v322_v42 = vsub.f32 0.0, %v1053_v32  ;;  %v1064_v46 = vld [vmem:[%s1200_s1 + $0x30] sm:$0xff] }
  0xac   :  { %v977_v25 = vsub.f32 %v891_v29, %v103_v43  ;;  %176 = vadd.xlane.f32.xlu1 %v175_v41  ;;  %155 = vadd.xlane.f32.xlu0 %v154_v48  ;;  %v157_v49 = vsel %vm38_vm0, %v127_v24, 0.0  ;;  %v651_v29 = vld [vmem:[%s1203_s4] sm:$0xff]   ;;  %v358_v34 = vadd.f32 1.0, %v653_v26  ;;  %v336_v41 = vmul.f32 1.442695, %v315_v31 }
  0xad   :  { %v134_v50 = vmul.f32 %v974_v47, %v974_v47  ;;  %628 = vmatprep.subr.bf16.mxu0 %v651_v29  ;;  %646 = vmatprep.subr.bf16.mxu1 %v651_v29 }
  0xae   :  { %v135_v51 = vmul.f32 %v977_v25, %v977_v25  ;;  %629 = vmatpush3.bf16.msra.mxu0 %v651_v29  ;;  %647 = vmatpush3.bf16.msra.mxu1 %v651_v29  ;;  %v655_v33 = vpop.eup %654  ;;  %668 = vrcp.f32 %v358_v34  ;;  %v316_v29 = vsub.f32 0.0, %v1064_v46 }
  0xaf   :  { %v178_v52 = vsel %vm38_vm0, %v134_v50, 0.0  ;;  %v657_v20 = vpop.eup %656  ;;  %v359_v43 = vadd.f32 1.0, %v655_v33  ;;  %670 = vpow2.f32 %v334_v38 }
  0xb0   :  { %158 = vadd.xlane.f32.xlu1 %v157_v49  ;;  %179 = vadd.xlane.f32.xlu0 %v178_v52  ;;  %v181_v28 = vsel %vm38_vm0, %v135_v51, 0.0  ;;  %v659_v40 = vpop.eup %658  ;;  %v366_v48 = vadd.f32 1.0, %v657_v20  ;;  %v323_v49 = vsub.f32 0.0, %v1058_v39  ;;  %672 = vpow2.f32 %v336_v41 }
  0xb1   :  { %v661_v24 = vpop.eup %660  ;;  %v367_v50 = vadd.f32 1.0, %v659_v40  ;;  %v350_v52 = vmul.f32 1.442695, %v322_v42  ;;  %674 = vrcp.f32 %v359_v43  ;;  %v338_v6 = vmul.f32 1.442695, %v316_v29 }
  0xb2   :  { %v663_v51 = vpop.eup %662  ;;  %v360_v57 = vadd.f32 1.0, %v661_v24  ;;  %676 = vrcp.f32 %v366_v48  ;;  %v352_v61 = vmul.f32 1.442695, %v323_v49  ;;  %v356_v41 = vmul.f32 1.442695, %v325_v19 }
  0xb3   :  { %v665_v62 = vpop.eup %664  ;;  %678 = vrcp.f32 %v367_v50  ;;  %v361_v2 = vadd.f32 1.0, %v663_v51 }
  0xb4   :  { %182 = vadd.xlane.f32.xlu1 %v181_v28  ;;  %v1070_v28 = vld [vmem:[%s1200_s1 + $0x38] sm:$0xff]  ;;  %680 = vpow2.f32 %v350_v52  ;;  %v368_v13 = vadd.f32 1.0, %v665_v62 }
  0xb5   :  { %v317_v4 = vsub.f32 0.0, %v1070_v28  ;;  %682 = vrcp.f32 %v360_v57 }
  0xb6   :  { %684 = vpow2.f32 %v352_v61  ;;  %v667_v31 = vpop.eup %666 }
  0xb7   :  { %686 = vrcp.f32 %v361_v2  ;;  %v340_v18 = vmul.f32 1.442695, %v317_v4  ;;  %v369_v48 = vadd.f32 1.0, %v667_v31 }
  0xb8   :  { %688 = vpow2.f32 %v338_v6 }
  0xbb   :  { %v669_v20 = vpop.eup %668 }
  0xbc   :  { %v671_v42 = vpop.eup %670 }
  0xbd   :  { %v673_v49 = vpop.eup %672  ;;  %v362_v62 = vadd.f32 1.0, %v671_v42  ;;  %v1089_v42 = vld [vmem:[%s1201_s2] ss:$0 sm:$0xff] }
  0xbe   :  { %v675_v52 = vpop.eup %674  ;;  %v363_v6 = vadd.f32 1.0, %v673_v49 }
  0xbf   :  { %v677_v29 = vpop.eup %676 }
  0xc0   :  { %v679_v2 = vpop.eup %678 }
  0xc1   :  { %v681_v8 = vpop.eup %680 }
 0x11d   :  { %v138_v5 = vpop.xlane.xlu0 %137 }
 0x11e   :  { %v184_v12 = vmul.f32 0.0625, %v138_v5 }
 0x120   :  { %v200_v14 = vadd.f32 1e-05, %v184_v12 }
 0x121   :  { %v141_v26 = vpop.xlane.xlu1 %140  ;;  %v162_v27 = vpop.xlane.xlu0 %161 }
 0x122   :  { %690 = vrsqrt.f32 %v200_v14  ;;  %v185_v33 = vmul.f32 0.0625, %v141_v26  ;;  %v192_v34 = vmul.f32 0.0625, %v162_v27  ;;  %v683_v14 = vpop.eup %682 }
 0x123   :  { %692 = vrcp.f32 %v368_v13 }
 0x124   :  { %v201_v38 = vadd.f32 1e-05, %v185_v33  ;;  %v208_v40 = vadd.f32 1e-05, %v192_v34  ;;  %694 = vpow2.f32 %v340_v18  ;;  %v685_v18 = vpop.eup %684  ;;  %v370_v33 = vadd.f32 1.0, %v681_v8 }
 0x125   :  { %v165_v43 = vpop.xlane.xlu1 %164  ;;  %v144_v24 = vpop.xlane.xlu0 %143  ;;  %696 = vpow2.f32 %v354_v30 }
 0x126   :  { %698 = vrsqrt.f32 %v201_v38  ;;  %v193_v50 = vmul.f32 0.0625, %v165_v43  ;;  %v186_v51 = vmul.f32 0.0625, %v144_v24  ;;  %v687_v27 = vpop.eup %686 }
 0x127   :  { %700 = vrsqrt.f32 %v208_v40  ;;  %v689_v34 = vpop.eup %688 }
 0x128   :  { %v209_v57 = vadd.f32 1e-05, %v193_v50  ;;  %v202_v61 = vadd.f32 1e-05, %v186_v51  ;;  %702 = vpow2.f32 %v356_v41  ;;  %v371_v50 = vadd.f32 1.0, %v685_v18 }
 0x129   :  { %v147_v4 = vpop.xlane.xlu1 %146  ;;  %v168_v5 = vpop.xlane.xlu0 %167  ;;  %704 = vrcp.f32 %v369_v48 }
 0x12a   :  { %706 = vrsqrt.f32 %v209_v57  ;;  %v187_v12 = vmul.f32 0.0625, %v147_v4  ;;  %v194_v13 = vmul.f32 0.0625, %v168_v5  ;;  %v407_v4 = vmul.f32 %v675_v52, %v998_v56 }
 0x12b   :  { %708 = vrsqrt.f32 %v202_v61  ;;  %v364_v5 = vadd.f32 1.0, %v689_v34  ;;  %v1107_v56 = vmul.f32 %v683_v14, %v1016_v63 }
 0x12c   :  { %v203_v19 = vadd.f32 1e-05, %v187_v12  ;;  %v210_v26 = vadd.f32 1e-05, %v194_v13  ;;  %710 = vrcp.f32 %v362_v62  ;;  %v406_v62 = vmul.f32 %v669_v20, %v993_v53 }
 0x12d   :  { %v171_v30 = vpop.xlane.xlu1 %170  ;;  %v150_v31 = vpop.xlane.xlu0 %149  ;;  %712 = vrcp.f32 %v363_v6  ;;  %v1104_v53 = vmul.f32 %v679_v2, %v1009_v59 }
 0x12e   :  { %714 = vrsqrt.f32 %v203_v19  ;;  %v195_v38 = vmul.f32 0.0625, %v171_v30  ;;  %v188_v40 = vmul.f32 0.0625, %v150_v31  ;;  %v1101_v19 = vmul.f32 %v677_v29, %v1004_v58 }
 0x12f   :  { %v691_v41 = vpop.eup %690  ;;  %716 = vrsqrt.f32 %v210_v26 }
 0x130   :  { %v693_v43 = vpop.eup %692  ;;  %v211_v24 = vadd.f32 1e-05, %v195_v38  ;;  %v204_v48 = vadd.f32 1e-05, %v188_v40  ;;  %v232_v49 = vmul.f32 %v691_v41, %v897_v36  ;;  %718 = vrcp.f32 %v370_v33  ;;  %v1098_v36 = vld [vmem:[%s1202_s3] ss:$0 sm:$0xff] }
 0x131   :  { %v695_v51 = vpop.eup %694  ;;  %v153_v57 = vpop.xlane.xlu1 %152  ;;  %v409_v41 = vmul.f32 %v687_v27, %v1022_v3  ;;  %s770_s3 = smov [#allocation2]  }
 0x132   :  { %v174_v61 = vpop.xlane.xlu0 %173  ;;  %v697_v6 = vpop.eup %696  ;;  %720 = vrsqrt.f32 %v211_v24  ;;  %v189_v8 = vmul.f32 0.0625, %v153_v57  ;;  %v255_v13 = vmul.f32 %v1089_v42, %v232_v49  ;;  %v365_v29 = vadd.f32 1.0, %v695_v51  ;;  %s597_s7 = sshll.u32 %s770_s3, 4  ;;  %s598_s7 = int_to_ptr.vmem [resolvable:$true] %s597_s7 }
 0x133   :  { %v196_v12 = vmul.f32 0.0625, %v174_v61  ;;  %v699_v18 = vpop.eup %698  ;;  %722 = vrsqrt.f32 %v204_v48  ;;  %v1116_v24 = vmul.f32 %v693_v43, %v1029_v9  ;;  %s748_s8 = scalar_lea.vmem %s598_s7, 2048  ;;  %p753_p1 = scmp.lt.s32.totalorder %s598_s7, %s598_s7 }
 0x134   :  { %v701_v20 = vpop.eup %700  ;;  %v205_v52 = vadd.f32 1e-05, %v189_v8  ;;  %v233_v30 = vmul.f32 %v699_v18, %v905_v44  ;;  %724 = vrcp.f32 %v371_v50  ;;  %v278_v38 = vadd.f32 %v1098_v36, %v255_v13  ;;  %p749_p0 = scmp.ne.s32.totalorder %s598_s7, %s748_s8  ;;  %p754_p2 = scmp.lt.s32.totalorder %s748_s8, %s748_s8 }
 0x135   :  { %v212_v26 = vadd.f32 1e-05, %v196_v12  ;;  %v703_v31 = vpop.eup %702  ;;  %v177_v33 = vpop.xlane.xlu1 %176  ;;  %v240_v58 = vmul.f32 %v701_v20, %v899_v37  ;;  %726 = vrcp.f32 %v364_v5  ;;  %v372_v13 = vadd.f32 1.0, %v697_v6 }
 0x136   :  { %v156_v34 = vpop.xlane.xlu0 %155  ;;  %v705_v59 = vpop.eup %704  ;;  %728 = vrsqrt.f32 %v205_v52  ;;  %v197_v2 = vmul.f32 0.0625, %v177_v33  ;;  %v256_v14 = vmul.f32 %v1089_v42, %v233_v30  ;;  %v422_v8 = vmul.f32 %v406_v62, %v278_v38  ;;  %p755_p3 = por %p754_p2, %p753_p1 }
 0x137   :  { %v190_v63 = vmul.f32 0.0625, %v156_v34  ;;  %v707_v40 = vpop.eup %706  ;;  %730 = vrsqrt.f32 %v212_v26  ;;  %v263_v44 = vmul.f32 %v1089_v42, %v240_v58  ;;  %v373_v58 = vadd.f32 1.0, %v703_v31 }
 0x138   :  { %v709_v48 = vpop.eup %708  ;;  %v213_v49 = vadd.f32 1e-05, %v197_v2  ;;  %v279_v50 = vadd.f32 %v1098_v36, %v256_v14  ;;  %v241_v51 = vmul.f32 %v707_v40, %v907_v45  ;;  %732 = vrcp.f32 %v365_v29  ;;  %p756_p4 = pnand %p755_p3, %p749_p0 }
 0x139   :  { %v206_v37 = vadd.f32 1e-05, %v190_v63  ;;  %v711_v57 = vpop.eup %710  ;;  %v159_v61 = vpop.xlane.xlu1 %158  ;;  %v234_v12 = vmul.f32 %v709_v48, %v915_v54  ;;  %v286_v52 = vadd.f32 %v1098_v36, %v263_v44  ;;  %v417_v14 = vmul.f32 %v705_v59, %v1035_v15 }
 0x13a   :  { %v180_v5 = vpop.xlane.xlu0 %179  ;;  %v713_v18 = vpop.eup %712  ;;  %734 = vrsqrt.f32 %v213_v49  ;;  %v191_v3 = vmul.f32 0.0625, %v159_v61  ;;  %v423_v27 = vmul.f32 %v407_v4, %v279_v50  ;;  %v264_v20 = vmul.f32 %v1089_v42, %v241_v51 }
 0x13b   :  { %v198_v9 = vmul.f32 0.0625, %v180_v5  ;;  %v715_v43 = vpop.eup %714  ;;  %736 = vrsqrt.f32 %v206_v37  ;;  %v257_v45 = vmul.f32 %v1089_v42, %v234_v12 }
 0x13c   :  { %v717_v26 = vpop.eup %716  ;;  %v207_v30 = vadd.f32 1e-05, %v191_v3  ;;  %v438_v33 = vpack.c.bf16 %v423_v27, %v422_v8  ;;  %v235_v54 = vmul.f32 %v715_v43, %v917_v55  ;;  %v287_v34 = vadd.f32 %v1098_v36, %v264_v20 }
 0x13d   :  { %v214_v62 = vadd.f32 1e-05, %v198_v9  ;;  %v183_v6 = vpop.xlane.xlu1 %182  ;;  %v280_v38 = vadd.f32 %v1098_v36, %v257_v45  ;;  %v242_v4 = vmul.f32 %v717_v26, %v926_v0  ;;  %v719_v29 = vpop.eup %718  ;;  %v430_v55 = vmul.f32 %v1101_v19, %v286_v52 }
 0x13e   :  { %738 = vrsqrt.f32 %v207_v30  ;;  %v199_v2 = vmul.f32 0.0625, %v183_v6  ;;  %630 = vmatprep.mubr.msk.bf16.mxu0 %vm38_vm0, %v438_v33  ;;  %v258_v63 = vmul.f32 %v1089_v42, %v235_v54  ;;  %v431_v44 = vmul.f32 %v1104_v53, %v287_v34 }
 0x13f   :  { %v721_v40 = vpop.eup %720  ;;  %740 = vrsqrt.f32 %v214_v62  ;;  %v265_v48 = vmul.f32 %v1089_v42, %v242_v4  ;;  %v424_v61 = vmul.f32 %v1107_v56, %v280_v38  ;;  %v411_v9 = vmul.f32 %v713_v18, %v1046_v16 }
 0x140   :  { %v723_v49 = vpop.eup %722  ;;  %v215_v0 = vadd.f32 1e-05, %v199_v2  ;;  %v281_v31 = vadd.f32 %v1098_v36, %v258_v63  ;;  %v243_v37 = vmul.f32 %v721_v40, %v929_v1  ;;  %742 = vrcp.f32 %v372_v13 }
 0x141   :  { %v725_v50 = vpop.eup %724  ;;  %v442_v51 = vpack.c.bf16 %v431_v44, %v430_v55  ;;  %v236_v15 = vmul.f32 %v723_v49, %v938_v10  ;;  %744 = vrcp.f32 %v373_v58  ;;  %v288_v5 = vadd.f32 %v1098_v36, %v265_v48 }
 0x142   :  { %v727_v59 = vpop.eup %726  ;;  %746 = vrsqrt.f32 %v215_v0  ;;  %v425_v19 = vmul.f32 %v409_v41, %v281_v31  ;;  %v266_v53 = vmul.f32 %v1089_v42, %v243_v37  ;;  %v410_v10 = vmul.f32 %v711_v57, %v1041_v22 }
 0x143   :  { %v729_v8 = vpop.eup %728  ;;  %638 = vmatprep.mubr.msk.bf16.mxu1 %vm38_vm0, %v442_v51  ;;  %v259_v1 = vmul.f32 %v1089_v42, %v236_v15  ;;  %v432_v43 = vmul.f32 %v1116_v24, %v288_v5  ;;  %v419_v57 = vmul.f32 %v725_v50, %v1058_v39 }
 0x144   :  { %v731_v12 = vpop.eup %730  ;;  %v439_v13 = vpack.c.bf16 %v425_v19, %v424_v61  ;;  %v289_v3 = vadd.f32 %v1098_v36, %v266_v53  ;;  %v237_v56 = vmul.f32 %v729_v8, %v941_v11 }
 0x145   :  { %v244_v41 = vmul.f32 %v731_v12, %v950_v23  ;;  %v733_v27 = vpop.eup %732  ;;  %v282_v45 = vadd.f32 %v1098_v36, %v259_v1  ;;  %v418_v23 = vmul.f32 %v719_v29, %v1053_v32  ;;  %v412_v29 = vmul.f32 %v727_v59, %v1064_v46 }
 0x146   :  { %631 = vmatmul.mubr.msk.bf16.vlgmr.msra.gmra.mxu0 %vm38_vm0, %v439_v13  ;;  %v433_v20 = vmul.f32 %v417_v14, %v289_v3  ;;  %v260_v52 = vmul.f32 %v1089_v42, %v237_v56  ;;  %v413_v2 = vmul.f32 %v733_v27, %v1070_v28 }
 0x147   :  { %v735_v26 = vpop.eup %734  ;;  %v267_v30 = vmul.f32 %v1089_v42, %v244_v41  ;;  %v426_v18 = vmul.f32 %v410_v10, %v282_v45 }
 0x148   :  { %v737_v11 = vpop.eup %736  ;;  %v443_v62 = vpack.c.bf16 %v433_v20, %v432_v43  ;;  %v283_v22 = vadd.f32 %v1098_v36, %v260_v52  ;;  %v245_v16 = vmul.f32 %v735_v26, %v953_v17 }
 0x149   :  { %v238_v24 = vmul.f32 %v737_v11, %v962_v35  ;;  %v290_v6 = vadd.f32 %v1098_v36, %v267_v30 }
 0x14a   :  { %639 = vmatmul.mubr.msk.bf16.vlgmr.msra.gmra.mxu1 %vm38_vm0, %v443_v62  ;;  %v427_v33 = vmul.f32 %v411_v9, %v283_v22  ;;  %v268_v54 = vmul.f32 %v1089_v42, %v245_v16 }
 0x14b   :  { %v739_v34 = vpop.eup %738  ;;  %v261_v38 = vmul.f32 %v1089_v42, %v238_v24  ;;  %v434_v14 = vmul.f32 %v418_v23, %v290_v6 }
 0x14c   :  { %v741_v4 = vpop.eup %740  ;;  %v440_v58 = vpack.c.bf16 %v427_v33, %v426_v18  ;;  %v291_v17 = vadd.f32 %v1098_v36, %v268_v54  ;;  %v239_v32 = vmul.f32 %v739_v34, %v965_v21 }
 0x14d   :  { %v743_v39 = vpop.eup %742  ;;  %v246_v35 = vmul.f32 %v741_v4, %v974_v47  ;;  %v284_v44 = vadd.f32 %v1098_v36, %v261_v38 }
 0x14e   :  { %v745_v63 = vpop.eup %744  ;;  %634 = vmatprep.mubr.msk.bf16.mxu0 %vm38_vm0, %v440_v58  ;;  %v435_v40 = vmul.f32 %v419_v57, %v291_v17  ;;  %v262_v55 = vmul.f32 %v1089_v42, %v239_v32  ;;  %v420_v46 = vmul.f32 %v743_v39, %v1076_v60 }
 0x14f   :  { %v747_v48 = vpop.eup %746  ;;  %v269_v49 = vmul.f32 %v1089_v42, %v246_v35  ;;  %v421_v28 = vmul.f32 %v745_v63, %v1082_v7  ;;  %v428_v31 = vmul.f32 %v412_v29, %v284_v44 }
 0x150   :  { %v247_v21 = vmul.f32 %v747_v48, %v977_v25  ;;  %v444_v0 = vpack.c.bf16 %v435_v40, %v434_v14  ;;  %v285_v47 = vadd.f32 %v1098_v36, %v262_v55 }
 0x151   :  { %v292_v51 = vadd.f32 %v1098_v36, %v269_v49 }
 0x152   :  { %642 = vmatprep.mubr.msk.bf16.mxu1 %vm38_vm0, %v444_v0  ;;  %v429_v37 = vmul.f32 %v413_v2, %v285_v47  ;;  %v270_v50 = vmul.f32 %v1089_v42, %v247_v21 }
 0x153   :  { %v436_v25 = vmul.f32 %v420_v46, %v292_v51 }
 0x154   :  { %v441_v61 = vpack.c.bf16 %v429_v37, %v428_v31  ;;  %v293_v15 = vadd.f32 %v1098_v36, %v270_v50 }
 0x156   :  { %635 = vmatmul.mubr.msk.bf16.gmra.mxu0 %vm38_vm0, %v441_v61  ;;  %v437_v59 = vmul.f32 %v421_v28, %v293_v15 }
 0x158   :  { %v445_v19 = vpack.c.bf16 %v437_v59, %v436_v25 }
 0x15a   :  { %643 = vmatmul.mubr.msk.bf16.gmra.mxu1 %vm38_vm0, %v445_v19 }
 0x206   :  { %v632_v60 = vpop.f32.mrf.mxu0 }
 0x207   :  { %578 = vst.msk [vmem:[#allocation2 + $0x10] sm:$0xff] %vm575_vm1, %v632_v60 }
 0x208   :  { %v512_v7 = vpop.f32.mrf.mxu0 }
 0x209   :  { %576 = vst.msk [vmem:[#allocation2] sm:$0xff] %vm575_vm1, %v512_v7 }
 0x20a   :  { %v633_v42 = vpop.f32.mrf.mxu0  ;;  %v640_v53 = vpop.f32.mrf.mxu1 }
 0x20b   :  { %579 = vst.msk [vmem:[#allocation2 + $0x18] sm:$0xff] %vm575_vm1, %v633_v42  ;;  %586 = vst.msk [vmem:[#allocation2 + $0x50] sm:$0xff] %vm575_vm1, %v640_v53 }
 0x20c   :  { %v515_v36 = vpop.f32.mrf.mxu0  ;;  %v544_v5 = vpop.f32.mrf.mxu1 }
 0x20d   :  { %577 = vst.msk [vmem:[#allocation2 + $0x8] sm:$0xff] %vm575_vm1, %v515_v36  ;;  %584 = vst.msk [vmem:[#allocation2 + $0x40] sm:$0xff] %vm575_vm1, %v544_v5 }
 0x20e   :  { %v641_v8 = vpop.f32.mrf.mxu1 }
 0x20f   :  { %587 = vst.msk [vmem:[#allocation2 + $0x58] sm:$0xff] %vm575_vm1, %v641_v8 }
 0x210   :  { %v547_v1 = vpop.f32.mrf.mxu1 }
 0x211   :  { %585 = vst.msk [vmem:[#allocation2 + $0x48] sm:$0xff] %vm575_vm1, %v547_v1 }
 0x216   :  { %v636_v12 = vpop.f32.mrf.mxu0 }
 0x217   :  { %582 = vst.msk [vmem:[#allocation2 + $0x30] sm:$0xff] %vm575_vm1, %v636_v12 }
 0x218   :  { %v528_v13 = vpop.f32.mrf.mxu0 }
 0x219   :  { %580 = vst.msk [vmem:[#allocation2 + $0x20] sm:$0xff] %vm575_vm1, %v528_v13 }
 0x21a   :  { %v637_v3 = vpop.f32.mrf.mxu0  ;;  %v644_v56 = vpop.f32.mrf.mxu1 }
 0x21b   :  { %583 = vst.msk [vmem:[#allocation2 + $0x38] sm:$0xff] %vm575_vm1, %v637_v3  ;;  %590 = vst.msk [vmem:[#allocation2 + $0x70] sm:$0xff] %vm575_vm1, %v644_v56 }
 0x21c   :  { %v531_v10 = vpop.f32.mrf.mxu0  ;;  %v560_v9 = vpop.f32.mrf.mxu1 }
 0x21d   :  { %581 = vst.msk [vmem:[#allocation2 + $0x28] sm:$0xff] %vm575_vm1, %v531_v10  ;;  %588 = vst.msk [vmem:[#allocation2 + $0x60] sm:$0xff] %vm575_vm1, %v560_v9 }
 0x21e   :  { %v645_v41 = vpop.f32.mrf.mxu1 }
 0x21f   :  { %591 = vst.msk [vmem:[#allocation2 + $0x78] sm:$0xff] %vm575_vm1, %v645_v41 }
 0x220   :  { %v563_v27 = vpop.f32.mrf.mxu1 }
 0x221   :  { %589 = vst.msk [vmem:[#allocation2 + $0x68] sm:$0xff] %vm575_vm1, %v563_v27 }
 0x222   :  { %759 = shalt.err (!%p756_p4)
}
 0x223   :  { %s771_s9 = smov 128   ;;  %s772_s10 = smov 8  }
 0x224   :  { %603 = dma.vmem_to_hbm [thread:$0]  %s598_s7, 2048, %s1204_s5, [#allocation3], %s771_s9, %s771_s9, %s772_s10  }
 0x225   :  { %768 = dma.done.wait [#allocation3], 2048  }
 0x226   :  { %769 = vsyncadd [#allocation3], 4294965248 }
 0x227   :  { %607 = vsyncpa [#allocation3], 1 }

// kernel: ss2d_forward.6
= control target key start
LH: loop header
LB: loop body
LE: loop exit
PB: predicated region body
PF: predicated region fallthrough
CT: control target
= control target key end

     0   :  { %s5596_s25 = smov 0   ;;  %s5598_s26 = smov 0   ;;  %s7463_s0 = inlined_call_operand.vmem [shape: f32[2,64,16], index: 0, kind: input, shape index: {}, may-alias: {0,2}]   ;;  %s7464_s1 = inlined_call_operand.vmem [shape: f32[2,64,16], index: 1, kind: input, shape index: {}, may-alias: {1,3}]   ;;  %s7465_s2 = inlined_call_operand.vmem [shape: f32[2,64,16], index: 2, kind: input, shape index: {}, may-alias: {0,2}]   ;;  %s7466_s3 = inlined_call_operand.vmem [shape: f32[2,64,16], index: 3, kind: input, shape index: {}, may-alias: {1,3}]   ;;  %s7467_s4 = inlined_call_operand.vmem [shape: bf16[4,16,16], index: 4, kind: input, shape index: {}]   ;;  %s7468_s5 = inlined_call_operand.vmem [shape: bf16[4,16,16], index: 5, kind: input, shape index: {}]   ;;  %s7469_s6 = inlined_call_operand.vmem [shape: bf16[4,16,16], index: 6, kind: input, shape index: {}]   ;;  %s7470_s7 = inlined_call_operand.vmem [shape: f32[4,16,16], index: 7, kind: input, shape index: {}]   ;;  %s7471_s8 = inlined_call_operand.vmem [shape: f32[4,1,16], index: 8, kind: input, shape index: {}]   ;;  %s7472_s9 = inlined_call_operand.vmem [shape: f32[4,1,16], index: 9, kind: input, shape index: {}]   ;;  %s7473_s10 = inlined_call_operand.vmem [shape: f32[2,64,16], index: 10, kind: output, shape index: {0}]   ;;  %s7474_s11 = inlined_call_operand.vmem [shape: f32[2,64,16], index: 11, kind: output, shape index: {1}]   ;;  %s7475_s12 = inlined_call_operand.vmem [shape: f32[2,64,16], index: 12, kind: output, shape index: {2}]   ;;  %s7476_s13 = inlined_call_operand.vmem [shape: f32[2,64,16], index: 13, kind: output, shape index: {3}]  }
   0x1   :  { %7506 = sst [smem:[#allocation34_spill]] %s7463_s0  ;;  %s5600_s27 = smov 0  }
   0x2   :  { %7507 = sst [smem:[#allocation35_spill]] %s7464_s1 }
   0x3 LB: > { %s36_s28 = sadd.s32 1, %s5482_s26  ;;  %p4768_p0 = scmp.ge.s32.totalorder %s5486_s27, 1  ;;  %s5486_s27 = sphi %s5600_s27, %s24_s27   ;;  %s5482_s26 = sphi %s5598_s26, %s7595_s26   ;;  %s5478_s25 = sphi %s5596_s25, %s7594_s25  }
   0x4   : > { %p38_p1 = scmp.ge.s32.totalorder %s36_s28, 2  ;;  %p484_p2 = scmp.lt.s32.totalorder %s5486_s27, 3 }
   0x6   : > { %s7597_s28 = smov (%p38_p1, %s36_s28), 0  ;;  %p485_p3 = pnand %p4768_p0, %p484_p2 }
   0x8   : > { %488 = sbr.rel (%p485_p3) target bundleno = 738 (0x2e2), region = 60 }
   0xd   : > { %v5154_v0 = vld [vmem:[%s7468_s5] sm:$0xff]   ;;  %p595_p4 = scmp.lt.s32.totalorder %s5478_s25, 1  ;;  %v5625_v2 = vld [vmem:[%s7470_s7 + $0x8] sm:$0xff]  ;;  %v5630_v3 = vld [vmem:[%s7470_s7 + $0x10] sm:$0xff]  ;;  %vm687_vm0 = vcmask 130048   ;;  %v5524_v8 = vmov 0.0  }
   0xe   : > { %v5620_v1 = vld [vmem:[%s7470_s7] sm:$0xff]  ;;  %4946 = vmatprep.subr.bf16.mxu1 %v5154_v0  ;;  %7509 = vst [vmem:[#allocation7_spill] sm:$0xff] %v5625_v2  ;;  %7510 = vst [vmem:[#allocation8_spill] sm:$0xff] %v5630_v3  ;;  %v5635_v4 = vld [vmem:[%s7470_s7 + $0x18] sm:$0xff]  ;;  %s7520_s0 = sld [smem:[#allocation34_spill]]  ;;  %s6146_s18 = smov 0  }
   0xf   : > { %7508 = vst [vmem:[#allocation6_spill] sm:$0xff] %v5620_v1  ;;  %7511 = vst [vmem:[#allocation9_spill] sm:$0xff] %v5635_v4  ;;  %v5640_v5 = vld [vmem:[%s7470_s7 + $0x20] sm:$0xff]  ;;  %v5645_v6 = vld [vmem:[%s7470_s7 + $0x28] sm:$0xff]  ;;  %4947 = vmatpush3.bf16.msra.mxu1 %v5154_v0  ;;  %s7599_s25 = smov (!%p595_p4, %s5478_s25), 1  ;;  %s7521_s1 = sld [smem:[#allocation35_spill]] }
  0x10   : > { %7512 = vst [vmem:[#allocation10_spill] sm:$0xff] %v5640_v5  ;;  %7513 = vst [vmem:[#allocation11_spill] sm:$0xff] %v5645_v6  ;;  %v5650_v7 = vld [vmem:[%s7470_s7 + $0x30] sm:$0xff]  ;;  %v5663_v9 = vld [vmem:[%s7470_s7 + $0x38] sm:$0xff]  ;;  %s5688_s14 = sshll.u32 %s7599_s25, 6 }
  0x11   : > { %7514 = vst [vmem:[#allocation12_spill] sm:$0xff] %v5650_v7  ;;  %688 = vst.msk [vmem:[#allocation5] sm:$0xff] %vm687_vm0, %v5524_v8  ;;  %v5668_v10 = vld [vmem:[%s7471_s8] ss:$0 sm:$0xff]  ;;  %v5673_v11 = vld [vmem:[%s7471_s8 + $0x1] ss:$0 sm:$0xff]  ;;  %s5774_s20 = scalar_lea.vmem %s7465_s2, %s5688_s14  ;;  %s5800_s21 = scalar_lea.vmem %s7466_s3, %s5688_s14 }
  0x12   : > { %689 = vst.msk [vmem:[#allocation5 + $0x8] sm:$0xff] %vm687_vm0, %v5524_v8  ;;  %690 = vst.msk [vmem:[#allocation5 + $0x10] sm:$0xff] %vm687_vm0, %v5524_v8  ;;  %v5678_v12 = vld [vmem:[%s7471_s8 + $0x2] ss:$0 sm:$0xff]  ;;  %v5683_v13 = vld [vmem:[%s7471_s8 + $0x3] ss:$0 sm:$0xff] }
  0x13   : > { %691 = vst.msk [vmem:[#allocation5 + $0x18] sm:$0xff] %vm687_vm0, %v5524_v8  ;;  %692 = vst.msk [vmem:[#allocation5 + $0x20] sm:$0xff] %vm687_vm0, %v5524_v8  ;;  %v5155_v14 = vld [vmem:[%s7467_s4] sm:$0xff]   ;;  %v5156_v15 = vld [vmem:[%s7467_s4 + $0x8] sm:$0xff]  }
  0x14   : > { %693 = vst.msk [vmem:[#allocation5 + $0x28] sm:$0xff] %vm687_vm0, %v5524_v8  ;;  %694 = vst.msk [vmem:[#allocation5 + $0x30] sm:$0xff] %vm687_vm0, %v5524_v8  ;;  %s5694_s17 = scalar_lea.vmem %s7520_s0, %s5688_s14  ;;  %4936 = vmatprep.subr.bf16.mxu0 %v5155_v14  ;;  %4966 = vmatprep.subr.bf16.mxu1 %v5156_v15  ;;  %v5157_v25 = vld [vmem:[%s7469_s6] sm:$0xff]   ;;  %v5158_v28 = vld [vmem:[%s7469_s6 + $0x8] sm:$0xff]  }
  0x15   : > { %695 = vst.msk [vmem:[#allocation5 + $0x38] sm:$0xff] %vm687_vm0, %v5524_v8  ;;  %7515 = vst [vmem:[#allocation13_spill] sm:$0xff] %v5663_v9  ;;  %v736_v16 = vld [vmem:[%s5694_s17] sm:$0xff]  ;;  %v737_v17 = vld [vmem:[%s5694_s17 + $0x8] sm:$0xff]  ;;  %4937 = vmatpush3.bf16.msra.mxu0 %v5155_v14  ;;  %s5730_s29 = scalar_lea.vmem %s7521_s1, %s5688_s14 }
  0x16   : > { %7516 = vst [vmem:[#allocation14_spill] sm:$0xff] %v5668_v10  ;;  %7517 = vst [vmem:[#allocation15_spill] sm:$0xff] %v5673_v11  ;;  %v738_v18 = vld [vmem:[%s5694_s17 + $0x10] sm:$0xff]  ;;  %v744_v19 = vpack.c.bf16 %v737_v17, %v736_v16  ;;  %v739_v20 = vld [vmem:[%s5694_s17 + $0x18] sm:$0xff]  ;;  %4956 = vmatprep.subr.bf16.mxu0 %v5157_v25 }
  0x17   : > { %7518 = vst [vmem:[#allocation16_spill] sm:$0xff] %v5678_v12  ;;  %7519 = vst [vmem:[#allocation17_spill] sm:$0xff] %v5683_v13  ;;  %v740_v21 = vld [vmem:[%s5694_s17 + $0x20] sm:$0xff]  ;;  %v741_v22 = vld [vmem:[%s5694_s17 + $0x28] sm:$0xff]  ;;  %v745_v23 = vpack.c.bf16 %v739_v20, %v738_v18 }
  0x18   : > { %v746_v24 = vpack.c.bf16 %v741_v22, %v740_v21  ;;  %4938 = vmatprep.mubr.msk.bf16.mxu0 %vm687_vm0, %v744_v19  ;;  %4948 = vmatprep.mubr.msk.bf16.mxu1 %vm687_vm0, %v744_v19  ;;  %v742_v26 = vld [vmem:[%s5694_s17 + $0x30] sm:$0xff]  ;;  %v743_v27 = vld [vmem:[%s5694_s17 + $0x38] sm:$0xff]  ;;  %v1076_v29 = vld [vmem:[%s5730_s29] sm:$0xff] }
  0x19   : > { %4939 = vmatmul.mubr.msk.bf16.vlgmr.msra.gmra.mxu0 %vm687_vm0, %v745_v23  ;;  %4949 = vmatmul.mubr.msk.bf16.vlgmr.msra.gmra.mxu1 %vm687_vm0, %v745_v23  ;;  %v1077_v30 = vld [vmem:[%s5730_s29 + $0x8] sm:$0xff]  ;;  %v747_v31 = vpack.c.bf16 %v743_v27, %v742_v26  ;;  %v1078_v34 = vld [vmem:[%s5730_s29 + $0x10] sm:$0xff]  ;;  %v1079_v35 = vld [vmem:[%s5730_s29 + $0x18] sm:$0xff] }
  0x1a   : > { %4967 = vmatpush3.bf16.msra.mxu1 %v5156_v15  ;;  %4942 = vmatprep.mubr.msk.bf16.mxu0 %vm687_vm0, %v746_v24  ;;  %v5159_v32 = vld [vmem:[%s7468_s5 + $0x8] sm:$0xff]   ;;  %v1084_v33 = vpack.c.bf16 %v1077_v30, %v1076_v29  ;;  %v1080_v36 = vld [vmem:[%s5730_s29 + $0x20] sm:$0xff]  ;;  %v1085_v38 = vpack.c.bf16 %v1079_v35, %v1078_v34  ;;  %v5160_v40 = vld [vmem:[%s7468_s5 + $0x10] sm:$0xff]  }
  0x1b   : > { %4952 = vmatprep.mubr.msk.bf16.mxu1 %vm687_vm0, %v746_v24  ;;  %4957 = vmatpush3.bf16.msra.mxu0 %v5157_v25  ;;  %v1081_v37 = vld [vmem:[%s5730_s29 + $0x28] sm:$0xff]  ;;  %v5161_v41 = vld [vmem:[%s7467_s4 + $0x10] sm:$0xff]   ;;  %v1083_v43 = vld [vmem:[%s5730_s29 + $0x38] sm:$0xff] }
  0x1c   : > { %4986 = vmatprep.subr.bf16.mxu1 %v5158_v28  ;;  %4976 = vmatprep.subr.bf16.mxu0 %v5159_v32  ;;  %v1086_v39 = vpack.c.bf16 %v1081_v37, %v1080_v36  ;;  %v1082_v42 = vld [vmem:[%s5730_s29 + $0x30] sm:$0xff]  ;;  %v5162_v45 = vld [vmem:[%s7467_s4 + $0x18] sm:$0xff]   ;;  %v1415_v47 = vld [vmem:[%s5774_s20] sm:$0xff] }
  0x1d   : > { %v1087_v44 = vpack.c.bf16 %v1083_v43, %v1082_v42  ;;  %v5163_v46 = vld [vmem:[%s7469_s6 + $0x10] sm:$0xff]   ;;  %v1416_v48 = vld [vmem:[%s5774_s20 + $0x8] sm:$0xff]  ;;  %v1418_v51 = vld [vmem:[%s5774_s20 + $0x18] sm:$0xff] }
  0x1e   : > { %v1423_v49 = vpack.c.bf16 %v1416_v48, %v1415_v47  ;;  %v1417_v50 = vld [vmem:[%s5774_s20 + $0x10] sm:$0xff]  ;;  %v1419_v52 = vld [vmem:[%s5774_s20 + $0x20] sm:$0xff]  ;;  %v1420_v53 = vld [vmem:[%s5774_s20 + $0x28] sm:$0xff] }
  0x1f   : > { %v1424_v54 = vpack.c.bf16 %v1418_v51, %v1417_v50  ;;  %v1425_v55 = vpack.c.bf16 %v1420_v53, %v1419_v52  ;;  %v5164_v56 = vld [vmem:[%s7468_s5 + $0x18] sm:$0xff]   ;;  %v1421_v58 = vld [vmem:[%s5774_s20 + $0x30] sm:$0xff]  ;;  %v1754_v60 = vld [vmem:[%s5800_s21] sm:$0xff] }
  0x20   : > { %v5165_v57 = vld [vmem:[%s7469_s6 + $0x18] sm:$0xff]   ;;  %v1755_v61 = vld [vmem:[%s5800_s21 + $0x8] sm:$0xff]  ;;  %v1756_v0 = vld [vmem:[%s5800_s21 + $0x10] sm:$0xff] }
  0x21   : > { %4943 = vmatmul.mubr.msk.bf16.gmra.mxu0 %vm687_vm0, %v747_v31  ;;  %4953 = vmatmul.mubr.msk.bf16.gmra.mxu1 %vm687_vm0, %v747_v31  ;;  %v1422_v59 = vld [vmem:[%s5774_s20 + $0x38] sm:$0xff]  ;;  %v1762_v63 = vpack.c.bf16 %v1755_v61, %v1754_v60  ;;  %v1758_v14 = vld [vmem:[%s5800_s21 + $0x20] sm:$0xff]  ;;  %v1759_v15 = vld [vmem:[%s5800_s21 + $0x28] sm:$0xff] }
  0x22   : > { %4958 = vmatprep.mubr.msk.bf16.mxu0 %vm687_vm0, %v744_v19  ;;  %4968 = vmatprep.mubr.msk.bf16.mxu1 %vm687_vm0, %v1084_v33  ;;  %v1426_v62 = vpack.c.bf16 %v1422_v59, %v1421_v58  ;;  %v1757_v8 = vld [vmem:[%s5800_s21 + $0x18] sm:$0xff]  ;;  %v1764_v17 = vpack.c.bf16 %v1759_v15, %v1758_v14  ;;  %v1760_v18 = vld [vmem:[%s5800_s21 + $0x30] sm:$0xff]  ;;  %v5840_v21 = vld [vmem:[#allocation5] sm:$0xff]  }
  0x23   : > { %v1763_v16 = vpack.c.bf16 %v1757_v8, %v1756_v0  ;;  %v1761_v19 = vld [vmem:[%s5800_s21 + $0x38] sm:$0xff]  ;;  %v5842_v22 = vld [vmem:[#allocation5 + $0x8] sm:$0xff]   ;;  %v5848_v25 = vld [vmem:[#allocation5 + $0x20] sm:$0xff]  }
  0x24   : > { %v1765_v20 = vpack.c.bf16 %v1761_v19, %v1760_v18  ;;  %v5850_v26 = vld [vmem:[#allocation5 + $0x28] sm:$0xff]   ;;  %v4785_v27 = vld [vmem:[%s7472_s9] ss:$0 sm:$0xff]  ;;  %v5857_v29 = vld [vmem:[#allocation5 + $0x38] sm:$0xff]  }
  0x25   : > { %v5893_v19 = vld [vmem:[%s7472_s9 + $0x1] ss:$0 sm:$0xff] }
  0x29   : > { %4959 = vmatmul.mubr.msk.bf16.vlgmr.msra.gmra.mxu0 %vm687_vm0, %v745_v23  ;;  %4969 = vmatmul.mubr.msk.bf16.vlgmr.msra.gmra.mxu1 %vm687_vm0, %v1085_v38  ;;  %v5844_v23 = vld [vmem:[#allocation5 + $0x10] sm:$0xff]  }
  0x2a   : > { %4987 = vmatpush3.bf16.msra.mxu1 %v5158_v28  ;;  %4962 = vmatprep.mubr.msk.bf16.mxu0 %vm687_vm0, %v746_v24  ;;  %v5846_v24 = vld [vmem:[#allocation5 + $0x18] sm:$0xff]   ;;  %v5855_v28 = vld [vmem:[#allocation5 + $0x30] sm:$0xff]  }
  0x2b   : > { %4972 = vmatprep.mubr.msk.bf16.mxu1 %vm687_vm0, %v1086_v39  ;;  %4977 = vmatpush3.bf16.msra.mxu0 %v5159_v32 }
  0x2c   : > { %5006 = vmatprep.subr.bf16.mxu1 %v5160_v40  ;;  %4996 = vmatprep.subr.bf16.mxu0 %v5161_v41 }
  0x31   : > { %4963 = vmatmul.mubr.msk.bf16.gmra.mxu0 %vm687_vm0, %v747_v31  ;;  %4973 = vmatmul.mubr.msk.bf16.gmra.mxu1 %vm687_vm0, %v1087_v44 }
  0x32   : > { %4978 = vmatprep.mubr.msk.bf16.mxu0 %vm687_vm0, %v1084_v33  ;;  %4988 = vmatprep.mubr.msk.bf16.mxu1 %vm687_vm0, %v1084_v33 }
  0x39   : > { %4979 = vmatmul.mubr.msk.bf16.vlgmr.msra.gmra.mxu0 %vm687_vm0, %v1085_v38  ;;  %4989 = vmatmul.mubr.msk.bf16.vlgmr.msra.gmra.mxu1 %vm687_vm0, %v1085_v38 }
  0x3a   : > { %5007 = vmatpush3.bf16.msra.mxu1 %v5160_v40  ;;  %4982 = vmatprep.mubr.msk.bf16.mxu0 %vm687_vm0, %v1086_v39 }
  0x3b   : > { %4992 = vmatprep.mubr.msk.bf16.mxu1 %vm687_vm0, %v1086_v39  ;;  %4997 = vmatpush3.bf16.msra.mxu0 %v5161_v41 }
  0x3c   : > { %5026 = vmatprep.subr.bf16.mxu1 %v5162_v45  ;;  %5016 = vmatprep.subr.bf16.mxu0 %v5163_v46 }
  0x41   : > { %4983 = vmatmul.mubr.msk.bf16.gmra.mxu0 %vm687_vm0, %v1087_v44  ;;  %4993 = vmatmul.mubr.msk.bf16.gmra.mxu1 %vm687_vm0, %v1087_v44 }
  0x42   : > { %4998 = vmatprep.mubr.msk.bf16.mxu0 %vm687_vm0, %v1423_v49  ;;  %5008 = vmatprep.mubr.msk.bf16.mxu1 %vm687_vm0, %v1423_v49 }
  0x49   : > { %4999 = vmatmul.mubr.msk.bf16.vlgmr.msra.gmra.mxu0 %vm687_vm0, %v1424_v54  ;;  %5009 = vmatmul.mubr.msk.bf16.vlgmr.msra.gmra.mxu1 %vm687_vm0, %v1424_v54 }
  0x4a   : > { %5027 = vmatpush3.bf16.msra.mxu1 %v5162_v45  ;;  %5002 = vmatprep.mubr.msk.bf16.mxu0 %vm687_vm0, %v1425_v55 }
  0x4b   : > { %5012 = vmatprep.mubr.msk.bf16.mxu1 %vm687_vm0, %v1425_v55  ;;  %5017 = vmatpush3.bf16.msra.mxu0 %v5163_v46 }
  0x4c   : > { %5036 = vmatprep.subr.bf16.mxu0 %v5164_v56  ;;  %5046 = vmatprep.subr.bf16.mxu1 %v5165_v57 }
  0x51   : > { %5003 = vmatmul.mubr.msk.bf16.gmra.mxu0 %vm687_vm0, %v1426_v62  ;;  %5013 = vmatmul.mubr.msk.bf16.gmra.mxu1 %vm687_vm0, %v1426_v62 }
  0x52   : > { %5028 = vmatprep.mubr.msk.bf16.mxu1 %vm687_vm0, %v1762_v63  ;;  %5018 = vmatprep.mubr.msk.bf16.mxu0 %vm687_vm0, %v1423_v49 }
  0x59   : > { %5029 = vmatmul.mubr.msk.bf16.vlgmr.msra.gmra.mxu1 %vm687_vm0, %v1763_v16  ;;  %5019 = vmatmul.mubr.msk.bf16.vlgmr.msra.gmra.mxu0 %vm687_vm0, %v1424_v54 }
  0x5a   : > { %5032 = vmatprep.mubr.msk.bf16.mxu1 %vm687_vm0, %v1764_v17  ;;  %5037 = vmatpush3.bf16.msra.mxu0 %v5164_v56 }
  0x5b   : > { %5047 = vmatpush3.bf16.msra.mxu1 %v5165_v57  ;;  %5022 = vmatprep.mubr.msk.bf16.mxu0 %vm687_vm0, %v1425_v55 }
  0x61   : > { %5033 = vmatmul.mubr.msk.bf16.gmra.mxu1 %vm687_vm0, %v1765_v20  ;;  %5023 = vmatmul.mubr.msk.bf16.gmra.mxu0 %vm687_vm0, %v1426_v62 }
  0x62   : > { %5038 = vmatprep.mubr.msk.bf16.mxu0 %vm687_vm0, %v1762_v63  ;;  %5048 = vmatprep.mubr.msk.bf16.mxu1 %vm687_vm0, %v1762_v63 }
  0x69   : > { %5039 = vmatmul.mubr.msk.bf16.vlgmr.msra.gmra.mxu0 %vm687_vm0, %v1763_v16  ;;  %5049 = vmatmul.mubr.msk.bf16.vlgmr.msra.gmra.mxu1 %vm687_vm0, %v1763_v16 }
  0x6a   : > { %5042 = vmatprep.mubr.msk.bf16.mxu0 %vm687_vm0, %v1764_v17  ;;  %5052 = vmatprep.mubr.msk.bf16.mxu1 %vm687_vm0, %v1764_v17 }
  0x71   : > { %5043 = vmatmul.mubr.msk.bf16.gmra.mxu0 %vm687_vm0, %v1765_v20  ;;  %5053 = vmatmul.mubr.msk.bf16.gmra.mxu1 %vm687_vm0, %v1765_v20 }
  0xd9   : > { %v4940_v30 = vpop.f32.mrf.mxu0  ;;  %v4950_v31 = vpop.f32.mrf.mxu1 }
  0xda   : > { %v5859_v32 = vadd.f32 %v4940_v30, %v4785_v27  ;;  %991 = vst.msk [vmem:[#allocation3 + $0x10] sm:$0xff] %vm687_vm0, %v4950_v31 }
  0xdb   : > { %v807_v33 = vpop.f32.mrf.mxu0  ;;  %v958_v34 = vpop.f32.mrf.mxu1 }
  0xdc   : > { %v848_v35 = vand.u32 2147483647, %v5859_v32  ;;  %v5863_v36 = vadd.f32 %v4785_v27, %v807_v33  ;;  %989 = vst.msk [vmem:[#allocation3] sm:$0xff] %vm687_vm0, %v958_v34 }
  0xdd   : > { %v4941_v37 = vpop.f32.mrf.mxu0  ;;  %v4951_v38 = vpop.f32.mrf.mxu1 }
  0xde   : > { %v856_v39 = vsub.f32 0.0, %v848_v35  ;;  %v846_v40 = vand.u32 2147483647, %v5863_v36  ;;  %v5867_v41 = vadd.f32 %v4941_v37, %v4785_v27  ;;  %992 = vst.msk [vmem:[#allocation3 + $0x18] sm:$0xff] %vm687_vm0, %v4951_v38 }
  0xdf   : > { %v810_v42 = vpop.f32.mrf.mxu0  ;;  %v961_v43 = vpop.f32.mrf.mxu1 }
  0xe0   : > { %v866_v44 = vmul.f32 1.442695, %v856_v39  ;;  %v854_v45 = vsub.f32 0.0, %v846_v40  ;;  %v849_v46 = vand.u32 2147483647, %v5867_v41  ;;  %990 = vst.msk [vmem:[#allocation3 + $0x8] sm:$0xff] %vm687_vm0, %v961_v43  ;;  %v5872_v47 = vadd.f32 %v4785_v27, %v810_v42 }
  0xe1   : > { %v4944_v48 = vpop.f32.mrf.mxu0  ;;  %v4954_v49 = vpop.f32.mrf.mxu1 }
  0xe2   : > { %5166 = vpow2.f32 %v866_v44  ;;  %v862_v50 = vmul.f32 1.442695, %v854_v45  ;;  %v857_v51 = vsub.f32 0.0, %v849_v46  ;;  %v5874_v52 = vadd.f32 %v4944_v48, %v4785_v27  ;;  %995 = vst.msk [vmem:[#allocation3 + $0x30] sm:$0xff] %vm687_vm0, %v4954_v49 }
  0xe3   : > { %v847_v53 = vand.u32 2147483647, %v5872_v47  ;;  %v823_v54 = vpop.f32.mrf.mxu0  ;;  %v974_v55 = vpop.f32.mrf.mxu1 }
  0xe4   : > { %5168 = vpow2.f32 %v862_v50  ;;  %v868_v56 = vmul.f32 1.442695, %v857_v51  ;;  %v852_v57 = vand.u32 2147483647, %v5874_v52  ;;  %993 = vst.msk [vmem:[#allocation3 + $0x20] sm:$0xff] %vm687_vm0, %v974_v55  ;;  %v5880_v59 = vadd.f32 %v4785_v27, %v823_v54 }
  0xe5   : > { %v855_v58 = vsub.f32 0.0, %v847_v53  ;;  %v4945_v60 = vpop.f32.mrf.mxu0  ;;  %v4955_v61 = vpop.f32.mrf.mxu1 }
  0xe6   : > { %5170 = vpow2.f32 %v868_v56  ;;  %v860_v62 = vsub.f32 0.0, %v852_v57  ;;  %v5882_v63 = vadd.f32 %v4945_v60, %v4785_v27  ;;  %996 = vst.msk [vmem:[#allocation3 + $0x38] sm:$0xff] %vm687_vm0, %v4955_v61  ;;  %v850_v8 = vand.u32 2147483647, %v5880_v59 }
  0xe7   : > { %v864_v0 = vmul.f32 1.442695, %v855_v58  ;;  %v826_v14 = vpop.f32.mrf.mxu0  ;;  %v977_v15 = vpop.f32.mrf.mxu1 }
  0xe8   : > { %v874_v16 = vmul.f32 1.442695, %v860_v62  ;;  %v853_v17 = vand.u32 2147483647, %v5882_v63  ;;  %v5887_v18 = vadd.f32 %v4785_v27, %v826_v14  ;;  %994 = vst.msk [vmem:[#allocation3 + $0x28] sm:$0xff] %vm687_vm0, %v977_v15  ;;  %v858_v20 = vsub.f32 0.0, %v850_v8 }
  0xe9   : > { %5172 = vpow2.f32 %v864_v0  ;;  %v4960_v30 = vpop.f32.mrf.mxu0  ;;  %v4970_v31 = vpop.f32.mrf.mxu1 }
  0xea   : > { %5174 = vpow2.f32 %v874_v16  ;;  %v861_v33 = vsub.f32 0.0, %v853_v17  ;;  %v851_v34 = vand.u32 2147483647, %v5887_v18  ;;  %1070 = vst.msk [vmem:[#allocation4 + $0x10] sm:$0xff] %vm687_vm0, %v4960_v30  ;;  %v870_v35 = vmul.f32 1.442695, %v858_v20 }
  0xeb   : > { %v5898_v27 = vadd.f32 %v4970_v31, %v5893_v19  ;;  %v1037_v37 = vpop.f32.mrf.mxu0  ;;  %v1146_v38 = vpop.f32.mrf.mxu1 }
  0xec   : > { %v876_v39 = vmul.f32 1.442695, %v861_v33  ;;  %v859_v40 = vsub.f32 0.0, %v851_v34  ;;  %1068 = vst.msk [vmem:[#allocation4] sm:$0xff] %vm687_vm0, %v1037_v37  ;;  %v5902_v42 = vadd.f32 %v5893_v19, %v1146_v38  ;;  %5176 = vpow2.f32 %v870_v35 }
  0xed   : > { %v1187_v43 = vand.u32 2147483647, %v5898_v27  ;;  %v4961_v44 = vpop.f32.mrf.mxu0  ;;  %v4971_v45 = vpop.f32.mrf.mxu1 }
  0xee   : > { %5178 = vpow2.f32 %v876_v39  ;;  %v872_v46 = vmul.f32 1.442695, %v859_v40  ;;  %v1185_v48 = vand.u32 2147483647, %v5902_v42  ;;  %1071 = vst.msk [vmem:[#allocation4 + $0x18] sm:$0xff] %vm687_vm0, %v4961_v44  ;;  %v5908_v51 = vadd.f32 %v4971_v45, %v5893_v19 }
  0xef   : > { %v5167_v49 = vpop.eup %5166  ;;  %v1195_v50 = vsub.f32 0.0, %v1187_v43  ;;  %v1040_v53 = vpop.f32.mrf.mxu0 }
  0xf0   : > { %v1149_v54 = vpop.f32.mrf.mxu1  ;;  %v880_v55 = vadd.f32 1.0, %v5167_v49  ;;  %5180 = vpow2.f32 %v872_v46  ;;  %v1193_v56 = vsub.f32 0.0, %v1185_v48  ;;  %1069 = vst.msk [vmem:[#allocation4 + $0x8] sm:$0xff] %vm687_vm0, %v1040_v53  ;;  %v1188_v61 = vand.u32 2147483647, %v5908_v51 }
  0xf1   : > { %v5912_v57 = vadd.f32 %v5893_v19, %v1149_v54  ;;  %v5169_v58 = vpop.eup %5168  ;;  %v1205_v60 = vmul.f32 1.442695, %v1195_v50  ;;  %v4964_v62 = vpop.f32.mrf.mxu0 }
  0xf2   : > { %v4974_v0 = vpop.f32.mrf.mxu1  ;;  %5182 = vlog2.f32 %v880_v55  ;;  %v878_v8 = vadd.f32 1.0, %v5169_v58  ;;  %v1201_v14 = vmul.f32 1.442695, %v1193_v56  ;;  %1074 = vst.msk [vmem:[#allocation4 + $0x30] sm:$0xff] %vm687_vm0, %v4964_v62  ;;  %v1196_v16 = vsub.f32 0.0, %v1188_v61 }
  0xf3   : > { %v5171_v15 = vpop.eup %5170  ;;  %5184 = vpow2.f32 %v1205_v60  ;;  %v1186_v17 = vand.u32 2147483647, %v5912_v57  ;;  %v5918_v20 = vadd.f32 %v4974_v0, %v5893_v19  ;;  %v1053_v30 = vpop.f32.mrf.mxu0 }
  0xf4   : > { %v1162_v31 = vpop.f32.mrf.mxu1  ;;  %5186 = vlog2.f32 %v878_v8  ;;  %v881_v33 = vadd.f32 1.0, %v5171_v15  ;;  %1072 = vst.msk [vmem:[#allocation4 + $0x20] sm:$0xff] %vm687_vm0, %v1053_v30  ;;  %v1207_v35 = vmul.f32 1.442695, %v1196_v16 }
  0xf5   : > { %v5922_v34 = vadd.f32 %v5893_v19, %v1162_v31  ;;  %5188 = vpow2.f32 %v1201_v14  ;;  %v1194_v37 = vsub.f32 0.0, %v1186_v17  ;;  %v4965_v38 = vpop.f32.mrf.mxu0  ;;  %v1191_v43 = vand.u32 2147483647, %v5918_v20 }
  0xf6   : > { %v4975_v39 = vpop.f32.mrf.mxu1  ;;  %v5173_v40 = vpop.eup %5172  ;;  %5190 = vlog2.f32 %v881_v33  ;;  %1075 = vst.msk [vmem:[#allocation4 + $0x38] sm:$0xff] %vm687_vm0, %v4965_v38 }
  0xf7   : > { %v1189_v44 = vand.u32 2147483647, %v5922_v34  ;;  %v5175_v45 = vpop.eup %5174  ;;  %v879_v46 = vadd.f32 1.0, %v5173_v40  ;;  %5192 = vpow2.f32 %v1207_v35  ;;  %v1203_v48 = vmul.f32 1.442695, %v1194_v37  ;;  %v1056_v50 = vpop.f32.mrf.mxu0 }
  0xf8   : > { %v5928_v49 = vadd.f32 %v4975_v39, %v5893_v19  ;;  %v1165_v53 = vpop.f32.mrf.mxu1  ;;  %v884_v54 = vadd.f32 1.0, %v5175_v45  ;;  %v1199_v55 = vsub.f32 0.0, %v1191_v43  ;;  %1073 = vst.msk [vmem:[#allocation4 + $0x28] sm:$0xff] %vm687_vm0, %v1056_v50 }
  0xf9   : > { %v1197_v56 = vsub.f32 0.0, %v1189_v44  ;;  %v5932_v58 = vadd.f32 %v5893_v19, %v1165_v53  ;;  %5194 = vlog2.f32 %v879_v46  ;;  %v4980_v61 = vpop.f32.mrf.mxu0  ;;  %v5177_v0 = vpop.eup %5176  ;;  %v840_v53 = vmax.f32 %v5859_v32, 0.0 }
  0xfa   : > { %v1192_v60 = vand.u32 2147483647, %v5928_v49  ;;  %v4990_v62 = vpop.f32.mrf.mxu1  ;;  %5196 = vlog2.f32 %v884_v54  ;;  %v1213_v8 = vmul.f32 1.442695, %v1199_v55  ;;  %1330 = vst.msk [vmem:[#allocation3 + $0x50] sm:$0xff] %vm687_vm0, %v4980_v61  ;;  %v882_v16 = vadd.f32 1.0, %v5177_v0 }
  0xfb   : > { %v1209_v14 = vmul.f32 1.442695, %v1197_v56  ;;  %1409 = vst.msk [vmem:[#allocation4 + $0x50] sm:$0xff] %vm687_vm0, %v4990_v62  ;;  %v5179_v15 = vpop.eup %5178  ;;  %5198 = vpow2.f32 %v1203_v48  ;;  %v1190_v19 = vand.u32 2147483647, %v5932_v58  ;;  %v1297_v30 = vpop.f32.mrf.mxu0 }
  0xfc   : > { %v1200_v17 = vsub.f32 0.0, %v1192_v60  ;;  %v1376_v31 = vpop.f32.mrf.mxu1  ;;  %v885_v33 = vadd.f32 1.0, %v5179_v15  ;;  %5200 = vpow2.f32 %v1213_v8  ;;  %1328 = vst.msk [vmem:[#allocation3 + $0x40] sm:$0xff] %vm687_vm0, %v1297_v30  ;;  %v838_v8 = vmax.f32 %v5863_v36, 0.0 }
  0xfd   : > { %1407 = vst.msk [vmem:[#allocation4 + $0x40] sm:$0xff] %vm687_vm0, %v1376_v31  ;;  %v5181_v35 = vpop.eup %5180  ;;  %5202 = vlog2.f32 %v882_v16  ;;  %v1198_v38 = vsub.f32 0.0, %v1190_v19  ;;  %v4981_v39 = vpop.f32.mrf.mxu0  ;;  %v841_v31 = vmax.f32 %v5867_v41, 0.0  ;;  %v839_v41 = vmax.f32 %v5872_v47, 0.0 }
  0xfe   : > { %v1215_v37 = vmul.f32 1.442695, %v1200_v17  ;;  %v4991_v40 = vpop.f32.mrf.mxu1  ;;  %5204 = vlog2.f32 %v885_v33  ;;  %v883_v43 = vadd.f32 1.0, %v5181_v35  ;;  %1331 = vst.msk [vmem:[#allocation3 + $0x58] sm:$0xff] %vm687_vm0, %v4981_v39 }
  0xff   : > { %1410 = vst.msk [vmem:[#allocation4 + $0x58] sm:$0xff] %vm687_vm0, %v4991_v40  ;;  %v5183_v44 = vpop.eup %5182  ;;  %5206 = vpow2.f32 %v1209_v14  ;;  %v1211_v45 = vmul.f32 1.442695, %v1198_v38  ;;  %v1300_v46 = vpop.f32.mrf.mxu0 }
 0x100   : > { %v1379_v48 = vpop.f32.mrf.mxu1  ;;  %v5185_v50 = vpop.eup %5184  ;;  %v891_v54 = vmul.f32 0.6931472, %v5183_v44  ;;  %5208 = vlog2.f32 %v883_v43  ;;  %1329 = vst.msk [vmem:[#allocation3 + $0x48] sm:$0xff] %vm687_vm0, %v1300_v46  ;;  %v5959_v46 = vld [vmem:[%s7472_s9 + $0x2] ss:$0 sm:$0xff] }
 0x101   : > { %1408 = vst.msk [vmem:[#allocation4 + $0x48] sm:$0xff] %vm687_vm0, %v1379_v48  ;;  %v5187_v55 = vpop.eup %5186  ;;  %v1219_v56 = vadd.f32 1.0, %v5185_v50  ;;  %5210 = vpow2.f32 %v1215_v37  ;;  %v4984_v60 = vpop.f32.mrf.mxu0  ;;  %v844_v50 = vmax.f32 %v5874_v52, 0.0  ;;  %v842_v52 = vmax.f32 %v5880_v59, 0.0 }
 0x102   : > { %v4994_v61 = vpop.f32.mrf.mxu1  ;;  %v5189_v62 = vpop.eup %5188  ;;  %v904_v0 = vadd.f32 %v891_v54, %v840_v53  ;;  %v887_v14 = vmul.f32 0.6931472, %v5187_v55  ;;  %5212 = vpow2.f32 %v1211_v45  ;;  %1334 = vst.msk [vmem:[#allocation3 + $0x70] sm:$0xff] %vm687_vm0, %v4984_v60 }
 0x103   : > { %1413 = vst.msk [vmem:[#allocation4 + $0x70] sm:$0xff] %vm687_vm0, %v4994_v61  ;;  %v5191_v32 = vpop.eup %5190  ;;  %5214 = vlog2.f32 %v1219_v56  ;;  %v1217_v15 = vadd.f32 1.0, %v5189_v62  ;;  %v1313_v16 = vpop.f32.mrf.mxu0 }
 0x104   : > { %v1392_v17 = vpop.f32.mrf.mxu1  ;;  %v5193_v19 = vpop.eup %5192  ;;  %912 = vst.msk [vmem:[#allocation2 + $0x10] sm:$0xff] %vm687_vm0, %v904_v0  ;;  %v902_v30 = vadd.f32 %v887_v14, %v838_v8  ;;  %v893_v33 = vmul.f32 0.6931472, %v5191_v32  ;;  %1332 = vst.msk [vmem:[#allocation3 + $0x60] sm:$0xff] %vm687_vm0, %v1313_v16 }
 0x105   : > { %1411 = vst.msk [vmem:[#allocation4 + $0x60] sm:$0xff] %vm687_vm0, %v1392_v17  ;;  %5216 = vlog2.f32 %v1217_v15  ;;  %v1220_v36 = vadd.f32 1.0, %v5193_v19  ;;  %v4985_v35 = vpop.f32.mrf.mxu0  ;;  %v845_v19 = vmax.f32 %v5882_v63, 0.0 }
 0x106   : > { %v4995_v37 = vpop.f32.mrf.mxu1  ;;  %v5195_v38 = vpop.eup %5194  ;;  %910 = vst.msk [vmem:[#allocation2] sm:$0xff] %vm687_vm0, %v902_v30  ;;  %v905_v39 = vadd.f32 %v893_v33, %v841_v31  ;;  %1335 = vst.msk [vmem:[#allocation3 + $0x78] sm:$0xff] %vm687_vm0, %v4985_v35  ;;  %v843_v35 = vmax.f32 %v5887_v18, 0.0 }
 0x107   : > { %1414 = vst.msk [vmem:[#allocation4 + $0x78] sm:$0xff] %vm687_vm0, %v4995_v37  ;;  %v5197_v40 = vpop.eup %5196  ;;  %v889_v43 = vmul.f32 0.6931472, %v5195_v38  ;;  %5218 = vlog2.f32 %v1220_v36  ;;  %v1316_v44 = vpop.f32.mrf.mxu0 }
 0x108   : > { %v1395_v45 = vpop.f32.mrf.mxu1  ;;  %v5199_v48 = vpop.eup %5198  ;;  %913 = vst.msk [vmem:[#allocation2 + $0x18] sm:$0xff] %vm687_vm0, %v905_v39  ;;  %v899_v53 = vmul.f32 0.6931472, %v5197_v40  ;;  %1333 = vst.msk [vmem:[#allocation3 + $0x68] sm:$0xff] %vm687_vm0, %v1316_v44 }
 0x109   : > { %1412 = vst.msk [vmem:[#allocation4 + $0x68] sm:$0xff] %vm687_vm0, %v1395_v45  ;;  %v5201_v47 = vpop.eup %5200  ;;  %v903_v54 = vadd.f32 %v889_v43, %v839_v41  ;;  %v1218_v55 = vadd.f32 1.0, %v5199_v48  ;;  %v5000_v56 = vpop.f32.mrf.mxu0 }
 0x10a   : > { %v5010_v60 = vpop.f32.mrf.mxu1  ;;  %v5203_v61 = vpop.eup %5202  ;;  %v908_v62 = vadd.f32 %v899_v53, %v844_v50  ;;  %v1223_v0 = vadd.f32 1.0, %v5201_v47  ;;  %v5966_v8 = vadd.f32 %v5000_v56, %v5959_v46 }
 0x10b   : > { %1669 = vst.msk [vmem:[#allocation3 + $0x90] sm:$0xff] %vm687_vm0, %v5010_v60  ;;  %v5205_v14 = vpop.eup %5204  ;;  %911 = vst.msk [vmem:[#allocation2 + $0x8] sm:$0xff] %vm687_vm0, %v903_v54  ;;  %v895_v32 = vmul.f32 0.6931472, %v5203_v61  ;;  %5220 = vlog2.f32 %v1218_v55  ;;  %v1485_v15 = vpop.f32.mrf.mxu0  ;;  %v1179_v55 = vmax.f32 %v5898_v27, 0.0 }
 0x10c   : > { %v1636_v16 = vpop.f32.mrf.mxu1  ;;  %v5207_v17 = vpop.eup %5206  ;;  %916 = vst.msk [vmem:[#allocation2 + $0x30] sm:$0xff] %vm687_vm0, %v908_v62  ;;  %v901_v30 = vmul.f32 0.6931472, %v5205_v14  ;;  %5222 = vlog2.f32 %v1223_v0  ;;  %v1526_v31 = vand.u32 2147483647, %v5966_v8  ;;  %v5977_v37 = vadd.f32 %v5959_v46, %v1485_v15 }
 0x10d   : > { %1667 = vst.msk [vmem:[#allocation3 + $0x80] sm:$0xff] %vm687_vm0, %v1636_v16  ;;  %v5209_v33 = vpop.eup %5208  ;;  %v906_v36 = vadd.f32 %v895_v32, %v842_v52  ;;  %v1221_v59 = vadd.f32 1.0, %v5207_v17  ;;  %v5001_v38 = vpop.f32.mrf.mxu0  ;;  %v1177_v15 = vmax.f32 %v5902_v42, 0.0 }
 0x10e   : > { %v5011_v39 = vpop.f32.mrf.mxu1  ;;  %v5211_v40 = vpop.eup %5210  ;;  %v909_v41 = vadd.f32 %v901_v30, %v845_v19  ;;  %v897_v43 = vmul.f32 0.6931472, %v5209_v33  ;;  %v1534_v63 = vsub.f32 0.0, %v1526_v31  ;;  %v5980_v44 = vadd.f32 %v5001_v38, %v5959_v46 }
 0x10f   : > { %1670 = vst.msk [vmem:[#allocation3 + $0x98] sm:$0xff] %vm687_vm0, %v5011_v39  ;;  %v5213_v45 = vpop.eup %5212  ;;  %914 = vst.msk [vmem:[#allocation2 + $0x20] sm:$0xff] %vm687_vm0, %v906_v36  ;;  %5224 = vlog2.f32 %v1221_v59  ;;  %v1224_v18 = vadd.f32 1.0, %v5211_v40  ;;  %v1524_v48 = vand.u32 2147483647, %v5977_v37  ;;  %v1488_v50 = vpop.f32.mrf.mxu0 }
 0x110   : > { %v1639_v53 = vpop.f32.mrf.mxu1  ;;  %v5215_v47 = vpop.eup %5214  ;;  %917 = vst.msk [vmem:[#allocation2 + $0x38] sm:$0xff] %vm687_vm0, %v909_v41  ;;  %v907_v54 = vadd.f32 %v897_v43, %v843_v35  ;;  %v1222_v56 = vadd.f32 1.0, %v5213_v45  ;;  %v1544_v60 = vmul.f32 1.442695, %v1534_v63  ;;  %v1527_v0 = vand.u32 2147483647, %v5980_v44 }
 0x111   : > { %1668 = vst.msk [vmem:[#allocation3 + $0x88] sm:$0xff] %vm687_vm0, %v1639_v53  ;;  %v1230_v61 = vmul.f32 0.6931472, %v5215_v47  ;;  %5226 = vlog2.f32 %v1224_v18  ;;  %v1532_v62 = vsub.f32 0.0, %v1524_v48  ;;  %v5004_v14 = vpop.f32.mrf.mxu0  ;;  %v5992_v16 = vadd.f32 %v5959_v46, %v1488_v50 }
 0x112   : > { %v5014_v52 = vpop.f32.mrf.mxu1  ;;  %v5217_v32 = vpop.eup %5216  ;;  %915 = vst.msk [vmem:[#allocation2 + $0x28] sm:$0xff] %vm687_vm0, %v907_v54  ;;  %5228 = vlog2.f32 %v1222_v56  ;;  %v5995_v27 = vadd.f32 %v5004_v14, %v5959_v46  ;;  %v1180_v35 = vmax.f32 %v5908_v51, 0.0  ;;  %v1535_v59 = vsub.f32 0.0, %v1527_v0  ;;  %v6014_v54 = vld [vmem:[%s7472_s9 + $0x3] ss:$0 sm:$0xff] }
 0x113   : > { %1673 = vst.msk [vmem:[#allocation3 + $0xb0] sm:$0xff] %vm687_vm0, %v5014_v52  ;;  %v1243_v17 = vadd.f32 %v1230_v61, %v1179_v55  ;;  %v1226_v19 = vmul.f32 0.6931472, %v5217_v32  ;;  %5230 = vpow2.f32 %v1544_v60  ;;  %v1540_v30 = vmul.f32 1.442695, %v1532_v62  ;;  %v1501_v31 = vpop.f32.mrf.mxu0 }
 0x114   : > { %v1652_v33 = vpop.f32.mrf.mxu1  ;;  %v5219_v36 = vpop.eup %5218  ;;  %v1525_v42 = vand.u32 2147483647, %v5992_v16  ;;  %v1530_v40 = vand.u32 2147483647, %v5995_v27  ;;  %v1546_v63 = vmul.f32 1.442695, %v1535_v59  ;;  %v6004_v18 = vadd.f32 %v5959_v46, %v1501_v31 }
 0x115   : > { %1671 = vst.msk [vmem:[#allocation3 + $0xa0] sm:$0xff] %vm687_vm0, %v1652_v33  ;;  %1251 = vst.msk [vmem:[#allocation2 + $0x50] sm:$0xff] %vm687_vm0, %v1243_v17  ;;  %v1241_v38 = vadd.f32 %v1226_v19, %v1177_v15  ;;  %v1232_v39 = vmul.f32 0.6931472, %v5219_v36  ;;  %5232 = vpow2.f32 %v1540_v30  ;;  %v5005_v41 = vpop.f32.mrf.mxu0  ;;  %v1178_v56 = vmax.f32 %v5912_v57, 0.0 }
 0x116   : > { %v5015_v43 = vpop.f32.mrf.mxu1  ;;  %v1533_v45 = vsub.f32 0.0, %v1525_v42  ;;  %v6007_v51 = vadd.f32 %v5005_v41, %v5959_v46  ;;  %v1538_v50 = vsub.f32 0.0, %v1530_v40  ;;  %5234 = vpow2.f32 %v1546_v63 }
 0x117   : > { %1674 = vst.msk [vmem:[#allocation3 + $0xb8] sm:$0xff] %vm687_vm0, %v5015_v43  ;;  %1249 = vst.msk [vmem:[#allocation2 + $0x40] sm:$0xff] %vm687_vm0, %v1241_v38  ;;  %v1244_v48 = vadd.f32 %v1232_v39, %v1180_v35  ;;  %v1504_v53 = vpop.f32.mrf.mxu0  ;;  %v1528_v61 = vand.u32 2147483647, %v6004_v18  ;;  %v1183_v14 = vmax.f32 %v5918_v20, 0.0  ;;  %v1181_v39 = vmax.f32 %v5922_v34, 0.0 }
 0x118   : > { %v1655_v47 = vpop.f32.mrf.mxu1  ;;  %v5221_v55 = vpop.eup %5220  ;;  %v1542_v60 = vmul.f32 1.442695, %v1533_v45  ;;  %v1552_v52 = vmul.f32 1.442695, %v1538_v50  ;;  %v6022_v32 = vadd.f32 %v5959_v46, %v1504_v53  ;;  %v1531_v30 = vand.u32 2147483647, %v6007_v51 }
 0x119   : > { %1672 = vst.msk [vmem:[#allocation3 + $0xa8] sm:$0xff] %vm687_vm0, %v1655_v47  ;;  %v5223_v62 = vpop.eup %5222  ;;  %1252 = vst.msk [vmem:[#allocation2 + $0x58] sm:$0xff] %vm687_vm0, %v1244_v48  ;;  %v1228_v0 = vmul.f32 0.6931472, %v5221_v55  ;;  %v5020_v17 = vpop.f32.mrf.mxu0  ;;  %v1536_v57 = vsub.f32 0.0, %v1528_v61  ;;  %v1184_v50 = vmax.f32 %v5928_v49, 0.0 }
 0x11a   : > { %v5030_v15 = vpop.f32.mrf.mxu1  ;;  %v1238_v19 = vmul.f32 0.6931472, %v5223_v62  ;;  %5236 = vpow2.f32 %v1542_v60  ;;  %1748 = vst.msk [vmem:[#allocation4 + $0x90] sm:$0xff] %vm687_vm0, %v5020_v17  ;;  %v1529_v33 = vand.u32 2147483647, %v6022_v32  ;;  %v1539_v46 = vsub.f32 0.0, %v1531_v30 }
 0x11b   : > { %v1242_v31 = vadd.f32 %v1228_v0, %v1178_v56  ;;  %5238 = vpow2.f32 %v1552_v52  ;;  %v1715_v35 = vpop.f32.mrf.mxu0  ;;  %v1548_v42 = vmul.f32 1.442695, %v1536_v57  ;;  %v6028_v38 = vadd.f32 %v5030_v15, %v6014_v54 }
 0x11c   : > { %v1824_v36 = vpop.f32.mrf.mxu1  ;;  %v5225_v20 = vpop.eup %5224  ;;  %v1247_v59 = vadd.f32 %v1238_v19, %v1183_v14  ;;  %1746 = vst.msk [vmem:[#allocation4 + $0x80] sm:$0xff] %vm687_vm0, %v1715_v35  ;;  %v1537_v41 = vsub.f32 0.0, %v1529_v33  ;;  %v1554_v53 = vmul.f32 1.442695, %v1539_v46  ;;  %v1182_v60 = vmax.f32 %v5932_v58, 0.0 }
 0x11d   : > { %1250 = vst.msk [vmem:[#allocation2 + $0x48] sm:$0xff] %vm687_vm0, %v1242_v31  ;;  %v1234_v40 = vmul.f32 0.6931472, %v5225_v20  ;;  %v6034_v43 = vadd.f32 %v6014_v54, %v1824_v36  ;;  %v5021_v45 = vpop.f32.mrf.mxu0  ;;  %5240 = vpow2.f32 %v1548_v42  ;;  %v1865_v47 = vand.u32 2147483647, %v6028_v38 }
 0x11e   : > { %v5031_v63 = vpop.f32.mrf.mxu1  ;;  %v5227_v48 = vpop.eup %5226  ;;  %1255 = vst.msk [vmem:[#allocation2 + $0x70] sm:$0xff] %vm687_vm0, %v1247_v59  ;;  %1749 = vst.msk [vmem:[#allocation4 + $0x98] sm:$0xff] %vm687_vm0, %v5021_v45  ;;  %v1550_v61 = vmul.f32 1.442695, %v1537_v41  ;;  %5242 = vpow2.f32 %v1554_v53 }
 0x11f   : > { %v5229_v55 = vpop.eup %5228  ;;  %v1245_v34 = vadd.f32 %v1234_v40, %v1181_v39  ;;  %v1240_v56 = vmul.f32 0.6931472, %v5227_v48  ;;  %v1718_v0 = vpop.f32.mrf.mxu0  ;;  %v1873_v15 = vsub.f32 0.0, %v1865_v47  ;;  %v1863_v49 = vand.u32 2147483647, %v6034_v43 }
 0x120   : > { %v1827_v62 = vpop.f32.mrf.mxu1  ;;  %v5231_v14 = vpop.eup %5230  ;;  %v1236_v52 = vmul.f32 0.6931472, %v5229_v55  ;;  %1747 = vst.msk [vmem:[#allocation4 + $0x88] sm:$0xff] %vm687_vm0, %v1718_v0  ;;  %5244 = vpow2.f32 %v1550_v61  ;;  %v6045_v57 = vadd.f32 %v5031_v63, %v6014_v54 }
 0x121   : > { %1253 = vst.msk [vmem:[#allocation2 + $0x60] sm:$0xff] %vm687_vm0, %v1245_v34  ;;  %v1248_v17 = vadd.f32 %v1240_v56, %v1184_v50  ;;  %v1558_v19 = vadd.f32 1.0, %v5231_v14  ;;  %v5024_v30 = vpop.f32.mrf.mxu0  ;;  %v1883_v36 = vmul.f32 1.442695, %v1873_v15  ;;  %v1871_v35 = vsub.f32 0.0, %v1863_v49 }
 0x122   : > { %v5034_v58 = vpop.f32.mrf.mxu1  ;;  %v5233_v31 = vpop.eup %5232  ;;  %v1246_v33 = vadd.f32 %v1236_v52, %v1182_v60  ;;  %v6048_v20 = vadd.f32 %v6014_v54, %v1827_v62  ;;  %1752 = vst.msk [vmem:[#allocation4 + $0xb0] sm:$0xff] %vm687_vm0, %v5024_v30  ;;  %v1866_v42 = vand.u32 2147483647, %v6045_v57 }
 0x123   : > { %1256 = vst.msk [vmem:[#allocation2 + $0x78] sm:$0xff] %vm687_vm0, %v1248_v17  ;;  %5246 = vlog2.f32 %v1558_v19  ;;  %v1556_v59 = vadd.f32 1.0, %v5233_v31  ;;  %v1731_v39 = vpop.f32.mrf.mxu0  ;;  %v1879_v40 = vmul.f32 1.442695, %v1871_v35  ;;  %v5235_v63 = vpop.eup %5234  ;;  %v6057_v48 = vadd.f32 %v5034_v58, %v6014_v54 }
 0x124   : > { %v1840_v46 = vpop.f32.mrf.mxu1  ;;  %1254 = vst.msk [vmem:[#allocation2 + $0x68] sm:$0xff] %vm687_vm0, %v1246_v33  ;;  %5248 = vpow2.f32 %v1883_v36  ;;  %v1864_v41 = vand.u32 2147483647, %v6048_v20  ;;  %1750 = vst.msk [vmem:[#allocation4 + $0xa0] sm:$0xff] %vm687_vm0, %v1731_v39  ;;  %v1874_v45 = vsub.f32 0.0, %v1866_v42  ;;  %v1559_v55 = vadd.f32 1.0, %v5235_v63 }
 0x125   : > { %5250 = vlog2.f32 %v1556_v59  ;;  %v6060_v50 = vadd.f32 %v6014_v54, %v1840_v46  ;;  %v5025_v47 = vpop.f32.mrf.mxu0  ;;  %v1869_v62 = vand.u32 2147483647, %v6057_v48 }
 0x126   : > { %v5035_v53 = vpop.f32.mrf.mxu1  ;;  %5252 = vpow2.f32 %v1879_v40  ;;  %v1872_v34 = vsub.f32 0.0, %v1864_v41  ;;  %1753 = vst.msk [vmem:[#allocation4 + $0xb8] sm:$0xff] %vm687_vm0, %v5025_v47  ;;  %v1885_v61 = vmul.f32 1.442695, %v1874_v45 }
 0x127   : > { %v6063_v56 = vadd.f32 %v5035_v53, %v6014_v54  ;;  %v5237_v60 = vpop.eup %5236  ;;  %v1734_v14 = vpop.f32.mrf.mxu0  ;;  %5254 = vlog2.f32 %v1559_v55  ;;  %v1867_v17 = vand.u32 2147483647, %v6060_v50  ;;  %v1877_v58 = vsub.f32 0.0, %v1869_v62 }
 0x128   : > { %v1843_v0 = vpop.f32.mrf.mxu1  ;;  %v5239_v52 = vpop.eup %5238  ;;  %v1557_v15 = vadd.f32 1.0, %v5237_v60  ;;  %v1881_v49 = vmul.f32 1.442695, %v1872_v34  ;;  %1751 = vst.msk [vmem:[#allocation4 + $0xa8] sm:$0xff] %vm687_vm0, %v1734_v14  ;;  %5256 = vpow2.f32 %v1885_v61 }
 0x129   : > { %v1562_v19 = vadd.f32 1.0, %v5239_v52  ;;  %v5040_v30 = vpop.f32.mrf.mxu0  ;;  %v1875_v33 = vsub.f32 0.0, %v1867_v17  ;;  %v1870_v36 = vand.u32 2147483647, %v6063_v56  ;;  %v6071_v35 = vadd.f32 %v6014_v54, %v1843_v0 }
 0x12a   : > { %v5050_v31 = vpop.f32.mrf.mxu1  ;;  %5258 = vlog2.f32 %v1557_v15  ;;  %2008 = vst.msk [vmem:[#allocation3 + $0xd0] sm:$0xff] %vm687_vm0, %v5040_v30  ;;  %v5241_v59 = vpop.eup %5240  ;;  %v1891_v42 = vmul.f32 1.442695, %v1877_v58 }
 0x12b   : > { %2087 = vst.msk [vmem:[#allocation4 + $0xd0] sm:$0xff] %vm687_vm0, %v5050_v31  ;;  %5260 = vlog2.f32 %v1562_v19  ;;  %v1975_v46 = vpop.f32.mrf.mxu0  ;;  %v1560_v40 = vadd.f32 1.0, %v5241_v59  ;;  %v1887_v41 = vmul.f32 1.442695, %v1875_v33  ;;  %v1878_v63 = vsub.f32 0.0, %v1870_v36  ;;  %v5243_v45 = vpop.eup %5242 }
 0x12c   : > { %v2054_v39 = vpop.f32.mrf.mxu1  ;;  %5262 = vpow2.f32 %v1881_v49  ;;  %2006 = vst.msk [vmem:[#allocation3 + $0xc0] sm:$0xff] %vm687_vm0, %v1975_v46  ;;  %v1868_v54 = vand.u32 2147483647, %v6071_v35  ;;  %v1563_v34 = vadd.f32 1.0, %v5243_v45  ;;  %v1518_v49 = vmax.f32 %v5966_v8, 0.0 }
 0x12d   : > { %2085 = vst.msk [vmem:[#allocation4 + $0xc0] sm:$0xff] %vm687_vm0, %v2054_v39  ;;  %5264 = vpow2.f32 %v1891_v42  ;;  %v5041_v53 = vpop.f32.mrf.mxu0  ;;  %v5245_v55 = vpop.eup %5244  ;;  %v1893_v60 = vmul.f32 1.442695, %v1878_v63  ;;  %v1516_v42 = vmax.f32 %v5977_v37, 0.0 }
 0x12e   : > { %v5051_v47 = vpop.f32.mrf.mxu1  ;;  %5266 = vlog2.f32 %v1560_v40  ;;  %2009 = vst.msk [vmem:[#allocation3 + $0xd8] sm:$0xff] %vm687_vm0, %v5041_v53  ;;  %v1561_v61 = vadd.f32 1.0, %v5245_v55  ;;  %v1876_v62 = vsub.f32 0.0, %v1868_v54 }
 0x12f   : > { %2088 = vst.msk [vmem:[#allocation4 + $0xd8] sm:$0xff] %vm687_vm0, %v5051_v47  ;;  %5268 = vpow2.f32 %v1887_v41  ;;  %v1978_v0 = vpop.f32.mrf.mxu0  ;;  %v1519_v47 = vmax.f32 %v5980_v44, 0.0 }
 0x130   : > { %v2057_v14 = vpop.f32.mrf.mxu1  ;;  %v5247_v52 = vpop.eup %5246  ;;  %5270 = vlog2.f32 %v1563_v34  ;;  %2007 = vst.msk [vmem:[#allocation3 + $0xc8] sm:$0xff] %vm687_vm0, %v1978_v0  ;;  %v1889_v19 = vmul.f32 1.442695, %v1876_v62 }
 0x131   : > { %2086 = vst.msk [vmem:[#allocation4 + $0xc8] sm:$0xff] %vm687_vm0, %v2057_v14  ;;  %v5249_v15 = vpop.eup %5248  ;;  %v1569_v17 = vmul.f32 0.6931472, %v5247_v52  ;;  %5272 = vlog2.f32 %v1561_v61  ;;  %v5044_v58 = vpop.f32.mrf.mxu0  ;;  %v1517_v14 = vmax.f32 %v5992_v16, 0.0  ;;  %v1520_v16 = vmax.f32 %v6004_v18, 0.0 }
 0x132   : > { %v5054_v30 = vpop.f32.mrf.mxu1  ;;  %v5251_v31 = vpop.eup %5250  ;;  %v1897_v33 = vadd.f32 1.0, %v5249_v15  ;;  %5274 = vpow2.f32 %v1893_v60  ;;  %2012 = vst.msk [vmem:[#allocation3 + $0xf0] sm:$0xff] %vm687_vm0, %v5044_v58  ;;  %v1522_v15 = vmax.f32 %v5995_v27, 0.0 }
 0x133   : > { %2091 = vst.msk [vmem:[#allocation4 + $0xf0] sm:$0xff] %vm687_vm0, %v5054_v30  ;;  %v5253_v36 = vpop.eup %5252  ;;  %v1582_v59 = vadd.f32 %v1569_v17, %v1518_v49  ;;  %v1565_v46 = vmul.f32 0.6931472, %v5251_v31  ;;  %5276 = vpow2.f32 %v1889_v19  ;;  %v1991_v39 = vpop.f32.mrf.mxu0 }
 0x134   : > { %v2070_v8 = vpop.f32.mrf.mxu1  ;;  %5278 = vlog2.f32 %v1897_v33  ;;  %v1895_v40 = vadd.f32 1.0, %v5253_v36  ;;  %2010 = vst.msk [vmem:[#allocation3 + $0xe0] sm:$0xff] %vm687_vm0, %v1991_v39  ;;  %v5255_v41 = vpop.eup %5254 }
 0x135   : > { %2089 = vst.msk [vmem:[#allocation4 + $0xe0] sm:$0xff] %vm687_vm0, %v2070_v8  ;;  %1590 = vst.msk [vmem:[#allocation2 + $0x90] sm:$0xff] %vm687_vm0, %v1582_v59  ;;  %v1580_v63 = vadd.f32 %v1565_v46, %v1516_v42  ;;  %v5045_v45 = vpop.f32.mrf.mxu0  ;;  %v5257_v53 = vpop.eup %5256  ;;  %v1571_v37 = vmul.f32 0.6931472, %v5255_v41  ;;  %v1523_v8 = vmax.f32 %v6007_v51, 0.0 }
 0x136   : > { %v5055_v54 = vpop.f32.mrf.mxu1  ;;  %5280 = vlog2.f32 %v1895_v40  ;;  %2013 = vst.msk [vmem:[#allocation3 + $0xf8] sm:$0xff] %vm687_vm0, %v5045_v45  ;;  %v1898_v34 = vadd.f32 1.0, %v5257_v53 }
 0x137   : > { %2092 = vst.msk [vmem:[#allocation4 + $0xf8] sm:$0xff] %vm687_vm0, %v5055_v54  ;;  %v5259_v55 = vpop.eup %5258  ;;  %1588 = vst.msk [vmem:[#allocation2 + $0x80] sm:$0xff] %vm687_vm0, %v1580_v63  ;;  %v1994_v60 = vpop.f32.mrf.mxu0  ;;  %v1583_v0 = vadd.f32 %v1571_v37, %v1519_v47  ;;  %v1521_v63 = vmax.f32 %v6022_v32, 0.0 }
 0x138   : > { %v2073_v61 = vpop.f32.mrf.mxu1  ;;  %v5261_v62 = vpop.eup %5260  ;;  %v1567_v52 = vmul.f32 0.6931472, %v5259_v55  ;;  %2011 = vst.msk [vmem:[#allocation3 + $0xe8] sm:$0xff] %vm687_vm0, %v1994_v60  ;;  %5282 = vlog2.f32 %v1898_v34  ;;  %v1857_v34 = vmax.f32 %v6028_v38, 0.0 }
 0x139   : > { %2090 = vst.msk [vmem:[#allocation4 + $0xe8] sm:$0xff] %vm687_vm0, %v2073_v61  ;;  %v5263_v44 = vpop.eup %5262  ;;  %v1577_v49 = vmul.f32 0.6931472, %v5261_v62  ;;  %1591 = vst.msk [vmem:[#allocation2 + $0x98] sm:$0xff] %vm687_vm0, %v1583_v0  ;;  %v1855_v61 = vmax.f32 %v6034_v43, 0.0  ;;  %v1861_v43 = vmax.f32 %v6057_v48, 0.0 }
 0x13a   : > { %v5265_v17 = vpop.eup %5264  ;;  %v1581_v19 = vadd.f32 %v1567_v52, %v1517_v14  ;;  %v1896_v58 = vadd.f32 1.0, %v5263_v44  ;;  %v1858_v52 = vmax.f32 %v6045_v57, 0.0  ;;  %v1860_v48 = vmax.f32 %v6071_v35, 0.0 }
 0x13b   : > { %v5267_v30 = vpop.eup %5266  ;;  %v1586_v31 = vadd.f32 %v1577_v49, %v1522_v15  ;;  %v1901_v33 = vadd.f32 1.0, %v5265_v17  ;;  %v1856_v17 = vmax.f32 %v6048_v20, 0.0  ;;  %v1862_v20 = vmax.f32 %v6063_v56, 0.0 }
 0x13c   : > { %v5269_v36 = vpop.eup %5268  ;;  %1589 = vst.msk [vmem:[#allocation2 + $0x88] sm:$0xff] %vm687_vm0, %v1581_v19  ;;  %v1573_v59 = vmul.f32 0.6931472, %v5267_v30  ;;  %5284 = vlog2.f32 %v1896_v58 }
 0x13d   : > { %v5271_v42 = vpop.eup %5270  ;;  %1594 = vst.msk [vmem:[#allocation2 + $0xb0] sm:$0xff] %vm687_vm0, %v1586_v31  ;;  %5286 = vlog2.f32 %v1901_v33  ;;  %v1899_v27 = vadd.f32 1.0, %v5269_v36  ;;  %v1859_v36 = vmax.f32 %v6060_v50, 0.0 }
 0x13e   : > { %v5273_v46 = vpop.eup %5272  ;;  %v1584_v39 = vadd.f32 %v1573_v59, %v1520_v16  ;;  %v1579_v40 = vmul.f32 0.6931472, %v5271_v42 }
 0x13f   : > { %v5275_v41 = vpop.eup %5274  ;;  %v1575_v45 = vmul.f32 0.6931472, %v5273_v46  ;;  %5288 = vlog2.f32 %v1899_v27 }
 0x140   : > { %v5277_v54 = vpop.eup %5276  ;;  %1592 = vst.msk [vmem:[#allocation2 + $0xa0] sm:$0xff] %vm687_vm0, %v1584_v39  ;;  %v1587_v18 = vadd.f32 %v1579_v40, %v1523_v8  ;;  %v1902_v53 = vadd.f32 1.0, %v5275_v41 }
 0x141   : > { %v5279_v47 = vpop.eup %5278  ;;  %v1585_v37 = vadd.f32 %v1575_v45, %v1521_v63  ;;  %v1900_v55 = vadd.f32 1.0, %v5277_v54 }
 0x142   : > { %1595 = vst.msk [vmem:[#allocation2 + $0xb8] sm:$0xff] %vm687_vm0, %v1587_v18  ;;  %v1908_v60 = vmul.f32 0.6931472, %v5279_v47  ;;  %5290 = vlog2.f32 %v1902_v53 }
 0x143   : > { %v5281_v51 = vpop.eup %5280  ;;  %1593 = vst.msk [vmem:[#allocation2 + $0xa8] sm:$0xff] %vm687_vm0, %v1585_v37  ;;  %5292 = vlog2.f32 %v1900_v55 }
 0x144   : > { %v1921_v32 = vadd.f32 %v1908_v60, %v1857_v34  ;;  %v1904_v62 = vmul.f32 0.6931472, %v5281_v51 }
 0x145   : > { %v5283_v0 = vpop.eup %5282 }
 0x146   : > { %1929 = vst.msk [vmem:[#allocation2 + $0xd0] sm:$0xff] %vm687_vm0, %v1921_v32  ;;  %v1919_v14 = vadd.f32 %v1904_v62, %v1855_v61  ;;  %v1910_v44 = vmul.f32 0.6931472, %v5283_v0 }
 0x148   : > { %1927 = vst.msk [vmem:[#allocation2 + $0xc0] sm:$0xff] %vm687_vm0, %v1919_v14  ;;  %v1922_v15 = vadd.f32 %v1910_v44, %v1858_v52 }
 0x149   : > { %v5285_v38 = vpop.eup %5284 }
 0x14a   : > { %v5287_v49 = vpop.eup %5286  ;;  %v1906_v19 = vmul.f32 0.6931472, %v5285_v38  ;;  %1930 = vst.msk [vmem:[#allocation2 + $0xd8] sm:$0xff] %vm687_vm0, %v1922_v15 }
 0x14b   : > { %v1916_v58 = vmul.f32 0.6931472, %v5287_v49 }
 0x14c   : > { %v5289_v30 = vpop.eup %5288  ;;  %v1920_v31 = vadd.f32 %v1906_v19, %v1856_v17 }
 0x14d   : > { %v1925_v33 = vadd.f32 %v1916_v58, %v1861_v43  ;;  %v1912_v57 = vmul.f32 0.6931472, %v5289_v30 }
 0x14e   : > { %1928 = vst.msk [vmem:[#allocation2 + $0xc8] sm:$0xff] %vm687_vm0, %v1920_v31 }
 0x14f   : > { %v5291_v16 = vpop.eup %5290  ;;  %1933 = vst.msk [vmem:[#allocation2 + $0xf0] sm:$0xff] %vm687_vm0, %v1925_v33  ;;  %v1923_v59 = vadd.f32 %v1912_v57, %v1859_v36 }
 0x150   : > { %v5293_v42 = vpop.eup %5292  ;;  %v1918_v27 = vmul.f32 0.6931472, %v5291_v16 }
 0x151   : > { %1931 = vst.msk [vmem:[#allocation2 + $0xe0] sm:$0xff] %vm687_vm0, %v1923_v59  ;;  %v1914_v46 = vmul.f32 0.6931472, %v5293_v42 }
 0x152   : > { %v1926_v39 = vadd.f32 %v1918_v27, %v1862_v20 }
 0x153   : > { %v1924_v8 = vadd.f32 %v1914_v46, %v1860_v48 }
 0x154   : > { %1934 = vst.msk [vmem:[#allocation2 + $0xf8] sm:$0xff] %vm687_vm0, %v1926_v39 }
 0x155   : > { %1932 = vst.msk [vmem:[#allocation2 + $0xe8] sm:$0xff] %vm687_vm0, %v1924_v8 }
 0x156 LB: >> { %v7522_v4 = vld [vmem:[#allocation9_spill] sm:$0xff]  ;;  %v7523_v3 = vld [vmem:[#allocation8_spill] sm:$0xff]  ;;  %v7524_v1 = vld [vmem:[#allocation6_spill] sm:$0xff]  ;;  %7526 = vst [vmem:[#allocation18_spill] sm:$0xff] %v5490_v29  ;;  %v2131_v50 = vlaneseq  ;;  %s6176_s22 = sshll.u32 %s5522_s18, 3  ;;  %vm2666_vm1 = vcmask 1040384   ;;  %s7544_s25 = scalar_lea.vmem %s7473_s10, %s5688_s14  ;;  %v5502_v25 = vphi %v5848_v25, %v7587_v25   ;;  %v5498_v26 = vphi %v5850_v26, %v7586_v26   ;;  %v5494_v28 = vphi %v5855_v28, %v7585_v28   ;;  %v5490_v29 = vphi %v5857_v29, %v7584_v29   ;;  %s5522_s18 = sphi %s6146_s18, %s2106_s18   ;;  %v5518_v21 = vphi %v5840_v21, %v7591_v21   ;;  %v5514_v22 = vphi %v5842_v22, %v7590_v22   ;;  %v5510_v23 = vphi %v5844_v23, %v7589_v23   ;;  %v5506_v24 = vphi %v5846_v24, %v7588_v24  }
 0x157   : >> { %v7525_v2 = vld [vmem:[#allocation7_spill] sm:$0xff]  ;;  %7527 = vst [vmem:[#allocation19_spill] sm:$0xff] %v5494_v28  ;;  %7528 = vst [vmem:[#allocation20_spill] sm:$0xff] %v5498_v26  ;;  %s2121_s23 = scalar_lea.vmem [#allocation3], %s6176_s22  ;;  %s2123_s30 = scalar_lea.vmem [#allocation4], %s6176_s22  ;;  %v7536_v10 = vld [vmem:[#allocation14_spill] sm:$0xff] }
 0x158   : >> { %7529 = vst [vmem:[#allocation21_spill] sm:$0xff] %v5502_v25  ;;  %v6178_v56 = vshrl.u32 %v2131_v50, 7  ;;  %v2122_v35 = vld [vmem:[%s2121_s23] sm:$0xff]  ;;  %v5525_v31 = vmov 1966171168   ;;  %s2119_s19 = scalar_lea.vmem [#allocation2], %s6176_s22  ;;  %s2117_s16 = scalar_lea.vmem %s5694_s17, %s6176_s22 }
 0x159   : >> { %v2124_v0 = vld [vmem:[%s2123_s30] sm:$0xff]  ;;  %v2129_v33 = vunpack.c.l.s4 %v5525_v31  ;;  %vm2668_vm2 = vcmask 1041408   ;;  %vm2670_vm3 = vcmask 1042432   ;;  %vm2672_vm4 = vcmask 1043456   ;;  %s2688_s24 = scalar_lea.vmem %s7544_s25, %s6176_s22  ;;  %s7583_s0 = scalar_lea.vmem %s7476_s13, %s5688_s14 }
 0x15a   : >> { %v6184_v40 = vsub.s32 0, %v6178_v56  ;;  %v6187_v41 = vsub.s32 1, %v6178_v56  ;;  %v6192_v54 = vsub.s32 2, %v6178_v56  ;;  %v6196_v53 = vsub.s32 3, %v6178_v56  ;;  %v4854_v43 = vld [vmem:[%s2121_s23 + $0x40] sm:$0xff]  ;;  %s6263_s23 = ssub.s32 56, %s6176_s22 }
 0x15b   : >> { %v6200_v37 = vsub.s32 4, %v6178_v56  ;;  %v6204_v34 = vsub.s32 5, %v6178_v56  ;;  %v6208_v51 = vsub.s32 6, %v6178_v56  ;;  %v6212_v61 = vsub.s32 7, %v6178_v56  ;;  %s6766_s15 = scalar_lea.vmem %s5800_s21, %s6263_s23  ;;  %s4389_s1 = scalar_lea.vmem %s7583_s0, %s6263_s23 }
 0x15c   : >> { %v2278_v63 = vrot.slane %v2122_v35, %v6187_v41  ;;  %v2267_v45 = vrot.slane %v2122_v35, %v6184_v40  ;;  %7530 = vst [vmem:[#allocation22_spill] sm:$0xff] %v6192_v54  ;;  %v2289_v18 = vrot.slane %v2122_v35, %v6192_v54  ;;  %7531 = vst [vmem:[#allocation23_spill] sm:$0xff] %v6196_v53  ;;  %v2130_v57 = vunpack.c.0.s8 %v2129_v33  ;;  %v2120_v42 = vld [vmem:[%s2119_s19] sm:$0xff]  ;;  %s2106_s18 = sadd.s32 1, %s5522_s18  }
 0x15d   : >> { %v2300_v47 = vrot.slane %v2122_v35, %v6196_v53  ;;  %7532 = vst [vmem:[#allocation24_spill] sm:$0xff] %v6200_v37  ;;  %v2311_v55 = vrot.slane %v2122_v35, %v6200_v37  ;;  %7533 = vst [vmem:[#allocation25_spill] sm:$0xff] %v6204_v34  ;;  %v2322_v60 = vrot.slane %v2122_v35, %v6204_v34  ;;  %vm2674_vm5 = vcmask 1044480   ;;  %p2103_p5 = scmp.ge.s32.totalorder %s2106_s18, 8  }
 0x15e   : >> { %2280 = vbcast.lane.b32.xlu1 %v2278_v63, 256  ;;  %2269 = vbcast.lane.b32.xlu0 %v2267_v45, 256  ;;  %7534 = vst [vmem:[#allocation26_spill] sm:$0xff] %v6208_v51  ;;  %v2333_v32 = vrot.slane %v2122_v35, %v6208_v51  ;;  %7535 = vst [vmem:[#allocation27_spill] sm:$0xff] %v6212_v61  ;;  %v2344_v62 = vrot.slane %v2122_v35, %v6212_v61  ;;  %vm2676_vm6 = vcmask 1045504   ;;  %vm2678_vm7 = vcmask 1046528  }
 0x15f   : >> { %v2461_v14 = vrot.slane %v2124_v0, %v6184_v40  ;;  %v2472_v52 = vrot.slane %v2124_v0, %v6187_v41  ;;  %v2483_v44 = vrot.slane %v2124_v0, %v6192_v54  ;;  %v2494_v38 = vrot.slane %v2124_v0, %v6196_v53 }
 0x160   : >> { %v2505_v15 = vrot.slane %v2124_v0, %v6200_v37  ;;  %v2516_v49 = vrot.slane %v2124_v0, %v6204_v34  ;;  %v2527_v17 = vrot.slane %v2124_v0, %v6208_v51  ;;  %v2538_v19 = vrot.slane %v2124_v0, %v6212_v61 }
 0x161   : >> { %v2841_v58 = vrot.slane %v4854_v43, %v6184_v40  ;;  %v2852_v30 = vrot.slane %v4854_v43, %v6187_v41  ;;  %v2863_v36 = vrot.slane %v4854_v43, %v6192_v54  ;;  %v2874_v16 = vrot.slane %v4854_v43, %v6196_v53 }
 0x162   : >> { %2284 = vbcast.lane.b32.xlu1 %v2278_v63, 264  ;;  %2273 = vbcast.lane.b32.xlu0 %v2267_v45, 264  ;;  %v6233_v59 = vsub.s32 %v2130_v57, %v6178_v56  ;;  %v2885_v20 = vrot.slane %v4854_v43, %v6200_v37  ;;  %v2896_v48 = vrot.slane %v4854_v43, %v6204_v34  ;;  %v4856_v63 = vld [vmem:[%s2123_s30 + $0x40] sm:$0xff]  ;;  %s4616_s30 = scalar_lea.vmem [#allocation3], %s6263_s23 }
 0x163   : >> { %v2907_v39 = vrot.slane %v4854_v43, %v6208_v51  ;;  %v2918_v56 = vrot.slane %v4854_v43, %v6212_v61  ;;  %v2127_v43 = vcombine.high %v2120_v42, %v2120_v42  ;;  %v3079_v57 = vrot.slane %v4856_v63, %v6200_v37 }
 0x164   : >> { %v2134_v27 = vrot.slane %v2120_v42, %v6233_v59 }
 0x166   : >> { %2295 = vbcast.lane.b32.xlu1 %v2289_v18, 264  ;;  %2291 = vbcast.lane.b32.xlu0 %v2289_v18, 256  ;;  %v2150_v46 = vrot.slane %v2134_v27, %v6233_v59  ;;  %v2142_v8 = vcombine.high %v2134_v27, %v2134_v27  ;;  %v3035_v18 = vrot.slane %v4856_v63, %v6184_v40 }
 0x167   : >> { %v2141_v27 = vrot.slane %v2127_v43, %v6233_v59 }
 0x168   : >> { %v2179_v50 = vrot.slane %v2150_v46, %v6184_v40  ;;  %v2164_v35 = vrot.slane %v2142_v8, %v6233_v59 }
 0x16a   : >> { %2306 = vbcast.lane.b32.xlu1 %v2300_v47, 264  ;;  %2302 = vbcast.lane.b32.xlu0 %v2300_v47, 256  ;;  %v2216_v45 = vmul.f32 %v2179_v50, %v7524_v1  ;;  %v2183_v47 = vrot.slane %v2164_v35, %v6184_v40  ;;  %v2174_v31 = vcombine.high %v2164_v35, %v2164_v35 }
 0x16b   : >> { %v3090_v35 = vrot.slane %v4856_v63, %v6204_v34 }
 0x16c   : >> { %v2218_v0 = vmul.f32 %v2183_v47, %v7524_v1 }
 0x16e   : >> { %2317 = vbcast.lane.b32.xlu1 %v2311_v55, 264  ;;  %2313 = vbcast.lane.b32.xlu0 %v2311_v55, 256  ;;  %v2217_v55 = vmul.f32 %v2179_v50, %v7525_v2 }
 0x172   : >> { %2328 = vbcast.lane.b32.xlu1 %v2322_v60, 264  ;;  %2324 = vbcast.lane.b32.xlu0 %v2322_v60, 256  ;;  %v2232_v60 = vmul.f32 1.442695, %v2216_v45  ;;  %v3101_v45 = vrot.slane %v4856_v63, %v6208_v51 }
 0x174   : >> { %5298 = vpow2.f32 %v2232_v60 }
 0x176   : >> { %2339 = vbcast.lane.b32.xlu1 %v2333_v32, 264  ;;  %2335 = vbcast.lane.b32.xlu0 %v2333_v32, 256  ;;  %v3046_v32 = vrot.slane %v4856_v63, %v6187_v41 }
 0x17a   : >> { %2350 = vbcast.lane.b32.xlu1 %v2344_v62, 264  ;;  %2346 = vbcast.lane.b32.xlu0 %v2344_v62, 256  ;;  %v2172_v62 = vcombine.high %v2150_v46, %v2150_v46 }
 0x17e   : >> { %2467 = vbcast.lane.b32.xlu1 %v2461_v14, 264  ;;  %2463 = vbcast.lane.b32.xlu0 %v2461_v14, 256  ;;  %v2118_v14 = vld [vmem:[%s2117_s16] sm:$0xff]  ;;  %s4614_s16 = scalar_lea.vmem [#allocation2], %s6263_s23 }
 0x17f   : >> { %v6271_v8 = vmul.f32 %v7536_v10, %v2118_v14 }
 0x181   : >> { %7537 = vst [vmem:[#allocation28_spill] sm:$0xff] %v6271_v8  ;;  %v5299_v50 = vpop.eup %5298 }
 0x182   : >> { %2478 = vbcast.lane.b32.xlu1 %v2472_v52, 264  ;;  %2474 = vbcast.lane.b32.xlu0 %v2472_v52, 256  ;;  %v2234_v52 = vmul.f32 1.442695, %v2217_v55 }
 0x184   : >> { %5300 = vpow2.f32 %v2234_v52 }
 0x186   : >> { %2489 = vbcast.lane.b32.xlu1 %v2483_v44, 264  ;;  %2485 = vbcast.lane.b32.xlu0 %v2483_v44, 256  ;;  %v2219_v44 = vmul.f32 %v2183_v47, %v7525_v2  ;;  %v6279_v47 = vld [vmem:[%s4616_s30 + $0x80] sm:$0xff] }
 0x187   : >> { %v6295_v52 = vrot.slane %v6279_v47, %v6184_v40 }
 0x18a   : >> { %2500 = vbcast.lane.b32.xlu1 %v2494_v38, 264  ;;  %2496 = vbcast.lane.b32.xlu0 %v2494_v38, 256  ;;  %v3057_v38 = vrot.slane %v4856_v63, %v6192_v54 }
 0x18e   : >> { %2511 = vbcast.lane.b32.xlu1 %v2505_v15, 264  ;;  %2507 = vbcast.lane.b32.xlu0 %v2505_v15, 256  ;;  %v2125_v15 = vmul.f32 %v2120_v42, %v2118_v14 }
 0x190   : >> { %v2360_v33 = vrot.slane %v2125_v15, %v6233_v59 }
 0x192   : >> { %2522 = vbcast.lane.b32.xlu1 %v2516_v49, 264  ;;  %2518 = vbcast.lane.b32.xlu0 %v2516_v49, 256  ;;  %v2187_v49 = vrot.slane %v2172_v62, %v6184_v40  ;;  %v6286_v62 = vld [vmem:[%s2119_s19 + $0x40] sm:$0xff]  ;;  %s2690_s19 = scalar_lea.vmem %s5730_s29, %s6176_s22 }
 0x196   : >> { %2533 = vbcast.lane.b32.xlu1 %v2527_v17, 264  ;;  %2529 = vbcast.lane.b32.xlu0 %v2527_v17, 256  ;;  %v2236_v17 = vmul.f32 1.442695, %v2218_v0  ;;  %v6289_v0 = vrot.slane %v2141_v27, %v6233_v59 }
 0x198   : >> { %5302 = vpow2.f32 %v2236_v17 }
 0x19a   : >> { %2544 = vbcast.lane.b32.xlu1 %v2538_v19, 264  ;;  %2540 = vbcast.lane.b32.xlu0 %v2538_v19, 256  ;;  %v3068_v19 = vrot.slane %v4856_v63, %v6196_v53 }
 0x19e   : >> { %2847 = vbcast.lane.b32.xlu1 %v2841_v58, 264  ;;  %2843 = vbcast.lane.b32.xlu0 %v2841_v58, 256  ;;  %v2238_v58 = vmul.f32 1.442695, %v2219_v44  ;;  %v6299_v44 = vrot.slane %v6279_v47, %v6187_v41 }
 0x1a0   : >> { %5304 = vpow2.f32 %v2238_v58 }
 0x1a2   : >> { %2858 = vbcast.lane.b32.xlu1 %v2852_v30, 264  ;;  %2854 = vbcast.lane.b32.xlu0 %v2852_v30, 256  ;;  %v2221_v30 = vmul.f32 %v2187_v49, %v7525_v2 }
 0x1a4   : >> { %v2242_v42 = vmul.f32 1.442695, %v2221_v30  ;;  %v6307_v30 = vrot.slane %v6279_v47, %v6192_v54 }
 0x1a6   : >> { %2869 = vbcast.lane.b32.xlu1 %v2863_v36, 264  ;;  %2865 = vbcast.lane.b32.xlu0 %v2863_v36, 256  ;;  %v2220_v36 = vmul.f32 %v2187_v49, %v7524_v1  ;;  %5306 = vpow2.f32 %v2242_v42  ;;  %v5301_v49 = vpop.eup %5300  ;;  %v2173_v42 = vcombine.high %v6289_v0, %v6289_v0 }
 0x1a8   : >> { %v2240_v46 = vmul.f32 1.442695, %v2220_v36 }
 0x1aa   : >> { %2880 = vbcast.lane.b32.xlu1 %v2874_v16, 264  ;;  %2876 = vbcast.lane.b32.xlu0 %v2874_v16, 256  ;;  %v2376_v16 = vrot.slane %v2360_v33, %v6233_v59  ;;  %5308 = vpow2.f32 %v2240_v46  ;;  %v5303_v46 = vpop.eup %5302 }
 0x1ac   : >> { %v2405_v55 = vrot.slane %v2376_v16, %v6184_v40  ;;  %v2398_v58 = vcombine.high %v2376_v16, %v2376_v16  ;;  %v2195_v16 = vrot.slane %v6289_v0, %v6184_v40 }
 0x1ae   : >> { %2891 = vbcast.lane.b32.xlu1 %v2885_v20, 264  ;;  %2887 = vbcast.lane.b32.xlu0 %v2885_v20, 256  ;;  %v2353_v20 = vcombine.high %v2125_v15, %v2125_v15  ;;  %v2546_v15 = vmul.f32 %v5518_v21, %v5299_v50  ;;  %v6322_v50 = vrot.slane %v6279_v47, %v6212_v61 }
 0x1af   : >> { %v2413_v0 = vrot.slane %v2398_v58, %v6184_v40 }
 0x1b0   : >> { %v2367_v60 = vrot.slane %v2353_v20, %v6233_v59  ;;  %v6312_v20 = vld [vmem:[%s4616_s30 + $0xc0] sm:$0xff]  ;;  %s4618_s30 = scalar_lea.vmem [#allocation4], %s6263_s23 }
 0x1b2   : >> { %2902 = vbcast.lane.b32.xlu1 %v2896_v48, 264  ;;  %2898 = vbcast.lane.b32.xlu0 %v2896_v48, 256  ;;  %v2368_v48 = vcombine.high %v2360_v33, %v2360_v33 }
 0x1b6   : >> { %2913 = vbcast.lane.b32.xlu1 %v2907_v39, 264  ;;  %2909 = vbcast.lane.b32.xlu0 %v2907_v39, 256  ;;  %v2191_v39 = vrot.slane %v2174_v31, %v6184_v40  ;;  %v2708_v31 = vrot.slane %v6286_v62, %v6233_v59 }
 0x1b8   : >> { %v2222_v14 = vmul.f32 %v2191_v39, %v7524_v1 }
 0x1ba   : >> { %2924 = vbcast.lane.b32.xlu1 %v2918_v56, 264  ;;  %2920 = vbcast.lane.b32.xlu0 %v2918_v56, 256  ;;  %v2143_v56 = vcombine.high %v2141_v27, %v2141_v27 }
 0x1be   : >> { %3041 = vbcast.lane.b32.xlu1 %v3035_v18, 264  ;;  %3037 = vbcast.lane.b32.xlu0 %v3035_v18, 256  ;;  %v6276_v18 = vrot.slane %v4856_v63, %v6212_v61  ;;  %v2390_v63 = vrot.slane %v2368_v48, %v6233_v59  ;;  %v2244_v48 = vmul.f32 1.442695, %v2222_v14  ;;  %v6334_v14 = vrot.slane %v2708_v31, %v6233_v59 }
 0x1c0   : >> { %v2400_v36 = vcombine.high %v2390_v63, %v2390_v63  ;;  %v2409_v27 = vrot.slane %v2390_v63, %v6184_v40  ;;  %v6330_v63 = vrot.slane %v6312_v20, %v6212_v61 }
 0x1c2   : >> { %3052 = vbcast.lane.b32.xlu1 %v3046_v32, 264  ;;  %3048 = vbcast.lane.b32.xlu0 %v3046_v32, 256  ;;  %v2223_v32 = vmul.f32 %v2191_v39, %v7525_v2  ;;  %v6337_v10 = vrot.slane %v2400_v36, %v6184_v40 }
 0x1c4   : >> { %v2246_v21 = vmul.f32 1.442695, %v2223_v32 }
 0x1c6   : >> { %3063 = vbcast.lane.b32.xlu1 %v3057_v38, 264  ;;  %3059 = vbcast.lane.b32.xlu0 %v3057_v38, 256  ;;  %v2369_v38 = vcombine.high %v2367_v60, %v2367_v60  ;;  %5310 = vpow2.f32 %v2246_v21 }
 0x1c7   : >> { %5312 = vpow2.f32 %v2244_v48 }
 0x1c8   : >> { %v2397_v39 = vrot.slane %v2369_v38, %v6233_v59 }
 0x1ca   : >> { %3074 = vbcast.lane.b32.xlu1 %v3068_v19, 264  ;;  %3070 = vbcast.lane.b32.xlu0 %v3068_v19, 256  ;;  %v6303_v19 = vrot.slane %v2143_v56, %v6233_v59  ;;  %v2547_v56 = vmul.f32 %v5514_v22, %v5301_v49  ;;  %v6345_v13 = vrot.slane %v2397_v39, %v6184_v40 }
 0x1cb   : >> { %v2401_v29 = vcombine.high %v2397_v39, %v2397_v39 }
 0x1cc   : >> { %v2199_v36 = vrot.slane %v6303_v19, %v6184_v40 }
 0x1cd   : >> { %v6376_v61 = vrot.slane %v2401_v29, %v6184_v40 }
 0x1ce   : >> { %3085 = vbcast.lane.b32.xlu1 %v3079_v57, 264  ;;  %3081 = vbcast.lane.b32.xlu0 %v3079_v57, 256  ;;  %v2383_v57 = vrot.slane %v2367_v60, %v6233_v59 }
 0x1d0   : >> { %v2281_v17 = vpop.permute.xlu1 %2280  ;;  %v2270_v43 = vpop.permute.xlu0 %2269  ;;  %v6340_v22 = vrot.slane %v2383_v57, %v6184_v40  ;;  %v2399_v49 = vcombine.high %v2383_v57, %v2383_v57  ;;  %v2753_v57 = vrot.slane %v6334_v14, %v6184_v40 }
 0x1d1   : >> { %v2442_v33 = vmul.f32 %v2405_v55, %v2270_v43  ;;  %v2444_v12 = vmul.f32 %v2409_v27, %v2281_v17  ;;  %v6361_v17 = vrot.slane %v6279_v47, %v6208_v51 }
 0x1d2   : >> { %3096 = vbcast.lane.b32.xlu1 %v3090_v35, 264  ;;  %3092 = vbcast.lane.b32.xlu0 %v3090_v35, 256  ;;  %v2225_v35 = vmul.f32 %v2195_v16, %v7525_v2 }
 0x1d3   : >> { %v6325_v60 = vadd.f32 %v2546_v15, %v2442_v33  ;;  %v5305_v15 = vpop.eup %5304  ;;  %v2224_v33 = vmul.f32 %v2195_v16, %v7524_v1 }
 0x1d4   : >> { %v2285_v32 = vpop.permute.xlu1 %2284  ;;  %v2274_v43 = vpop.permute.xlu0 %2273 }
 0x1d5   : >> { %v2443_v38 = vmul.f32 %v2405_v55, %v2274_v43  ;;  %v2561_v58 = vmul.f32 %v5303_v46, %v6325_v60  ;;  %v2716_v43 = vcombine.high %v2708_v31, %v2708_v31  ;;  %v2445_v48 = vmul.f32 %v2409_v27, %v2285_v32 }
 0x1d6   : >> { %3107 = vbcast.lane.b32.xlu1 %v3101_v45, 264  ;;  %3103 = vbcast.lane.b32.xlu0 %v3101_v45, 256  ;;  %v2250_v45 = vmul.f32 1.442695, %v2225_v35  ;;  %v2227_v46 = vmul.f32 %v2199_v36, %v7525_v2  ;;  %v2248_v39 = vmul.f32 1.442695, %v2224_v33  ;;  %v2203_v27 = vrot.slane %v2173_v42, %v6184_v40 }
 0x1d7   : >> { %v6347_v55 = vadd.f32 %v2547_v56, %v2443_v38  ;;  %v2175_v56 = vcombine.high %v6303_v19, %v6303_v19  ;;  %v5307_v38 = vpop.eup %5306  ;;  %v6363_v31 = vadd.f32 %v2561_v58, %v2444_v12  ;;  %v6367_v35 = vrot.slane %v2399_v49, %v6184_v40 }
 0x1d8   : >> { %v2296_v21 = vpop.permute.xlu1 %2295  ;;  %v2292_v28 = vpop.permute.xlu0 %2291  ;;  %v2226_v19 = vmul.f32 %v2199_v36, %v7524_v1  ;;  %v2738_v25 = vrot.slane %v2716_v43, %v6233_v59  ;;  %v6380_v12 = vrot.slane %v6312_v20, %v6208_v51  ;;  %v2229_v42 = vmul.f32 %v2203_v27, %v7525_v2 }
 0x1d9   : >> { %v2562_v16 = vmul.f32 %v5305_v15, %v6347_v55  ;;  %v5309_v32 = vpop.eup %5308  ;;  %v2790_v49 = vmul.f32 %v2753_v57, %v7523_v3  ;;  %5314 = vpow2.f32 %v2250_v45  ;;  %v2254_v58 = vmul.f32 1.442695, %v2227_v46 }
 0x1da   : >> { %3118 = vbcast.lane.b32.xlu1 %v6276_v18, 264  ;;  %3114 = vbcast.lane.b32.xlu0 %v6276_v18, 256  ;;  %v2207_v33 = vrot.slane %v2175_v56, %v6184_v40  ;;  %v2791_v36 = vmul.f32 %v2753_v57, %v7522_v4  ;;  %v2446_v43 = vmul.f32 %v2413_v0, %v2292_v28  ;;  %5316 = vpow2.f32 %v2248_v39  ;;  %v5311_v7 = vpop.eup %5310 }
 0x1db   : >> { %v6369_v15 = vadd.f32 %v2562_v16, %v2445_v48  ;;  %v2576_v48 = vmul.f32 %v5309_v32, %v6363_v31  ;;  %v2252_v16 = vmul.f32 1.442695, %v2226_v19  ;;  %v2228_v51 = vmul.f32 %v2203_v27, %v7524_v1 }
 0x1dc   : >> { %v6373_v18 = vpop.permute.xlu1 %2306  ;;  %v2303_v26 = vpop.permute.xlu0 %2302  ;;  %v2746_v45 = vcombine.high %v6334_v14, %v6334_v14  ;;  %v2757_v46 = vrot.slane %v2738_v25, %v6184_v40  ;;  %v2447_v57 = vmul.f32 %v2413_v0, %v2296_v21  ;;  %v2806_v39 = vmul.f32 1.442695, %v2790_v49 }
 0x1dd   : >> { %v2577_v29 = vmul.f32 %v5307_v38, %v6369_v15  ;;  %v2231_v38 = vmul.f32 %v2207_v33, %v7525_v2  ;;  %v2258_v32 = vmul.f32 1.442695, %v2229_v42  ;;  %v2701_v27 = vcombine.high %v6286_v62, %v6286_v62  ;;  %v6414_v2 = vld [vmem:[%s2690_s19] sm:$0xff]  ;;  %v5313_v42 = vpop.eup %5312  ;;  %s6700_s19 = scalar_lea.vmem %s5774_s20, %s6263_s23 }
 0x1de   : >> { %3414 = vbcast.lane.b32.xlu1 %v6295_v52, 264  ;;  %3410 = vbcast.lane.b32.xlu0 %v6295_v52, 256  ;;  %v6402_v52 = vrot.slane %v6279_v47, %v6204_v34  ;;  %v2748_v19 = vcombine.high %v2738_v25, %v2738_v25  ;;  %v2808_v14 = vmul.f32 1.442695, %v2791_v36  ;;  %v6411_v21 = vadd.f32 %v2576_v48, %v2446_v43 }
 0x1df   : >> { %v6409_v0 = vadd.f32 %v2577_v29, %v2447_v57  ;;  %5318 = vpow2.f32 %v2254_v58  ;;  %v2230_v9 = vmul.f32 %v2207_v33, %v7524_v1  ;;  %7538 = vst [vmem:[#allocation29_spill] sm:$0xff] %v6414_v2  ;;  %v2256_v49 = vmul.f32 1.442695, %v2228_v51 }
 0x1e0   : >> { %v6396_v28 = vpop.permute.xlu1 %2317  ;;  %v6398_v56 = vpop.permute.xlu0 %2313  ;;  %5320 = vpow2.f32 %v2252_v16  ;;  %v2761_v25 = vrot.slane %v2746_v45, %v6184_v40  ;;  %v2793_v36 = vmul.f32 %v2757_v46, %v7522_v4  ;;  %v2262_v58 = vmul.f32 1.442695, %v2231_v38 }
 0x1e1   : >> { %5322 = vpow2.f32 %v2806_v39  ;;  %v2792_v33 = vmul.f32 %v2757_v46, %v7523_v3  ;;  %v6429_v43 = vmul.f32 %v6286_v62, %v6414_v2  ;;  %v2715_v51 = vrot.slane %v2701_v27, %v6233_v59 }
 0x1e2   : >> { %3425 = vbcast.lane.b32.xlu1 %v6299_v44, 264  ;;  %3421 = vbcast.lane.b32.xlu0 %v6299_v44, 256  ;;  %v6424_v44 = vrot.slane %v6312_v20, %v6204_v34  ;;  %v2765_v29 = vrot.slane %v2748_v19, %v6184_v40  ;;  %5324 = vpow2.f32 %v2808_v14  ;;  %v2448_v48 = vmul.f32 %v6337_v10, %v2303_v26 }
 0x1e3   : >> { %v2592_v16 = vmul.f32 %v5311_v7, %v6409_v0  ;;  %v2591_v45 = vmul.f32 %v5313_v42, %v6411_v21  ;;  %v2260_v46 = vmul.f32 1.442695, %v2230_v9  ;;  %5326 = vpow2.f32 %v2258_v32 }
 0x1e4   : >> { %v6418_v11 = vpop.permute.xlu1 %2328  ;;  %v6420_v5 = vpop.permute.xlu0 %2324  ;;  %v2717_v57 = vcombine.high %v2715_v51, %v2715_v51  ;;  %v2812_v62 = vmul.f32 1.442695, %v2793_v36  ;;  %v2795_v38 = vmul.f32 %v2761_v25, %v7522_v4  ;;  %v2449_v39 = vmul.f32 %v6337_v10, %v6373_v18 }
 0x1e5   : >> { %5328 = vpow2.f32 %v2256_v49  ;;  %v2810_v19 = vmul.f32 1.442695, %v2792_v33  ;;  %v6447_v7 = vrot.slane %v2715_v51, %v6233_v59  ;;  %v2934_v9 = vrot.slane %v6429_v43, %v6233_v59 }
 0x1e6   : >> { %3436 = vbcast.lane.b32.xlu1 %v6307_v30, 264  ;;  %3432 = vbcast.lane.b32.xlu0 %v6307_v30, 256  ;;  %v2794_v30 = vmul.f32 %v2761_v25, %v7523_v3  ;;  %5330 = vpow2.f32 %v2262_v58  ;;  %v2797_v32 = vmul.f32 %v2765_v29, %v7522_v4  ;;  %v5315_v14 = vpop.eup %5314  ;;  %v6454_v10 = vadd.f32 %v2592_v16, %v2449_v39 }
 0x1e7   : >> { %v6456_v18 = vadd.f32 %v2591_v45, %v2448_v48  ;;  %v6460_v42 = vrot.slane %v6279_v47, %v6200_v37  ;;  %5332 = vpow2.f32 %v2260_v46  ;;  %v5317_v49 = vpop.eup %5316  ;;  %v6463_v25 = vrot.slane %v2717_v57, %v6233_v59 }
 0x1e8   : >> { %v6441_v27 = vpop.permute.xlu1 %2339  ;;  %v6443_v26 = vpop.permute.xlu0 %2335  ;;  %5334 = vpow2.f32 %v2812_v62  ;;  %v2816_v36 = vmul.f32 1.442695, %v2795_v38  ;;  %v2796_v58 = vmul.f32 %v2765_v29, %v7523_v3  ;;  %v6472_v51 = vrot.slane %v6312_v20, %v6200_v37 }
 0x1e9   : >> { %v2942_v48 = vcombine.high %v2934_v9, %v2934_v9  ;;  %5336 = vpow2.f32 %v2810_v19  ;;  %v2814_v16 = vmul.f32 1.442695, %v2794_v30  ;;  %v2769_v45 = vrot.slane %v6447_v7, %v6184_v40 }
 0x1ea   : >> { %3491 = vbcast.lane.b32.xlu1 %v6322_v50, 264  ;;  %3487 = vbcast.lane.b32.xlu0 %v6322_v50, 256  ;;  %v6477_v46 = vrot.slane %v2934_v9, %v6233_v59  ;;  %v2820_v57 = vmul.f32 1.442695, %v2797_v32  ;;  %v2450_v29 = vmul.f32 %v6340_v22, %v6398_v56  ;;  %v2607_v62 = vmul.f32 %v5315_v14, %v6454_v10 }
 0x1eb   : >> { %v2606_v38 = vmul.f32 %v5317_v49, %v6456_v18  ;;  %v6487_v19 = vrot.slane %v6279_v47, %v6196_v53  ;;  %v2773_v30 = vrot.slane %v6463_v25, %v6184_v40  ;;  %5338 = vpow2.f32 %v2816_v36 }
 0x1ec   : >> { %v6466_v33 = vpop.permute.xlu1 %2350  ;;  %v6468_v50 = vpop.permute.xlu0 %2346  ;;  %v2818_v9 = vmul.f32 1.442695, %v2796_v58  ;;  %v2451_v56 = vmul.f32 %v6340_v22, %v6396_v28  ;;  %v6495_v14 = vrot.slane %v6312_v20, %v6196_v53  ;;  %v6498_v49 = vrot.slane %v2942_v48, %v6233_v59 }
 0x1ed   : >> { %v5319_v39 = vpop.eup %5318  ;;  %5340 = vpow2.f32 %v2814_v16  ;;  %v6502_v34 = vrot.slane %v6477_v46, %v6184_v40  ;;  %v6506_v36 = vrot.slane %v6312_v20, %v6192_v54  ;;  %v6512_v58 = vadd.f32 %v2606_v38, %v2450_v29 }
 0x1ee   : >> { %4058 = vbcast.lane.b32.xlu1 %v6330_v63, 264  ;;  %4054 = vbcast.lane.b32.xlu0 %v6330_v63, 256  ;;  %v5321_v32 = vpop.eup %5320  ;;  %v6510_v28 = vadd.f32 %v2607_v62, %v2451_v56  ;;  %5342 = vpow2.f32 %v2820_v57  ;;  %v2799_v48 = vmul.f32 %v2769_v45, %v7522_v4  ;;  %v2747_v16 = vcombine.high %v6447_v7, %v6447_v7 }
 0x1ef   : >> { %v5323_v47 = vpop.eup %5322  ;;  %5344 = vpow2.f32 %v2818_v9  ;;  %v2798_v37 = vmul.f32 %v2769_v45, %v7523_v3  ;;  %v2801_v53 = vmul.f32 %v2773_v30, %v7522_v4  ;;  %v6523_v57 = vrot.slane %v6498_v49, %v6184_v40 }
 0x1f0   : >> { %v2468_v1 = vpop.permute.xlu1 %2467  ;;  %v2464_v63 = vpop.permute.xlu0 %2463  ;;  %v6526_v29 = vmul.f32 %v5510_v23, %v5323_v47  ;;  %v6532_v9 = vrot.slane %v6312_v20, %v6187_v41  ;;  %v2622_v23 = vmul.f32 %v5319_v39, %v6510_v28  ;;  %v2777_v47 = vrot.slane %v2747_v16, %v6184_v40 }
 0x1f1   : >> { %v5325_v22 = vpop.eup %5324  ;;  %v2551_v2 = vmul.f32 %v6347_v55, %v2468_v1  ;;  %v2452_v55 = vmul.f32 %v6345_v13, %v6420_v5  ;;  %v2453_v5 = vmul.f32 %v6345_v13, %v6418_v11  ;;  %v2800_v6 = vmul.f32 %v2773_v30, %v7523_v3 }
 0x1f2   : >> { %3480 = vbcast.lane.b32.xlu1 %v6361_v17, 264  ;;  %3476 = vbcast.lane.b32.xlu0 %v6361_v17, 256  ;;  %v5327_v54 = vpop.eup %5326  ;;  %v2550_v17 = vmul.f32 %v6325_v60, %v2464_v63  ;;  %v6535_v1 = vmul.f32 %v5506_v24, %v5325_v22  ;;  %v2972_v24 = vcombine.high %v6477_v46, %v6477_v46  ;;  %v2822_v22 = vmul.f32 1.442695, %v2798_v37 }
 0x1f3   : >> { %v5329_v7 = vpop.eup %5328  ;;  %v2749_v13 = vcombine.high %v6463_v25, %v6463_v25  ;;  %v2826_v25 = vmul.f32 1.442695, %v2800_v6 }
 0x1f4   : >> { %v2479_v62 = vpop.permute.xlu1 %2478  ;;  %v2475_v56 = vpop.permute.xlu0 %2474  ;;  %v2552_v39 = vsel %vm687_vm0, %v2550_v17, 0.0 }
 0x1f5   : >> { %v2566_v38 = vmul.f32 %v6369_v15, %v2479_v62  ;;  %v2565_v45 = vmul.f32 %v6363_v31, %v2475_v56  ;;  %v6537_v60 = vpop.eup %5330  ;;  %v2621_v31 = vmul.f32 %v5321_v32, %v6512_v58  ;;  %v2824_v15 = vmul.f32 1.442695, %v2799_v48 }
 0x1f6   : >> { %4047 = vbcast.lane.b32.xlu1 %v6380_v12, 264  ;;  %4043 = vbcast.lane.b32.xlu0 %v6380_v12, 256  ;;  %v6545_v63 = vpop.eup %5332  ;;  %v2828_v62 = vmul.f32 1.442695, %v2801_v53  ;;  %v2553_v12 = vsel %vm687_vm0, %v2551_v2, 0.0  ;;  %v2624_v2 = vadd.f32 %v2622_v23, %v2453_v5  ;;  %v2454_v5 = vmul.f32 %v6367_v35, %v6443_v26 }
 0x1f7   : >> { %v6550_v56 = vpop.eup %5334  ;;  %v2568_v16 = vsel %vm687_vm0, %v2566_v38, 0.0  ;;  %v2567_v37 = vsel %vm687_vm0, %v2565_v45, 0.0  ;;  %v2623_v11 = vadd.f32 %v2621_v31, %v2452_v55  ;;  %5346 = vpow2.f32 %v2824_v15 }
 0x1f8   : >> { %v2490_v32 = vpop.permute.xlu1 %2489  ;;  %v2486_v48 = vpop.permute.xlu0 %2485  ;;  %v2554_v30 = vadd.f32 %v2553_v12, %v2552_v39  ;;  %v6570_v45 = vrot.slane %v2972_v24, %v6184_v40  ;;  %5348 = vpow2.f32 %v2822_v22  ;;  %v2803_v24 = vmul.f32 %v2777_v47, %v7522_v4 }
 0x1f9   : >> { %v6557_v8 = vpop.eup %5336  ;;  %v2581_v53 = vmul.f32 %v6409_v0, %v2490_v32  ;;  %v2580_v46 = vmul.f32 %v6411_v21, %v2486_v48  ;;  %v2569_v21 = vadd.f32 %v2568_v16, %v2567_v37  ;;  %v2636_v12 = vmul.f32 %v5329_v7, %v2623_v11 }
 0x1fa   : >> { %3469 = vbcast.lane.b32.xlu1 %v6402_v52, 264  ;;  %3465 = vbcast.lane.b32.xlu0 %v6402_v52, 256  ;;  %v6572_v0 = vpop.eup %5338  ;;  %v6576_v52 = vrot.slane %v6312_v20, %v6184_v40  ;;  %v2637_v20 = vmul.f32 %v5327_v54, %v2624_v2  ;;  %5350 = vpow2.f32 %v2828_v62  ;;  %v2555_v22 = vrot.slane %v2554_v30, 4 }
 0x1fb   : >> { %v2583_v17 = vsel %vm687_vm0, %v2581_v53, 0.0  ;;  %v2582_v38 = vsel %vm687_vm0, %v2580_v46, 0.0  ;;  %v6578_v55 = vpop.eup %5340  ;;  %v6592_v39 = vmul.f32 %v2777_v47, %v7523_v3  ;;  %v2570_v54 = vrot.slane %v2569_v21, 4 }
 0x1fc   : >> { %v2501_v32 = vpop.permute.xlu1 %2500  ;;  %v2497_v48 = vpop.permute.xlu0 %2496  ;;  %v2584_v23 = vadd.f32 %v2583_v17, %v2582_v38  ;;  %v2974_v37 = vcombine.high %v6498_v49, %v6498_v49  ;;  %v2927_v47 = vcombine.high %v6429_v43, %v6429_v43  ;;  %v6607_v38 = vld [vmem:[%s4614_s16 + $0x80] sm:$0xff]  ;;  %5352 = vpow2.f32 %v2826_v25 }
 0x1fd   : >> { %v2596_v31 = vmul.f32 %v6454_v10, %v2501_v32  ;;  %v2595_v15 = vmul.f32 %v6456_v18, %v2497_v48  ;;  %v6587_v6 = vpop.eup %5342  ;;  %v2638_v32 = vadd.f32 %v2636_v12, %v2454_v5  ;;  %v2556_v49 = vadd.f32 %v2555_v22, %v2554_v30 }
 0x1fe   : >> { %4036 = vbcast.lane.b32.xlu1 %v6424_v44, 264  ;;  %4032 = vbcast.lane.b32.xlu0 %v6424_v44, 256  ;;  %v6594_v26 = vpop.eup %5344  ;;  %v2455_v44 = vmul.f32 %v6367_v35, %v6441_v27  ;;  %v2585_v53 = vrot.slane %v2584_v23, 4  ;;  %v6614_v48 = vrot.slane %v2749_v13, %v6184_v40  ;;  %v2571_v43 = vadd.f32 %v2570_v54, %v2569_v21 }
 0x1ff   : >> { %v2598_v10 = vsel %vm687_vm0, %v2596_v31, 0.0  ;;  %v2597_v18 = vsel %vm687_vm0, %v2595_v15, 0.0  ;;  %v2456_v12 = vmul.f32 %v6376_v61, %v6468_v50  ;;  %v2651_v21 = vmul.f32 %v6545_v63, %v2638_v32 }
 0x200   : >> { %v2599_v7 = vadd.f32 %v2598_v10, %v2597_v18  ;;  %v2512_v62 = vpop.permute.xlu1 %2511  ;;  %v2508_v16 = vpop.permute.xlu0 %2507  ;;  %v2639_v27 = vadd.f32 %v2637_v20, %v2455_v44  ;;  %v6616_v18 = vmul.f32 1.442695, %v2803_v24  ;;  %v2586_v20 = vadd.f32 %v2585_v53, %v2584_v23 }
 0x201   : >> { %v2611_v46 = vmul.f32 %v6510_v28, %v2512_v62  ;;  %v2610_v17 = vmul.f32 %v6512_v58, %v2508_v16  ;;  %v2557_v44 = vrot.slane %v2556_v49, 2  ;;  %v2457_v50 = vmul.f32 %v6376_v61, %v6466_v33 }
 0x202   : >> { %v2600_v35 = vrot.slane %v2599_v7, 4  ;;  %3458 = vbcast.lane.b32.xlu1 %v6460_v42, 264  ;;  %3454 = vbcast.lane.b32.xlu0 %v6460_v42, 256  ;;  %v3268_v42 = vcombine.high %v6607_v38, %v6607_v38  ;;  %v2652_v13 = vmul.f32 %v6537_v60, %v2639_v27  ;;  %v2572_v54 = vrot.slane %v2571_v43, 2 }
 0x203   : >> { %v2613_v28 = vsel %vm687_vm0, %v2611_v46, 0.0  ;;  %v2612_v58 = vsel %vm687_vm0, %v2610_v17, 0.0  ;;  %v2587_v63 = vrot.slane %v2586_v20, 2  ;;  %v6641_v21 = vadd.f32 %v2651_v21, %v2456_v12  }
 0x204   : >> { %v2614_v31 = vadd.f32 %v2613_v28, %v2612_v58  ;;  %v2523_v15 = vpop.permute.xlu1 %2522  ;;  %v2519_v10 = vpop.permute.xlu0 %2518  ;;  %v2601_v5 = vadd.f32 %v2600_v35, %v2599_v7  ;;  %v6644_v33 = vrot.slane %v3268_v42, %v6233_v59  ;;  %v2558_v58 = vadd.f32 %v2557_v44, %v2556_v49 }
 0x205   : >> { %v2626_v25 = vmul.f32 %v2624_v2, %v2523_v15  ;;  %v2625_v30 = vmul.f32 %v2623_v11, %v2519_v10  ;;  %v6626_v24 = vpop.eup %5346  ;;  %v6631_v11 = vrot.slane %v2974_v37, %v6184_v40  ;;  %7541 = vst [vmem:[#allocation31_spill] sm:$0xff] %v6641_v21  ;;  %v7542_v61 = vmov %v6641_v21 }
 0x206   : >> { %v2615_v22 = vrot.slane %v2614_v31, 4  ;;  %4025 = vbcast.lane.b32.xlu1 %v6472_v51, 264  ;;  %4021 = vbcast.lane.b32.xlu0 %v6472_v51, 256  ;;  %v6635_v16 = vpop.eup %5348  ;;  %v2602_v53 = vrot.slane %v2601_v5, 2  ;;  %v2573_v10 = vadd.f32 %v2572_v54, %v2571_v43  ;;  %v2588_v42 = vadd.f32 %v2587_v63, %v2586_v20 }
 0x207   : >> { %v2628_v23 = vsel %vm687_vm0, %v2626_v25, 0.0  ;;  %v2627_v2 = vsel %vm687_vm0, %v2625_v30, 0.0  ;;  %v6646_v28 = vpop.eup %5350  ;;  %v3284_v43 = vcombine.high %v6644_v33, %v6644_v33  ;;  %v2559_v20 = vrot.slane %v2558_v58, 1 }
 0x208   : >> { %v2616_v7 = vadd.f32 %v2615_v22, %v2614_v31  ;;  %v2629_v51 = vadd.f32 %v2628_v23, %v2627_v2  ;;  %v2534_v62 = vpop.permute.xlu1 %2533  ;;  %v2530_v60 = vpop.permute.xlu0 %2529  ;;  %v6639_v22 = vadd.f32 %v2652_v13, %v2457_v50   ;;  %v2603_v13 = vadd.f32 %v2602_v53, %v2601_v5 }
 0x209   : >> { %v2641_v46 = vmul.f32 %v2639_v27, %v2534_v62  ;;  %v2640_v17 = vmul.f32 %v2638_v32, %v2530_v60  ;;  %v6652_v32 = vld [vmem:[%s4614_s16 + $0xc0] sm:$0xff]  ;;  %v6665_v2 = vpop.eup %5352  ;;  %5354 = vpow2.f32 %v6616_v18  ;;  %s7571_s16 = scalar_lea.vmem %s7474_s11, %s5688_s14 }
 0x20a   : >> { %v2630_v35 = vrot.slane %v2629_v51, 4  ;;  %3447 = vbcast.lane.b32.xlu1 %v6487_v19, 264  ;;  %3443 = vbcast.lane.b32.xlu0 %v6487_v19, 256  ;;  %7539 = vst [vmem:[#allocation30_spill] sm:$0xff] %v6639_v22  ;;  %v7540_v37 = vmov %v6639_v22  ;;  %v2617_v31 = vrot.slane %v2616_v7, 2  ;;  %v6655_v22 = vrot.slane %v2927_v47, %v6233_v59  ;;  %s3255_s25 = scalar_lea.vmem %s7571_s16, %s6176_s22 }
 0x20b   : >> { %v2643_v15 = vsel %vm687_vm0, %v2641_v46, 0.0  ;;  %v2642_v27 = vsel %vm687_vm0, %v2640_v17, 0.0  ;;  %v3835_v47 = vcombine.high %v6652_v32, %v6652_v32  ;;  %v2589_v46 = vrot.slane %v2588_v42, 1 }
 0x20c   : >> { %v2631_v19 = vadd.f32 %v2630_v35, %v2629_v51  ;;  %v2644_v25 = vadd.f32 %v2643_v15, %v2642_v27  ;;  %v2545_v30 = vpop.permute.xlu1 %2544  ;;  %v2541_v12 = vpop.permute.xlu0 %2540  ;;  %v2618_v5 = vadd.f32 %v2617_v31, %v2616_v7  ;;  %v2574_v51 = vrot.slane %v2573_v10, 1 }
 0x20d   : >> { %v2656_v49 = vmul.f32 %v7540_v37, %v2545_v30  ;;  %v2655_v21 = vmul.f32 %v7542_v61, %v2541_v12  ;;  %v2604_v17 = vrot.slane %v2603_v13, 1  ;;  %v6674_v27 = vrot.slane %v3284_v43, %v6233_v59 }
 0x20e   : >> { %v2632_v44 = vrot.slane %v2631_v19, 2  ;;  %v2645_v23 = vrot.slane %v2644_v25, 4  ;;  %4014 = vbcast.lane.b32.xlu1 %v6495_v14, 264  ;;  %4010 = vbcast.lane.b32.xlu0 %v6495_v14, 256  ;;  %v2619_v30 = vrot.slane %v2618_v5, 1 }
 0x20f   : >> { %v2658_v50 = vsel %vm687_vm0, %v2656_v49, 0.0  ;;  %v2657_v54 = vsel %vm687_vm0, %v2655_v21, 0.0  ;;  %v2575_v49 = vadd.f32 %v2574_v51, %v2573_v10  ;;  %v2805_v51 = vmul.f32 %v6614_v48, %v7522_v4 }
 0x210   : >> { %v2633_v62 = vadd.f32 %v2632_v44, %v2631_v19  ;;  %v2646_v60 = vadd.f32 %v2645_v23, %v2644_v25  ;;  %v2659_v14 = vadd.f32 %v2658_v50, %v2657_v54  ;;  %v2848_v63 = vpop.permute.xlu1 %2847  ;;  %v2844_v53 = vpop.permute.xlu0 %2843  ;;  %v6677_v19 = vrot.slane %v3835_v47, %v6233_v59 }
 0x211   : >> { %v3017_v35 = vmul.f32 %v6502_v34, %v2848_v63  ;;  %v3016_v15 = vmul.f32 %v6502_v34, %v2844_v53  ;;  %v2560_v25 = vadd.f32 %v2559_v20, %v2558_v58  ;;  %v2590_v47 = vadd.f32 %v2589_v46, %v2588_v42 }
 0x212   : >> { %v2647_v7 = vrot.slane %v2646_v60, 2  ;;  %v2660_v31 = vrot.slane %v2659_v14, 4  ;;  %4003 = vbcast.lane.b32.xlu1 %v6506_v36, 264  ;;  %3999 = vbcast.lane.b32.xlu0 %v6506_v36, 256  ;;  %v2634_v21 = vrot.slane %v2633_v62, 1  ;;  %v2605_v50 = vadd.f32 %v2604_v17, %v2603_v13  ;;  %v3258_v17 = vld [vmem:[%s6700_s19] sm:$0xff] }
 0x213   : >> { %v6680_v34 = vadd.f32 %v6535_v1, %v3017_v35  ;;  %v6683_v12 = vadd.f32 %v6526_v29, %v3016_v15  ;;  %v6690_v1 = vld [vmem:[%s4618_s30 + $0x80] sm:$0xff]  ;;  %v2830_v13 = vmul.f32 1.442695, %v6592_v39  ;;  %v2804_v39 = vmul.f32 %v6614_v48, %v7523_v3 }
 0x214   : >> { %v2648_v36 = vadd.f32 %v2647_v7, %v2646_v60  ;;  %v2661_v44 = vadd.f32 %v2660_v31, %v2659_v14  ;;  %v2859_v23 = vpop.permute.xlu1 %2858  ;;  %v2855_v43 = vpop.permute.xlu0 %2854  ;;  %v3316_v60 = vcombine.high %v6674_v27, %v6674_v27  ;;  %v2635_v14 = vadd.f32 %v2634_v21, %v2633_v62 }
 0x215   : >> { %v3019_v58 = vmul.f32 %v6523_v57, %v2859_v23  ;;  %v3018_v20 = vmul.f32 %v6523_v57, %v2855_v43  ;;  %v3136_v10 = vmul.f32 %v6550_v56, %v6680_v34  ;;  %v3135_v42 = vmul.f32 %v6557_v8, %v6683_v12 }
 0x216   : >> { %v2649_v29 = vrot.slane %v2648_v36, 1  ;;  %v2662_v54 = vrot.slane %v2661_v44, 2  ;;  %3992 = vbcast.lane.b32.xlu1 %v6532_v9, 264  ;;  %3988 = vbcast.lane.b32.xlu0 %v6532_v9, 256  ;;  %v2620_v57 = vadd.f32 %v2619_v30, %v2618_v5  ;;  %v2667_v9 = vsel %vm2666_vm1, %v2560_v25, %v2575_v49 }
 0x217   : >> { %v3602_v8 = vrot.slane %v6690_v1, %v6184_v40  ;;  %v2669_v46 = vsel %vm2668_vm2, %v2667_v9, %v2590_v47  ;;  %v3851_v35 = vcombine.high %v6677_v19, %v6677_v19  ;;  %v6719_v62 = vadd.f32 %v3136_v10, %v3019_v58  ;;  %v7546_v9 = vld [vmem:[#allocation11_spill] sm:$0xff] }
 0x218   : >> { %v2663_v63 = vadd.f32 %v2662_v54, %v2661_v44  ;;  %v2870_v56 = vpop.permute.xlu1 %2869  ;;  %v2866_v53 = vpop.permute.xlu0 %2865  ;;  %v2650_v5 = vadd.f32 %v2649_v29, %v2648_v36  ;;  %v2671_v15 = vsel %vm2670_vm3, %v2669_v46, %v2605_v50  ;;  %v6721_v31 = vadd.f32 %v3135_v42, %v3018_v20  ;;  %v6756_v42 = vld [vmem:[%s4618_s30 + $0xc0] sm:$0xff] }
 0x219   : >> { %v2673_v25 = vsel %vm2672_vm4, %v2671_v15, %v2620_v57  ;;  %v2957_v48 = vrot.slane %v6655_v22, %v6233_v59  ;;  %v2943_v30 = vcombine.high %v6655_v22, %v6655_v22  ;;  %v3348_v49 = vrot.slane %v3316_v60, %v6184_v40 }
 0x21a   : >> { %v2664_v7 = vrot.slane %v2663_v63, 1  ;;  %3981 = vbcast.lane.b32.xlu1 %v6576_v52, 264  ;;  %3977 = vbcast.lane.b32.xlu0 %v6576_v52, 256  ;;  %v2675_v21 = vsel %vm2674_vm5, %v2673_v25, %v2635_v14  ;;  %v3613_v23 = vrot.slane %v6690_v1, %v6187_v41  ;;  %v6733_v43 = vmul.f32 %v6607_v38, %v3258_v17  ;;  %v7548_v25 = vld [vmem:[#allocation29_spill] sm:$0xff] }
 0x21b   : >> { %v2677_v47 = vsel %vm2676_vm6, %v2675_v21, %v2650_v5  ;;  %v3021_v22 = vmul.f32 %v6570_v45, %v2870_v56  ;;  %v3020_v50 = vmul.f32 %v6570_v45, %v2866_v53  ;;  %v6739_v58 = vrot.slane %v3851_v35, %v6233_v59  ;;  %v7545_v45 = vld [vmem:[#allocation28_spill] sm:$0xff] }
 0x21c   : >> { %v2665_v36 = vadd.f32 %v2664_v7, %v2663_v63  ;;  %v2881_v52 = vpop.permute.xlu1 %2880  ;;  %v2877_v44 = vpop.permute.xlu0 %2876  ;;  %v3151_v29 = vmul.f32 %v6572_v0, %v6719_v62  ;;  %v3150_v54 = vmul.f32 %v6578_v55, %v6721_v31  ;;  %v2971_v57 = vrot.slane %v2943_v30, %v6233_v59  ;;  %v7547_v56 = vld [vmem:[#allocation10_spill] sm:$0xff]  ;;  %v7549_v30 = vld [vmem:[#allocation15_spill] sm:$0xff] }
 0x21d   : >> { %7543 = vst [vmem:[#allocation32_spill] sm:$0xff] %v6739_v58  ;;  %v6761_v60 = vrot.slane %v6644_v33, %v6233_v59  ;;  %v3372_v14 = vmul.f32 %v3348_v49, %v7546_v9  ;;  %v2973_v18 = vcombine.high %v2957_v48, %v2957_v48  ;;  %5356 = vpow2.f32 %v2830_v13  ;;  %v3825_v7 = vld [vmem:[%s6766_s15] sm:$0xff] }
 0x21e   : >> { %v2679_v20 = vsel %vm2678_vm7, %v2677_v47, %v2665_v36  ;;  %3608 = vbcast.lane.b32.xlu1 %v3602_v8, 264  ;;  %3604 = vbcast.lane.b32.xlu0 %v3602_v8, 256  ;;  %v3494_v63 = vcombine.high %v6733_v43, %v6733_v43  ;;  %v3371_v53 = vmul.f32 %v3348_v49, %v7547_v56  ;;  %v2836_v46 = vmul.f32 1.442695, %v2805_v51 }
 0x21f   : >> { %v2687_v10 = vadd.f32 %v7545_v45, %v2679_v20  ;;  %v6777_v33 = vrot.slane %v2957_v48, %v6184_v40  ;;  %v2975_v8 = vcombine.high %v2971_v57, %v2971_v57  ;;  %v3883_v5 = vcombine.high %v6739_v58, %v6739_v58 }
 0x220   : >> { %v6768_v0 = vpop.permute.xlu1 %2891  ;;  %v6770_v55 = vpop.permute.xlu0 %2887  ;;  %v4169_v13 = vrot.slane %v6756_v42, %v6184_v40  ;;  %v6783_v17 = vadd.f32 %v3151_v29, %v3021_v22  ;;  %v6785_v35 = vadd.f32 %v3150_v54, %v3020_v50  ;;  %v2834_v15 = vmul.f32 1.442695, %v2804_v39 }
 0x221   : >> { %2689 = vst.msk [vmem:[%s2688_s24] sm:$0xff] %vm687_vm0, %v2687_v10  ;;  %v6790_v48 = vmul.f32 %v7549_v30, %v7548_v25  ;;  %v6793_v51 = vrot.slane %v2971_v57, %v6184_v40  ;;  %v3314_v49 = vcombine.high %v6761_v60, %v6761_v60  ;;  %v3403_v21 = vmul.f32 1.442695, %v3372_v14  ;;  %s7581_s24 = scalar_lea.vmem %s7475_s12, %s5688_s14 }
 0x222   : >> { %3619 = vbcast.lane.b32.xlu1 %v3613_v23, 264  ;;  %3615 = vbcast.lane.b32.xlu0 %v3613_v23, 256  ;;  %v6802_v47 = vrot.slane %v2973_v18, %v6184_v40  ;;  %v4180_v39 = vrot.slane %v6756_v42, %v6187_v41  ;;  %v6807_v22 = vrot.slane %v3494_v63, %v6233_v59  ;;  %v3401_v50 = vmul.f32 1.442695, %v3371_v53  ;;  %v7554_v53 = vld [vmem:[#allocation23_spill] sm:$0xff]  ;;  %s3822_s30 = scalar_lea.vmem %s7581_s24, %s6263_s23 }
 0x223   : >> { %7550 = vst [vmem:[#allocation28_spill] sm:$0xff] %v6790_v48  ;;  %v3023_v20 = vmul.f32 %v6631_v11, %v2881_v52  ;;  %v6811_v29 = vrot.slane %v2975_v8, %v6184_v40  ;;  %v6814_v54 = vmul.f32 %v6652_v32, %v3825_v7  ;;  %v3915_v45 = vrot.slane %v3883_v5, %v6184_v40  ;;  %v7553_v52 = vld [vmem:[#allocation22_spill] sm:$0xff]  ;;  %v7555_v5 = vld [vmem:[#allocation13_spill] sm:$0xff] }
 0x224   : >> { %v6797_v36 = vpop.permute.xlu1 %2902  ;;  %v6799_v23 = vpop.permute.xlu0 %2898  ;;  %7551 = vst [vmem:[#allocation29_spill] sm:$0xff] %v6807_v22  ;;  %v3022_v10 = vmul.f32 %v6631_v11, %v2877_v44  ;;  %v3166_v41 = vmul.f32 %v6587_v6, %v6783_v17  ;;  %v3165_v57 = vmul.f32 %v6594_v26, %v6785_v35  ;;  %5358 = vpow2.f32 %v2836_v46 }
 0x225   : >> { %7552 = vst [vmem:[#allocation33_spill] sm:$0xff] %v6814_v54  ;;  %v3624_v14 = vrot.slane %v6690_v1, %v7553_v52  ;;  %v3344_v18 = vrot.slane %v3314_v49, %v6184_v40  ;;  %v6827_v63 = vrot.slane %v6677_v19, %v6233_v59  ;;  %5360 = vpow2.f32 %v3403_v21  ;;  %v7556_v49 = vld [vmem:[#allocation12_spill] sm:$0xff] }
 0x226   : >> { %4175 = vbcast.lane.b32.xlu1 %v4169_v13, 264  ;;  %4171 = vbcast.lane.b32.xlu0 %v4169_v13, 256  ;;  %v4191_v6 = vrot.slane %v6756_v42, %v7553_v52  ;;  %v6837_v26 = vrot.slane %v6690_v1, %v7554_v53  ;;  %v3510_v8 = vcombine.high %v6807_v22, %v6807_v22  ;;  %5362 = vpow2.f32 %v3401_v50  ;;  %v6855_v50 = vpop.eup %5354  ;;  %v7557_v52 = vld [vmem:[#allocation24_spill] sm:$0xff] }
 0x227   : >> { %v6843_v19 = vrot.slane %v6756_v42, %v7554_v53  ;;  %v3501_v46 = vrot.slane %v6733_v43, %v6233_v59  ;;  %v3939_v13 = vmul.f32 %v3915_v45, %v7555_v5  ;;  %v4061_v7 = vcombine.high %v6814_v54, %v6814_v54 }
 0x228   : >> { %v6829_v11 = vpop.permute.xlu1 %2913  ;;  %v6831_v44 = vpop.permute.xlu0 %2909  ;;  %v6850_v25 = vadd.f32 %v3166_v41, %v3023_v20  ;;  %v6852_v30 = vadd.f32 %v3165_v57, %v3022_v10  ;;  %5364 = vpow2.f32 %v2834_v15  ;;  %v3938_v21 = vmul.f32 %v3915_v45, %v7556_v49  ;;  %v7558_v45 = vld [vmem:[#allocation25_spill] sm:$0xff]  ;;  %v7560_v49 = vld [vmem:[#allocation26_spill] sm:$0xff] }
 0x229   : >> { %v6859_v53 = vrot.slane %v6690_v1, %v7557_v52  ;;  %v6863_v43 = vrot.slane %v6756_v42, %v7557_v52  ;;  %v3370_v20 = vmul.f32 %v3344_v18, %v7546_v9  ;;  %v6874_v41 = vrot.slane %v6690_v1, %v7558_v45 }
 0x22a   : >> { %4186 = vbcast.lane.b32.xlu1 %v4180_v39, 264  ;;  %4182 = vbcast.lane.b32.xlu0 %v4180_v39, 256  ;;  %v3881_v39 = vcombine.high %v6827_v63, %v6827_v63  ;;  %v6878_v57 = vrot.slane %v6756_v42, %v7558_v45  ;;  %v3509_v3 = vcombine.high %v3501_v46, %v3501_v46  ;;  %v6883_v4 = vpop.eup %5356  ;;  %v3970_v37 = vmul.f32 1.442695, %v3939_v13 }
 0x22b   : >> { %v6881_v52 = vrot.slane %v3510_v8, %v6233_v59  ;;  %v3025_v61 = vmul.f32 %v6777_v33, %v6768_v0  ;;  %v6888_v54 = vrot.slane %v4061_v7, %v6233_v59  ;;  %v3369_v48 = vmul.f32 %v3344_v18, %v7547_v56 }
 0x22c   : >> { %v6868_v10 = vpop.permute.xlu1 %2924  ;;  %v6870_v15 = vpop.permute.xlu0 %2920  ;;  %v3024_v22 = vmul.f32 %v6777_v33, %v6770_v55  ;;  %v3181_v8 = vmul.f32 %v6626_v24, %v6850_v25  ;;  %v3180_v45 = vmul.f32 %v6635_v16, %v6852_v30  ;;  %v3968_v58 = vmul.f32 1.442695, %v3938_v21 }
 0x22d   : >> { %7559 = vst [vmem:[#allocation22_spill] sm:$0xff] %v6881_v52  ;;  %v6899_v0 = vrot.slane %v6690_v1, %v7560_v49  ;;  %v6902_v13 = vrot.slane %v3501_v46, %v6233_v59  ;;  %v3399_v18 = vmul.f32 1.442695, %v3370_v20  ;;  %v6905_v7 = vrot.slane %v3881_v39, %v6184_v40 }
 0x22e   : >> { %3630 = vbcast.lane.b32.xlu1 %v3624_v14, 264  ;;  %3626 = vbcast.lane.b32.xlu0 %v3624_v14, 256  ;;  %v6909_v24 = vrot.slane %v6756_v42, %v7560_v49  ;;  %v6912_v16 = vrot.slane %v3509_v3, %v6233_v59  ;;  %v7563_v14 = vld [vmem:[#allocation27_spill] sm:$0xff]  ;;  %v3542_v46 = vcombine.high %v6881_v52, %v6881_v52  ;;  %5366 = vpow2.f32 %v3970_v37 }
 0x22f   : >> { %7561 = vst [vmem:[#allocation23_spill] sm:$0xff] %v6902_v13  ;;  %v6916_v21 = vrot.slane %v6690_v1, %v7563_v14  ;;  %v4077_v39 = vcombine.high %v6888_v54, %v6888_v54  ;;  %v6922_v20 = vadd.f32 %v3181_v8, %v3025_v61  ;;  %v6924_v49 = vadd.f32 %v3180_v45, %v3024_v22 }
 0x230   : >> { %v3042_v55 = vpop.permute.xlu1 %3041  ;;  %v3038_v33 = vpop.permute.xlu0 %3037  ;;  %7562 = vst [vmem:[#allocation24_spill] sm:$0xff] %v6912_v16  ;;  %5368 = vpow2.f32 %v3968_v58  ;;  %v3397_v3 = vmul.f32 1.442695, %v3369_v48  ;;  %v6930_v1 = vrot.slane %v6674_v27, %v6184_v40  ;;  %v6934_v37 = vrot.slane %v6756_v42, %v7563_v14 }
 0x231   : >> { %v6926_v13 = vpop.eup %5358  ;;  %5370 = vpow2.f32 %v3399_v18  ;;  %v3275_v58 = vrot.slane %v6607_v38, %v6233_v59  ;;  %v6941_v48 = vrot.slane %v3542_v46, %v6184_v40  ;;  %v3027_v27 = vmul.f32 %v6793_v51, %v6797_v36 }
 0x232   : >> { %4197 = vbcast.lane.b32.xlu1 %v4191_v6, 264  ;;  %4193 = vbcast.lane.b32.xlu0 %v4191_v6, 256  ;;  %v3937_v6 = vmul.f32 %v6905_v7, %v7555_v5  ;;  %v5361_v61 = vpop.eup %5360  ;;  %v6948_v14 = vrot.slane %v4077_v39, %v6233_v59  ;;  %v3026_v16 = vmul.f32 %v6793_v51, %v6799_v23  ;;  %5372 = vpow2.f32 %v3397_v3 }
 0x233   : >> { %v5363_v45 = vpop.eup %5362  ;;  %v3196_v38 = vmul.f32 %v6646_v28, %v6922_v20  ;;  %v3195_v36 = vmul.f32 %v6665_v2, %v6924_v49  ;;  %v3124_v46 = vmul.f32 %v6683_v12, %v3038_v33  ;;  %v6964_v51 = vrot.slane %v6761_v60, %v6184_v40  ;;  %v7565_v28 = vld [vmem:[#allocation21_spill] sm:$0xff] }
 0x234   : >> { %v3053_v8 = vpop.permute.xlu1 %3052  ;;  %v3049_v22 = vpop.permute.xlu0 %3048  ;;  %v6970_v52 = vmul.f32 %v7565_v28, %v5363_v45  ;;  %v6972_v2 = vmul.f32 1.442695, %v3937_v6 }
 0x235   : >> { %v3140_v42 = vmul.f32 %v6719_v62, %v3053_v8  ;;  %v3139_v18 = vmul.f32 %v6721_v31, %v3049_v22  ;;  %v6958_v62 = vpop.eup %5364  ;;  %v3125_v31 = vmul.f32 %v6680_v34, %v3042_v55  ;;  %v7564_v8 = vld [vmem:[#allocation20_spill] sm:$0xff]  ;;  %v3198_v55 = vadd.f32 %v3196_v38, %v3027_v27 }
 0x236   : >> { %3641 = vbcast.lane.b32.xlu1 %v6837_v26, 264  ;;  %3637 = vbcast.lane.b32.xlu0 %v6837_v26, 256  ;;  %v3283_v26 = vcombine.high %v3275_v58, %v3275_v58  ;;  %v6967_v22 = vmul.f32 %v7564_v8, %v5361_v61  ;;  %v3197_v33 = vadd.f32 %v3195_v36, %v3026_v16  ;;  %v3126_v45 = vsel %vm687_vm0, %v3124_v46, 0.0 }
 0x237   : >> { %v3142_v3 = vsel %vm687_vm0, %v3140_v42, 0.0  ;;  %v3141_v34 = vsel %vm687_vm0, %v3139_v18, 0.0  ;;  %v3127_v61 = vsel %vm687_vm0, %v3125_v31, 0.0  ;;  %v6992_v36 = vrot.slane %v6652_v32, %v6233_v59 }
 0x238   : >> { %v3064_v23 = vpop.permute.xlu1 %3063  ;;  %v3060_v39 = vpop.permute.xlu0 %3059  ;;  %v3143_v8 = vadd.f32 %v3142_v3, %v3141_v34  ;;  %v3029_v46 = vmul.f32 %v6802_v47, %v6829_v11  ;;  %5374 = vpow2.f32 %v6972_v2 }
 0x239   : >> { %v3155_v12 = vmul.f32 %v6783_v17, %v3064_v23  ;;  %v3154_v60 = vmul.f32 %v6785_v35, %v3060_v39  ;;  %v3291_v17 = vrot.slane %v3275_v58, %v6233_v59  ;;  %v3305_v35 = vrot.slane %v3283_v26, %v6233_v59 }
 0x23a   : >> { %4208 = vbcast.lane.b32.xlu1 %v6843_v19, 264  ;;  %4204 = vbcast.lane.b32.xlu0 %v6843_v19, 256  ;;  %v4109_v19 = vcombine.high %v6948_v14, %v6948_v14  ;;  %v3128_v58 = vadd.f32 %v3127_v61, %v3126_v45  ;;  %v3211_v23 = vmul.f32 %v6855_v50, %v3198_v55  ;;  %v3144_v11 = vrot.slane %v3143_v8, 4 }
 0x23b   : >> { %v3157_v6 = vsel %vm687_vm0, %v3155_v12, 0.0  ;;  %v3156_v42 = vsel %vm687_vm0, %v3154_v60, 0.0  ;;  %v6994_v31 = vpop.eup %5366  ;;  %v3210_v26 = vmul.f32 %v6883_v4, %v3197_v33  ;;  %v3315_v61 = vcombine.high %v3305_v35, %v3305_v35 }
 0x23c   : >> { %v3075_v18 = vpop.permute.xlu1 %3074  ;;  %v3071_v28 = vpop.permute.xlu0 %3070  ;;  %v3158_v27 = vadd.f32 %v3157_v6, %v3156_v42  ;;  %v3213_v4 = vadd.f32 %v3211_v23, %v3029_v46 }
 0x23d   : >> { %v3170_v16 = vmul.f32 %v6850_v25, %v3075_v18  ;;  %v3169_v38 = vmul.f32 %v6852_v30, %v3071_v28  ;;  %v7001_v39 = vpop.eup %5368  ;;  %v3028_v25 = vmul.f32 %v6802_v47, %v6831_v44  ;;  %v7014_v47 = vrot.slane %v6827_v63, %v6184_v40 }
 0x23e   : >> { %3652 = vbcast.lane.b32.xlu1 %v6859_v53, 264  ;;  %3648 = vbcast.lane.b32.xlu0 %v6859_v53, 256  ;;  %v7008_v3 = vpop.eup %5370  ;;  %v3313_v53 = vcombine.high %v3291_v17, %v3291_v17  ;;  %v3159_v50 = vrot.slane %v3158_v27, 4  ;;  %v3129_v44 = vrot.slane %v3128_v58, 4  ;;  %v7019_v18 = vrot.slane %v3291_v17, %v6184_v40 }
 0x23f   : >> { %v3172_v32 = vsel %vm687_vm0, %v3170_v16, 0.0  ;;  %v3171_v30 = vsel %vm687_vm0, %v3169_v38, 0.0  ;;  %v7021_v28 = vpop.eup %5372  ;;  %v3212_v16 = vadd.f32 %v3210_v26, %v3028_v25  ;;  %v3324_v63 = vrot.slane %v3305_v35, %v6184_v40 }
 0x240   : >> { %v3173_v34 = vadd.f32 %v3172_v32, %v3171_v30  ;;  %v3086_v12 = vpop.permute.xlu1 %3085  ;;  %v3082_v60 = vpop.permute.xlu0 %3081  ;;  %v3145_v38 = vadd.f32 %v3144_v11, %v3143_v8  ;;  %v3031_v17 = vmul.f32 %v6811_v29, %v6868_v10  ;;  %v3160_v46 = vadd.f32 %v3159_v50, %v3158_v27 }
 0x241   : >> { %v3185_v45 = vmul.f32 %v6922_v20, %v3086_v12  ;;  %v3184_v6 = vmul.f32 %v6924_v49, %v3082_v60  ;;  %v7027_v60 = vrot.slane %v3313_v53, %v6184_v40  ;;  %v3226_v8 = vmul.f32 %v6926_v13, %v3213_v4 }
 0x242   : >> { %v3174_v42 = vrot.slane %v3173_v34, 4  ;;  %4219 = vbcast.lane.b32.xlu1 %v6863_v43, 264  ;;  %4215 = vbcast.lane.b32.xlu0 %v6863_v43, 256  ;;  %v7030_v43 = vrot.slane %v3315_v61, %v6184_v40  ;;  %v3030_v35 = vmul.f32 %v6811_v29, %v6870_v15  ;;  %v3225_v10 = vmul.f32 %v6958_v62, %v3212_v16 }
 0x243   : >> { %v3187_v20 = vsel %vm687_vm0, %v3185_v45, 0.0  ;;  %v3186_v49 = vsel %vm687_vm0, %v3184_v6, 0.0  ;;  %v3130_v6 = vadd.f32 %v3129_v44, %v3128_v58  ;;  %v3161_v61 = vrot.slane %v3160_v46, 2 }
 0x244   : >> { %v3188_v32 = vadd.f32 %v3187_v20, %v3186_v49  ;;  %v3097_v30 = vpop.permute.xlu1 %3096  ;;  %v3093_v12 = vpop.permute.xlu0 %3092  ;;  %v3175_v25 = vadd.f32 %v3174_v42, %v3173_v34  ;;  %v3359_v13 = vmul.f32 %v3324_v63, %v7547_v56  ;;  %v7046_v62 = vadd.f32 %v3226_v8, %v3031_v17  }
 0x245   : >> { %v3200_v23 = vmul.f32 %v3198_v55, %v3097_v30  ;;  %v3199_v45 = vmul.f32 %v3197_v33, %v3093_v12  ;;  %v3146_v55 = vrot.slane %v3145_v38, 2  ;;  %v3131_v44 = vrot.slane %v3130_v6, 2 }
 0x246   : >> { %v3189_v26 = vrot.slane %v3188_v32, 4  ;;  %3663 = vbcast.lane.b32.xlu1 %v6874_v41, 264  ;;  %3659 = vbcast.lane.b32.xlu0 %v6874_v41, 256  ;;  %v3176_v29 = vrot.slane %v3175_v25, 2  ;;  %v3850_v17 = vcombine.high %v6992_v36, %v6992_v36  ;;  %4394 = vst.msk [vmem:[#allocation5 + $0x18] sm:$0xff] (%p2103_p5), %vm687_vm0, %v7046_v62 }
 0x247   : >> { %v3202_v11 = vsel %vm687_vm0, %v3200_v23, 0.0  ;;  %v3201_v53 = vsel %vm687_vm0, %v3199_v45, 0.0  ;;  %v7050_v23 = vadd.f32 %v3225_v10, %v3030_v35   ;;  %v3360_v45 = vmul.f32 %v3324_v63, %v7546_v9 }
 0x248   : >> { %v3190_v33 = vadd.f32 %v3189_v26, %v3188_v32  ;;  %v3203_v27 = vadd.f32 %v3202_v11, %v3201_v53  ;;  %v3108_v58 = vpop.permute.xlu1 %3107  ;;  %v3104_v34 = vpop.permute.xlu0 %3103  ;;  %v3162_v26 = vadd.f32 %v3161_v61, %v3160_v46  ;;  %v3132_v8 = vadd.f32 %v3131_v44, %v3130_v6 }
 0x249   : >> { %v3215_v41 = vmul.f32 %v3213_v4, %v3108_v58  ;;  %v3214_v50 = vmul.f32 %v3212_v16, %v3104_v34  ;;  %v7566_v2 = vmov %v7050_v23  ;;  %v3147_v4 = vadd.f32 %v3146_v55, %v3145_v38 }
 0x24a   : >> { %v3204_v15 = vrot.slane %v3203_v27, 4  ;;  %4230 = vbcast.lane.b32.xlu1 %v6878_v57, 264  ;;  %4226 = vbcast.lane.b32.xlu0 %v6878_v57, 256  ;;  %v3191_v42 = vrot.slane %v3190_v33, 2  ;;  %v3177_v53 = vadd.f32 %v3176_v29, %v3175_v25  ;;  %v7063_v46 = vrot.slane %v6992_v36, %v6233_v59  ;;  %4393 = vst.msk [vmem:[#allocation5 + $0x10] sm:$0xff] (%p2103_p5), %vm687_vm0, %v7566_v2 }
 0x24b   : >> { %v3217_v20 = vsel %vm687_vm0, %v3215_v41, 0.0  ;;  %v3216_v49 = vsel %vm687_vm0, %v3214_v50, 0.0  ;;  %v3148_v10 = vrot.slane %v3147_v4, 1  ;;  %v3163_v61 = vrot.slane %v3162_v26, 1 }
 0x24c   : >> { %v3205_v16 = vadd.f32 %v3204_v15, %v3203_v27  ;;  %v3218_v32 = vadd.f32 %v3217_v20, %v3216_v49  ;;  %v3119_v30 = vpop.permute.xlu1 %3118  ;;  %v3115_v12 = vpop.permute.xlu0 %3114  ;;  %v3192_v38 = vadd.f32 %v3191_v42, %v3190_v33  ;;  %v3377_v41 = vmul.f32 1.442695, %v3359_v13  ;;  %v7567_v33 = vld [vmem:[#allocation12_spill] sm:$0xff] }
 0x24d   : >> { %v3230_v11 = vmul.f32 %v7046_v62, %v3119_v30  ;;  %v3229_v57 = vmul.f32 %v7566_v2, %v3115_v12  ;;  %v3936_v36 = vmul.f32 %v6905_v7, %v7567_v33  ;;  %v3133_v50 = vrot.slane %v3132_v8, 1  ;;  %v7568_v49 = vld [vmem:[#allocation18_spill] sm:$0xff] }
 0x24e   : >> { %v3206_v58 = vrot.slane %v3205_v16, 2  ;;  %v3219_v35 = vrot.slane %v3218_v32, 4  ;;  %3674 = vbcast.lane.b32.xlu1 %v6899_v0, 264  ;;  %3670 = vbcast.lane.b32.xlu0 %v6899_v0, 256  ;;  %v7073_v0 = vrot.slane %v4109_v19, %v6184_v40  ;;  %v3178_v44 = vrot.slane %v3177_v53, 1 }
 0x24f   : >> { %v3232_v23 = vsel %vm687_vm0, %v3230_v11, 0.0  ;;  %v3231_v63 = vsel %vm687_vm0, %v3229_v57, 0.0  ;;  %v3193_v42 = vrot.slane %v3192_v38, 1  ;;  %v3379_v20 = vmul.f32 1.442695, %v3360_v45  ;;  %v7090_v57 = vpop.eup %5374 }
 0x250   : >> { %v3207_v55 = vadd.f32 %v3206_v58, %v3205_v16  ;;  %v3220_v27 = vadd.f32 %v3219_v35, %v3218_v32  ;;  %v3233_v6 = vadd.f32 %v3232_v23, %v3231_v63  ;;  %v7065_v25 = vpop.permute.xlu1 %3414  ;;  %v7067_v34 = vpop.permute.xlu0 %3410  ;;  %v7080_v13 = vrot.slane %v3850_v17, %v6233_v59  ;;  %v7569_v17 = vld [vmem:[#allocation32_spill] sm:$0xff] }
 0x251   : >> { %v7084_v19 = vmul.f32 %v7568_v49, %v6994_v31  ;;  %v3149_v16 = vadd.f32 %v3148_v10, %v3147_v4  ;;  %5376 = vpow2.f32 %v3377_v41  ;;  %v3964_v45 = vmul.f32 1.442695, %v3936_v36 }
 0x252   : >> { %v3221_v29 = vrot.slane %v3220_v27, 2  ;;  %v3234_v15 = vrot.slane %v3233_v6, 4  ;;  %4241 = vbcast.lane.b32.xlu1 %v6909_v24, 264  ;;  %4237 = vbcast.lane.b32.xlu0 %v6909_v24, 256  ;;  %v3208_v32 = vrot.slane %v3207_v55, 1  ;;  %v3164_v24 = vadd.f32 %v3163_v61, %v3162_v26 }
 0x253   : >> { %v3907_v58 = vrot.slane %v7569_v17, %v6184_v40  ;;  %v3134_v35 = vadd.f32 %v3133_v50, %v3132_v8  ;;  %v3179_v23 = vadd.f32 %v3178_v44, %v3177_v53  ;;  %v3194_v4 = vadd.f32 %v3193_v42, %v3192_v38 }
 0x254   : >> { %v3222_v7 = vadd.f32 %v3221_v29, %v3220_v27  ;;  %v3235_v30 = vadd.f32 %v3234_v15, %v3233_v6  ;;  %v7086_v12 = vpop.permute.xlu1 %3425  ;;  %v7088_v11 = vpop.permute.xlu0 %3421  ;;  %v3882_v10 = vcombine.high %v7080_v13, %v7080_v13  ;;  %v7570_v27 = vld [vmem:[#allocation29_spill] sm:$0xff]  ;;  %v3368_v6 = vmul.f32 %v6930_v1, %v7546_v9 }
 0x255   : >> { %v7100_v26 = vrot.slane %v7570_v27, %v6233_v59  ;;  %v3240_v8 = vsel %vm2666_vm1, %v3134_v35, %v3149_v16  ;;  %v3209_v53 = vadd.f32 %v3208_v32, %v3207_v55  ;;  %5378 = vpow2.f32 %v3964_v45 }
 0x256   : >> { %v3223_v31 = vrot.slane %v3222_v7, 1  ;;  %v3236_v63 = vrot.slane %v3235_v30, 2  ;;  %3685 = vbcast.lane.b32.xlu1 %v6916_v21, 264  ;;  %3681 = vbcast.lane.b32.xlu0 %v6916_v21, 256  ;;  %v3367_v21 = vmul.f32 %v6930_v1, %v7547_v56  ;;  %v3241_v38 = vsel %vm2668_vm2, %v3240_v8, %v3164_v24 }
 0x257   : >> { %v3366_v44 = vmul.f32 %v6964_v51, %v7546_v9  ;;  %v3242_v29 = vsel %vm2670_vm3, %v3241_v38, %v3179_v23  ;;  %v7119_v55 = vrot.slane %v6888_v54, %v6233_v59  ;;  %v3935_v1 = vmul.f32 %v3907_v58, %v7555_v5  ;;  %v7573_v38 = vld [vmem:[#allocation19_spill] sm:$0xff] }
 0x258   : >> { %v3237_v61 = vadd.f32 %v3236_v63, %v3235_v30  ;;  %v7105_v41 = vpop.permute.xlu1 %3436  ;;  %v7107_v36 = vpop.permute.xlu0 %3432  ;;  %v3224_v50 = vadd.f32 %v3223_v31, %v3222_v7  ;;  %v3243_v42 = vsel %vm2672_vm4, %v3242_v29, %v3194_v4  ;;  %5380 = vpow2.f32 %v3379_v20  ;;  %v7572_v4 = vld [vmem:[#allocation28_spill] sm:$0xff] }
 0x259   : >> { %v3395_v49 = vmul.f32 1.442695, %v3368_v6  ;;  %v3934_v16 = vmul.f32 %v3907_v58, %v7567_v33  ;;  %v3244_v32 = vsel %vm2674_vm5, %v3243_v42, %v3209_v53  ;;  %v3393_v54 = vmul.f32 1.442695, %v3367_v21 }
 0x25a   : >> { %v3238_v15 = vrot.slane %v3237_v61, 1  ;;  %4252 = vbcast.lane.b32.xlu1 %v6934_v37, 264  ;;  %4248 = vbcast.lane.b32.xlu0 %v6934_v37, 256  ;;  %v3540_v37 = vcombine.high %v7100_v26, %v7100_v26  ;;  %v3245_v45 = vsel %vm2676_vm6, %v3244_v32, %v3224_v50  ;;  %v3391_v23 = vmul.f32 1.442695, %v3366_v44 }
 0x25b   : >> { %v4107_v58 = vcombine.high %v7119_v55, %v7119_v55  ;;  %v3962_v31 = vmul.f32 1.442695, %v3935_v1  ;;  %v3365_v63 = vmul.f32 %v6964_v51, %v7547_v56  ;;  %5382 = vpow2.f32 %v3395_v49 }
 0x25c   : >> { %v3239_v7 = vadd.f32 %v3238_v15, %v3237_v61  ;;  %v3492_v30 = vpop.permute.xlu1 %3491  ;;  %v3488_v24 = vpop.permute.xlu0 %3487  ;;  %v3960_v6 = vmul.f32 1.442695, %v3934_v16  ;;  %v4254_v50 = vmul.f32 %v7573_v38, %v7001_v39  ;;  %5384 = vpow2.f32 %v3393_v54 }
 0x25d   : >> { %v3598_v17 = vmul.f32 %v6941_v48, %v3492_v30  ;;  %v3597_v35 = vmul.f32 %v6941_v48, %v3488_v24  ;;  %v3933_v48 = vmul.f32 %v7014_v47, %v7555_v5  ;;  %v3570_v29 = vrot.slane %v3540_v37, %v6184_v40 }
 0x25e   : >> { %v3246_v20 = vsel %vm2678_vm7, %v3245_v45, %v3239_v7  ;;  %5386 = vpow2.f32 %v3391_v23  ;;  %v3389_v15 = vmul.f32 1.442695, %v3365_v63  ;;  %v3932_v39 = vmul.f32 %v7014_v47, %v7567_v33 }
 0x25f   : >> { %v3254_v27 = vadd.f32 %v7572_v4, %v3246_v20  ;;  %v7145_v8 = vadd.f32 %v6967_v22, %v3598_v17  ;;  %v7148_v53 = vadd.f32 %v6970_v52, %v3597_v35  ;;  %v7156_v22 = vpop.eup %5376  ;;  %v3880_v52 = vcombine.high %v7063_v46, %v7063_v46 }
 0x260   : >> { %v4059_v61 = vpop.permute.xlu1 %4058  ;;  %v4055_v21 = vpop.permute.xlu0 %4054  ;;  %5388 = vpow2.f32 %v3962_v31  ;;  %v4137_v1 = vrot.slane %v4107_v58, %v6184_v40  ;;  %v3958_v42 = vmul.f32 1.442695, %v3933_v48  ;;  %v3899_v49 = vrot.slane %v3882_v10, %v6184_v40 }
 0x261   : >> { %3256 = vst.msk [vmem:[%s3255_s25] sm:$0xff] %vm687_vm0, %v3254_v27  ;;  %v4165_v51 = vmul.f32 %v7073_v0, %v4059_v61  ;;  %v4164_v44 = vmul.f32 %v7073_v0, %v4055_v21  ;;  %5390 = vpow2.f32 %v3960_v6  ;;  %v3703_v16 = vmul.f32 %v7008_v3, %v7145_v8 }
 0x262   : >> { %v3702_v7 = vmul.f32 %v7021_v28, %v7148_v53  ;;  %v3364_v30 = vmul.f32 %v7030_v43, %v7546_v9  ;;  %v3363_v47 = vmul.f32 %v7030_v43, %v7547_v56  ;;  %v5379_v45 = vpop.eup %5378  ;;  %v3895_v3 = vrot.slane %v3880_v52, %v6184_v40 }
 0x263   : >> { %v7173_v24 = vadd.f32 %v7084_v19, %v4165_v51  ;;  %v7175_v37 = vadd.f32 %v4254_v50, %v4164_v44  ;;  %5392 = vpow2.f32 %v3389_v15  ;;  %v3956_v17 = vmul.f32 1.442695, %v3932_v39  ;;  %v7574_v50 = vld [vmem:[#allocation22_spill] sm:$0xff]  ;;  %v7575_v15 = vld [vmem:[#allocation33_spill] sm:$0xff] }
 0x264   : >> { %v3481_v0 = vpop.permute.xlu1 %3480  ;;  %v3477_v32 = vpop.permute.xlu0 %3476  ;;  %v3362_v28 = vmul.f32 %v7027_v60, %v7546_v9  ;;  %5394 = vpow2.f32 %v3958_v42  ;;  %v3931_v43 = vmul.f32 %v3899_v49, %v7555_v5  ;;  %v3387_v31 = vmul.f32 1.442695, %v3364_v30 }
 0x265   : >> { %v3596_v10 = vmul.f32 %v3570_v29, %v3481_v0  ;;  %v3595_v54 = vmul.f32 %v3570_v29, %v3477_v32  ;;  %v7185_v19 = vpop.eup %5380  ;;  %v3361_v63 = vmul.f32 %v7027_v60, %v7547_v56  ;;  %v3385_v4 = vmul.f32 1.442695, %v3363_v47 }
 0x266   : >> { %v3930_v27 = vmul.f32 %v3899_v49, %v7567_v33  ;;  %v4270_v48 = vmul.f32 %v7090_v57, %v7173_v24  ;;  %v4269_v21 = vmul.f32 %v5379_v45, %v7175_v37  ;;  %v3891_v38 = vrot.slane %v7080_v13, %v6184_v40 }
 0x267   : >> { %v7180_v35 = vadd.f32 %v3703_v16, %v3596_v10  ;;  %v7182_v23 = vadd.f32 %v3702_v7, %v3595_v54  ;;  %v3566_v51 = vrot.slane %v7574_v50, %v6184_v40  ;;  %5396 = vpow2.f32 %v3956_v17 }
 0x268   : >> { %v4048_v20 = vpop.permute.xlu1 %4047  ;;  %v4044_v58 = vpop.permute.xlu0 %4043  ;;  %v3383_v44 = vmul.f32 1.442695, %v3362_v28  ;;  %v3954_v52 = vmul.f32 1.442695, %v3931_v43  ;;  %v4068_v39 = vrot.slane %v7575_v15, %v6233_v59  ;;  %5398 = vpow2.f32 %v3387_v31 }
 0x269   : >> { %v4163_v6 = vmul.f32 %v4137_v1, %v4048_v20  ;;  %v4162_v61 = vmul.f32 %v4137_v1, %v4044_v58  ;;  %v5383_v57 = vpop.eup %5382  ;;  %v3357_v1 = vmul.f32 %v7019_v18, %v7547_v56  ;;  %v3952_v13 = vmul.f32 1.442695, %v3930_v27 }
 0x26a   : >> { %v3929_v0 = vmul.f32 %v3895_v3, %v7555_v5  ;;  %v5385_v16 = vpop.eup %5384  ;;  %v3358_v32 = vmul.f32 %v7019_v18, %v7546_v9  ;;  %v3381_v7 = vmul.f32 1.442695, %v3361_v63  ;;  %5400 = vpow2.f32 %v3385_v4 }
 0x26b   : >> { %v7197_v29 = vadd.f32 %v4270_v48, %v4163_v6  ;;  %v7199_v60 = vadd.f32 %v4269_v21, %v4162_v61  ;;  %v3928_v30 = vmul.f32 %v3895_v3, %v7567_v33  ;;  %v5387_v47 = vpop.eup %5386  ;;  %v7211_v10 = vrot.slane %v7063_v46, %v6184_v40  ;;  %v7576_v61 = vld [vmem:[#allocation24_spill] sm:$0xff] }
 0x26c   : >> { %v3470_v42 = vpop.permute.xlu1 %3469  ;;  %v3466_v49 = vpop.permute.xlu0 %3465  ;;  %v4133_v54 = vrot.slane %v6948_v14, %v6184_v40  ;;  %5402 = vpow2.f32 %v3383_v44  ;;  %v3927_v45 = vmul.f32 %v3891_v38, %v7555_v5  ;;  %v4076_v18 = vcombine.high %v4068_v39, %v4068_v39 }
 0x26d   : >> { %v5389_v17 = vpop.eup %5388  ;;  %v3594_v28 = vmul.f32 %v3566_v51, %v3470_v42  ;;  %v3593_v43 = vmul.f32 %v3566_v51, %v3466_v49  ;;  %5404 = vpow2.f32 %v3954_v52  ;;  %v3562_v3 = vrot.slane %v7100_v26, %v6184_v40 }
 0x26e   : >> { %v5391_v20 = vpop.eup %5390  ;;  %v4129_v46 = vrot.slane %v7119_v55, %v6184_v40  ;;  %5406 = vpow2.f32 %v3952_v13  ;;  %v3950_v63 = vmul.f32 1.442695, %v3929_v0  ;;  %v3718_v14 = vmul.f32 %v5383_v57, %v7180_v35 }
 0x26f   : >> { %v3717_v4 = vmul.f32 %v5385_v16, %v7182_v23  ;;  %5408 = vpow2.f32 %v3381_v7  ;;  %v3948_v27 = vmul.f32 1.442695, %v3928_v30  ;;  %v3541_v21 = vcombine.high %v7576_v61, %v7576_v61 }
 0x270   : >> { %v4037_v58 = vpop.permute.xlu1 %4036  ;;  %v4033_v31 = vpop.permute.xlu0 %4032  ;;  %v3946_v50 = vmul.f32 1.442695, %v3927_v45  ;;  %v7224_v44 = vadd.f32 %v3718_v14, %v3594_v28  ;;  %v7229_v55 = vrot.slane %v4076_v18, %v6233_v59  ;;  %v3926_v52 = vmul.f32 %v3891_v38, %v7567_v33 }
 0x271   : >> { %v4161_v6 = vmul.f32 %v4133_v54, %v4037_v58  ;;  %v4160_v48 = vmul.f32 %v4133_v54, %v4033_v31  ;;  %v5393_v51 = vpop.eup %5392  ;;  %v7226_v26 = vadd.f32 %v3717_v4, %v3593_v43  ;;  %v4285_v57 = vmul.f32 %v5389_v17, %v7197_v29 }
 0x272   : >> { %v5395_v15 = vpop.eup %5394  ;;  %v4284_v42 = vmul.f32 %v5391_v20, %v7199_v60  ;;  %5410 = vpow2.f32 %v3950_v63  ;;  %v3375_v0 = vmul.f32 1.442695, %v3358_v32  ;;  %v7235_v30 = vrot.slane %v4068_v39, %v6233_v59  ;;  %v7577_v20 = vld [vmem:[#allocation23_spill] sm:$0xff] }
 0x273   : >> { %5412 = vpow2.f32 %v3948_v27  ;;  %v7237_v54 = vadd.f32 %v4285_v57, %v4161_v6  ;;  %v3373_v38 = vmul.f32 1.442695, %v3357_v1  ;;  %v3733_v17 = vmul.f32 %v5387_v47, %v7224_v44 }
 0x274   : >> { %v3459_v49 = vpop.permute.xlu1 %3458  ;;  %v3455_v13 = vpop.permute.xlu0 %3454  ;;  %v7239_v45 = vadd.f32 %v4284_v42, %v4160_v48  ;;  %5414 = vpow2.f32 %v3946_v50  ;;  %v3732_v43 = vmul.f32 %v5393_v51, %v7226_v26  ;;  %v3944_v18 = vmul.f32 1.442695, %v3926_v52 }
 0x275   : >> { %v3592_v16 = vmul.f32 %v3562_v3, %v3459_v49  ;;  %v3591_v7 = vmul.f32 %v3562_v3, %v3455_v13  ;;  %v5397_v28 = vpop.eup %5396  ;;  %v3925_v32 = vmul.f32 %v7211_v10, %v7555_v5  ;;  %v3539_v59 = vcombine.high %v7577_v20, %v7577_v20 }
 0x276   : >> { %v3558_v31 = vrot.slane %v3541_v21, %v6184_v40  ;;  %v4108_v3 = vcombine.high %v7229_v55, %v7229_v55  ;;  %5416 = vpow2.f32 %v3375_v0  ;;  %v5399_v1 = vpop.eup %5398  ;;  %v4300_v6 = vmul.f32 %v5395_v15, %v7237_v54 }
 0x277   : >> { %v7250_v63 = vadd.f32 %v3733_v17, %v3592_v16  ;;  %v7252_v47 = vadd.f32 %v3732_v43, %v3591_v7  ;;  %v5401_v27 = vpop.eup %5400  ;;  %v4299_v48 = vmul.f32 %v5397_v28, %v7239_v45  ;;  %5418 = vpow2.f32 %v3373_v38 }
 0x278   : >> { %v4026_v39 = vpop.permute.xlu1 %4025  ;;  %v4022_v58 = vpop.permute.xlu0 %4021  ;;  %v3924_v21 = vmul.f32 %v7211_v10, %v7567_v33  ;;  %v4106_v51 = vcombine.high %v7235_v30, %v7235_v30  ;;  %5420 = vpow2.f32 %v3944_v18  ;;  %v3942_v52 = vmul.f32 1.442695, %v3925_v32 }
 0x279   : >> { %v4159_v14 = vmul.f32 %v4129_v46, %v4026_v39  ;;  %v4158_v4 = vmul.f32 %v4129_v46, %v4022_v58  ;;  %v5403_v50 = vpop.eup %5402  ;;  %v3554_v42 = vrot.slane %v3539_v59, %v6184_v40  ;;  %v4125_v0 = vrot.slane %v4108_v3, %v6184_v40 }
 0x27a   : >> { %v5405_v57 = vpop.eup %5404  ;;  %v3748_v10 = vmul.f32 %v5399_v1, %v7250_v63  ;;  %v3747_v28 = vmul.f32 %v5401_v27, %v7252_v47  ;;  %v3940_v43 = vmul.f32 1.442695, %v3924_v21  ;;  %v4121_v59 = vrot.slane %v4106_v51, %v6184_v40 }
 0x27b   : >> { %v7261_v49 = vadd.f32 %v4300_v6, %v4159_v14  ;;  %v7263_v46 = vadd.f32 %v4299_v48, %v4158_v4  ;;  %v5407_v16 = vpop.eup %5406  ;;  %5422 = vpow2.f32 %v3942_v52  ;;  %v3588_v39 = vmul.f32 %v3554_v42, %v7105_v41 }
 0x27c   : >> { %v3448_v15 = vpop.permute.xlu1 %3447  ;;  %v3444_v13 = vpop.permute.xlu0 %3443  ;;  %v3587_v58 = vmul.f32 %v3554_v42, %v7107_v36  ;;  %v3550_v51 = vrot.slane %v7576_v61, %v6184_v40  ;;  %5424 = vpow2.f32 %v3940_v43 }
 0x27d   : >> { %v3590_v7 = vmul.f32 %v3558_v31, %v3448_v15  ;;  %v3589_v38 = vmul.f32 %v3558_v31, %v3444_v13  ;;  %v5409_v17 = vpop.eup %5408  ;;  %v4315_v14 = vmul.f32 %v5405_v57, %v7261_v49  ;;  %v4314_v31 = vmul.f32 %v5407_v16, %v7263_v46 }
 0x27f   : >> { %v7268_v18 = vadd.f32 %v3748_v10, %v3590_v7  ;;  %v7270_v32 = vadd.f32 %v3747_v28, %v3589_v38  ;;  %v5411_v4 = vpop.eup %5410  ;;  %v3586_v28 = vmul.f32 %v3550_v51, %v7086_v12 }
 0x280   : >> { %v4015_v3 = vpop.permute.xlu1 %4014  ;;  %v4011_v1 = vpop.permute.xlu0 %4010 }
 0x281   : >> { %v3763_v27 = vmul.f32 %v5403_v50, %v7268_v18  ;;  %v3762_v6 = vmul.f32 %v5409_v17, %v7270_v32  ;;  %v4157_v48 = vmul.f32 %v4125_v0, %v4015_v3  ;;  %v4156_v21 = vmul.f32 %v4125_v0, %v4011_v1  ;;  %v5413_v15 = vpop.eup %5412 }
 0x282   : >> { %v5415_v41 = vpop.eup %5414  ;;  %v3546_v50 = vrot.slane %v7577_v20, %v6184_v40  ;;  %v3585_v17 = vmul.f32 %v3550_v51, %v7088_v11 }
 0x283   : >> { %v7281_v36 = vadd.f32 %v3763_v27, %v3588_v39  ;;  %v7283_v52 = vadd.f32 %v3762_v6, %v3587_v58  ;;  %v7285_v57 = vadd.f32 %v4315_v14, %v4157_v48  ;;  %v7287_v42 = vadd.f32 %v4314_v31, %v4156_v21  ;;  %v5417_v0 = vpop.eup %5416 }
 0x284   : >> { %v4004_v13 = vpop.permute.xlu1 %4003  ;;  %v4000_v16 = vpop.permute.xlu0 %3999  ;;  %v3584_v11 = vmul.f32 %v3546_v50, %v7065_v25 }
 0x285   : >> { %v4155_v7 = vmul.f32 %v4121_v59, %v4004_v13  ;;  %v4330_v10 = vmul.f32 %v5411_v4, %v7285_v57  ;;  %v4154_v61 = vmul.f32 %v4121_v59, %v4000_v16  ;;  %v4329_v38 = vmul.f32 %v5413_v15, %v7287_v42  ;;  %v5419_v20 = vpop.eup %5418 }
 0x286   : >> { %v3778_v43 = vmul.f32 %v7185_v19, %v7281_v36  ;;  %v3777_v39 = vmul.f32 %v7156_v22, %v7283_v52  ;;  %v4117_v59 = vrot.slane %v7229_v55, %v6184_v40  ;;  %v5421_v14 = vpop.eup %5420  ;;  %v3583_v19 = vmul.f32 %v3546_v50, %v7067_v34 }
 0x287   : >> { %v7299_v58 = vadd.f32 %v4330_v10, %v4155_v7  ;;  %v7301_v3 = vadd.f32 %v4329_v38, %v4154_v61  ;;  %v4113_v10 = vrot.slane %v7235_v30, %v6184_v40 }
 0x288   : >> { %v3993_v1 = vpop.permute.xlu1 %3992  ;;  %v3989_v31 = vpop.permute.xlu0 %3988  ;;  %v3780_v12 = vadd.f32 %v3778_v43, %v3586_v28  ;;  %v3779_v4 = vadd.f32 %v3777_v39, %v3585_v17 }
 0x289   : >> { %v4153_v22 = vmul.f32 %v4117_v59, %v3993_v1  ;;  %v4345_v48 = vmul.f32 %v5415_v41, %v7299_v58  ;;  %v4152_v21 = vmul.f32 %v4117_v59, %v3989_v31  ;;  %v4344_v15 = vmul.f32 %v5421_v14, %v7301_v3  ;;  %v5423_v51 = vpop.eup %5422 }
 0x28a   : >> { %v3793_v27 = vmul.f32 %v5417_v0, %v3780_v12  ;;  %v3792_v6 = vmul.f32 %v5419_v20, %v3779_v4  ;;  %v5425_v61 = vpop.eup %5424 }
 0x28b   : >> { %v4347_v34 = vadd.f32 %v4345_v48, %v4153_v22  ;;  %v4346_v50 = vadd.f32 %v4344_v15, %v4152_v21 }
 0x28c   : >> { %v3982_v13 = vpop.permute.xlu1 %3981  ;;  %v3978_v55 = vpop.permute.xlu0 %3977  ;;  %v7309_v16 = vadd.f32 %v3793_v27, %v3584_v11   ;;  %v7311_v25 = vadd.f32 %v3792_v6, %v3583_v19  }
 0x28d   : >> { %v4151_v17 = vmul.f32 %v4113_v10, %v3982_v13  ;;  %v4150_v43 = vmul.f32 %v4113_v10, %v3978_v55  ;;  %v4360_v59 = vmul.f32 %v5423_v51, %v4347_v34 }
 0x28e   : >> { %v7578_v7 = vmov %v7311_v25  ;;  %v4359_v25 = vmul.f32 %v5425_v61, %v4346_v50  ;;  %4396 = vst.msk [vmem:[#allocation5 + $0x28] sm:$0xff] (%p2103_p5), %vm687_vm0, %v7309_v16 }
 0x28f   : >> { %v7321_v6 = vadd.f32 %v4360_v59, %v4151_v17   ;;  %4395 = vst.msk [vmem:[#allocation5 + $0x20] sm:$0xff] (%p2103_p5), %vm687_vm0, %v7578_v7 }
 0x290   : >> { %v3609_v0 = vpop.permute.xlu1 %3608  ;;  %v3605_v38 = vpop.permute.xlu0 %3604 }
 0x291   : >> { %v3797_v41 = vmul.f32 %v7309_v16, %v3609_v0  ;;  %v3796_v28 = vmul.f32 %v7578_v7, %v3605_v38  ;;  %4398 = vst.msk [vmem:[#allocation5 + $0x38] sm:$0xff] (%p2103_p5), %vm687_vm0, %v7321_v6 }
 0x293   : >> { %v3799_v39 = vsel %vm687_vm0, %v3797_v41, 0.0  ;;  %v3798_v20 = vsel %vm687_vm0, %v3796_v28, 0.0  ;;  %v7323_v28 = vadd.f32 %v4359_v25, %v4150_v43  }
 0x294   : >> { %v3800_v14 = vadd.f32 %v3799_v39, %v3798_v20  ;;  %v3620_v1 = vpop.permute.xlu1 %3619  ;;  %v3616_v40 = vpop.permute.xlu0 %3615 }
 0x295   : >> { %v3782_v30 = vmul.f32 %v3780_v12, %v3620_v1  ;;  %v3781_v31 = vmul.f32 %v3779_v4, %v3616_v40  ;;  %v7579_v48 = vmov %v7323_v28 }
 0x296   : >> { %v3801_v11 = vrot.slane %v3800_v14, 4  ;;  %4397 = vst.msk [vmem:[#allocation5 + $0x30] sm:$0xff] (%p2103_p5), %vm687_vm0, %v7579_v48 }
 0x297   : >> { %v3784_v19 = vsel %vm687_vm0, %v3782_v30, 0.0  ;;  %v3783_v27 = vsel %vm687_vm0, %v3781_v31, 0.0 }
 0x298   : >> { %v3802_v22 = vadd.f32 %v3801_v11, %v3800_v14  ;;  %v3785_v21 = vadd.f32 %v3784_v19, %v3783_v27  ;;  %v4176_v15 = vpop.permute.xlu1 %4175  ;;  %v4172_v13 = vpop.permute.xlu0 %4171 }
 0x299   : >> { %v4364_v51 = vmul.f32 %v7321_v6, %v4176_v15  ;;  %v4363_v55 = vmul.f32 %v7579_v48, %v4172_v13 }
 0x29a   : >> { %v3803_v10 = vrot.slane %v3802_v22, 2  ;;  %v3786_v12 = vrot.slane %v3785_v21, 4 }
 0x29b   : >> { %v4366_v4 = vsel %vm687_vm0, %v4364_v51, 0.0  ;;  %v4365_v61 = vsel %vm687_vm0, %v4363_v55, 0.0 }
 0x29c   : >> { %v3804_v0 = vadd.f32 %v3803_v10, %v3802_v22  ;;  %v3787_v38 = vadd.f32 %v3786_v12, %v3785_v21  ;;  %v4367_v41 = vadd.f32 %v4366_v4, %v4365_v61  ;;  %v4187_v17 = vpop.permute.xlu1 %4186  ;;  %v4183_v43 = vpop.permute.xlu0 %4182 }
 0x29d   : >> { %v4349_v28 = vmul.f32 %v4347_v34, %v4187_v17  ;;  %v4348_v39 = vmul.f32 %v4346_v50, %v4183_v43 }
 0x29e   : >> { %v3788_v20 = vrot.slane %v3787_v38, 2  ;;  %v4368_v59 = vrot.slane %v4367_v41, 4  ;;  %v3805_v25 = vrot.slane %v3804_v0, 1 }
 0x29f   : >> { %v4351_v14 = vsel %vm687_vm0, %v4349_v28, 0.0  ;;  %v4350_v1 = vsel %vm687_vm0, %v4348_v39, 0.0 }
 0x2a0   : >> { %v3789_v40 = vadd.f32 %v3788_v20, %v3787_v38  ;;  %v4369_v30 = vadd.f32 %v4368_v59, %v4367_v41  ;;  %v4352_v31 = vadd.f32 %v4351_v14, %v4350_v1  ;;  %v3631_v11 = vpop.permute.xlu1 %3630  ;;  %v3627_v19 = vpop.permute.xlu0 %3626  ;;  %v3806_v50 = vadd.f32 %v3805_v25, %v3804_v0 }
 0x2a1   : >> { %v3767_v27 = vmul.f32 %v7281_v36, %v3631_v11  ;;  %v3766_v22 = vmul.f32 %v7283_v52, %v3627_v19 }
 0x2a2   : >> { %v3790_v21 = vrot.slane %v3789_v40, 1  ;;  %v4370_v15 = vrot.slane %v4369_v30, 2  ;;  %v4353_v34 = vrot.slane %v4352_v31, 4 }
 0x2a3   : >> { %v3769_v13 = vsel %vm687_vm0, %v3767_v27, 0.0  ;;  %v3768_v51 = vsel %vm687_vm0, %v3766_v22, 0.0 }
 0x2a4   : >> { %v3791_v55 = vadd.f32 %v3790_v21, %v3789_v40  ;;  %v4371_v10 = vadd.f32 %v4370_v15, %v4369_v30  ;;  %v4354_v12 = vadd.f32 %v4353_v34, %v4352_v31  ;;  %v3770_v4 = vadd.f32 %v3769_v13, %v3768_v51  ;;  %v4198_v61 = vpop.permute.xlu1 %4197  ;;  %v4194_v38 = vpop.permute.xlu0 %4193 }
 0x2a5   : >> { %v4334_v41 = vmul.f32 %v7299_v58, %v4198_v61  ;;  %v4333_v36 = vmul.f32 %v7301_v3, %v4194_v38 }
 0x2a6   : >> { %v3807_v52 = vsel %vm2666_vm1, %v3806_v50, %v3791_v55  ;;  %v4355_v17 = vrot.slane %v4354_v12, 2  ;;  %v3771_v43 = vrot.slane %v3770_v4, 4  ;;  %v4372_v28 = vrot.slane %v4371_v10, 1 }
 0x2a7   : >> { %v4336_v0 = vsel %vm687_vm0, %v4334_v41, 0.0  ;;  %v4335_v39 = vsel %vm687_vm0, %v4333_v36, 0.0 }
 0x2a8   : >> { %v4356_v20 = vadd.f32 %v4355_v17, %v4354_v12  ;;  %v3772_v59 = vadd.f32 %v3771_v43, %v3770_v4  ;;  %v4337_v25 = vadd.f32 %v4336_v0, %v4335_v39  ;;  %v3642_v14 = vpop.permute.xlu1 %3641  ;;  %v3638_v1 = vpop.permute.xlu0 %3637  ;;  %v4373_v11 = vadd.f32 %v4372_v28, %v4371_v10 }
 0x2a9   : >> { %v3752_v40 = vmul.f32 %v7268_v18, %v3642_v14  ;;  %v3751_v58 = vmul.f32 %v7270_v32, %v3638_v1 }
 0x2aa   : >> { %v4357_v30 = vrot.slane %v4356_v20, 1  ;;  %v3773_v3 = vrot.slane %v3772_v59, 2  ;;  %v4338_v31 = vrot.slane %v4337_v25, 4 }
 0x2ab   : >> { %v3754_v19 = vsel %vm687_vm0, %v3752_v40, 0.0  ;;  %v3753_v27 = vsel %vm687_vm0, %v3751_v58, 0.0 }
 0x2ac   : >> { %v4358_v22 = vadd.f32 %v4357_v30, %v4356_v20  ;;  %v3774_v21 = vadd.f32 %v3773_v3, %v3772_v59  ;;  %v4339_v15 = vadd.f32 %v4338_v31, %v4337_v25  ;;  %v3755_v34 = vadd.f32 %v3754_v19, %v3753_v27  ;;  %v4209_v50 = vpop.permute.xlu1 %4208  ;;  %v4205_v13 = vpop.permute.xlu0 %4204 }
 0x2ad   : >> { %v4319_v51 = vmul.f32 %v7285_v57, %v4209_v50  ;;  %v4318_v18 = vmul.f32 %v7287_v42, %v4205_v13 }
 0x2ae   : >> { %v4374_v32 = vsel %vm2666_vm1, %v4373_v11, %v4358_v22  ;;  %v3775_v55 = vrot.slane %v3774_v21, 1  ;;  %v4340_v12 = vrot.slane %v4339_v15, 2  ;;  %v3756_v4 = vrot.slane %v3755_v34, 4 }
 0x2af   : >> { %v4321_v10 = vsel %vm687_vm0, %v4319_v51, 0.0  ;;  %v4320_v61 = vsel %vm687_vm0, %v4318_v18, 0.0 }
 0x2b0   : >> { %v3776_v38 = vadd.f32 %v3775_v55, %v3774_v21  ;;  %v4341_v41 = vadd.f32 %v4340_v12, %v4339_v15  ;;  %v3757_v36 = vadd.f32 %v3756_v4, %v3755_v34  ;;  %v4322_v17 = vadd.f32 %v4321_v10, %v4320_v61  ;;  %v3653_v43 = vpop.permute.xlu1 %3652  ;;  %v3649_v28 = vpop.permute.xlu0 %3648 }
 0x2b1   : >> { %v3737_v0 = vmul.f32 %v7250_v63, %v3653_v43  ;;  %v3736_v57 = vmul.f32 %v7252_v47, %v3649_v28 }
 0x2b2   : >> { %v3808_v42 = vsel %vm2668_vm2, %v3807_v52, %v3776_v38  ;;  %v4342_v39 = vrot.slane %v4341_v41, 1  ;;  %v3758_v20 = vrot.slane %v3757_v36, 2  ;;  %v4323_v59 = vrot.slane %v4322_v17, 4 }
 0x2b3   : >> { %v3739_v25 = vsel %vm687_vm0, %v3737_v0, 0.0  ;;  %v3738_v14 = vsel %vm687_vm0, %v3736_v57, 0.0 }
 0x2b4   : >> { %v4343_v1 = vadd.f32 %v4342_v39, %v4341_v41  ;;  %v3759_v40 = vadd.f32 %v3758_v20, %v3757_v36  ;;  %v4324_v58 = vadd.f32 %v4323_v59, %v4322_v17  ;;  %v3740_v30 = vadd.f32 %v3739_v25, %v3738_v14  ;;  %v4220_v3 = vpop.permute.xlu1 %4219  ;;  %v4216_v31 = vpop.permute.xlu0 %4215 }
 0x2b5   : >> { %v4304_v11 = vmul.f32 %v7261_v49, %v4220_v3  ;;  %v4303_v63 = vmul.f32 %v7263_v46, %v4216_v31 }
 0x2b6   : >> { %v4375_v47 = vsel %vm2668_vm2, %v4374_v32, %v4343_v1  ;;  %v3760_v52 = vrot.slane %v3759_v40, 1  ;;  %v4325_v19 = vrot.slane %v4324_v58, 2  ;;  %v3741_v27 = vrot.slane %v3740_v30, 4 }
 0x2b7   : >> { %v4306_v22 = vsel %vm687_vm0, %v4304_v11, 0.0  ;;  %v4305_v21 = vsel %vm687_vm0, %v4303_v63, 0.0 }
 0x2b8   : >> { %v3761_v15 = vadd.f32 %v3760_v52, %v3759_v40  ;;  %v4326_v34 = vadd.f32 %v4325_v19, %v4324_v58  ;;  %v3742_v50 = vadd.f32 %v3741_v27, %v3740_v30  ;;  %v4307_v13 = vadd.f32 %v4306_v22, %v4305_v21  ;;  %v3664_v51 = vpop.permute.xlu1 %3663  ;;  %v3660_v18 = vpop.permute.xlu0 %3659 }
 0x2b9   : >> { %v3722_v55 = vmul.f32 %v7224_v44, %v3664_v51  ;;  %v3721_v49 = vmul.f32 %v7226_v26, %v3660_v18 }
 0x2ba   : >> { %v3809_v46 = vsel %vm2670_vm3, %v3808_v42, %v3761_v15  ;;  %v4327_v32 = vrot.slane %v4326_v34, 1  ;;  %v3743_v12 = vrot.slane %v3742_v50, 2  ;;  %v4308_v4 = vrot.slane %v4307_v13, 4 }
 0x2bb   : >> { %v3724_v10 = vsel %vm687_vm0, %v3722_v55, 0.0  ;;  %v3723_v61 = vsel %vm687_vm0, %v3721_v49, 0.0 }
 0x2bc   : >> { %v4328_v38 = vadd.f32 %v4327_v32, %v4326_v34  ;;  %v3744_v41 = vadd.f32 %v3743_v12, %v3742_v50  ;;  %v4309_v36 = vadd.f32 %v4308_v4, %v4307_v13  ;;  %v3725_v17 = vadd.f32 %v3724_v10, %v3723_v61  ;;  %v4231_v43 = vpop.permute.xlu1 %4230  ;;  %v4227_v28 = vpop.permute.xlu0 %4226 }
 0x2bd   : >> { %v4289_v0 = vmul.f32 %v7237_v54, %v4231_v43  ;;  %v4288_v44 = vmul.f32 %v7239_v45, %v4227_v28 }
 0x2be   : >> { %v4376_v26 = vsel %vm2670_vm3, %v4375_v47, %v4328_v38  ;;  %v3745_v57 = vrot.slane %v3744_v41, 1  ;;  %v4310_v42 = vrot.slane %v4309_v36, 2  ;;  %v3726_v39 = vrot.slane %v3725_v17, 4 }
 0x2bf   : >> { %v4291_v20 = vsel %vm687_vm0, %v4289_v0, 0.0  ;;  %v4290_v59 = vsel %vm687_vm0, %v4288_v44, 0.0 }
 0x2c0   : >> { %v3746_v25 = vadd.f32 %v3745_v57, %v3744_v41  ;;  %v4311_v14 = vadd.f32 %v4310_v42, %v4309_v36  ;;  %v3727_v1 = vadd.f32 %v3726_v39, %v3725_v17  ;;  %v4292_v40 = vadd.f32 %v4291_v20, %v4290_v59  ;;  %v3675_v58 = vpop.permute.xlu1 %3674  ;;  %v3671_v30 = vpop.permute.xlu0 %3670 }
 0x2c1   : >> { %v3707_v3 = vmul.f32 %v7180_v35, %v3675_v58  ;;  %v3706_v54 = vmul.f32 %v7182_v23, %v3671_v30 }
 0x2c2   : >> { %v3810_v45 = vsel %vm2672_vm4, %v3809_v46, %v3746_v25  ;;  %v4312_v31 = vrot.slane %v4311_v14, 1  ;;  %v3728_v11 = vrot.slane %v3727_v1, 2  ;;  %v4293_v63 = vrot.slane %v4292_v40, 4 }
 0x2c3   : >> { %v3709_v47 = vsel %vm687_vm0, %v3707_v3, 0.0  ;;  %v3708_v52 = vsel %vm687_vm0, %v3706_v54, 0.0 }
 0x2c4   : >> { %v4313_v19 = vadd.f32 %v4312_v31, %v4311_v14  ;;  %v3729_v27 = vadd.f32 %v3728_v11, %v3727_v1  ;;  %v4294_v22 = vadd.f32 %v4293_v63, %v4292_v40  ;;  %v3710_v21 = vadd.f32 %v3709_v47, %v3708_v52  ;;  %v4242_v15 = vpop.permute.xlu1 %4241  ;;  %v4238_v34 = vpop.permute.xlu0 %4237 }
 0x2c5   : >> { %v4274_v50 = vmul.f32 %v7197_v29, %v4242_v15  ;;  %v4273_v35 = vmul.f32 %v7199_v60, %v4238_v34 }
 0x2c6   : >> { %v4377_v23 = vsel %vm2672_vm4, %v4376_v26, %v4313_v19  ;;  %v3730_v13 = vrot.slane %v3729_v27, 1  ;;  %v4295_v51 = vrot.slane %v4294_v22, 2  ;;  %v3711_v18 = vrot.slane %v3710_v21, 4 }
 0x2c7   : >> { %v4276_v55 = vsel %vm687_vm0, %v4274_v50, 0.0  ;;  %v4275_v49 = vsel %vm687_vm0, %v4273_v35, 0.0 }
 0x2c8   : >> { %v3731_v46 = vadd.f32 %v3730_v13, %v3729_v27  ;;  %v4296_v32 = vadd.f32 %v4295_v51, %v4294_v22  ;;  %v3712_v12 = vadd.f32 %v3711_v18, %v3710_v21  ;;  %v4277_v4 = vadd.f32 %v4276_v55, %v4275_v49  ;;  %v3686_v10 = vpop.permute.xlu1 %3685  ;;  %v3682_v61 = vpop.permute.xlu0 %3681  ;;  %v5426_v22 = vld [vmem:[%s6700_s19] sm:$0xff]  ;;  %v7580_v21 = vld [vmem:[#allocation16_spill] sm:$0xff]  ;;  %v7582_v18 = vld [vmem:[#allocation17_spill] sm:$0xff] }
 0x2c9   : >> { %v3692_v38 = vmul.f32 %v7145_v8, %v3686_v10  ;;  %v3691_v29 = vmul.f32 %v7148_v53, %v3682_v61  ;;  %v3820_v15 = vmul.f32 %v5426_v22, %v7580_v21  ;;  %v5427_v51 = vld [vmem:[%s6766_s15] sm:$0xff]  ;;  %v7591_v21 = vld [vmem:[#allocation31_spill] sm:$0xff] }
 0x2ca   : >> { %v3811_v60 = vsel %vm2674_vm5, %v3810_v45, %v3731_v46  ;;  %v4297_v41 = vrot.slane %v4296_v32, 1  ;;  %v3713_v36 = vrot.slane %v3712_v12, 2  ;;  %v4278_v17 = vrot.slane %v4277_v4, 4  ;;  %v7590_v22 = vld [vmem:[#allocation30_spill] sm:$0xff] }
 0x2cb   : >> { %v3694_v43 = vsel %vm687_vm0, %v3692_v38, 0.0  ;;  %v3693_v28 = vsel %vm687_vm0, %v3691_v29, 0.0  ;;  %v4387_v55 = vmul.f32 %v5427_v51, %v7582_v18  ;;  %v7584_v29 = vmov %v7321_v6 }
 0x2cc   : >> { %v4298_v0 = vadd.f32 %v4297_v41, %v4296_v32  ;;  %v3714_v44 = vadd.f32 %v3713_v36, %v3712_v12  ;;  %v4279_v26 = vadd.f32 %v4278_v17, %v4277_v4  ;;  %v3695_v57 = vadd.f32 %v3694_v43, %v3693_v28  ;;  %v4253_v42 = vpop.permute.xlu1 %4252  ;;  %v4249_v39 = vpop.permute.xlu0 %4248  ;;  %v7592_v12 = vld [vmem:[#allocation31_spill] sm:$0xff] (%p2103_p5)  ;;  %v7593_v4 = vld [vmem:[#allocation30_spill] sm:$0xff] (%p2103_p5) }
 0x2cd   : >> { %v4259_v20 = vmul.f32 %v7173_v24, %v4253_v42  ;;  %v4258_v8 = vmul.f32 %v7175_v37, %v4249_v39  ;;  %v7585_v28 = vmov %v7579_v48  ;;  %4391 = vst.msk [vmem:[#allocation5] sm:$0xff] (%p2103_p5), %vm687_vm0, %v7592_v12  ;;  %4392 = vst.msk [vmem:[#allocation5 + $0x8] sm:$0xff] (%p2103_p5), %vm687_vm0, %v7593_v4 }
 0x2ce   : >> { %v4378_v53 = vsel %vm2674_vm5, %v4377_v23, %v4298_v0  ;;  %v3715_v59 = vrot.slane %v3714_v44, 1  ;;  %v4280_v25 = vrot.slane %v4279_v26, 2  ;;  %v3696_v14 = vrot.slane %v3695_v57, 4 }
 0x2cf   : >> { %v4261_v1 = vsel %vm687_vm0, %v4259_v20, 0.0  ;;  %v4260_v40 = vsel %vm687_vm0, %v4258_v8, 0.0 }
 0x2d0   : >> { %v3716_v58 = vadd.f32 %v3715_v59, %v3714_v44  ;;  %v4281_v30 = vadd.f32 %v4280_v25, %v4279_v26  ;;  %v3697_v3 = vadd.f32 %v3696_v14, %v3695_v57  ;;  %v4262_v54 = vadd.f32 %v4261_v1, %v4260_v40 }
 0x2d1   : >> { %v7586_v26 = vmov %v7309_v16  ;;  %v7587_v25 = vmov %v7578_v7 }
 0x2d2   : >> { %v3812_v24 = vsel %vm2676_vm6, %v3811_v60, %v3716_v58  ;;  %v4282_v45 = vrot.slane %v4281_v30, 1  ;;  %v3698_v37 = vrot.slane %v3697_v3, 2  ;;  %v4263_v31 = vrot.slane %v4262_v54, 4 }
 0x2d4   : >> { %v4283_v11 = vadd.f32 %v4282_v45, %v4281_v30  ;;  %v3699_v63 = vadd.f32 %v3698_v37, %v3697_v3  ;;  %v4264_v47 = vadd.f32 %v4263_v31, %v4262_v54 }
 0x2d6   : >> { %v4379_v52 = vsel %vm2676_vm6, %v4378_v53, %v4283_v11  ;;  %v3700_v19 = vrot.slane %v3699_v63, 1  ;;  %v4265_v27 = vrot.slane %v4264_v47, 2 }
 0x2d8   : >> { %v3701_v34 = vadd.f32 %v3700_v19, %v3699_v63  ;;  %v4266_v50 = vadd.f32 %v4265_v27, %v4264_v47 }
 0x2da   : >> { %v3813_v35 = vsel %vm2678_vm7, %v3812_v24, %v3701_v34  ;;  %v4267_v23 = vrot.slane %v4266_v50, 1  ;;  %v7588_v24 = vmov %v7046_v62 }
 0x2db   : >> { %v3821_v13 = vadd.f32 %v3820_v15, %v3813_v35 }
 0x2dc   : >> { %v4268_v49 = vadd.f32 %v4267_v23, %v4266_v50  ;;  %v7589_v23 = vmov %v7566_v2 }
 0x2dd   : >> { %3823 = vst.msk [vmem:[%s3822_s30] sm:$0xff] %vm687_vm0, %v3821_v13  ;;  %2105 = sbr.rel (!%p2103_p5) target bundleno = 342 (0x156), region = 166 }
 0x2de   : >> { %v4380_v46 = vsel %vm2678_vm7, %v4379_v52, %v4268_v49 }
 0x2df   : >> { %v4388_v32 = vadd.f32 %v4387_v55, %v4380_v46 }
 0x2e1   : >> { %4390 = vst.msk [vmem:[%s4389_s1] sm:$0xff] %vm687_vm0, %v4388_v32 }
 0x2e2 PF: > { %s24_s27 = sadd.s32 1, %s5486_s27   ;;  %s7594_s25 = smov %s5482_s26 }
 0x2e3   : > { %p21_p6 = scmp.ge.s32.totalorder %s24_s27, 4   ;;  %s7595_s26 = smov %s7597_s28 }
 0x2e5   :  { %23 = sbr.rel (!%p21_p6) target bundleno = 3 (0x3), region = 177 }

</bundles_post_ra>
